<compile_context>
chip_gen: v7x
topology: tpu7x:2x2x1
jax: 0.10.0
libtpu: 0.0.40
codegen_flags: <defaults>
</compile_context>

<pallas_src>
import jax
import jax.numpy as jnp
from jax import lax
from jax.experimental import pallas as pl
from jax.experimental.pallas import tpu as pltpu


def _round_up(x, m):
    return (x + m - 1) // m * m


def _pick_tile(n, bytes_per_row, budget=6 << 20):
    """Largest divisor of n (multiple of 8, or n itself) whose per-step footprint fits."""
    if n * bytes_per_row <= budget:
        return n
    for t in range(n, 0, -1):
        if n % t == 0 and (t % 8 == 0 or t == n) and t * bytes_per_row <= budget:
            return t
    return n


def _compiler_params(semantics, est_bytes):
    limit = None
    if 3 * est_bytes > (16 << 20):          # raise the scoped-VMEM default only when needed
        limit = int(min(64 << 20, 3 * est_bytes))
    return pltpu.CompilerParams(dimension_semantics=semantics, vmem_limit_bytes=limit)


# ------------------- fused conv1+conv2 (3x3, pad=1) + GAP of conv1 -------------------

def _make_conv_kernel(H, W, C, PW, lead):
    Cout2 = 2 * C
    Macc = H * PW                 # accumulator rows: H image rows x padded width
    span = Macc + 2 * PW          # rows of the kw-concatenated view needed by kh = 0..2

    def kernel(x_ref, w_ref, b_ref, x1_ref, x2_ref, gap_ref):
        # three kw-shifted copies of the padded flat image, concatenated on the lane axis
        # -> one K=3C operand reused by the three (sublane-aligned, PW % 8 == 0) kh shifts.
        xl = x_ref[0, lead - 1:lead - 1 + span, :]
        xc = x_ref[0, lead:lead + span, :]
        xr = x_ref[0, lead + 1:lead + 1 + span, :]
        xcat = jnp.concatenate([xl, xc, xr], axis=-1)                    # (span, 3C) bf16

        acc = jnp.dot(xcat[0:Macc], w_ref[0], preferred_element_type=jnp.float32)
        acc = acc + jnp.dot(xcat[PW:PW + Macc], w_ref[1],
                            preferred_element_type=jnp.float32)
        acc = acc + jnp.dot(xcat[2 * PW:2 * PW + Macc], w_ref[2],
                            preferred_element_type=jnp.float32)
        acc = acc + b_ref[...]                                           # bias added once

        y = acc.reshape(H, PW, Cout2)[:, 1:W + 1, :]                     # interior only
        x1 = y[..., :C]
        x2 = y[..., C:]
        x1_ref[0] = x1.astype(x1_ref.dtype)
        x2_ref[0] = x2.astype(x2_ref.dtype)
        # global average pool of the conv1 half (f32) so CAM never re-reads x1 from HBM
        g = jnp.sum(jnp.sum(x1, axis=1, keepdims=True), axis=0, keepdims=True)  # (1,1,C)
        gap_ref[0] = (g * (1.0 / float(H * W))).reshape(1, C)

    return kernel


def conv3x3_pair_gap(x_nhwc, w1, b1, w2, b2):
    """Fused conv1/conv2 (3x3, pad=1) on NHWC input; returns bf16 x1, x2 and f32 GAP(x1)."""
    B, H, W, C = x_nhwc.shape
    PW = _round_up(W + 2, 8)      # padded row stride: multiple of 8 -> aligned kh shifts
    PH = H + 2
    lead = 8
    Macc = H * PW
    span = PH * PW
    Mtot = lead + span + 8
    Cout2 = 2 * C

    xp = jnp.pad(x_nhwc.astype(jnp.bfloat16),
                 ((0, 0), (1, 1), (1, PW - W - 1), (0, 0)))              # (B, PH, PW, C)
    x_flat = jnp.pad(xp.reshape(B, span, C),
                     ((0, 0), (lead, Mtot - lead - span), (0, 0)))       # (B, Mtot, C)

    def taps(w):  # (Cout, Cin, 3, 3) -> (3, 3*Cin, Cout), K ordered (kw, cin)
        return jnp.transpose(w, (2, 3, 1, 0)).reshape(3, 3 * C, w.shape[0])

    w_k = jnp.concatenate([taps(w1), taps(w2)], axis=-1).astype(jnp.bfloat16)  # (3,3C,2C)
    bias = jnp.concatenate([b1, b2]).reshape(1, Cout2).astype(jnp.float32)

    est = 2 * Mtot * C * 2 + span * 3 * C * 2 + Macc * Cout2 * 4 + 4 * H * W * C * 2
    # TODO(synk): tile the spatial axis (row groups + halo) for very large H*W (v7x 64 MiB).
    x1, x2, gap = pl.pallas_call(
        _make_conv_kernel(H, W, C, PW, lead),
        out_shape=(jax.ShapeDtypeStruct((B, H, W, C), jnp.bfloat16),
                   jax.ShapeDtypeStruct((B, H, W, C), jnp.bfloat16),
                   jax.ShapeDtypeStruct((B, 1, C), jnp.float32)),
        grid=(B,),
        in_specs=[
            pl.BlockSpec((1, Mtot, C), lambda b: (b, 0, 0)),
            pl.BlockSpec((3, 3 * C, Cout2), lambda b: (0, 0, 0)),
            pl.BlockSpec((1, Cout2), lambda b: (0, 0)),
        ],
        out_specs=(
            pl.BlockSpec((1, H, W, C), lambda b: (b, 0, 0, 0)),
            pl.BlockSpec((1, H, W, C), lambda b: (b, 0, 0, 0)),
            pl.BlockSpec((1, 1, C), lambda b: (b, 0, 0)),
        ),
        compiler_params=_compiler_params(("parallel",), est),
    )(x_flat, w_k, bias)
    return x1, x2, gap


# ------------------------------ fused QKV 1x1 projections ------------------------------

def _qkv_kernel(x_ref, wq_ref, wk_ref, wv_ref, bq_ref, bk_ref, bv_ref,
                q_ref, k_ref, v_ref):
    x = x_ref[0]                                                         # (tm, C) bf16
    q_ref[0] = (jnp.dot(x, wq_ref[...], preferred_element_type=jnp.float32)
                + bq_ref[...]).astype(q_ref.dtype)
    k_ref[0] = (jnp.dot(x, wk_ref[...], preferred_element_type=jnp.float32)
                + bk_ref[...]).astype(k_ref.dtype)
    v_ref[0] = (jnp.dot(x, wv_ref[...], preferred_element_type=jnp.float32)
                + bv_ref[...]).astype(v_ref.dtype)


def qkv_project(x2, qw, qb, kw, kb, vw, vb):
    """x2 (B,H,W,C) bf16 -> q,k (B,H,W,C/8) bf16 and v (B,H,W,C) bf16, single fused kernel."""
    B, H, W, C = x2.shape
    C8 = qw.shape[0]
    HW = H * W
    tm = _pick_tile(HW, (2 * C + 2 * (2 * C8 + C)) * 2)
    x_flat = x2.reshape(B, HW, C)

    to_mat = lambda w: w.reshape(w.shape[0], C).T.astype(jnp.bfloat16)   # (C, Cout)
    vec = lambda b: b.reshape(1, -1).astype(jnp.float32)

    q, k, v = pl.pallas_call(
        _qkv_kernel,
        out_shape=(jax.ShapeDtypeStruct((B, HW, C8), jnp.bfloat16),
                   jax.ShapeDtypeStruct((B, HW, C8), jnp.bfloat16),
                   jax.ShapeDtypeStruct((B, HW, C), jnp.bfloat16)),
        grid=(B, HW // tm),
        in_specs=[
            pl.BlockSpec((1, tm, C), lambda b, m: (b, m, 0)),
            pl.BlockSpec((C, C8), lambda b, m: (0, 0)),
            pl.BlockSpec((C, C8), lambda b, m: (0, 0)),
            pl.BlockSpec((C, C), lambda b, m: (0, 0)),
            pl.BlockSpec((1, C8), lambda b, m: (0, 0)),
            pl.BlockSpec((1, C8), lambda b, m: (0, 0)),
            pl.BlockSpec((1, C), lambda b, m: (0, 0)),
        ],
        out_specs=(
            pl.BlockSpec((1, tm, C8), lambda b, m: (b, m, 0)),
            pl.BlockSpec((1, tm, C8), lambda b, m: (b, m, 0)),
            pl.BlockSpec((1, tm, C), lambda b, m: (b, m, 0)),
        ),
        compiler_params=pltpu.CompilerParams(
            dimension_semantics=("parallel", "parallel")),
    )(x_flat, to_mat(qw), to_mat(kw), to_mat(vw), vec(qb), vec(kb), vec(vb))
    return q.reshape(B, H, W, C8), k.reshape(B, H, W, C8), v.reshape(B, H, W, C)


# --------------- SAM criss-cross attention (+ fused CAM scaling / residual) ---------------

def _sam_col_kernel(mask_ref, q_ref, k_ref, v_ref, ms_ref, o_ref):
    # pass 1: height-direction (column) attention, batched over columns (MXU matmuls),
    # emitting flash-style unnormalised partials + packed per-position [max, sum-exp].
    q = q_ref[0]                                   # (tw, H, C8) bf16
    k = k_ref[0]
    v = v_ref[0]                                   # (tw, H, C)  bf16

    e = jnp.einsum('wic,wjc->wij', q, k, preferred_element_type=jnp.float32)  # (tw,H,H)
    e = e + mask_ref[...]                          # precomputed -1e30 diagonal, bcast over w

    m = jnp.max(e, axis=-1, keepdims=True)         # (tw, H, 1)
    p = jnp.exp(e - m)
    s = jnp.sum(p, axis=-1, keepdims=True)
    ms_ref[0] = jnp.concatenate([m, s], axis=-1)   # (tw, H, 2) packed stats, one store
    o_ref[0] = jnp.einsum('wij,wjc->wic', p.astype(jnp.bfloat16), v,
                          preferred_element_type=jnp.float32).astype(o_ref.dtype)


def _sam_row_combine_kernel(gamma_ref, scale_ref, q_ref, k_ref, v_ref,
                            ms_ref, ocol_ref, x2_ref, x1_ref, o_ref):
    # pass 2: width-direction (row) attention, joint-softmax completion, fused epilogue:
    #   gamma * (out_H + out_W) + x2 + CAM_scale * x1   (== cam + sam)
    q = q_ref[0]                                   # (th, W, C8) bf16
    k = k_ref[0]
    v = v_ref[0]                                   # (th, W, C)  bf16

    e = jnp.einsum('iwc,ivc->iwv', q, k, preferred_element_type=jnp.float32)  # (th,W,W)

    ms = ms_ref[0]                                 # (th, W, 2) column-branch stats
    m_c = ms[..., 0:1]
    s_c = ms[..., 1:2]
    m = jnp.maximum(jnp.max(e, axis=-1, keepdims=True), m_c)
    p = jnp.exp(e - m)
    alpha = jnp.exp(m_c - m)                       # rescale factor for the column partials
    denom = jnp.sum(p, axis=-1, keepdims=True) + alpha * s_c
    inv = pl.reciprocal(denom, approx=True)        # EUP reciprocal, ~free

    out_w = jnp.einsum('iwv,ivc->iwc', p.astype(jnp.bfloat16), v,
                       preferred_element_type=jnp.float32)                     # (th, W, C)
    attn = (out_w + alpha * ocol_ref[0].astype(jnp.float32)) * inv

    res = (gamma_ref[0] * attn + x2_ref[0].astype(jnp.float32)
           + scale_ref[0] * x1_ref[0].astype(jnp.float32))
    o_ref[0] = res.astype(o_ref.dtype)


def sam_cam_fused(gamma, scale, q, k, v, x2, x1):
    B, H, W, C = x2.shape
    C8 = q.shape[-1]
    tw = _pick_tile(W, H * H * 8 + H * (8 * C + 64))
    th = _pick_tile(H, W * W * 8 + W * (8 * C + 64))

    q_wh, k_wh, v_wh = (jnp.swapaxes(t, 1, 2) for t in (q, k, v))        # (B, W, H, c)
    diag = (-1e30) * jnp.eye(H, dtype=jnp.float32)                       # finite diag mask

    est1 = tw * (H * H * 8 + H * (8 * C + 64))
    ms, ocol = pl.pallas_call(
        _sam_col_kernel,
        out_shape=(jax.ShapeDtypeStruct((B, W, H, 2), jnp.float32),
                   jax.ShapeDtypeStruct((B, W, H, C), jnp.bfloat16)),
        grid=(B, W // tw),
        in_specs=[
            pl.BlockSpec((H, H), lambda b, t: (0, 0)),
            pl.BlockSpec((1, tw, H, C8), lambda b, t: (b, t, 0, 0)),
            pl.BlockSpec((1, tw, H, C8), lambda b, t: (b, t, 0, 0)),
            pl.BlockSpec((1, tw, H, C), lambda b, t: (b, t, 0, 0)),
        ],
        out_specs=(
            pl.BlockSpec((1, tw, H, 2), lambda b, t: (b, t, 0, 0)),
            pl.BlockSpec((1, tw, H, C), lambda b, t: (b, t, 0, 0)),
        ),
        compiler_params=_compiler_params(("parallel", "parallel"), est1),
    )(diag, q_wh, k_wh, v_wh)

    # TODO(synk): these swapaxes of the partials are the remaining HBM glue; removing them
    #             requires an in-kernel major-dim transpose (or fusing pass 1 into pass 2).
    ms = jnp.swapaxes(ms, 1, 2)                    # (B, H, W, 2)
    ocol = jnp.swapaxes(ocol, 1, 2)                # (B, H, W, C)

    tile = lambda c: pl.BlockSpec((1, th, W, c), lambda b, r: (b, r, 0, 0))
    est2 = th * (W * W * 8 + W * (8 * C + 64))
    return pl.pallas_call(
        _sam_row_combine_kernel,
        out_shape=jax.ShapeDtypeStruct((B, H, W, C), jnp.float32),
        grid=(B, H // th),
        in_specs=[
            pl.BlockSpec(memory_space=pltpu.MemorySpace.SMEM),   # gamma (scalar)
            pl.BlockSpec((1, 1, C), lambda b, r: (b, 0, 0)),     # CAM channel scale
            tile(C8), tile(C8), tile(C),                          # q, k, v row tiles
            tile(2), tile(C),                                     # column stats + partial
            tile(C), tile(C),                                     # x2 (residual), x1 (CAM)
        ],
        out_specs=tile(C),
        compiler_params=_compiler_params(("parallel", "parallel"), est2),
    )(gamma, scale.reshape(B, 1, C), q, k, v, ms, ocol, x2, x1)


# ------------------------------------- EAU forward -------------------------------------

def eau_forward(x_nchw, p):
    B, C, H, W = x_nchw.shape
    x = jnp.transpose(x_nchw, (0, 2, 3, 1))                              # NHWC

    # conv1 + conv2 fused (single pass over x, bf16 interior outputs) + GAP of conv1
    x1, x2, gap = conv3x3_pair_gap(x, p["conv1_w"], p["conv1_b"],
                                   p["conv2_w"], p["conv2_b"])

    # CAM excitation MLP: tiny (B,C) matmuls, plain XLA (below one vreg of useful work).
    g = gap.reshape(B, C)
    scale = jax.nn.sigmoid((g @ p["wd_w"].T + p["wd_b"]) @ p["wu_w"].T + p["wu_b"])

    # q/k/v 1x1 convs fused into one kernel emitting three bf16 outputs
    q, k, v = qkv_project(x2, p["q_w"], p["q_b"], p["k_w"], p["k_b"],
                          p["v_w"], p["v_b"])

    # criss-cross attention + fused CAM scaling + final cam+sam add
    out = sam_cam_fused(p["gamma"], scale, q, k, v, x2, x1)              # (B, H, W, C) f32
    return jnp.transpose(out, (0, 3, 1, 2))                              # back to NCHW


# --------------------------- pure-JAX reference (verification) ---------------------------

def eau_reference(x, p):
    def conv(x, w, b, pad):
        y = lax.conv_general_dilated(x, w, (1, 1), ((pad, pad), (pad, pad)),
                                     dimension_numbers=("NCHW", "OIHW", "NCHW"))
        return y + b[None, :, None, None]

    x1 = conv(x, p["conv1_w"], p["conv1_b"], 1)
    x2 = conv(x, p["conv2_w"], p["conv2_b"], 1)

    gap = jnp.mean(x1, axis=(2, 3))
    s = jax.nn.sigmoid((gap @ p["wd_w"].T + p["wd_b"]) @ p["wu_w"].T + p["wu_b"])
    cam = s[:, :, None, None] * x1

    q = conv(x2, p["q_w"], p["q_b"], 0)
    k = conv(x2, p["k_w"], p["k_b"], 0)
    v = conv(x2, p["v_w"], p["v_b"], 0)
    B, C, H, W = x2.shape
    e_h = jnp.einsum('bciw,bcjw->biwj', q, k)
    e_h = jnp.where(jnp.eye(H, dtype=bool)[None, :, None, :], -jnp.inf, e_h)
    e_w = jnp.einsum('bchw,bchv->bhwv', q, k)
    att = jax.nn.softmax(jnp.concatenate([e_h, e_w], axis=-1), axis=-1)
    att_h, att_w = att[..., :H], att[..., H:]
    out_h = jnp.einsum('bcjw,biwj->bciw', v, att_h)
    out_w = jnp.einsum('bchv,bhwv->bchw', v, att_w)
    sam = p["gamma"][0] * (out_h + out_w) + x2
    return cam + sam


# ----------------------------- deterministic parameter init -----------------------------

def init_params(key, channels, r=16):
    c8 = channels // 8
    cr = channels // r
    keys = jax.random.split(key, 14)
    w = lambda k, shape, s=0.05: s * jax.random.normal(k, shape, dtype=jnp.float32)
    return {
        "conv1_w": w(keys[0], (channels, channels, 3, 3)),
        "conv1_b": w(keys[1], (channels,)),
        "conv2_w": w(keys[2], (channels, channels, 3, 3)),
        "conv2_b": w(keys[3], (channels,)),
        # CAM: nn.Linear(channels, channels//r), nn.Linear(channels//r, channels)
        "wd_w": w(keys[4], (cr, channels)),
        "wd_b": w(keys[5], (cr,)),
        "wu_w": w(keys[6], (channels, cr)),
        "wu_b": w(keys[7], (channels,)),
        # SAM: 1x1 convs for query/key (C//8) and value (C)
        "q_w": w(keys[8], (c8, channels, 1, 1)),
        "q_b": w(keys[9], (c8,)),
        "k_w": w(keys[10], (c8, channels, 1, 1)),
        "k_b": w(keys[11], (c8,)),
        "v_w": w(keys[12], (channels, channels, 1, 1)),
        "v_b": w(keys[13], (channels,)),
        # nn.Parameter(torch.zeros(1)) — matches the module's init
        "gamma": jnp.zeros((1,), jnp.float32),
    }


if __name__ == "__main__":
    key = jax.random.PRNGKey(0)
    k_in, k_p = jax.random.split(key)
    channels, B, H, W = 32, 2, 16, 16          # channels >= 16 so channels//16 >= 1
    x = jax.random.normal(k_in, (B, channels, H, W), dtype=jnp.float32)
    params = init_params(k_p, channels)

    fwd = jax.jit(eau_forward)
    out = fwd(x, params)
    jax.block_until_ready(out)
    assert out.shape == (B, channels, H, W)
    assert bool(jnp.all(jnp.isfinite(out)))

    # cross-check vs. a pure-JAX reference (gamma != 0 so the attention path is exercised)
    params_chk = dict(params, gamma=jnp.full((1,), 0.3, jnp.float32))
    got = jax.jit(eau_forward)(x, params_chk)
    ref = eau_reference(x, params_chk)
    err = float(jnp.max(jnp.abs(got - ref)))
    assert err < 1e-1, f"mismatch vs reference: max abs err {err}"

    print("KERNEL_OK")
</pallas_src>

<mosaic_0001>
module attributes {stable_mosaic.version = 11 : i64} {
  func.func @kernel(%arg0: i32, %arg1: memref<1x448x32xbf16, #tpu.memory_space<vmem>>, %arg2: memref<3x96x64xbf16, #tpu.memory_space<vmem>>, %arg3: memref<1x64xf32, #tpu.memory_space<vmem>>, %arg4: memref<1x16x16x32xbf16, #tpu.memory_space<vmem>>, %arg5: memref<1x16x16x32xbf16, #tpu.memory_space<vmem>>, %arg6: memref<1x1x32xf32, #tpu.memory_space<vmem>>) attributes {dimension_semantics = [#tpu.dimension_semantics<parallel>], iteration_bounds = array<i64: 2>, scalar_prefetch = 0 : i64, scratch_operands = 0 : i64, tpu.core_type = #tpu.core_type<tc>, window_params = [{transform_indices = @transform_0, window_bounds = array<i64: 1, 448, 32>}, {pipeline_mode = #tpu.pipeline_mode<synchronous>, transform_indices = @transform_1, window_bounds = array<i64: 3, 96, 64>}, {pipeline_mode = #tpu.pipeline_mode<synchronous>, transform_indices = @transform_2, window_bounds = array<i64: 1, 64>}, {transform_indices = @transform_3, window_bounds = array<i64: 1, 16, 16, 32>}, {transform_indices = @transform_4, window_bounds = array<i64: 1, 16, 16, 32>}, {transform_indices = @transform_5, window_bounds = array<i64: 1, 1, 32>}]} {
    %c0 = arith.constant 0 : index
    %c7 = arith.constant 7 : index
    %c0_0 = arith.constant 0 : index
    %0 = vector.load %arg1[%c0, %c7, %c0_0] : memref<1x448x32xbf16, #tpu.memory_space<vmem>>, vector<1x432x32xbf16>
    %1 = vector.shape_cast %0 : vector<1x432x32xbf16> to vector<432x32xbf16>
    %c0_1 = arith.constant 0 : index
    %c8 = arith.constant 8 : index
    %c0_2 = arith.constant 0 : index
    %2 = vector.load %arg1[%c0_1, %c8, %c0_2] : memref<1x448x32xbf16, #tpu.memory_space<vmem>>, vector<1x432x32xbf16>
    %3 = vector.shape_cast %2 : vector<1x432x32xbf16> to vector<432x32xbf16>
    %c0_3 = arith.constant 0 : index
    %c9 = arith.constant 9 : index
    %c0_4 = arith.constant 0 : index
    %4 = vector.load %arg1[%c0_3, %c9, %c0_4] : memref<1x448x32xbf16, #tpu.memory_space<vmem>>, vector<1x432x32xbf16>
    %5 = vector.shape_cast %4 : vector<1x432x32xbf16> to vector<432x32xbf16>
    %6 = tpu.concatenate %1, %3, %5 in 1 : vector<432x32xbf16>, vector<432x32xbf16>, vector<432x32xbf16> -> vector<432x96xbf16>
    %7 = vector.extract_strided_slice %6 {offsets = [0, 0], sizes = [384, 96], strides = [1, 1]} : vector<432x96xbf16> to vector<384x96xbf16>
    %c0_5 = arith.constant 0 : index
    %c0_6 = arith.constant 0 : index
    %c0_7 = arith.constant 0 : index
    %8 = vector.load %arg2[%c0_5, %c0_6, %c0_7] : memref<3x96x64xbf16, #tpu.memory_space<vmem>>, vector<1x96x64xbf16>
    %9 = vector.shape_cast %8 : vector<1x96x64xbf16> to vector<96x64xbf16>
    %cst = arith.constant dense<0.000000e+00> : vector<384x64xf32>
    %10 = tpu.matmul %7, %9, %cst {dimension_numbers = #tpu.dot_dimension_numbers<[1], [0], [0], [1], [0, 0, 1, 1], [], []>} : vector<384x96xbf16>, vector<96x64xbf16>, vector<384x64xf32> -> vector<384x64xf32>
    %11 = vector.extract_strided_slice %6 {offsets = [24, 0], sizes = [384, 96], strides = [1, 1]} : vector<432x96xbf16> to vector<384x96xbf16>
    %c1 = arith.constant 1 : index
    %c0_8 = arith.constant 0 : index
    %c0_9 = arith.constant 0 : index
    %12 = vector.load %arg2[%c1, %c0_8, %c0_9] : memref<3x96x64xbf16, #tpu.memory_space<vmem>>, vector<1x96x64xbf16>
    %13 = vector.shape_cast %12 : vector<1x96x64xbf16> to vector<96x64xbf16>
    %cst_10 = arith.constant dense<0.000000e+00> : vector<384x64xf32>
    %14 = tpu.matmul %11, %13, %cst_10 {dimension_numbers = #tpu.dot_dimension_numbers<[1], [0], [0], [1], [0, 0, 1, 1], [], []>} : vector<384x96xbf16>, vector<96x64xbf16>, vector<384x64xf32> -> vector<384x64xf32>
    %15 = arith.addf %10, %14 : vector<384x64xf32>
    %16 = vector.extract_strided_slice %6 {offsets = [48, 0], sizes = [384, 96], strides = [1, 1]} : vector<432x96xbf16> to vector<384x96xbf16>
    %c2 = arith.constant 2 : index
    %c0_11 = arith.constant 0 : index
    %c0_12 = arith.constant 0 : index
    %17 = vector.load %arg2[%c2, %c0_11, %c0_12] : memref<3x96x64xbf16, #tpu.memory_space<vmem>>, vector<1x96x64xbf16>
    %18 = vector.shape_cast %17 : vector<1x96x64xbf16> to vector<96x64xbf16>
    %cst_13 = arith.constant dense<0.000000e+00> : vector<384x64xf32>
    %19 = tpu.matmul %16, %18, %cst_13 {dimension_numbers = #tpu.dot_dimension_numbers<[1], [0], [0], [1], [0, 0, 1, 1], [], []>} : vector<384x96xbf16>, vector<96x64xbf16>, vector<384x64xf32> -> vector<384x64xf32>
    %20 = arith.addf %15, %19 : vector<384x64xf32>
    %c0_14 = arith.constant 0 : index
    %c0_15 = arith.constant 0 : index
    %21 = vector.load %arg3[%c0_14, %c0_15] : memref<1x64xf32, #tpu.memory_space<vmem>>, vector<1x64xf32>
    %22 = vector.broadcast %21 : vector<1x64xf32> to vector<384x64xf32>
    %23 = arith.addf %20, %22 : vector<384x64xf32>
    %24 = vector.shape_cast %23 : vector<384x64xf32> to vector<16x24x64xf32>
    %25 = vector.extract_strided_slice %24 {offsets = [0, 1, 0], sizes = [16, 16, 64], strides = [1, 1, 1]} : vector<16x24x64xf32> to vector<16x16x64xf32>
    %26 = vector.extract_strided_slice %25 {offsets = [0, 0, 0], sizes = [16, 16, 32], strides = [1, 1, 1]} : vector<16x16x64xf32> to vector<16x16x32xf32>
    %27 = vector.extract_strided_slice %25 {offsets = [0, 0, 32], sizes = [16, 16, 32], strides = [1, 1, 1]} : vector<16x16x64xf32> to vector<16x16x32xf32>
    %28 = arith.truncf %26 : vector<16x16x32xf32> to vector<16x16x32xbf16>
    %c0_16 = arith.constant 0 : index
    %c0_17 = arith.constant 0 : index
    %c0_18 = arith.constant 0 : index
    %c0_19 = arith.constant 0 : index
    %29 = vector.load %arg4[%c0_16, %c0_17, %c0_18, %c0_19] : memref<1x16x16x32xbf16, #tpu.memory_space<vmem>>, vector<1x16x16x32xbf16>
    %30 = vector.shape_cast %29 : vector<1x16x16x32xbf16> to vector<16x16x32xbf16>
    %31 = vector.shape_cast %28 : vector<16x16x32xbf16> to vector<1x16x16x32xbf16>
    tpu.vector_store %arg4[%c0_16, %c0_17, %c0_18, %c0_19], %31 {strides = array<i32>} : memref<1x16x16x32xbf16, #tpu.memory_space<vmem>>, vector<1x16x16x32xbf16>,
    %32 = arith.truncf %27 : vector<16x16x32xf32> to vector<16x16x32xbf16>
    %c0_20 = arith.constant 0 : index
    %c0_21 = arith.constant 0 : index
    %c0_22 = arith.constant 0 : index
    %c0_23 = arith.constant 0 : index
    %33 = vector.load %arg5[%c0_20, %c0_21, %c0_22, %c0_23] : memref<1x16x16x32xbf16, #tpu.memory_space<vmem>>, vector<1x16x16x32xbf16>
    %34 = vector.shape_cast %33 : vector<1x16x16x32xbf16> to vector<16x16x32xbf16>
    %35 = vector.shape_cast %32 : vector<16x16x32xbf16> to vector<1x16x16x32xbf16>
    tpu.vector_store %arg5[%c0_20, %c0_21, %c0_22, %c0_23], %35 {strides = array<i32>} : memref<1x16x16x32xbf16, #tpu.memory_space<vmem>>, vector<1x16x16x32xbf16>,
    %cst_24 = arith.constant dense<0.000000e+00> : vector<16x32xf32>
    %36 = vector.multi_reduction <add>, %26, %cst_24 [1] : vector<16x16x32xf32> to vector<16x32xf32>
    %37 = vector.shape_cast %36 : vector<16x32xf32> to vector<16x1x32xf32>
    %cst_25 = arith.constant dense<0.000000e+00> : vector<1x32xf32>
    %38 = vector.multi_reduction <add>, %37, %cst_25 [0] : vector<16x1x32xf32> to vector<1x32xf32>
    %39 = vector.shape_cast %38 : vector<1x32xf32> to vector<1x1x32xf32>
    %cst_26 = arith.constant 3.906250e-03 : f32
    %40 = vector.broadcast %cst_26 : f32 to vector<1x1x32xf32>
    %41 = arith.mulf %39, %40 : vector<1x1x32xf32>
    %42 = vector.shape_cast %41 : vector<1x1x32xf32> to vector<1x32xf32>
    %c0_27 = arith.constant 0 : index
    %c0_28 = arith.constant 0 : index
    %c0_29 = arith.constant 0 : index
    %43 = vector.load %arg6[%c0_27, %c0_28, %c0_29] : memref<1x1x32xf32, #tpu.memory_space<vmem>>, vector<1x1x32xf32>
    %44 = vector.shape_cast %43 : vector<1x1x32xf32> to vector<1x32xf32>
    %45 = vector.shape_cast %42 : vector<1x32xf32> to vector<1x1x32xf32>
    tpu.vector_store %arg6[%c0_27, %c0_28, %c0_29], %45 {strides = array<i32>} : memref<1x1x32xf32, #tpu.memory_space<vmem>>, vector<1x1x32xf32>,
    return
  }
  func.func @transform_0(%arg0: i32) -> (i32, i32, i32) {
    %c0_i32 = arith.constant 0 : i32
    %c0_i32_0 = arith.constant 0 : i32
    %c0_i32_1 = arith.constant 0 : i32
    return %arg0, %c0_i32, %c0_i32_0 : i32, i32, i32
  }
  func.func @transform_1(%arg0: i32) -> (i32, i32, i32) {
    %c0_i32 = arith.constant 0 : i32
    %c0_i32_0 = arith.constant 0 : i32
    %c0_i32_1 = arith.constant 0 : i32
    %c0_i32_2 = arith.constant 0 : i32
    return %c0_i32, %c0_i32_0, %c0_i32_1 : i32, i32, i32
  }
  func.func @transform_2(%arg0: i32) -> (i32, i32) {
    %c0_i32 = arith.constant 0 : i32
    %c0_i32_0 = arith.constant 0 : i32
    %c0_i32_1 = arith.constant 0 : i32
    return %c0_i32, %c0_i32_0 : i32, i32
  }
  func.func @transform_3(%arg0: i32) -> (i32, i32, i32, i32) {
    %c0_i32 = arith.constant 0 : i32
    %c0_i32_0 = arith.constant 0 : i32
    %c0_i32_1 = arith.constant 0 : i32
    %c0_i32_2 = arith.constant 0 : i32
    return %arg0, %c0_i32, %c0_i32_0, %c0_i32_1 : i32, i32, i32, i32
  }
  func.func @transform_4(%arg0: i32) -> (i32, i32, i32, i32) {
    %c0_i32 = arith.constant 0 : i32
    %c0_i32_0 = arith.constant 0 : i32
    %c0_i32_1 = arith.constant 0 : i32
    %c0_i32_2 = arith.constant 0 : i32
    return %arg0, %c0_i32, %c0_i32_0, %c0_i32_1 : i32, i32, i32, i32
  }
  func.func @transform_5(%arg0: i32) -> (i32, i32, i32) {
    %c0_i32 = arith.constant 0 : i32
    %c0_i32_0 = arith.constant 0 : i32
    %c0_i32_1 = arith.constant 0 : i32
    return %arg0, %c0_i32, %c0_i32_0 : i32, i32, i32
  }
}

module attributes {stable_mosaic.version = 11 : i64} {
  func.func @_qkv_kernel(%arg0: i32, %arg1: i32, %arg2: memref<1x256x32xbf16, #tpu.memory_space<vmem>>, %arg3: memref<32x4xbf16, #tpu.memory_space<vmem>>, %arg4: memref<32x4xbf16, #tpu.memory_space<vmem>>, %arg5: memref<32x32xbf16, #tpu.memory_space<vmem>>, %arg6: memref<1x4xf32, #tpu.memory_space<vmem>>, %arg7: memref<1x4xf32, #tpu.memory_space<vmem>>, %arg8: memref<1x32xf32, #tpu.memory_space<vmem>>, %arg9: memref<1x256x4xbf16, #tpu.memory_space<vmem>>, %arg10: memref<1x256x4xbf16, #tpu.memory_space<vmem>>, %arg11: memref<1x256x32xbf16, #tpu.memory_space<vmem>>) attributes {dimension_semantics = [#tpu.dimension_semantics<parallel>, #tpu.dimension_semantics<parallel>], iteration_bounds = array<i64: 2, 1>, scalar_prefetch = 0 : i64, scratch_operands = 0 : i64, tpu.core_type = #tpu.core_type<tc>, window_params = [{transform_indices = @transform_0, window_bounds = array<i64: 1, 256, 32>}, {pipeline_mode = #tpu.pipeline_mode<synchronous>, transform_indices = @transform_1, window_bounds = array<i64: 32, 4>}, {pipeline_mode = #tpu.pipeline_mode<synchronous>, transform_indices = @transform_2, window_bounds = array<i64: 32, 4>}, {pipeline_mode = #tpu.pipeline_mode<synchronous>, transform_indices = @transform_3, window_bounds = array<i64: 32, 32>}, {pipeline_mode = #tpu.pipeline_mode<synchronous>, transform_indices = @transform_4, window_bounds = array<i64: 1, 4>}, {pipeline_mode = #tpu.pipeline_mode<synchronous>, transform_indices = @transform_5, window_bounds = array<i64: 1, 4>}, {pipeline_mode = #tpu.pipeline_mode<synchronous>, transform_indices = @transform_6, window_bounds = array<i64: 1, 32>}, {transform_indices = @transform_7, window_bounds = array<i64: 1, 256, 4>}, {transform_indices = @transform_8, window_bounds = array<i64: 1, 256, 4>}, {transform_indices = @transform_9, window_bounds = array<i64: 1, 256, 32>}]} {
    %c0 = arith.constant 0 : index
    %c0_0 = arith.constant 0 : index
    %c0_1 = arith.constant 0 : index
    %0 = vector.load %arg2[%c0, %c0_0, %c0_1] : memref<1x256x32xbf16, #tpu.memory_space<vmem>>, vector<1x256x32xbf16>
    %1 = vector.shape_cast %0 : vector<1x256x32xbf16> to vector<256x32xbf16>
    %c0_2 = arith.constant 0 : index
    %c0_3 = arith.constant 0 : index
    %2 = vector.load %arg3[%c0_2, %c0_3] : memref<32x4xbf16, #tpu.memory_space<vmem>>, vector<32x4xbf16>
    %cst = arith.constant dense<0.000000e+00> : vector<256x4xf32>
    %3 = tpu.matmul %1, %2, %cst {dimension_numbers = #tpu.dot_dimension_numbers<[1], [0], [0], [1], [0, 0, 1, 1], [], []>} : vector<256x32xbf16>, vector<32x4xbf16>, vector<256x4xf32> -> vector<256x4xf32>
    %c0_4 = arith.constant 0 : index
    %c0_5 = arith.constant 0 : index
    %4 = vector.load %arg6[%c0_4, %c0_5] : memref<1x4xf32, #tpu.memory_space<vmem>>, vector<1x4xf32>
    %5 = vector.broadcast %4 : vector<1x4xf32> to vector<256x4xf32>
    %6 = arith.addf %3, %5 : vector<256x4xf32>
    %7 = arith.truncf %6 : vector<256x4xf32> to vector<256x4xbf16>
    %c0_6 = arith.constant 0 : index
    %c0_7 = arith.constant 0 : index
    %c0_8 = arith.constant 0 : index
    %8 = vector.load %arg9[%c0_6, %c0_7, %c0_8] : memref<1x256x4xbf16, #tpu.memory_space<vmem>>, vector<1x256x4xbf16>
    %9 = vector.shape_cast %8 : vector<1x256x4xbf16> to vector<256x4xbf16>
    %10 = vector.shape_cast %7 : vector<256x4xbf16> to vector<1x256x4xbf16>
    tpu.vector_store %arg9[%c0_6, %c0_7, %c0_8], %10 {strides = array<i32>} : memref<1x256x4xbf16, #tpu.memory_space<vmem>>, vector<1x256x4xbf16>,
    %c0_9 = arith.constant 0 : index
    %c0_10 = arith.constant 0 : index
    %11 = vector.load %arg4[%c0_9, %c0_10] : memref<32x4xbf16, #tpu.memory_space<vmem>>, vector<32x4xbf16>
    %cst_11 = arith.constant dense<0.000000e+00> : vector<256x4xf32>
    %12 = tpu.matmul %1, %11, %cst_11 {dimension_numbers = #tpu.dot_dimension_numbers<[1], [0], [0], [1], [0, 0, 1, 1], [], []>} : vector<256x32xbf16>, vector<32x4xbf16>, vector<256x4xf32> -> vector<256x4xf32>
    %c0_12 = arith.constant 0 : index
    %c0_13 = arith.constant 0 : index
    %13 = vector.load %arg7[%c0_12, %c0_13] : memref<1x4xf32, #tpu.memory_space<vmem>>, vector<1x4xf32>
    %14 = vector.broadcast %13 : vector<1x4xf32> to vector<256x4xf32>
    %15 = arith.addf %12, %14 : vector<256x4xf32>
    %16 = arith.truncf %15 : vector<256x4xf32> to vector<256x4xbf16>
    %c0_14 = arith.constant 0 : index
    %c0_15 = arith.constant 0 : index
    %c0_16 = arith.constant 0 : index
    %17 = vector.load %arg10[%c0_14, %c0_15, %c0_16] : memref<1x256x4xbf16, #tpu.memory_space<vmem>>, vector<1x256x4xbf16>
    %18 = vector.shape_cast %17 : vector<1x256x4xbf16> to vector<256x4xbf16>
    %19 = vector.shape_cast %16 : vector<256x4xbf16> to vector<1x256x4xbf16>
    tpu.vector_store %arg10[%c0_14, %c0_15, %c0_16], %19 {strides = array<i32>} : memref<1x256x4xbf16, #tpu.memory_space<vmem>>, vector<1x256x4xbf16>,
    %c0_17 = arith.constant 0 : index
    %c0_18 = arith.constant 0 : index
    %20 = vector.load %arg5[%c0_17, %c0_18] : memref<32x32xbf16, #tpu.memory_space<vmem>>, vector<32x32xbf16>
    %cst_19 = arith.constant dense<0.000000e+00> : vector<256x32xf32>
    %21 = tpu.matmul %1, %20, %cst_19 {dimension_numbers = #tpu.dot_dimension_numbers<[1], [0], [0], [1], [0, 0, 1, 1], [], []>} : vector<256x32xbf16>, vector<32x32xbf16>, vector<256x32xf32> -> vector<256x32xf32>
    %c0_20 = arith.constant 0 : index
    %c0_21 = arith.constant 0 : index
    %22 = vector.load %arg8[%c0_20, %c0_21] : memref<1x32xf32, #tpu.memory_space<vmem>>, vector<1x32xf32>
    %23 = vector.broadcast %22 : vector<1x32xf32> to vector<256x32xf32>
    %24 = arith.addf %21, %23 : vector<256x32xf32>
    %25 = arith.truncf %24 : vector<256x32xf32> to vector<256x32xbf16>
    %c0_22 = arith.constant 0 : index
    %c0_23 = arith.constant 0 : index
    %c0_24 = arith.constant 0 : index
    %26 = vector.load %arg11[%c0_22, %c0_23, %c0_24] : memref<1x256x32xbf16, #tpu.memory_space<vmem>>, vector<1x256x32xbf16>
    %27 = vector.shape_cast %26 : vector<1x256x32xbf16> to vector<256x32xbf16>
    %28 = vector.shape_cast %25 : vector<256x32xbf16> to vector<1x256x32xbf16>
    tpu.vector_store %arg11[%c0_22, %c0_23, %c0_24], %28 {strides = array<i32>} : memref<1x256x32xbf16, #tpu.memory_space<vmem>>, vector<1x256x32xbf16>,
    return
  }
  func.func @transform_0(%arg0: i32, %arg1: i32) -> (i32, i32, i32) {
    %c0_i32 = arith.constant 0 : i32
    %c0_i32_0 = arith.constant 0 : i32
    return %arg0, %arg1, %c0_i32 : i32, i32, i32
  }
  func.func @transform_1(%arg0: i32, %arg1: i32) -> (i32, i32) {
    %c0_i32 = arith.constant 0 : i32
    %c0_i32_0 = arith.constant 0 : i32
    %c0_i32_1 = arith.constant 0 : i32
    return %c0_i32, %c0_i32_0 : i32, i32
  }
  func.func @transform_2(%arg0: i32, %arg1: i32) -> (i32, i32) {
    %c0_i32 = arith.constant 0 : i32
    %c0_i32_0 = arith.constant 0 : i32
    %c0_i32_1 = arith.constant 0 : i32
    return %c0_i32, %c0_i32_0 : i32, i32
  }
  func.func @transform_3(%arg0: i32, %arg1: i32) -> (i32, i32) {
    %c0_i32 = arith.constant 0 : i32
    %c0_i32_0 = arith.constant 0 : i32
    %c0_i32_1 = arith.constant 0 : i32
    return %c0_i32, %c0_i32_0 : i32, i32
  }
  func.func @transform_4(%arg0: i32, %arg1: i32) -> (i32, i32) {
    %c0_i32 = arith.constant 0 : i32
    %c0_i32_0 = arith.constant 0 : i32
    %c0_i32_1 = arith.constant 0 : i32
    return %c0_i32, %c0_i32_0 : i32, i32
  }
  func.func @transform_5(%arg0: i32, %arg1: i32) -> (i32, i32) {
    %c0_i32 = arith.constant 0 : i32
    %c0_i32_0 = arith.constant 0 : i32
    %c0_i32_1 = arith.constant 0 : i32
    return %c0_i32, %c0_i32_0 : i32, i32
  }
  func.func @transform_6(%arg0: i32, %arg1: i32) -> (i32, i32) {
    %c0_i32 = arith.constant 0 : i32
    %c0_i32_0 = arith.constant 0 : i32
    %c0_i32_1 = arith.constant 0 : i32
    return %c0_i32, %c0_i32_0 : i32, i32
  }
  func.func @transform_7(%arg0: i32, %arg1: i32) -> (i32, i32, i32) {
    %c0_i32 = arith.constant 0 : i32
    %c0_i32_0 = arith.constant 0 : i32
    return %arg0, %arg1, %c0_i32 : i32, i32, i32
  }
  func.func @transform_8(%arg0: i32, %arg1: i32) -> (i32, i32, i32) {
    %c0_i32 = arith.constant 0 : i32
    %c0_i32_0 = arith.constant 0 : i32
    return %arg0, %arg1, %c0_i32 : i32, i32, i32
  }
  func.func @transform_9(%arg0: i32, %arg1: i32) -> (i32, i32, i32) {
    %c0_i32 = arith.constant 0 : i32
    %c0_i32_0 = arith.constant 0 : i32
    return %arg0, %arg1, %c0_i32 : i32, i32, i32
  }
}

module attributes {stable_mosaic.version = 11 : i64} {
  func.func @_sam_col_kernel(%arg0: i32, %arg1: i32, %arg2: memref<16x16xf32, #tpu.memory_space<vmem>>, %arg3: memref<1x16x16x4xbf16, #tpu.memory_space<vmem>>, %arg4: memref<1x16x16x4xbf16, #tpu.memory_space<vmem>>, %arg5: memref<1x16x16x32xbf16, #tpu.memory_space<vmem>>, %arg6: memref<1x16x16x2xf32, #tpu.memory_space<vmem>>, %arg7: memref<1x16x16x32xbf16, #tpu.memory_space<vmem>>) attributes {dimension_semantics = [#tpu.dimension_semantics<parallel>, #tpu.dimension_semantics<parallel>], iteration_bounds = array<i64: 2, 1>, scalar_prefetch = 0 : i64, scratch_operands = 0 : i64, tpu.core_type = #tpu.core_type<tc>, window_params = [{pipeline_mode = #tpu.pipeline_mode<synchronous>, transform_indices = @transform_0, window_bounds = array<i64: 16, 16>}, {transform_indices = @transform_1, window_bounds = array<i64: 1, 16, 16, 4>}, {transform_indices = @transform_2, window_bounds = array<i64: 1, 16, 16, 4>}, {transform_indices = @transform_3, window_bounds = array<i64: 1, 16, 16, 32>}, {transform_indices = @transform_4, window_bounds = array<i64: 1, 16, 16, 2>}, {transform_indices = @transform_5, window_bounds = array<i64: 1, 16, 16, 32>}]} {
    %c0 = arith.constant 0 : index
    %c0_0 = arith.constant 0 : index
    %c0_1 = arith.constant 0 : index
    %c0_2 = arith.constant 0 : index
    %0 = vector.load %arg3[%c0, %c0_0, %c0_1, %c0_2] : memref<1x16x16x4xbf16, #tpu.memory_space<vmem>>, vector<1x16x16x4xbf16>
    %1 = vector.shape_cast %0 : vector<1x16x16x4xbf16> to vector<16x16x4xbf16>
    %c0_3 = arith.constant 0 : index
    %c0_4 = arith.constant 0 : index
    %c0_5 = arith.constant 0 : index
    %c0_6 = arith.constant 0 : index
    %2 = vector.load %arg4[%c0_3, %c0_4, %c0_5, %c0_6] : memref<1x16x16x4xbf16, #tpu.memory_space<vmem>>, vector<1x16x16x4xbf16>
    %3 = vector.shape_cast %2 : vector<1x16x16x4xbf16> to vector<16x16x4xbf16>
    %c0_7 = arith.constant 0 : index
    %c0_8 = arith.constant 0 : index
    %c0_9 = arith.constant 0 : index
    %c0_10 = arith.constant 0 : index
    %4 = vector.load %arg5[%c0_7, %c0_8, %c0_9, %c0_10] : memref<1x16x16x32xbf16, #tpu.memory_space<vmem>>, vector<1x16x16x32xbf16>
    %5 = vector.shape_cast %4 : vector<1x16x16x32xbf16> to vector<16x16x32xbf16>
    "tpu.trace_start"() <{level = 10 : i32, message = "wic,wjc->wij"}> : () -> ()
    %cst = arith.constant dense<0.000000e+00> : vector<16x16x16xf32>
    %6 = tpu.matmul %1, %3, %cst {dimension_numbers = #tpu.dot_dimension_numbers<[2], [2], [1], [1], [0, 0, 0, 1, 1, 1], [0], [0]>} : vector<16x16x4xbf16>, vector<16x16x4xbf16>, vector<16x16x16xf32> -> vector<16x16x16xf32>
    "tpu.trace_stop"() : () -> ()
    %c0_11 = arith.constant 0 : index
    %c0_12 = arith.constant 0 : index
    %7 = vector.load %arg2[%c0_11, %c0_12] : memref<16x16xf32, #tpu.memory_space<vmem>>, vector<16x16xf32>
    %8 = vector.shape_cast %7 : vector<16x16xf32> to vector<1x16x16xf32>
    %9 = vector.broadcast %8 : vector<1x16x16xf32> to vector<16x16x16xf32>
    %10 = arith.addf %6, %9 : vector<16x16x16xf32>
    %cst_13 = arith.constant dense<0xFF800000> : vector<16x16xf32>
    %11 = vector.multi_reduction <maximumf>, %10, %cst_13 [2] : vector<16x16x16xf32> to vector<16x16xf32>
    %12 = vector.shape_cast %11 : vector<16x16xf32> to vector<16x16x1xf32>
    %13 = vector.broadcast %12 : vector<16x16x1xf32> to vector<16x16x16xf32>
    %14 = arith.subf %10, %13 : vector<16x16x16xf32>
    %15 = math.exp %14 : vector<16x16x16xf32>
    %cst_14 = arith.constant dense<0.000000e+00> : vector<16x16xf32>
    %16 = vector.multi_reduction <add>, %15, %cst_14 [2] : vector<16x16x16xf32> to vector<16x16xf32>
    %17 = vector.shape_cast %16 : vector<16x16xf32> to vector<16x16x1xf32>
    %18 = tpu.concatenate %12, %17 in 2 : vector<16x16x1xf32>, vector<16x16x1xf32> -> vector<16x16x2xf32>
    %c0_15 = arith.constant 0 : index
    %c0_16 = arith.constant 0 : index
    %c0_17 = arith.constant 0 : index
    %c0_18 = arith.constant 0 : index
    %19 = vector.load %arg6[%c0_15, %c0_16, %c0_17, %c0_18] : memref<1x16x16x2xf32, #tpu.memory_space<vmem>>, vector<1x16x16x2xf32>
    %20 = vector.shape_cast %19 : vector<1x16x16x2xf32> to vector<16x16x2xf32>
    %21 = vector.shape_cast %18 : vector<16x16x2xf32> to vector<1x16x16x2xf32>
    tpu.vector_store %arg6[%c0_15, %c0_16, %c0_17, %c0_18], %21 {strides = array<i32>} : memref<1x16x16x2xf32, #tpu.memory_space<vmem>>, vector<1x16x16x2xf32>,
    %22 = arith.truncf %15 : vector<16x16x16xf32> to vector<16x16x16xbf16>
    "tpu.trace_start"() <{level = 10 : i32, message = "wij,wjc->wic"}> : () -> ()
    %cst_19 = arith.constant dense<0.000000e+00> : vector<16x16x32xf32>
    %23 = tpu.matmul %22, %5, %cst_19 {dimension_numbers = #tpu.dot_dimension_numbers<[2], [1], [1], [2], [0, 0, 0, 1, 1, 2], [0], [0]>} : vector<16x16x16xbf16>, vector<16x16x32xbf16>, vector<16x16x32xf32> -> vector<16x16x32xf32>
    "tpu.trace_stop"() : () -> ()
    %24 = arith.truncf %23 : vector<16x16x32xf32> to vector<16x16x32xbf16>
    %c0_20 = arith.constant 0 : index
    %c0_21 = arith.constant 0 : index
    %c0_22 = arith.constant 0 : index
    %c0_23 = arith.constant 0 : index
    %25 = vector.load %arg7[%c0_20, %c0_21, %c0_22, %c0_23] : memref<1x16x16x32xbf16, #tpu.memory_space<vmem>>, vector<1x16x16x32xbf16>
    %26 = vector.shape_cast %25 : vector<1x16x16x32xbf16> to vector<16x16x32xbf16>
    %27 = vector.shape_cast %24 : vector<16x16x32xbf16> to vector<1x16x16x32xbf16>
    tpu.vector_store %arg7[%c0_20, %c0_21, %c0_22, %c0_23], %27 {strides = array<i32>} : memref<1x16x16x32xbf16, #tpu.memory_space<vmem>>, vector<1x16x16x32xbf16>,
    return
  }
  func.func @transform_0(%arg0: i32, %arg1: i32) -> (i32, i32) {
    %c0_i32 = arith.constant 0 : i32
    %c0_i32_0 = arith.constant 0 : i32
    %c0_i32_1 = arith.constant 0 : i32
    return %c0_i32, %c0_i32_0 : i32, i32
  }
  func.func @transform_1(%arg0: i32, %arg1: i32) -> (i32, i32, i32, i32) {
    %c0_i32 = arith.constant 0 : i32
    %c0_i32_0 = arith.constant 0 : i32
    %c0_i32_1 = arith.constant 0 : i32
    return %arg0, %arg1, %c0_i32, %c0_i32_0 : i32, i32, i32, i32
  }
  func.func @transform_2(%arg0: i32, %arg1: i32) -> (i32, i32, i32, i32) {
    %c0_i32 = arith.constant 0 : i32
    %c0_i32_0 = arith.constant 0 : i32
    %c0_i32_1 = arith.constant 0 : i32
    return %arg0, %arg1, %c0_i32, %c0_i32_0 : i32, i32, i32, i32
  }
  func.func @transform_3(%arg0: i32, %arg1: i32) -> (i32, i32, i32, i32) {
    %c0_i32 = arith.constant 0 : i32
    %c0_i32_0 = arith.constant 0 : i32
    %c0_i32_1 = arith.constant 0 : i32
    return %arg0, %arg1, %c0_i32, %c0_i32_0 : i32, i32, i32, i32
  }
  func.func @transform_4(%arg0: i32, %arg1: i32) -> (i32, i32, i32, i32) {
    %c0_i32 = arith.constant 0 : i32
    %c0_i32_0 = arith.constant 0 : i32
    %c0_i32_1 = arith.constant 0 : i32
    return %arg0, %arg1, %c0_i32, %c0_i32_0 : i32, i32, i32, i32
  }
  func.func @transform_5(%arg0: i32, %arg1: i32) -> (i32, i32, i32, i32) {
    %c0_i32 = arith.constant 0 : i32
    %c0_i32_0 = arith.constant 0 : i32
    %c0_i32_1 = arith.constant 0 : i32
    return %arg0, %arg1, %c0_i32, %c0_i32_0 : i32, i32, i32, i32
  }
}

module attributes {stable_mosaic.version = 11 : i64} {
  func.func @_sam_row_combine_kernel(%arg0: i32, %arg1: i32, %arg2: memref<1xf32, #tpu.memory_space<smem>>, %arg3: memref<1x1x32xf32, #tpu.memory_space<vmem>>, %arg4: memref<1x16x16x4xbf16, #tpu.memory_space<vmem>>, %arg5: memref<1x16x16x4xbf16, #tpu.memory_space<vmem>>, %arg6: memref<1x16x16x32xbf16, #tpu.memory_space<vmem>>, %arg7: memref<1x16x16x2xf32, #tpu.memory_space<vmem>>, %arg8: memref<1x16x16x32xbf16, #tpu.memory_space<vmem>>, %arg9: memref<1x16x16x32xbf16, #tpu.memory_space<vmem>>, %arg10: memref<1x16x16x32xbf16, #tpu.memory_space<vmem>>, %arg11: memref<1x16x16x32xf32, #tpu.memory_space<vmem>>) attributes {dimension_semantics = [#tpu.dimension_semantics<parallel>, #tpu.dimension_semantics<parallel>], iteration_bounds = array<i64: 2, 1>, scalar_prefetch = 0 : i64, scratch_operands = 0 : i64, tpu.core_type = #tpu.core_type<tc>, window_params = [{transform_indices = @transform_0, window_bounds = array<i64: 1>}, {transform_indices = @transform_1, window_bounds = array<i64: 1, 1, 32>}, {transform_indices = @transform_2, window_bounds = array<i64: 1, 16, 16, 4>}, {transform_indices = @transform_3, window_bounds = array<i64: 1, 16, 16, 4>}, {transform_indices = @transform_4, window_bounds = array<i64: 1, 16, 16, 32>}, {transform_indices = @transform_5, window_bounds = array<i64: 1, 16, 16, 2>}, {transform_indices = @transform_6, window_bounds = array<i64: 1, 16, 16, 32>}, {transform_indices = @transform_7, window_bounds = array<i64: 1, 16, 16, 32>}, {transform_indices = @transform_8, window_bounds = array<i64: 1, 16, 16, 32>}, {transform_indices = @transform_9, window_bounds = array<i64: 1, 16, 16, 32>}]} {
    %c0 = arith.constant 0 : index
    %c0_0 = arith.constant 0 : index
    %c0_1 = arith.constant 0 : index
    %c0_2 = arith.constant 0 : index
    %0 = vector.load %arg4[%c0, %c0_0, %c0_1, %c0_2] : memref<1x16x16x4xbf16, #tpu.memory_space<vmem>>, vector<1x16x16x4xbf16>
    %1 = vector.shape_cast %0 : vector<1x16x16x4xbf16> to vector<16x16x4xbf16>
    %c0_3 = arith.constant 0 : index
    %c0_4 = arith.constant 0 : index
    %c0_5 = arith.constant 0 : index
    %c0_6 = arith.constant 0 : index
    %2 = vector.load %arg5[%c0_3, %c0_4, %c0_5, %c0_6] : memref<1x16x16x4xbf16, #tpu.memory_space<vmem>>, vector<1x16x16x4xbf16>
    %3 = vector.shape_cast %2 : vector<1x16x16x4xbf16> to vector<16x16x4xbf16>
    %c0_7 = arith.constant 0 : index
    %c0_8 = arith.constant 0 : index
    %c0_9 = arith.constant 0 : index
    %c0_10 = arith.constant 0 : index
    %4 = vector.load %arg6[%c0_7, %c0_8, %c0_9, %c0_10] : memref<1x16x16x32xbf16, #tpu.memory_space<vmem>>, vector<1x16x16x32xbf16>
    %5 = vector.shape_cast %4 : vector<1x16x16x32xbf16> to vector<16x16x32xbf16>
    "tpu.trace_start"() <{level = 10 : i32, message = "iwc,ivc->iwv"}> : () -> ()
    %cst = arith.constant dense<0.000000e+00> : vector<16x16x16xf32>
    %6 = tpu.matmul %1, %3, %cst {dimension_numbers = #tpu.dot_dimension_numbers<[2], [2], [1], [1], [0, 0, 0, 1, 1, 1], [0], [0]>} : vector<16x16x4xbf16>, vector<16x16x4xbf16>, vector<16x16x16xf32> -> vector<16x16x16xf32>
    "tpu.trace_stop"() : () -> ()
    %c0_11 = arith.constant 0 : index
    %c0_12 = arith.constant 0 : index
    %c0_13 = arith.constant 0 : index
    %c0_14 = arith.constant 0 : index
    %7 = vector.load %arg7[%c0_11, %c0_12, %c0_13, %c0_14] : memref<1x16x16x2xf32, #tpu.memory_space<vmem>>, vector<1x16x16x2xf32>
    %8 = vector.shape_cast %7 : vector<1x16x16x2xf32> to vector<16x16x2xf32>
    %9 = vector.extract_strided_slice %8 {offsets = [0, 0, 0], sizes = [16, 16, 1], strides = [1, 1, 1]} : vector<16x16x2xf32> to vector<16x16x1xf32>
    %10 = vector.extract_strided_slice %8 {offsets = [0, 0, 1], sizes = [16, 16, 1], strides = [1, 1, 1]} : vector<16x16x2xf32> to vector<16x16x1xf32>
    %cst_15 = arith.constant dense<0xFF800000> : vector<16x16xf32>
    %11 = vector.multi_reduction <maximumf>, %6, %cst_15 [2] : vector<16x16x16xf32> to vector<16x16xf32>
    %12 = vector.shape_cast %11 : vector<16x16xf32> to vector<16x16x1xf32>
    %13 = arith.maximumf %12, %9 : vector<16x16x1xf32>
    %14 = vector.broadcast %13 : vector<16x16x1xf32> to vector<16x16x16xf32>
    %15 = arith.subf %6, %14 : vector<16x16x16xf32>
    %16 = math.exp %15 : vector<16x16x16xf32>
    %17 = arith.subf %9, %13 : vector<16x16x1xf32>
    %18 = math.exp %17 : vector<16x16x1xf32>
    %cst_16 = arith.constant dense<0.000000e+00> : vector<16x16xf32>
    %19 = vector.multi_reduction <add>, %16, %cst_16 [2] : vector<16x16x16xf32> to vector<16x16xf32>
    %20 = vector.shape_cast %19 : vector<16x16xf32> to vector<16x16x1xf32>
    %21 = arith.mulf %18, %10 : vector<16x16x1xf32>
    %22 = arith.addf %20, %21 : vector<16x16x1xf32>
    %23 = tpu.reciprocal %22 {approx = true} : vector<16x16x1xf32> -> vector<16x16x1xf32>
    %24 = arith.truncf %16 : vector<16x16x16xf32> to vector<16x16x16xbf16>
    "tpu.trace_start"() <{level = 10 : i32, message = "iwv,ivc->iwc"}> : () -> ()
    %cst_17 = arith.constant dense<0.000000e+00> : vector<16x16x32xf32>
    %25 = tpu.matmul %24, %5, %cst_17 {dimension_numbers = #tpu.dot_dimension_numbers<[2], [1], [1], [2], [0, 0, 0, 1, 1, 2], [0], [0]>} : vector<16x16x16xbf16>, vector<16x16x32xbf16>, vector<16x16x32xf32> -> vector<16x16x32xf32>
    "tpu.trace_stop"() : () -> ()
    %c0_18 = arith.constant 0 : index
    %c0_19 = arith.constant 0 : index
    %c0_20 = arith.constant 0 : index
    %c0_21 = arith.constant 0 : index
    %26 = vector.load %arg8[%c0_18, %c0_19, %c0_20, %c0_21] : memref<1x16x16x32xbf16, #tpu.memory_space<vmem>>, vector<1x16x16x32xbf16>
    %27 = vector.shape_cast %26 : vector<1x16x16x32xbf16> to vector<16x16x32xbf16>
    %28 = arith.extf %27 : vector<16x16x32xbf16> to vector<16x16x32xf32>
    %29 = vector.broadcast %18 : vector<16x16x1xf32> to vector<16x16x32xf32>
    %30 = arith.mulf %29, %28 : vector<16x16x32xf32>
    %31 = arith.addf %25, %30 : vector<16x16x32xf32>
    %32 = vector.broadcast %23 : vector<16x16x1xf32> to vector<16x16x32xf32>
    %33 = arith.mulf %31, %32 : vector<16x16x32xf32>
    %c0_22 = arith.constant 0 : index
    %34 = memref.load %arg2[%c0_22] : memref<1xf32, #tpu.memory_space<smem>>
    %35 = vector.broadcast %34 : f32 to vector<16x16x32xf32>
    %36 = arith.mulf %35, %33 : vector<16x16x32xf32>
    %c0_23 = arith.constant 0 : index
    %c0_24 = arith.constant 0 : index
    %c0_25 = arith.constant 0 : index
    %c0_26 = arith.constant 0 : index
    %37 = vector.load %arg9[%c0_23, %c0_24, %c0_25, %c0_26] : memref<1x16x16x32xbf16, #tpu.memory_space<vmem>>, vector<1x16x16x32xbf16>
    %38 = vector.shape_cast %37 : vector<1x16x16x32xbf16> to vector<16x16x32xbf16>
    %39 = arith.extf %38 : vector<16x16x32xbf16> to vector<16x16x32xf32>
    %40 = arith.addf %36, %39 : vector<16x16x32xf32>
    %c0_27 = arith.constant 0 : index
    %c0_28 = arith.constant 0 : index
    %c0_29 = arith.constant 0 : index
    %41 = vector.load %arg3[%c0_27, %c0_28, %c0_29] : memref<1x1x32xf32, #tpu.memory_space<vmem>>, vector<1x1x32xf32>
    %42 = vector.shape_cast %41 : vector<1x1x32xf32> to vector<1x32xf32>
    %c0_30 = arith.constant 0 : index
    %c0_31 = arith.constant 0 : index
    %c0_32 = arith.constant 0 : index
    %c0_33 = arith.constant 0 : index
    %43 = vector.load %arg10[%c0_30, %c0_31, %c0_32, %c0_33] : memref<1x16x16x32xbf16, #tpu.memory_space<vmem>>, vector<1x16x16x32xbf16>
    %44 = vector.shape_cast %43 : vector<1x16x16x32xbf16> to vector<16x16x32xbf16>
    %45 = arith.extf %44 : vector<16x16x32xbf16> to vector<16x16x32xf32>
    %46 = vector.shape_cast %42 : vector<1x32xf32> to vector<1x1x32xf32>
    %47 = vector.broadcast %46 : vector<1x1x32xf32> to vector<16x16x32xf32>
    %48 = arith.mulf %47, %45 : vector<16x16x32xf32>
    %49 = arith.addf %40, %48 : vector<16x16x32xf32>
    %c0_34 = arith.constant 0 : index
    %c0_35 = arith.constant 0 : index
    %c0_36 = arith.constant 0 : index
    %c0_37 = arith.constant 0 : index
    %50 = vector.load %arg11[%c0_34, %c0_35, %c0_36, %c0_37] : memref<1x16x16x32xf32, #tpu.memory_space<vmem>>, vector<1x16x16x32xf32>
    %51 = vector.shape_cast %50 : vector<1x16x16x32xf32> to vector<16x16x32xf32>
    %52 = vector.shape_cast %49 : vector<16x16x32xf32> to vector<1x16x16x32xf32>
    tpu.vector_store %arg11[%c0_34, %c0_35, %c0_36, %c0_37], %52 {strides = array<i32>} : memref<1x16x16x32xf32, #tpu.memory_space<vmem>>, vector<1x16x16x32xf32>,
    return
  }
  func.func @transform_0(%arg0: i32, %arg1: i32) -> i32 {
    %c0_i32 = arith.constant 0 : i32
    %c0_i32_0 = arith.constant 0 : i32
    return %c0_i32 : i32
  }
  func.func @transform_1(%arg0: i32, %arg1: i32) -> (i32, i32, i32) {
    %c0_i32 = arith.constant 0 : i32
    %c0_i32_0 = arith.constant 0 : i32
    %c0_i32_1 = arith.constant 0 : i32
    return %arg0, %c0_i32, %c0_i32_0 : i32, i32, i32
  }
  func.func @transform_2(%arg0: i32, %arg1: i32) -> (i32, i32, i32, i32) {
    %c0_i32 = arith.constant 0 : i32
    %c0_i32_0 = arith.constant 0 : i32
    %c0_i32_1 = arith.constant 0 : i32
    return %arg0, %arg1, %c0_i32, %c0_i32_0 : i32, i32, i32, i32
  }
  func.func @transform_3(%arg0: i32, %arg1: i32) -> (i32, i32, i32, i32) {
    %c0_i32 = arith.constant 0 : i32
    %c0_i32_0 = arith.constant 0 : i32
    %c0_i32_1 = arith.constant 0 : i32
    return %arg0, %arg1, %c0_i32, %c0_i32_0 : i32, i32, i32, i32
  }
  func.func @transform_4(%arg0: i32, %arg1: i32) -> (i32, i32, i32, i32) {
    %c0_i32 = arith.constant 0 : i32
    %c0_i32_0 = arith.constant 0 : i32
    %c0_i32_1 = arith.constant 0 : i32
    return %arg0, %arg1, %c0_i32, %c0_i32_0 : i32, i32, i32, i32
  }
  func.func @transform_5(%arg0: i32, %arg1: i32) -> (i32, i32, i32, i32) {
    %c0_i32 = arith.constant 0 : i32
    %c0_i32_0 = arith.constant 0 : i32
    %c0_i32_1 = arith.constant 0 : i32
    return %arg0, %arg1, %c0_i32, %c0_i32_0 : i32, i32, i32, i32
  }
  func.func @transform_6(%arg0: i32, %arg1: i32) -> (i32, i32, i32, i32) {
    %c0_i32 = arith.constant 0 : i32
    %c0_i32_0 = arith.constant 0 : i32
    %c0_i32_1 = arith.constant 0 : i32
    return %arg0, %arg1, %c0_i32, %c0_i32_0 : i32, i32, i32, i32
  }
  func.func @transform_7(%arg0: i32, %arg1: i32) -> (i32, i32, i32, i32) {
    %c0_i32 = arith.constant 0 : i32
    %c0_i32_0 = arith.constant 0 : i32
    %c0_i32_1 = arith.constant 0 : i32
    return %arg0, %arg1, %c0_i32, %c0_i32_0 : i32, i32, i32, i32
  }
  func.func @transform_8(%arg0: i32, %arg1: i32) -> (i32, i32, i32, i32) {
    %c0_i32 = arith.constant 0 : i32
    %c0_i32_0 = arith.constant 0 : i32
    %c0_i32_1 = arith.constant 0 : i32
    return %arg0, %arg1, %c0_i32, %c0_i32_0 : i32, i32, i32, i32
  }
  func.func @transform_9(%arg0: i32, %arg1: i32) -> (i32, i32, i32, i32) {
    %c0_i32 = arith.constant 0 : i32
    %c0_i32_0 = arith.constant 0 : i32
    %c0_i32_1 = arith.constant 0 : i32
    return %arg0, %arg1, %c0_i32, %c0_i32_0 : i32, i32, i32, i32
  }
}

</mosaic_0001>

<bundles_post_ra>
// kernel: eau_forward.5
= control target key start
LH: loop header
LB: loop body
LE: loop exit
PB: predicated region body
PF: predicated region fallthrough
CT: control target
= control target key end

     0   :  { %s2372_s30 = smov 0   ;;  %s2374_s10 = smov 0   ;;  %s2810_s0 = inlined_call_operand.vmem [shape: bf16[2,256,32], index: 0, kind: input, shape index: {}]   ;;  %s2811_s1 = inlined_call_operand.vmem [shape: bf16[32,4], index: 1, kind: input, shape index: {}]   ;;  %s2812_s2 = inlined_call_operand.vmem [shape: bf16[32,4], index: 2, kind: input, shape index: {}]   ;;  %s2813_s3 = inlined_call_operand.vmem [shape: bf16[32,32], index: 3, kind: input, shape index: {}]   ;;  %s2814_s4 = inlined_call_operand.vmem [shape: f32[1,4], index: 4, kind: input, shape index: {}]   ;;  %s2815_s5 = inlined_call_operand.vmem [shape: f32[1,4], index: 5, kind: input, shape index: {}]   ;;  %s2816_s6 = inlined_call_operand.vmem [shape: f32[1,32], index: 6, kind: input, shape index: {}]   ;;  %s2817_s7 = inlined_call_operand.vmem [shape: bf16[2,256,4], index: 7, kind: output, shape index: {0}]   ;;  %s2818_s8 = inlined_call_operand.vmem [shape: bf16[2,256,4], index: 8, kind: output, shape index: {1}]   ;;  %s2819_s9 = inlined_call_operand.vmem [shape: bf16[2,256,32], index: 9, kind: output, shape index: {2}]  }
   0x1   :  { %s2376_s11 = smov 0  }
   0x2 LB: > { %s32_s12 = sadd.s32 1, %s2316_s10  ;;  %p1806_p0 = scmp.ge.s32.totalorder %s2320_s11, 1  ;;  %s2320_s11 = sphi %s2376_s11, %s20_s11   ;;  %s2316_s10 = sphi %s2374_s10, %s2821_s10   ;;  %s2312_s30 = sphi %s2372_s30, %s2820_s30  }
   0x3   : > { %p34_p1 = scmp.ge.s32.totalorder %s32_s12, 2  ;;  %p317_p2 = scmp.lt.s32.totalorder %s2320_s11, 3 }
   0x5   : > { %s2823_s12 = smov (%p34_p1, %s32_s12), 0  ;;  %p318_p3 = pnand %p1806_p0, %p317_p2 }
   0x6   : > { %v2276_v0 = vld [vmem:[%s2811_s1] sm:$0xff] (!%p318_p3)   ;;  %p380_p4 = scmp.lt.s32.totalorder (!%p318_p3), %s2312_s30, 1  ;;  %v2277_v1 = vld [vmem:[%s2811_s1 + $0x8] sm:$0xff] (!%p318_p3)   ;;  %vm555_vm0 = vcmask (!%p318_p3), 261120   ;;  %vm893_vm1 = vcmask (!%p318_p3), 27648   ;;  %vm1582_vm2 = vcmask (!%p318_p3), 257024  }
   0x7   : > { %321 = sbr.rel (%p318_p3) target bundleno = 329 (0x149), region = 48  ;;  %2140 = vmatprep.subr.bf16.mxu0 (!%p318_p3), %v2276_v0  ;;  %2248 = vmatprep.subr.bf16.mxu1 (!%p318_p3), %v2276_v0  ;;  %v2282_v2 = vld [vmem:[%s2812_s2] sm:$0xff] (!%p318_p3)   ;;  %v2292_v6 = vld [vmem:[%s2812_s2 + $0x8] sm:$0xff] (!%p318_p3)  }
   0x8   : > { %2141 = vmatpush3.bf16.msra.mxu0 (!%p318_p3), %v2276_v0  ;;  %2250 = vmatpush3.bf16.msra.mxu1 (!%p318_p3), %v2276_v0  ;;  %v2283_v3 = vld [vmem:[%s2813_s3] sm:$0xff] (!%p318_p3)   ;;  %v2293_v8 = vld [vmem:[%s2813_s3 + $0x8] sm:$0xff] (!%p318_p3)  }
   0x9   : > { %2142 = vmatprep.subr.bf16.mxu0 (!%p318_p3), %v2277_v1  ;;  %2249 = vmatprep.subr.bf16.mxu1 (!%p318_p3), %v2277_v1  ;;  %v2483_v22 = vld [vmem:[%s2814_s4] ss:$0 sm:$0xff] (!%p318_p3) }
   0xc   : > { %2143 = vmatpush3.bf16.msra.mxu0 (!%p318_p3), %v2277_v1  ;;  %2251 = vmatpush3.bf16.msra.mxu1 (!%p318_p3), %v2277_v1 }
   0xd   : > { %2176 = vmatprep.subr.bf16.mxu1 (!%p318_p3), %v2282_v2  ;;  %2212 = vmatprep.subr.bf16.mxu0 (!%p318_p3), %v2283_v3 }
   0xe   : > { %s2825_s30 = smov (!%p380_p4, %s2312_s30), 1 }
   0xf   : > { %s2396_s17 = sshll.u32 %s2825_s30, 7 }
  0x10   : > { %s2405_s22 = scalar_lea.vmem %s2810_s0, %s2396_s17  ;;  %s2490_s15 = scalar_lea.vmem %s2817_s7, %s2396_s17 }
  0x11   : > { %v2278_v4 = vld [vmem:[%s2405_s22] sm:$0xff]   ;;  %v2280_v7 = vld [vmem:[%s2405_s22 + $0x8] sm:$0xff]   ;;  %v2284_v10 = vld [vmem:[%s2405_s22 + $0x10] sm:$0xff]   ;;  %s2603_s23 = scalar_lea.vmem %s2819_s9, %s2396_s17  ;;  %s2610_s26 = scalar_lea.vmem %s2818_s8, %s2396_s17 }
  0x12   : > { %v2279_v5 = vld [vmem:[%s2405_s22 + $0x40] sm:$0xff]   ;;  %2144 = vmatprep.mubr.msk.bf16.mxu0 %vm555_vm0, %v2278_v4  ;;  %v2281_v9 = vld [vmem:[%s2405_s22 + $0x48] sm:$0xff]   ;;  %v2285_v11 = vld [vmem:[%s2405_s22 + $0x50] sm:$0xff]  }
  0x13   : > { %2160 = vmatprep.mubr.msk.bf16.mxu1 %vm555_vm0, %v2279_v5  ;;  %2145 = vmatmul.mubr.msk.bf16.vlgmr.msra.gmra.mrb[0].mxu0 %vm555_vm0, %v2280_v7  ;;  %v2286_v12 = vld [vmem:[%s2405_s22 + $0x18] sm:$0xff]   ;;  %v2288_v14 = vld [vmem:[%s2405_s22 + $0x20] sm:$0xff]   ;;  %v2290_v16 = vld [vmem:[%s2405_s22 + $0x28] sm:$0xff]  }
  0x14   : > { %2161 = vmatmul.mubr.msk.bf16.vlgmr.msra.gmra.mrb[0].mxu1 %vm555_vm0, %v2281_v9  ;;  %2213 = vmatpush3.bf16.msra.mxu0 %v2283_v3  ;;  %v2287_v13 = vld [vmem:[%s2405_s22 + $0x58] sm:$0xff]   ;;  %v2289_v15 = vld [vmem:[%s2405_s22 + $0x60] sm:$0xff]   ;;  %v2291_v17 = vld [vmem:[%s2405_s22 + $0x68] sm:$0xff]  }
  0x15   : > { %2177 = vmatpush3.bf16.msra.mxu1 %v2282_v2  ;;  %2148 = vmatprep.mubr.msk.bf16.mxu0 %vm555_vm0, %v2284_v10  ;;  %v2294_v18 = vld [vmem:[%s2405_s22 + $0x30] sm:$0xff]   ;;  %v2296_v20 = vld [vmem:[%s2405_s22 + $0x38] sm:$0xff]  }
  0x16   : > { %2164 = vmatprep.mubr.msk.bf16.mxu1 %vm555_vm0, %v2285_v11  ;;  %2178 = vmatprep.subr.bf16.mxu1 %v2292_v6  ;;  %v2295_v19 = vld [vmem:[%s2405_s22 + $0x70] sm:$0xff]   ;;  %v2297_v21 = vld [vmem:[%s2405_s22 + $0x78] sm:$0xff]  }
  0x17   : > { %2214 = vmatprep.subr.bf16.mxu0 %v2293_v8 }
  0x18   : > { %2215 = vmatpush3.bf16.msra.mxu0 %v2293_v8 }
  0x19   : > { %2179 = vmatpush3.bf16.msra.mxu1 %v2292_v6 }
  0x1b   : > { %2149 = vmatmul.mubr.msk.bf16.gmra.mrb[4].mxu0 %vm555_vm0, %v2286_v12 }
  0x1c   : > { %2165 = vmatmul.mubr.msk.bf16.gmra.mrb[4].mxu1 %vm555_vm0, %v2287_v13  ;;  %2152 = vmatprep.mubr.msk.bf16.mxu0 %vm555_vm0, %v2288_v14 }
  0x1d   : > { %2168 = vmatprep.mubr.msk.bf16.mxu1 %vm555_vm0, %v2289_v15 }
  0x23   : > { %2153 = vmatmul.mubr.msk.bf16.gmra.mrb[8].mxu0 %vm555_vm0, %v2290_v16 }
  0x24   : > { %2169 = vmatmul.mubr.msk.bf16.gmra.mrb[8].mxu1 %vm555_vm0, %v2291_v17  ;;  %2156 = vmatprep.mubr.msk.bf16.mxu0 %vm555_vm0, %v2294_v18 }
  0x25   : > { %2172 = vmatprep.mubr.msk.bf16.mxu1 %vm555_vm0, %v2295_v19 }
  0x2b   : > { %2157 = vmatmul.mubr.msk.bf16.gmra.mrb[12].mxu0 %vm555_vm0, %v2296_v20 }
  0x2c   : > { %2173 = vmatmul.mubr.msk.bf16.gmra.mrb[12].mxu1 %vm555_vm0, %v2297_v21  ;;  %2216 = vmatprep.mubr.msk.bf16.mxu0 %vm555_vm0, %v2278_v4 }
  0x2d   : > { %2180 = vmatprep.mubr.msk.bf16.mxu1 %vm555_vm0, %v2278_v4 }
  0x33   : > { %2217 = vmatmul.mubr.msk.bf16.vlgmr.msra.gmra.mrb[16].mxu0 %vm555_vm0, %v2280_v7 }
  0x34   : > { %2181 = vmatmul.mubr.msk.bf16.vlgmr.msra.gmra.mrb[16].mxu1 %vm555_vm0, %v2280_v7  ;;  %2220 = vmatprep.mubr.msk.bf16.mxu0 %vm555_vm0, %v2284_v10 }
  0x35   : > { %2184 = vmatprep.mubr.msk.bf16.mxu1 %vm555_vm0, %v2284_v10 }
  0x3b   : > { %2221 = vmatmul.mubr.msk.bf16.gmra.mrb[20].mxu0 %vm555_vm0, %v2286_v12 }
  0x3c   : > { %2185 = vmatmul.mubr.msk.bf16.gmra.mrb[20].mxu1 %vm555_vm0, %v2286_v12  ;;  %2224 = vmatprep.mubr.msk.bf16.mxu0 %vm555_vm0, %v2288_v14 }
  0x3d   : > { %2188 = vmatprep.mubr.msk.bf16.mxu1 %vm555_vm0, %v2288_v14 }
  0x43   : > { %2225 = vmatmul.mubr.msk.bf16.gmra.mrb[24].mxu0 %vm555_vm0, %v2290_v16 }
  0x44   : > { %2189 = vmatmul.mubr.msk.bf16.gmra.mrb[24].mxu1 %vm555_vm0, %v2290_v16  ;;  %2228 = vmatprep.mubr.msk.bf16.mxu0 %vm555_vm0, %v2294_v18 }
  0x45   : > { %2192 = vmatprep.mubr.msk.bf16.mxu1 %vm555_vm0, %v2294_v18 }
  0x4b   : > { %2229 = vmatmul.mubr.msk.bf16.gmra.mrb[28].mxu0 %vm555_vm0, %v2296_v20 }
  0x4c   : > { %2193 = vmatmul.mubr.msk.bf16.gmra.mrb[28].mxu1 %vm555_vm0, %v2296_v20  ;;  %2232 = vmatprep.mubr.msk.bf16.mxu0 %vm555_vm0, %v2279_v5 }
  0x4d   : > { %2196 = vmatprep.mubr.msk.bf16.mxu1 %vm555_vm0, %v2279_v5 }
  0x53   : > { %2233 = vmatmul.mubr.msk.bf16.gmra.mrb[32].mxu0 %vm555_vm0, %v2281_v9 }
  0x54   : > { %2197 = vmatmul.mubr.msk.bf16.gmra.mrb[32].mxu1 %vm555_vm0, %v2281_v9  ;;  %2236 = vmatprep.mubr.msk.bf16.mxu0 %vm555_vm0, %v2285_v11 }
  0x55   : > { %2200 = vmatprep.mubr.msk.bf16.mxu1 %vm555_vm0, %v2285_v11 }
  0x5b   : > { %2237 = vmatmul.mubr.msk.bf16.gmra.mrb[36].mxu0 %vm555_vm0, %v2287_v13 }
  0x5c   : > { %2201 = vmatmul.mubr.msk.bf16.gmra.mrb[36].mxu1 %vm555_vm0, %v2287_v13  ;;  %2240 = vmatprep.mubr.msk.bf16.mxu0 %vm555_vm0, %v2289_v15 }
  0x5d   : > { %2204 = vmatprep.mubr.msk.bf16.mxu1 %vm555_vm0, %v2289_v15 }
  0x63   : > { %2241 = vmatmul.mubr.msk.bf16.gmra.mrb[40].mxu0 %vm555_vm0, %v2291_v17 }
  0x64   : > { %2205 = vmatmul.mubr.msk.bf16.gmra.mrb[40].mxu1 %vm555_vm0, %v2291_v17  ;;  %2244 = vmatprep.mubr.msk.bf16.mxu0 %vm555_vm0, %v2295_v19 }
  0x65   : > { %2208 = vmatprep.mubr.msk.bf16.mxu1 %vm555_vm0, %v2295_v19 }
  0x6b   : > { %2245 = vmatmul.mubr.msk.bf16.gmra.mrb[44].mxu0 %vm555_vm0, %v2297_v21 }
  0x6c   : > { %2209 = vmatmul.mubr.msk.bf16.gmra.mrb[44].mxu1 %vm555_vm0, %v2297_v21 }
  0xe6   : > { %v2146_v23 = vpop.f32.mrb[0].mxu0 }
  0xe7   : > { %v647_v24 = vadd.f32 %v2146_v23, %v2483_v22  ;;  %v2162_v25 = vpop.f32.mrb[0].mxu1  ;;  %v638_v26 = vpop.f32.mrb[1].mxu0 }
  0xe8   : > { %v711_v27 = vadd.f32 %v2162_v25, %v2483_v22  ;;  %v639_v28 = vadd.f32 %v2483_v22, %v638_v26  ;;  %v702_v29 = vpop.f32.mrb[1].mxu1  ;;  %v2147_v30 = vpop.f32.mrb[2].mxu0 }
  0xe9   : > { %v1992_v31 = vpack.c.bf16 %v647_v24, %v647_v24  ;;  %v703_v32 = vadd.f32 %v2483_v22, %v702_v29  ;;  %v650_v33 = vadd.f32 %v2147_v30, %v2483_v22  ;;  %v2163_v34 = vpop.f32.mrb[2].mxu1  ;;  %v641_v35 = vpop.f32.mrb[3].mxu0 }
  0xea   : > { %v2008_v36 = vpack.c.bf16 %v711_v27, %v711_v27  ;;  %v1990_v37 = vpack.c.bf16 %v639_v28, %v639_v28  ;;  %v714_v38 = vadd.f32 %v2163_v34, %v2483_v22  ;;  %v642_v39 = vadd.f32 %v2483_v22, %v641_v35  ;;  %v705_v40 = vpop.f32.mrb[3].mxu1 }
  0xeb   : > { %896 = vst.msk [vmem:[%s2490_s15 + $0x8] sm:$0xf] %vm893_vm1, %v1992_v31  ;;  %v2006_v41 = vpack.c.bf16 %v703_v32, %v703_v32  ;;  %v1993_v42 = vpack.c.bf16 %v650_v33, %v650_v33  ;;  %v706_v43 = vadd.f32 %v2483_v22, %v705_v40 }
  0xec   : > { %912 = vst.msk [vmem:[%s2490_s15 + $0x48] sm:$0xf] %vm893_vm1, %v2008_v36  ;;  %894 = vst.msk [vmem:[%s2490_s15] sm:$0xf] %vm893_vm1, %v1990_v37  ;;  %v2009_v44 = vpack.c.bf16 %v714_v38, %v714_v38  ;;  %v1991_v45 = vpack.c.bf16 %v642_v39, %v642_v39 }
  0xed   : > { %910 = vst.msk [vmem:[%s2490_s15 + $0x40] sm:$0xf] %vm893_vm1, %v2006_v41  ;;  %897 = vst.msk [vmem:[%s2490_s15 + $0xc] sm:$0xf] %vm893_vm1, %v1993_v42  ;;  %v2007_v46 = vpack.c.bf16 %v706_v43, %v706_v43 }
  0xee   : > { %913 = vst.msk [vmem:[%s2490_s15 + $0x4c] sm:$0xf] %vm893_vm1, %v2009_v44  ;;  %895 = vst.msk [vmem:[%s2490_s15 + $0x4] sm:$0xf] %vm893_vm1, %v1991_v45  ;;  %v2150_v47 = vpop.f32.mrb[4].mxu0 }
  0xef   : > { %911 = vst.msk [vmem:[%s2490_s15 + $0x44] sm:$0xf] %vm893_vm1, %v2007_v46  ;;  %v663_v48 = vadd.f32 %v2150_v47, %v2483_v22  ;;  %v2166_v49 = vpop.f32.mrb[4].mxu1  ;;  %v654_v50 = vpop.f32.mrb[5].mxu0 }
  0xf0   : > { %v727_v51 = vadd.f32 %v2166_v49, %v2483_v22  ;;  %v655_v52 = vadd.f32 %v2483_v22, %v654_v50  ;;  %v718_v53 = vpop.f32.mrb[5].mxu1  ;;  %v2151_v54 = vpop.f32.mrb[6].mxu0 }
  0xf1   : > { %v1996_v55 = vpack.c.bf16 %v663_v48, %v663_v48  ;;  %v719_v56 = vadd.f32 %v2483_v22, %v718_v53  ;;  %v666_v57 = vadd.f32 %v2151_v54, %v2483_v22  ;;  %v2167_v58 = vpop.f32.mrb[6].mxu1  ;;  %v657_v59 = vpop.f32.mrb[7].mxu0 }
  0xf2   : > { %v2012_v60 = vpack.c.bf16 %v727_v51, %v727_v51  ;;  %v1994_v61 = vpack.c.bf16 %v655_v52, %v655_v52  ;;  %v730_v62 = vadd.f32 %v2167_v58, %v2483_v22  ;;  %v658_v63 = vadd.f32 %v2483_v22, %v657_v59  ;;  %v721_v0 = vpop.f32.mrb[7].mxu1 }
  0xf3   : > { %900 = vst.msk [vmem:[%s2490_s15 + $0x18] sm:$0xf] %vm893_vm1, %v1996_v55  ;;  %v2010_v1 = vpack.c.bf16 %v719_v56, %v719_v56  ;;  %v1997_v2 = vpack.c.bf16 %v666_v57, %v666_v57  ;;  %v722_v3 = vadd.f32 %v2483_v22, %v721_v0  ;;  %v2580_v55 = vld [vmem:[%s2816_s6] ss:$0 sm:$0xff] }
  0xf4   : > { %916 = vst.msk [vmem:[%s2490_s15 + $0x58] sm:$0xf] %vm893_vm1, %v2012_v60  ;;  %898 = vst.msk [vmem:[%s2490_s15 + $0x10] sm:$0xf] %vm893_vm1, %v1994_v61  ;;  %v2013_v4 = vpack.c.bf16 %v730_v62, %v730_v62  ;;  %v1995_v5 = vpack.c.bf16 %v658_v63, %v658_v63 }
  0xf5   : > { %914 = vst.msk [vmem:[%s2490_s15 + $0x50] sm:$0xf] %vm893_vm1, %v2010_v1  ;;  %901 = vst.msk [vmem:[%s2490_s15 + $0x1c] sm:$0xf] %vm893_vm1, %v1997_v2  ;;  %v2011_v6 = vpack.c.bf16 %v722_v3, %v722_v3 }
  0xf6   : > { %917 = vst.msk [vmem:[%s2490_s15 + $0x5c] sm:$0xf] %vm893_vm1, %v2013_v4  ;;  %899 = vst.msk [vmem:[%s2490_s15 + $0x14] sm:$0xf] %vm893_vm1, %v1995_v5  ;;  %v2154_v7 = vpop.f32.mrb[8].mxu0 }
  0xf7   : > { %915 = vst.msk [vmem:[%s2490_s15 + $0x54] sm:$0xf] %vm893_vm1, %v2011_v6  ;;  %v679_v8 = vadd.f32 %v2154_v7, %v2483_v22  ;;  %v2170_v9 = vpop.f32.mrb[8].mxu1  ;;  %v670_v10 = vpop.f32.mrb[9].mxu0 }
  0xf8   : > { %v743_v11 = vadd.f32 %v2170_v9, %v2483_v22  ;;  %v671_v12 = vadd.f32 %v2483_v22, %v670_v10  ;;  %v734_v13 = vpop.f32.mrb[9].mxu1  ;;  %v2155_v14 = vpop.f32.mrb[10].mxu0 }
  0xf9   : > { %v2000_v15 = vpack.c.bf16 %v679_v8, %v679_v8  ;;  %v735_v16 = vadd.f32 %v2483_v22, %v734_v13  ;;  %v682_v17 = vadd.f32 %v2155_v14, %v2483_v22  ;;  %v2171_v18 = vpop.f32.mrb[10].mxu1  ;;  %v673_v19 = vpop.f32.mrb[11].mxu0 }
  0xfa   : > { %v2016_v20 = vpack.c.bf16 %v743_v11, %v743_v11  ;;  %v1998_v21 = vpack.c.bf16 %v671_v12, %v671_v12  ;;  %v746_v23 = vadd.f32 %v2171_v18, %v2483_v22  ;;  %v674_v24 = vadd.f32 %v2483_v22, %v673_v19  ;;  %v737_v25 = vpop.f32.mrb[11].mxu1 }
  0xfb   : > { %904 = vst.msk [vmem:[%s2490_s15 + $0x28] sm:$0xf] %vm893_vm1, %v2000_v15  ;;  %v2014_v26 = vpack.c.bf16 %v735_v16, %v735_v16  ;;  %v2001_v27 = vpack.c.bf16 %v682_v17, %v682_v17  ;;  %v738_v28 = vadd.f32 %v2483_v22, %v737_v25 }
  0xfc   : > { %920 = vst.msk [vmem:[%s2490_s15 + $0x68] sm:$0xf] %vm893_vm1, %v2016_v20  ;;  %902 = vst.msk [vmem:[%s2490_s15 + $0x20] sm:$0xf] %vm893_vm1, %v1998_v21  ;;  %v2017_v29 = vpack.c.bf16 %v746_v23, %v746_v23  ;;  %v1999_v30 = vpack.c.bf16 %v674_v24, %v674_v24 }
  0xfd   : > { %918 = vst.msk [vmem:[%s2490_s15 + $0x60] sm:$0xf] %vm893_vm1, %v2014_v26  ;;  %905 = vst.msk [vmem:[%s2490_s15 + $0x2c] sm:$0xf] %vm893_vm1, %v2001_v27  ;;  %v2015_v31 = vpack.c.bf16 %v738_v28, %v738_v28 }
  0xfe   : > { %921 = vst.msk [vmem:[%s2490_s15 + $0x6c] sm:$0xf] %vm893_vm1, %v2017_v29  ;;  %903 = vst.msk [vmem:[%s2490_s15 + $0x24] sm:$0xf] %vm893_vm1, %v1999_v30  ;;  %v2158_v32 = vpop.f32.mrb[12].mxu0 }
  0xff   : > { %919 = vst.msk [vmem:[%s2490_s15 + $0x64] sm:$0xf] %vm893_vm1, %v2015_v31  ;;  %v695_v33 = vadd.f32 %v2158_v32, %v2483_v22  ;;  %v2174_v34 = vpop.f32.mrb[12].mxu1  ;;  %v686_v35 = vpop.f32.mrb[13].mxu0 }
 0x100   : > { %v759_v36 = vadd.f32 %v2174_v34, %v2483_v22  ;;  %v687_v37 = vadd.f32 %v2483_v22, %v686_v35  ;;  %v750_v38 = vpop.f32.mrb[13].mxu1  ;;  %v2159_v39 = vpop.f32.mrb[14].mxu0 }
 0x101   : > { %v2004_v40 = vpack.c.bf16 %v695_v33, %v695_v33  ;;  %v751_v41 = vadd.f32 %v2483_v22, %v750_v38  ;;  %v698_v42 = vadd.f32 %v2159_v39, %v2483_v22  ;;  %v2175_v43 = vpop.f32.mrb[14].mxu1  ;;  %v689_v44 = vpop.f32.mrb[15].mxu0 }
 0x102   : > { %v2020_v45 = vpack.c.bf16 %v759_v36, %v759_v36  ;;  %v2002_v46 = vpack.c.bf16 %v687_v37, %v687_v37  ;;  %v762_v47 = vadd.f32 %v2175_v43, %v2483_v22  ;;  %v690_v48 = vadd.f32 %v2483_v22, %v689_v44  ;;  %v753_v49 = vpop.f32.mrb[15].mxu1 }
 0x103   : > { %908 = vst.msk [vmem:[%s2490_s15 + $0x38] sm:$0xf] %vm893_vm1, %v2004_v40  ;;  %v2018_v50 = vpack.c.bf16 %v751_v41, %v751_v41  ;;  %v2005_v51 = vpack.c.bf16 %v698_v42, %v698_v42  ;;  %v754_v52 = vadd.f32 %v2483_v22, %v753_v49  ;;  %v2589_v22 = vld [vmem:[%s2815_s5] ss:$0 sm:$0xff] }
 0x104   : > { %924 = vst.msk [vmem:[%s2490_s15 + $0x78] sm:$0xf] %vm893_vm1, %v2020_v45  ;;  %906 = vst.msk [vmem:[%s2490_s15 + $0x30] sm:$0xf] %vm893_vm1, %v2002_v46  ;;  %v2021_v53 = vpack.c.bf16 %v762_v47, %v762_v47  ;;  %v2003_v54 = vpack.c.bf16 %v690_v48, %v690_v48 }
 0x105   : > { %922 = vst.msk [vmem:[%s2490_s15 + $0x70] sm:$0xf] %vm893_vm1, %v2018_v50  ;;  %909 = vst.msk [vmem:[%s2490_s15 + $0x3c] sm:$0xf] %vm893_vm1, %v2005_v51  ;;  %v2019_v56 = vpack.c.bf16 %v754_v52, %v754_v52 }
 0x106   : > { %925 = vst.msk [vmem:[%s2490_s15 + $0x7c] sm:$0xf] %vm893_vm1, %v2021_v53  ;;  %907 = vst.msk [vmem:[%s2490_s15 + $0x34] sm:$0xf] %vm893_vm1, %v2003_v54  ;;  %v2218_v57 = vpop.f32.mrb[16].mxu0 }
 0x107   : > { %923 = vst.msk [vmem:[%s2490_s15 + $0x74] sm:$0xf] %vm893_vm1, %v2019_v56  ;;  %v2182_v58 = vpop.f32.mrb[16].mxu1  ;;  %v1336_v59 = vadd.f32 %v2218_v57, %v2580_v55  ;;  %v1327_v60 = vpop.f32.mrb[17].mxu0 }
 0x108   : > { %v992_v61 = vadd.f32 %v2182_v58, %v2589_v22  ;;  %v983_v62 = vpop.f32.mrb[17].mxu1  ;;  %v1328_v63 = vadd.f32 %v2580_v55, %v1327_v60  ;;  %v2219_v0 = vpop.f32.mrb[18].mxu0 }
 0x109   : > { %v2056_v1 = vpack.c.bf16 %v1336_v59, %v1336_v59  ;;  %v984_v2 = vadd.f32 %v2589_v22, %v983_v62  ;;  %v2183_v3 = vpop.f32.mrb[18].mxu1  ;;  %v1339_v4 = vadd.f32 %v2219_v0, %v2580_v55  ;;  %v1330_v5 = vpop.f32.mrb[19].mxu0 }
 0x10a   : > { %v2024_v6 = vpack.c.bf16 %v992_v61, %v992_v61  ;;  %v2054_v7 = vpack.c.bf16 %v1328_v63, %v1328_v63  ;;  %v995_v8 = vadd.f32 %v2183_v3, %v2589_v22  ;;  %v986_v9 = vpop.f32.mrb[19].mxu1  ;;  %v1331_v10 = vadd.f32 %v2580_v55, %v1330_v5 }
 0x10b   : > { %1585 = vst.msk [vmem:[%s2603_s23 + $0x8] sm:$0xf] %vm1582_vm2, %v2056_v1  ;;  %v2022_v11 = vpack.c.bf16 %v984_v2, %v984_v2  ;;  %v2057_v12 = vpack.c.bf16 %v1339_v4, %v1339_v4  ;;  %v987_v13 = vadd.f32 %v2589_v22, %v986_v9 }
 0x10c   : > { %1240 = vst.msk [vmem:[%s2610_s26 + $0x8] sm:$0xf] %vm893_vm1, %v2024_v6  ;;  %v2025_v14 = vpack.c.bf16 %v995_v8, %v995_v8  ;;  %v2055_v15 = vpack.c.bf16 %v1331_v10, %v1331_v10 }
 0x10d   : > { %1583 = vst.msk [vmem:[%s2603_s23] sm:$0xf] %vm1582_vm2, %v2054_v7  ;;  %1586 = vst.msk [vmem:[%s2603_s23 + $0xc] sm:$0xf] %vm1582_vm2, %v2057_v12  ;;  %v2023_v16 = vpack.c.bf16 %v987_v13, %v987_v13 }
 0x10e   : > { %1238 = vst.msk [vmem:[%s2610_s26] sm:$0xf] %vm893_vm1, %v2022_v11  ;;  %1241 = vst.msk [vmem:[%s2610_s26 + $0xc] sm:$0xf] %vm893_vm1, %v2025_v14  ;;  %v2222_v17 = vpop.f32.mrb[20].mxu0 }
 0x10f   : > { %1584 = vst.msk [vmem:[%s2603_s23 + $0x4] sm:$0xf] %vm1582_vm2, %v2055_v15  ;;  %v2186_v18 = vpop.f32.mrb[20].mxu1  ;;  %v1352_v19 = vadd.f32 %v2222_v17, %v2580_v55  ;;  %v1343_v20 = vpop.f32.mrb[21].mxu0 }
 0x110   : > { %1239 = vst.msk [vmem:[%s2610_s26 + $0x4] sm:$0xf] %vm893_vm1, %v2023_v16  ;;  %v1008_v21 = vadd.f32 %v2186_v18, %v2589_v22  ;;  %v999_v23 = vpop.f32.mrb[21].mxu1  ;;  %v1344_v24 = vadd.f32 %v2580_v55, %v1343_v20  ;;  %v2223_v25 = vpop.f32.mrb[22].mxu0 }
 0x111   : > { %v2060_v26 = vpack.c.bf16 %v1352_v19, %v1352_v19  ;;  %v1000_v27 = vadd.f32 %v2589_v22, %v999_v23  ;;  %v2187_v28 = vpop.f32.mrb[22].mxu1  ;;  %v1355_v29 = vadd.f32 %v2223_v25, %v2580_v55  ;;  %v1346_v30 = vpop.f32.mrb[23].mxu0 }
 0x112   : > { %v2028_v31 = vpack.c.bf16 %v1008_v21, %v1008_v21  ;;  %v2058_v32 = vpack.c.bf16 %v1344_v24, %v1344_v24  ;;  %v1011_v33 = vadd.f32 %v2187_v28, %v2589_v22  ;;  %v1002_v34 = vpop.f32.mrb[23].mxu1  ;;  %v1347_v35 = vadd.f32 %v2580_v55, %v1346_v30 }
 0x113   : > { %1589 = vst.msk [vmem:[%s2603_s23 + $0x18] sm:$0xf] %vm1582_vm2, %v2060_v26  ;;  %v2026_v36 = vpack.c.bf16 %v1000_v27, %v1000_v27  ;;  %v2061_v37 = vpack.c.bf16 %v1355_v29, %v1355_v29  ;;  %v1003_v38 = vadd.f32 %v2589_v22, %v1002_v34 }
 0x114   : > { %1244 = vst.msk [vmem:[%s2610_s26 + $0x18] sm:$0xf] %vm893_vm1, %v2028_v31  ;;  %v2029_v39 = vpack.c.bf16 %v1011_v33, %v1011_v33  ;;  %v2059_v40 = vpack.c.bf16 %v1347_v35, %v1347_v35 }
 0x115   : > { %1587 = vst.msk [vmem:[%s2603_s23 + $0x10] sm:$0xf] %vm1582_vm2, %v2058_v32  ;;  %1590 = vst.msk [vmem:[%s2603_s23 + $0x1c] sm:$0xf] %vm1582_vm2, %v2061_v37  ;;  %v2027_v41 = vpack.c.bf16 %v1003_v38, %v1003_v38 }
 0x116   : > { %1242 = vst.msk [vmem:[%s2610_s26 + $0x10] sm:$0xf] %vm893_vm1, %v2026_v36  ;;  %1245 = vst.msk [vmem:[%s2610_s26 + $0x1c] sm:$0xf] %vm893_vm1, %v2029_v39  ;;  %v2226_v42 = vpop.f32.mrb[24].mxu0 }
 0x117   : > { %1588 = vst.msk [vmem:[%s2603_s23 + $0x14] sm:$0xf] %vm1582_vm2, %v2059_v40  ;;  %v2190_v43 = vpop.f32.mrb[24].mxu1  ;;  %v1368_v44 = vadd.f32 %v2226_v42, %v2580_v55  ;;  %v1359_v45 = vpop.f32.mrb[25].mxu0 }
 0x118   : > { %1243 = vst.msk [vmem:[%s2610_s26 + $0x14] sm:$0xf] %vm893_vm1, %v2027_v41  ;;  %v1024_v46 = vadd.f32 %v2190_v43, %v2589_v22  ;;  %v1015_v47 = vpop.f32.mrb[25].mxu1  ;;  %v1360_v48 = vadd.f32 %v2580_v55, %v1359_v45  ;;  %v2227_v49 = vpop.f32.mrb[26].mxu0 }
 0x119   : > { %v2064_v50 = vpack.c.bf16 %v1368_v44, %v1368_v44  ;;  %v1016_v51 = vadd.f32 %v2589_v22, %v1015_v47  ;;  %v2191_v52 = vpop.f32.mrb[26].mxu1  ;;  %v1371_v53 = vadd.f32 %v2227_v49, %v2580_v55  ;;  %v1362_v54 = vpop.f32.mrb[27].mxu0 }
 0x11a   : > { %v2032_v56 = vpack.c.bf16 %v1024_v46, %v1024_v46  ;;  %v2062_v57 = vpack.c.bf16 %v1360_v48, %v1360_v48  ;;  %v1027_v58 = vadd.f32 %v2191_v52, %v2589_v22  ;;  %v1018_v59 = vpop.f32.mrb[27].mxu1  ;;  %v1363_v60 = vadd.f32 %v2580_v55, %v1362_v54 }
 0x11b   : > { %1593 = vst.msk [vmem:[%s2603_s23 + $0x28] sm:$0xf] %vm1582_vm2, %v2064_v50  ;;  %v2030_v61 = vpack.c.bf16 %v1016_v51, %v1016_v51  ;;  %v2065_v62 = vpack.c.bf16 %v1371_v53, %v1371_v53  ;;  %v1019_v63 = vadd.f32 %v2589_v22, %v1018_v59 }
 0x11c   : > { %1248 = vst.msk [vmem:[%s2610_s26 + $0x28] sm:$0xf] %vm893_vm1, %v2032_v56  ;;  %v2033_v0 = vpack.c.bf16 %v1027_v58, %v1027_v58  ;;  %v2063_v1 = vpack.c.bf16 %v1363_v60, %v1363_v60 }
 0x11d   : > { %1591 = vst.msk [vmem:[%s2603_s23 + $0x20] sm:$0xf] %vm1582_vm2, %v2062_v57  ;;  %1594 = vst.msk [vmem:[%s2603_s23 + $0x2c] sm:$0xf] %vm1582_vm2, %v2065_v62  ;;  %v2031_v2 = vpack.c.bf16 %v1019_v63, %v1019_v63 }
 0x11e   : > { %1246 = vst.msk [vmem:[%s2610_s26 + $0x20] sm:$0xf] %vm893_vm1, %v2030_v61  ;;  %1249 = vst.msk [vmem:[%s2610_s26 + $0x2c] sm:$0xf] %vm893_vm1, %v2033_v0  ;;  %v2230_v3 = vpop.f32.mrb[28].mxu0 }
 0x11f   : > { %1592 = vst.msk [vmem:[%s2603_s23 + $0x24] sm:$0xf] %vm1582_vm2, %v2063_v1  ;;  %v2194_v4 = vpop.f32.mrb[28].mxu1  ;;  %v1384_v5 = vadd.f32 %v2230_v3, %v2580_v55  ;;  %v1375_v6 = vpop.f32.mrb[29].mxu0 }
 0x120   : > { %1247 = vst.msk [vmem:[%s2610_s26 + $0x24] sm:$0xf] %vm893_vm1, %v2031_v2  ;;  %v1040_v7 = vadd.f32 %v2194_v4, %v2589_v22  ;;  %v1031_v8 = vpop.f32.mrb[29].mxu1  ;;  %v1376_v9 = vadd.f32 %v2580_v55, %v1375_v6  ;;  %v2231_v10 = vpop.f32.mrb[30].mxu0 }
 0x121   : > { %v2068_v11 = vpack.c.bf16 %v1384_v5, %v1384_v5  ;;  %v1032_v12 = vadd.f32 %v2589_v22, %v1031_v8  ;;  %v2195_v13 = vpop.f32.mrb[30].mxu1  ;;  %v1387_v14 = vadd.f32 %v2231_v10, %v2580_v55  ;;  %v1378_v15 = vpop.f32.mrb[31].mxu0 }
 0x122   : > { %v2036_v16 = vpack.c.bf16 %v1040_v7, %v1040_v7  ;;  %v2066_v17 = vpack.c.bf16 %v1376_v9, %v1376_v9  ;;  %v1043_v18 = vadd.f32 %v2195_v13, %v2589_v22  ;;  %v1034_v19 = vpop.f32.mrb[31].mxu1  ;;  %v1379_v20 = vadd.f32 %v2580_v55, %v1378_v15 }
 0x123   : > { %1597 = vst.msk [vmem:[%s2603_s23 + $0x38] sm:$0xf] %vm1582_vm2, %v2068_v11  ;;  %v2034_v21 = vpack.c.bf16 %v1032_v12, %v1032_v12  ;;  %v2069_v23 = vpack.c.bf16 %v1387_v14, %v1387_v14  ;;  %v1035_v24 = vadd.f32 %v2589_v22, %v1034_v19 }
 0x124   : > { %1252 = vst.msk [vmem:[%s2610_s26 + $0x38] sm:$0xf] %vm893_vm1, %v2036_v16  ;;  %v2037_v25 = vpack.c.bf16 %v1043_v18, %v1043_v18  ;;  %v2067_v26 = vpack.c.bf16 %v1379_v20, %v1379_v20 }
 0x125   : > { %1595 = vst.msk [vmem:[%s2603_s23 + $0x30] sm:$0xf] %vm1582_vm2, %v2066_v17  ;;  %1598 = vst.msk [vmem:[%s2603_s23 + $0x3c] sm:$0xf] %vm1582_vm2, %v2069_v23  ;;  %v2035_v27 = vpack.c.bf16 %v1035_v24, %v1035_v24 }
 0x126   : > { %1250 = vst.msk [vmem:[%s2610_s26 + $0x30] sm:$0xf] %vm893_vm1, %v2034_v21  ;;  %1253 = vst.msk [vmem:[%s2610_s26 + $0x3c] sm:$0xf] %vm893_vm1, %v2037_v25  ;;  %v2234_v28 = vpop.f32.mrb[32].mxu0 }
 0x127   : > { %1596 = vst.msk [vmem:[%s2603_s23 + $0x34] sm:$0xf] %vm1582_vm2, %v2067_v26  ;;  %v2198_v29 = vpop.f32.mrb[32].mxu1  ;;  %v1400_v30 = vadd.f32 %v2234_v28, %v2580_v55  ;;  %v1391_v31 = vpop.f32.mrb[33].mxu0 }
 0x128   : > { %1251 = vst.msk [vmem:[%s2610_s26 + $0x34] sm:$0xf] %vm893_vm1, %v2035_v27  ;;  %v1056_v32 = vadd.f32 %v2198_v29, %v2589_v22  ;;  %v1047_v33 = vpop.f32.mrb[33].mxu1  ;;  %v1392_v34 = vadd.f32 %v2580_v55, %v1391_v31  ;;  %v2235_v35 = vpop.f32.mrb[34].mxu0 }
 0x129   : > { %v2072_v36 = vpack.c.bf16 %v1400_v30, %v1400_v30  ;;  %v1048_v37 = vadd.f32 %v2589_v22, %v1047_v33  ;;  %v2199_v38 = vpop.f32.mrb[34].mxu1  ;;  %v1403_v39 = vadd.f32 %v2235_v35, %v2580_v55  ;;  %v1394_v40 = vpop.f32.mrb[35].mxu0 }
 0x12a   : > { %v2040_v41 = vpack.c.bf16 %v1056_v32, %v1056_v32  ;;  %v2070_v42 = vpack.c.bf16 %v1392_v34, %v1392_v34  ;;  %v1059_v43 = vadd.f32 %v2199_v38, %v2589_v22  ;;  %v1050_v44 = vpop.f32.mrb[35].mxu1  ;;  %v1395_v45 = vadd.f32 %v2580_v55, %v1394_v40 }
 0x12b   : > { %1601 = vst.msk [vmem:[%s2603_s23 + $0x48] sm:$0xf] %vm1582_vm2, %v2072_v36  ;;  %v2038_v46 = vpack.c.bf16 %v1048_v37, %v1048_v37  ;;  %v2073_v47 = vpack.c.bf16 %v1403_v39, %v1403_v39  ;;  %v1051_v48 = vadd.f32 %v2589_v22, %v1050_v44 }
 0x12c   : > { %1256 = vst.msk [vmem:[%s2610_s26 + $0x48] sm:$0xf] %vm893_vm1, %v2040_v41  ;;  %v2041_v49 = vpack.c.bf16 %v1059_v43, %v1059_v43  ;;  %v2071_v50 = vpack.c.bf16 %v1395_v45, %v1395_v45 }
 0x12d   : > { %1599 = vst.msk [vmem:[%s2603_s23 + $0x40] sm:$0xf] %vm1582_vm2, %v2070_v42  ;;  %1602 = vst.msk [vmem:[%s2603_s23 + $0x4c] sm:$0xf] %vm1582_vm2, %v2073_v47  ;;  %v2039_v51 = vpack.c.bf16 %v1051_v48, %v1051_v48 }
 0x12e   : > { %1254 = vst.msk [vmem:[%s2610_s26 + $0x40] sm:$0xf] %vm893_vm1, %v2038_v46  ;;  %1257 = vst.msk [vmem:[%s2610_s26 + $0x4c] sm:$0xf] %vm893_vm1, %v2041_v49  ;;  %v2238_v52 = vpop.f32.mrb[36].mxu0 }
 0x12f   : > { %1600 = vst.msk [vmem:[%s2603_s23 + $0x44] sm:$0xf] %vm1582_vm2, %v2071_v50  ;;  %v2202_v53 = vpop.f32.mrb[36].mxu1  ;;  %v1416_v54 = vadd.f32 %v2238_v52, %v2580_v55  ;;  %v1407_v56 = vpop.f32.mrb[37].mxu0 }
 0x130   : > { %1255 = vst.msk [vmem:[%s2610_s26 + $0x44] sm:$0xf] %vm893_vm1, %v2039_v51  ;;  %v1072_v57 = vadd.f32 %v2202_v53, %v2589_v22  ;;  %v1063_v58 = vpop.f32.mrb[37].mxu1  ;;  %v1408_v59 = vadd.f32 %v2580_v55, %v1407_v56  ;;  %v2239_v60 = vpop.f32.mrb[38].mxu0 }
 0x131   : > { %v2076_v61 = vpack.c.bf16 %v1416_v54, %v1416_v54  ;;  %v1064_v62 = vadd.f32 %v2589_v22, %v1063_v58  ;;  %v2203_v63 = vpop.f32.mrb[38].mxu1  ;;  %v1419_v0 = vadd.f32 %v2239_v60, %v2580_v55  ;;  %v1410_v1 = vpop.f32.mrb[39].mxu0 }
 0x132   : > { %v2044_v2 = vpack.c.bf16 %v1072_v57, %v1072_v57  ;;  %v2074_v3 = vpack.c.bf16 %v1408_v59, %v1408_v59  ;;  %v1075_v4 = vadd.f32 %v2203_v63, %v2589_v22  ;;  %v1066_v5 = vpop.f32.mrb[39].mxu1  ;;  %v1411_v6 = vadd.f32 %v2580_v55, %v1410_v1 }
 0x133   : > { %1605 = vst.msk [vmem:[%s2603_s23 + $0x58] sm:$0xf] %vm1582_vm2, %v2076_v61  ;;  %v2042_v7 = vpack.c.bf16 %v1064_v62, %v1064_v62  ;;  %v2077_v8 = vpack.c.bf16 %v1419_v0, %v1419_v0  ;;  %v1067_v9 = vadd.f32 %v2589_v22, %v1066_v5 }
 0x134   : > { %1260 = vst.msk [vmem:[%s2610_s26 + $0x58] sm:$0xf] %vm893_vm1, %v2044_v2  ;;  %v2045_v10 = vpack.c.bf16 %v1075_v4, %v1075_v4  ;;  %v2075_v11 = vpack.c.bf16 %v1411_v6, %v1411_v6 }
 0x135   : > { %1603 = vst.msk [vmem:[%s2603_s23 + $0x50] sm:$0xf] %vm1582_vm2, %v2074_v3  ;;  %1606 = vst.msk [vmem:[%s2603_s23 + $0x5c] sm:$0xf] %vm1582_vm2, %v2077_v8  ;;  %v2043_v12 = vpack.c.bf16 %v1067_v9, %v1067_v9 }
 0x136   : > { %1258 = vst.msk [vmem:[%s2610_s26 + $0x50] sm:$0xf] %vm893_vm1, %v2042_v7  ;;  %1261 = vst.msk [vmem:[%s2610_s26 + $0x5c] sm:$0xf] %vm893_vm1, %v2045_v10  ;;  %v2242_v13 = vpop.f32.mrb[40].mxu0 }
 0x137   : > { %1604 = vst.msk [vmem:[%s2603_s23 + $0x54] sm:$0xf] %vm1582_vm2, %v2075_v11  ;;  %v2206_v14 = vpop.f32.mrb[40].mxu1  ;;  %v1432_v15 = vadd.f32 %v2242_v13, %v2580_v55  ;;  %v1423_v16 = vpop.f32.mrb[41].mxu0 }
 0x138   : > { %1259 = vst.msk [vmem:[%s2610_s26 + $0x54] sm:$0xf] %vm893_vm1, %v2043_v12  ;;  %v1088_v17 = vadd.f32 %v2206_v14, %v2589_v22  ;;  %v1079_v18 = vpop.f32.mrb[41].mxu1  ;;  %v1424_v19 = vadd.f32 %v2580_v55, %v1423_v16  ;;  %v2243_v20 = vpop.f32.mrb[42].mxu0 }
 0x139   : > { %v2080_v21 = vpack.c.bf16 %v1432_v15, %v1432_v15  ;;  %v1080_v23 = vadd.f32 %v2589_v22, %v1079_v18  ;;  %v2207_v24 = vpop.f32.mrb[42].mxu1  ;;  %v1435_v25 = vadd.f32 %v2243_v20, %v2580_v55  ;;  %v1426_v26 = vpop.f32.mrb[43].mxu0 }
 0x13a   : > { %v2048_v27 = vpack.c.bf16 %v1088_v17, %v1088_v17  ;;  %v2078_v28 = vpack.c.bf16 %v1424_v19, %v1424_v19  ;;  %v1091_v29 = vadd.f32 %v2207_v24, %v2589_v22  ;;  %v1082_v30 = vpop.f32.mrb[43].mxu1  ;;  %v1427_v31 = vadd.f32 %v2580_v55, %v1426_v26 }
 0x13b   : > { %1609 = vst.msk [vmem:[%s2603_s23 + $0x68] sm:$0xf] %vm1582_vm2, %v2080_v21  ;;  %v2046_v32 = vpack.c.bf16 %v1080_v23, %v1080_v23  ;;  %v2081_v33 = vpack.c.bf16 %v1435_v25, %v1435_v25  ;;  %v1083_v34 = vadd.f32 %v2589_v22, %v1082_v30 }
 0x13c   : > { %1264 = vst.msk [vmem:[%s2610_s26 + $0x68] sm:$0xf] %vm893_vm1, %v2048_v27  ;;  %v2049_v35 = vpack.c.bf16 %v1091_v29, %v1091_v29  ;;  %v2079_v36 = vpack.c.bf16 %v1427_v31, %v1427_v31 }
 0x13d   : > { %1607 = vst.msk [vmem:[%s2603_s23 + $0x60] sm:$0xf] %vm1582_vm2, %v2078_v28  ;;  %1610 = vst.msk [vmem:[%s2603_s23 + $0x6c] sm:$0xf] %vm1582_vm2, %v2081_v33  ;;  %v2047_v37 = vpack.c.bf16 %v1083_v34, %v1083_v34 }
 0x13e   : > { %1262 = vst.msk [vmem:[%s2610_s26 + $0x60] sm:$0xf] %vm893_vm1, %v2046_v32  ;;  %1265 = vst.msk [vmem:[%s2610_s26 + $0x6c] sm:$0xf] %vm893_vm1, %v2049_v35  ;;  %v2246_v38 = vpop.f32.mrb[44].mxu0 }
 0x13f   : > { %1608 = vst.msk [vmem:[%s2603_s23 + $0x64] sm:$0xf] %vm1582_vm2, %v2079_v36  ;;  %v2210_v39 = vpop.f32.mrb[44].mxu1  ;;  %v1448_v40 = vadd.f32 %v2246_v38, %v2580_v55  ;;  %v1439_v41 = vpop.f32.mrb[45].mxu0 }
 0x140   : > { %1263 = vst.msk [vmem:[%s2610_s26 + $0x64] sm:$0xf] %vm893_vm1, %v2047_v37  ;;  %v1104_v42 = vadd.f32 %v2210_v39, %v2589_v22  ;;  %v1095_v43 = vpop.f32.mrb[45].mxu1  ;;  %v1440_v44 = vadd.f32 %v2580_v55, %v1439_v41  ;;  %v2247_v45 = vpop.f32.mrb[46].mxu0 }
 0x141   : > { %v2084_v46 = vpack.c.bf16 %v1448_v40, %v1448_v40  ;;  %v1096_v47 = vadd.f32 %v2589_v22, %v1095_v43  ;;  %v2211_v48 = vpop.f32.mrb[46].mxu1  ;;  %v1451_v49 = vadd.f32 %v2247_v45, %v2580_v55  ;;  %v1442_v50 = vpop.f32.mrb[47].mxu0 }
 0x142   : > { %v2052_v51 = vpack.c.bf16 %v1104_v42, %v1104_v42  ;;  %v2082_v52 = vpack.c.bf16 %v1440_v44, %v1440_v44  ;;  %v1107_v53 = vadd.f32 %v2211_v48, %v2589_v22  ;;  %v1098_v54 = vpop.f32.mrb[47].mxu1  ;;  %v1443_v56 = vadd.f32 %v2580_v55, %v1442_v50 }
 0x143   : > { %1613 = vst.msk [vmem:[%s2603_s23 + $0x78] sm:$0xf] %vm1582_vm2, %v2084_v46  ;;  %v2050_v57 = vpack.c.bf16 %v1096_v47, %v1096_v47  ;;  %v2085_v58 = vpack.c.bf16 %v1451_v49, %v1451_v49  ;;  %v1099_v59 = vadd.f32 %v2589_v22, %v1098_v54 }
 0x144   : > { %1268 = vst.msk [vmem:[%s2610_s26 + $0x78] sm:$0xf] %vm893_vm1, %v2052_v51  ;;  %v2053_v60 = vpack.c.bf16 %v1107_v53, %v1107_v53  ;;  %v2083_v61 = vpack.c.bf16 %v1443_v56, %v1443_v56 }
 0x145   : > { %1611 = vst.msk [vmem:[%s2603_s23 + $0x70] sm:$0xf] %vm1582_vm2, %v2082_v52  ;;  %1614 = vst.msk [vmem:[%s2603_s23 + $0x7c] sm:$0xf] %vm1582_vm2, %v2085_v58  ;;  %v2051_v62 = vpack.c.bf16 %v1099_v59, %v1099_v59 }
 0x146   : > { %1266 = vst.msk [vmem:[%s2610_s26 + $0x70] sm:$0xf] %vm893_vm1, %v2050_v57  ;;  %1269 = vst.msk [vmem:[%s2610_s26 + $0x7c] sm:$0xf] %vm893_vm1, %v2053_v60 }
 0x147   : > { %1612 = vst.msk [vmem:[%s2603_s23 + $0x74] sm:$0xf] %vm1582_vm2, %v2083_v61 }
 0x148   : > { %1267 = vst.msk [vmem:[%s2610_s26 + $0x74] sm:$0xf] %vm893_vm1, %v2051_v62 }
 0x149 PF: > { %s20_s11 = sadd.s32 1, %s2320_s11   ;;  %s2820_s30 = smov %s2316_s10 }
 0x14a   : > { %p17_p5 = scmp.ge.s32.totalorder %s20_s11, 4   ;;  %s2821_s10 = smov %s2823_s12 }
 0x14c   :  { %19 = sbr.rel (!%p17_p5) target bundleno = 2 (0x2), region = 102 }

// kernel: eau_forward.6
= control target key start
LH: loop header
LB: loop body
LE: loop exit
PB: predicated region body
PF: predicated region fallthrough
CT: control target
= control target key end

     0   :  { %s3527_s18 = smov 0   ;;  %s3529_s19 = smov 0   ;;  %s4303_s0 = inlined_call_operand.vmem [shape: f32[16,16], index: 0, kind: input, shape index: {}]   ;;  %s4304_s1 = inlined_call_operand.vmem [shape: bf16[2,16,16,4], index: 1, kind: input, shape index: {}]   ;;  %s4305_s2 = inlined_call_operand.vmem [shape: bf16[2,16,16,4], index: 2, kind: input, shape index: {}]   ;;  %s4306_s3 = inlined_call_operand.vmem [shape: bf16[2,16,16,32], index: 3, kind: input, shape index: {}]   ;;  %s4307_s4 = inlined_call_operand.vmem [shape: f32[2,16,16,2], index: 4, kind: output, shape index: {0}]   ;;  %s4308_s5 = inlined_call_operand.vmem [shape: bf16[2,16,16,32], index: 5, kind: output, shape index: {1}]  }
   0x1   :  { %s3531_s20 = smov 0  }
   0x2 LB: > { %s28_s21 = sadd.s32 1, %s3489_s19  ;;  %p2915_p0 = scmp.ge.s32.totalorder %s3493_s20, 1  ;;  %s3493_s20 = sphi %s3531_s20, %s16_s20   ;;  %s3489_s19 = sphi %s3529_s19, %s4310_s19   ;;  %s3485_s18 = sphi %s3527_s18, %s4309_s18  }
   0x3   : > { %p30_p1 = scmp.ge.s32.totalorder %s28_s21, 2  ;;  %p250_p2 = scmp.lt.s32.totalorder %s3493_s20, 3 }
   0x5   : > { %s4312_s21 = smov (%p30_p1, %s28_s21), 0  ;;  %p251_p3 = pnand %p2915_p0, %p250_p2 }
   0x6   : > { %p319_p4 = scmp.lt.s32.totalorder (!%p251_p3), %s3485_s18, 1  ;;  %v3495_v0 = vmov (!%p251_p3), 0.0   ;;  %vm3496_vm0 = vmmov (!%p251_p3), 0   ;;  %vm482_vm1 = vcmask (!%p251_p3), 31744   ;;  %v3683_v49 = vld [vmem:[%s4303_s0] sm:$0xff] (!%p251_p3)  ;;  %v3688_v51 = vld [vmem:[%s4303_s0 + $0x8] sm:$0xff] (!%p251_p3) }
   0x7   : > { %254 = sbr.rel (%p251_p3) target bundleno = 679 (0x2a7), region = 36  ;;  %3141 = vmatprep.subr.bf16.mxu0 (!%p251_p3), %v3495_v0  ;;  %3147 = vmatprep.subr.bf16.mxu1 (!%p251_p3), %v3495_v0  ;;  %vm1385_vm2 = vcmask (!%p251_p3), 130048   ;;  %vm1674_vm3 = vcmask (!%p251_p3), 7168   ;;  %vm1707_vm4 = vcmask (!%p251_p3), 15360   ;;  %vm2684_vm5 = vcmask (!%p251_p3), 257024  }
   0x8   : > { %3143 = vmatprep.mubr.msk.bf16.mxu0 (!%p251_p3), %vm3496_vm0, %v3495_v0  ;;  %3149 = vmatprep.mubr.msk.bf16.mxu1 (!%p251_p3), %vm3496_vm0, %v3495_v0 }
   0xe   : > { %s4314_s18 = smov (!%p319_p4, %s3485_s18), 1 }
   0xf   : > { %s3554_s22 = sshll.u32 %s4314_s18, 7  ;;  %s3043_s11 = sshll.u32 %s4314_s18, 8 }
  0x10   : > { %s3560_s25 = scalar_lea.vmem %s4305_s2, %s3554_s22  ;;  %s3568_s28 = scalar_lea.vmem %s4304_s1, %s3554_s22 }
  0x11   : > { %v3359_v1 = vld [vmem:[%s3560_s25] sm:$0xff]   ;;  %v3360_v2 = vld [vmem:[%s3560_s25 + $0x8] sm:$0xff]   ;;  %v3363_v5 = vld [vmem:[%s3560_s25 + $0x10] sm:$0xff]   ;;  %s3780_s10 = scalar_lea.vmem %s4306_s3, %s3554_s22  ;;  %s4094_s14 = scalar_lea.vmem %s4307_s4, %s3043_s11 }
  0x12   : > { %v487_v3 = vsel %vm482_vm1, %v3359_v1, 0  ;;  %v544_v4 = vsel %vm482_vm1, %v3360_v2, 0  ;;  %v3364_v6 = vld [vmem:[%s3560_s25 + $0x18] sm:$0xff]   ;;  %v3361_v7 = vld [vmem:[%s3568_s28] sm:$0xff]   ;;  %v3362_v8 = vld [vmem:[%s3568_s28 + $0x8] sm:$0xff]   ;;  %v601_v9 = vsel %vm482_vm1, %v3363_v5, 0  ;;  %s4228_s17 = scalar_lea.vmem %s4308_s5, %s3554_s22 }
  0x13   : > { %3142 = vmatpush3.bf16.xpose.msra.mxu0 %v487_v3  ;;  %3148 = vmatpush3.bf16.xpose.msra.mxu1 %v544_v4  ;;  %v658_v10 = vsel %vm482_vm1, %v3364_v6, 0  ;;  %v3366_v11 = vld [vmem:[%s3560_s25 + $0x20] sm:$0xff]   ;;  %v3368_v12 = vld [vmem:[%s3560_s25 + $0x28] sm:$0xff]   ;;  %v3365_v13 = vld [vmem:[%s3568_s28 + $0x10] sm:$0xff]  }
  0x14   : > { %3153 = vmatprep.subr.bf16.mxu0 %v3495_v0  ;;  %3159 = vmatprep.subr.bf16.mxu1 %v3495_v0  ;;  %v3367_v14 = vld [vmem:[%s3568_s28 + $0x18] sm:$0xff]   ;;  %v715_v15 = vsel %vm482_vm1, %v3366_v11, 0  ;;  %v772_v16 = vsel %vm482_vm1, %v3368_v12, 0  ;;  %v3370_v17 = vld [vmem:[%s3560_s25 + $0x30] sm:$0xff]   ;;  %v3369_v19 = vld [vmem:[%s3568_s28 + $0x20] sm:$0xff]  }
  0x15   : > { %v3372_v18 = vld [vmem:[%s3560_s25 + $0x38] sm:$0xff]   ;;  %v3371_v20 = vld [vmem:[%s3568_s28 + $0x28] sm:$0xff]   ;;  %v829_v21 = vsel %vm482_vm1, %v3370_v17, 0  ;;  %v3374_v23 = vld [vmem:[%s3560_s25 + $0x40] sm:$0xff]  }
  0x16   : > { %v886_v22 = vsel %vm482_vm1, %v3372_v18, 0  ;;  %v3376_v24 = vld [vmem:[%s3560_s25 + $0x48] sm:$0xff]   ;;  %v3373_v25 = vld [vmem:[%s3568_s28 + $0x30] sm:$0xff]   ;;  %v3375_v26 = vld [vmem:[%s3568_s28 + $0x38] sm:$0xff]   ;;  %v943_v27 = vsel %vm482_vm1, %v3374_v23, 0 }
  0x17   : > { %v1000_v28 = vsel %vm482_vm1, %v3376_v24, 0  ;;  %v3378_v29 = vld [vmem:[%s3560_s25 + $0x50] sm:$0xff]   ;;  %v3380_v30 = vld [vmem:[%s3560_s25 + $0x58] sm:$0xff]   ;;  %v3377_v31 = vld [vmem:[%s3568_s28 + $0x40] sm:$0xff]  }
  0x18   : > { %v3379_v32 = vld [vmem:[%s3568_s28 + $0x48] sm:$0xff]   ;;  %v1057_v33 = vsel %vm482_vm1, %v3378_v29, 0  ;;  %v1114_v34 = vsel %vm482_vm1, %v3380_v30, 0  ;;  %v3382_v35 = vld [vmem:[%s3560_s25 + $0x60] sm:$0xff]   ;;  %v3381_v37 = vld [vmem:[%s3568_s28 + $0x50] sm:$0xff]  }
  0x19   : > { %v3384_v36 = vld [vmem:[%s3560_s25 + $0x68] sm:$0xff]   ;;  %v3383_v38 = vld [vmem:[%s3568_s28 + $0x58] sm:$0xff]   ;;  %v1171_v39 = vsel %vm482_vm1, %v3382_v35, 0  ;;  %v3386_v41 = vld [vmem:[%s3560_s25 + $0x70] sm:$0xff]  }
  0x1a   : > { %3144 = vmatmul.mubr.msk.bf16.vlgmr.msra.gmra.mrb[0].mxu0 %vm482_vm1, %v3361_v7  ;;  %3150 = vmatmul.mubr.msk.bf16.vlgmr.msra.gmra.mrb[0].mxu1 %vm482_vm1, %v3362_v8  ;;  %v1228_v40 = vsel %vm482_vm1, %v3384_v36, 0  ;;  %v3388_v42 = vld [vmem:[%s3560_s25 + $0x78] sm:$0xff]   ;;  %v3385_v43 = vld [vmem:[%s3568_s28 + $0x60] sm:$0xff]   ;;  %v3387_v44 = vld [vmem:[%s3568_s28 + $0x68] sm:$0xff]   ;;  %v1285_v45 = vsel %vm482_vm1, %v3386_v41, 0 }
  0x1b   : > { %3154 = vmatpush3.bf16.xpose.msra.mxu0 %v601_v9  ;;  %3160 = vmatpush3.bf16.xpose.msra.mxu1 %v658_v10  ;;  %v1342_v46 = vsel %vm482_vm1, %v3388_v42, 0  ;;  %v3389_v47 = vld [vmem:[%s3568_s28 + $0x70] sm:$0xff]   ;;  %v3390_v48 = vld [vmem:[%s3568_s28 + $0x78] sm:$0xff]  }
  0x1c   : > { %3155 = vmatprep.mubr.msk.bf16.mxu0 %vm3496_vm0, %v3495_v0  ;;  %3165 = vmatprep.subr.bf16.mxu0 %v3495_v0 }
  0x1d   : > { %3161 = vmatprep.mubr.msk.bf16.mxu1 %vm3496_vm0, %v3495_v0  ;;  %3171 = vmatprep.subr.bf16.mxu1 %v3495_v0 }
  0x22   : > { %3156 = vmatmul.mubr.msk.bf16.vlgmr.msra.gmra.mrb[4].mxu0 %vm482_vm1, %v3365_v13  ;;  %3162 = vmatmul.mubr.msk.bf16.vlgmr.msra.gmra.mrb[4].mxu1 %vm482_vm1, %v3367_v14 }
  0x23   : > { %3166 = vmatpush3.bf16.xpose.msra.mxu0 %v715_v15  ;;  %3172 = vmatpush3.bf16.xpose.msra.mxu1 %v772_v16 }
  0x24   : > { %3167 = vmatprep.mubr.msk.bf16.mxu0 %vm3496_vm0, %v3495_v0  ;;  %3177 = vmatprep.subr.bf16.mxu0 %v3495_v0 }
  0x25   : > { %3173 = vmatprep.mubr.msk.bf16.mxu1 %vm3496_vm0, %v3495_v0  ;;  %3183 = vmatprep.subr.bf16.mxu1 %v3495_v0 }
  0x2a   : > { %3168 = vmatmul.mubr.msk.bf16.vlgmr.msra.gmra.mrb[8].mxu0 %vm482_vm1, %v3369_v19  ;;  %3174 = vmatmul.mubr.msk.bf16.vlgmr.msra.gmra.mrb[8].mxu1 %vm482_vm1, %v3371_v20 }
  0x2b   : > { %3178 = vmatpush3.bf16.xpose.msra.mxu0 %v829_v21  ;;  %3184 = vmatpush3.bf16.xpose.msra.mxu1 %v886_v22 }
  0x2c   : > { %3179 = vmatprep.mubr.msk.bf16.mxu0 %vm3496_vm0, %v3495_v0  ;;  %3189 = vmatprep.subr.bf16.mxu0 %v3495_v0 }
  0x2d   : > { %3185 = vmatprep.mubr.msk.bf16.mxu1 %vm3496_vm0, %v3495_v0  ;;  %3195 = vmatprep.subr.bf16.mxu1 %v3495_v0 }
  0x32   : > { %3180 = vmatmul.mubr.msk.bf16.vlgmr.msra.gmra.mrb[12].mxu0 %vm482_vm1, %v3373_v25  ;;  %3186 = vmatmul.mubr.msk.bf16.vlgmr.msra.gmra.mrb[12].mxu1 %vm482_vm1, %v3375_v26 }
  0x33   : > { %3190 = vmatpush3.bf16.xpose.msra.mxu0 %v943_v27  ;;  %3196 = vmatpush3.bf16.xpose.msra.mxu1 %v1000_v28 }
  0x34   : > { %3191 = vmatprep.mubr.msk.bf16.mxu0 %vm3496_vm0, %v3495_v0  ;;  %3201 = vmatprep.subr.bf16.mxu0 %v3495_v0 }
  0x35   : > { %3197 = vmatprep.mubr.msk.bf16.mxu1 %vm3496_vm0, %v3495_v0  ;;  %3207 = vmatprep.subr.bf16.mxu1 %v3495_v0 }
  0x3a   : > { %3192 = vmatmul.mubr.msk.bf16.vlgmr.msra.gmra.mrb[16].mxu0 %vm482_vm1, %v3377_v31  ;;  %3198 = vmatmul.mubr.msk.bf16.vlgmr.msra.gmra.mrb[16].mxu1 %vm482_vm1, %v3379_v32 }
  0x3b   : > { %3202 = vmatpush3.bf16.xpose.msra.mxu0 %v1057_v33  ;;  %3208 = vmatpush3.bf16.xpose.msra.mxu1 %v1114_v34 }
  0x3c   : > { %3203 = vmatprep.mubr.msk.bf16.mxu0 %vm3496_vm0, %v3495_v0  ;;  %3213 = vmatprep.subr.bf16.mxu0 %v3495_v0 }
  0x3d   : > { %3209 = vmatprep.mubr.msk.bf16.mxu1 %vm3496_vm0, %v3495_v0  ;;  %3219 = vmatprep.subr.bf16.mxu1 %v3495_v0 }
  0x42   : > { %3204 = vmatmul.mubr.msk.bf16.vlgmr.msra.gmra.mrb[20].mxu0 %vm482_vm1, %v3381_v37  ;;  %3210 = vmatmul.mubr.msk.bf16.vlgmr.msra.gmra.mrb[20].mxu1 %vm482_vm1, %v3383_v38 }
  0x43   : > { %3214 = vmatpush3.bf16.xpose.msra.mxu0 %v1171_v39  ;;  %3220 = vmatpush3.bf16.xpose.msra.mxu1 %v1228_v40 }
  0x44   : > { %3215 = vmatprep.mubr.msk.bf16.mxu0 %vm3496_vm0, %v3495_v0  ;;  %3225 = vmatprep.subr.bf16.mxu0 %v3495_v0 }
  0x45   : > { %3221 = vmatprep.mubr.msk.bf16.mxu1 %vm3496_vm0, %v3495_v0  ;;  %3231 = vmatprep.subr.bf16.mxu1 %v3495_v0 }
  0x4a   : > { %3216 = vmatmul.mubr.msk.bf16.vlgmr.msra.gmra.mrb[24].mxu0 %vm482_vm1, %v3385_v43  ;;  %3222 = vmatmul.mubr.msk.bf16.vlgmr.msra.gmra.mrb[24].mxu1 %vm482_vm1, %v3387_v44 }
  0x4b   : > { %3226 = vmatpush3.bf16.xpose.msra.mxu0 %v1285_v45  ;;  %3232 = vmatpush3.bf16.xpose.msra.mxu1 %v1342_v46 }
  0x4c   : > { %3227 = vmatprep.mubr.msk.bf16.mxu0 %vm3496_vm0, %v3495_v0  ;;  %3233 = vmatprep.mubr.msk.bf16.mxu1 %vm3496_vm0, %v3495_v0 }
  0x4d   : > { %3237 = vmatprep.subr.bf16.mxu0 %v3495_v0  ;;  %3243 = vmatprep.subr.bf16.mxu1 %v3495_v0 }
  0x52   : > { %3228 = vmatmul.mubr.msk.bf16.vlgmr.msra.gmra.mrb[28].mxu0 %vm482_vm1, %v3389_v47  ;;  %3234 = vmatmul.mubr.msk.bf16.vlgmr.msra.gmra.mrb[28].mxu1 %vm482_vm1, %v3390_v48 }
  0x53   : > { %3239 = vmatprep.mubr.msk.bf16.mxu0 %vm3496_vm0, %v3495_v0  ;;  %3245 = vmatprep.mubr.msk.bf16.mxu1 %vm3496_vm0, %v3495_v0 }
  0xed   : > { %v523_v50 = vpop.f32.mrb[0].mxu0  ;;  %v580_v53 = vpop.f32.mrb[0].mxu1 }
  0xee   : > { %v3691_v52 = vadd.f32 %v523_v50, %v3683_v49  ;;  %v3145_v54 = vpop.f32.mrb[1].mxu0  ;;  %v3694_v55 = vadd.f32 %v580_v53, %v3683_v49  ;;  %v3151_v56 = vpop.f32.mrb[1].mxu1 }
  0xef   : > { %v526_v57 = vpop.f32.mrb[2].mxu0  ;;  %v583_v59 = vpop.f32.mrb[2].mxu1 }
  0xf0   : > { %v3697_v58 = vadd.f32 %v526_v57, %v3688_v51  ;;  %v3146_v60 = vpop.f32.mrb[3].mxu0  ;;  %v1386_v61 = vsel %vm1385_vm2, %v3691_v52, -inf  ;;  %v3702_v62 = vadd.f32 %v583_v59, %v3688_v51  ;;  %v3152_v63 = vpop.f32.mrb[3].mxu1  ;;  %v1392_v1 = vsel %vm1385_vm2, %v3694_v55, -inf }
  0xf1   : > { %1387 = vmax.xlane.f32.xlu0 %v1386_v61  ;;  %1393 = vmax.xlane.f32.xlu1 %v1392_v1 }
  0xf2   : > { %v1389_v2 = vsel %vm1385_vm2, %v3697_v58, -inf  ;;  %v1395_v3 = vsel %vm1385_vm2, %v3702_v62, -inf }
  0xf5   : > { %1390 = vmax.xlane.f32.xlu0 %v1389_v2  ;;  %v637_v4 = vpop.f32.mrb[4].mxu0  ;;  %1396 = vmax.xlane.f32.xlu1 %v1395_v3  ;;  %v694_v7 = vpop.f32.mrb[4].mxu1 }
  0xf6   : > { %v3711_v5 = vadd.f32 %v637_v4, %v3683_v49  ;;  %v3157_v6 = vpop.f32.mrb[5].mxu0  ;;  %v3714_v9 = vadd.f32 %v694_v7, %v3683_v49  ;;  %v3163_v10 = vpop.f32.mrb[5].mxu1  ;;  %v3391_v7 = vld [vmem:[%s3780_s10] sm:$0xff]  }
  0xf7   : > { %v640_v8 = vpop.f32.mrb[6].mxu0  ;;  %v697_v13 = vpop.f32.mrb[6].mxu1  ;;  %3238 = vmatpush3.bf16.msra.mxu0 %v3391_v7 }
  0xf8   : > { %v3717_v11 = vadd.f32 %v640_v8, %v3688_v51  ;;  %v3158_v12 = vpop.f32.mrb[7].mxu0  ;;  %v1398_v14 = vsel %vm1385_vm2, %v3711_v5, -inf  ;;  %v3164_v15 = vpop.f32.mrb[7].mxu1  ;;  %v3722_v16 = vadd.f32 %v697_v13, %v3688_v51  ;;  %v1404_v18 = vsel %vm1385_vm2, %v3714_v9, -inf  ;;  %3249 = vmatprep.subr.bf16.mxu0 %v3495_v0 }
  0xf9   : > { %1399 = vmax.xlane.f32.xlu0 %v1398_v14  ;;  %v3392_v14 = vld [vmem:[%s3780_s10 + $0x8] sm:$0xff]  }
  0xfa   : > { %v1401_v17 = vsel %vm1385_vm2, %v3717_v11, -inf  ;;  %v1407_v23 = vsel %vm1385_vm2, %v3722_v16, -inf  ;;  %3244 = vmatpush3.bf16.msra.mxu1 %v3392_v14 }
  0xfb   : > { %1402 = vmax.xlane.f32.xlu1 %v1401_v17  ;;  %3255 = vmatprep.subr.bf16.mxu1 %v3495_v0 }
  0xfd   : > { %1405 = vmax.xlane.f32.xlu0 %v1404_v18  ;;  %v751_v19 = vpop.f32.mrb[8].mxu0  ;;  %v808_v22 = vpop.f32.mrb[8].mxu1 }
  0xfe   : > { %v3729_v20 = vadd.f32 %v751_v19, %v3683_v49  ;;  %v3169_v21 = vpop.f32.mrb[9].mxu0  ;;  %v3734_v24 = vadd.f32 %v808_v22, %v3683_v49  ;;  %v3175_v26 = vpop.f32.mrb[9].mxu1 }
  0xff   : > { %1408 = vmax.xlane.f32.xlu1 %v1407_v23  ;;  %v754_v25 = vpop.f32.mrb[10].mxu0  ;;  %v811_v29 = vpop.f32.mrb[10].mxu1 }
 0x100   : > { %v3737_v27 = vadd.f32 %v754_v25, %v3688_v51  ;;  %v3170_v28 = vpop.f32.mrb[11].mxu0  ;;  %v1410_v30 = vsel %vm1385_vm2, %v3729_v20, -inf  ;;  %v3176_v31 = vpop.f32.mrb[11].mxu1  ;;  %v3742_v32 = vadd.f32 %v811_v29, %v3688_v51  ;;  %v1416_v34 = vsel %vm1385_vm2, %v3734_v24, -inf }
 0x101   : > { %1411 = vmax.xlane.f32.xlu0 %v1410_v30 }
 0x102   : > { %v1413_v33 = vsel %vm1385_vm2, %v3737_v27, -inf  ;;  %v1419_v39 = vsel %vm1385_vm2, %v3742_v32, -inf }
 0x103   : > { %1414 = vmax.xlane.f32.xlu1 %v1413_v33 }
 0x105   : > { %1417 = vmax.xlane.f32.xlu0 %v1416_v34  ;;  %v865_v35 = vpop.f32.mrb[12].mxu0  ;;  %v922_v38 = vpop.f32.mrb[12].mxu1 }
 0x106   : > { %v3749_v36 = vadd.f32 %v865_v35, %v3683_v49  ;;  %v3181_v37 = vpop.f32.mrb[13].mxu0  ;;  %v3754_v40 = vadd.f32 %v922_v38, %v3683_v49  ;;  %v3187_v42 = vpop.f32.mrb[13].mxu1 }
 0x107   : > { %1420 = vmax.xlane.f32.xlu1 %v1419_v39  ;;  %v868_v41 = vpop.f32.mrb[14].mxu0  ;;  %v925_v45 = vpop.f32.mrb[14].mxu1 }
 0x108   : > { %v3757_v43 = vadd.f32 %v868_v41, %v3688_v51  ;;  %v3182_v44 = vpop.f32.mrb[15].mxu0  ;;  %v1422_v46 = vsel %vm1385_vm2, %v3749_v36, -inf  ;;  %v3188_v47 = vpop.f32.mrb[15].mxu1  ;;  %v3762_v48 = vadd.f32 %v925_v45, %v3688_v51  ;;  %v1428_v53 = vsel %vm1385_vm2, %v3754_v40, -inf }
 0x109   : > { %1423 = vmax.xlane.f32.xlu0 %v1422_v46 }
 0x10a   : > { %v1425_v50 = vsel %vm1385_vm2, %v3757_v43, -inf  ;;  %v1431_v60 = vsel %vm1385_vm2, %v3762_v48, -inf }
 0x10b   : > { %1426 = vmax.xlane.f32.xlu1 %v1425_v50 }
 0x10d   : > { %1429 = vmax.xlane.f32.xlu0 %v1428_v53  ;;  %v979_v54 = vpop.f32.mrb[16].mxu0  ;;  %v1036_v59 = vpop.f32.mrb[16].mxu1 }
 0x10e   : > { %v3769_v56 = vadd.f32 %v979_v54, %v3683_v49  ;;  %v3193_v57 = vpop.f32.mrb[17].mxu0  ;;  %v3774_v61 = vadd.f32 %v1036_v59, %v3683_v49  ;;  %v3199_v1 = vpop.f32.mrb[17].mxu1 }
 0x10f   : > { %1432 = vmax.xlane.f32.xlu1 %v1431_v60  ;;  %v982_v63 = vpop.f32.mrb[18].mxu0  ;;  %v1039_v4 = vpop.f32.mrb[18].mxu1 }
 0x110   : > { %v3783_v2 = vadd.f32 %v982_v63, %v3688_v51  ;;  %v3194_v3 = vpop.f32.mrb[19].mxu0  ;;  %v1434_v6 = vsel %vm1385_vm2, %v3769_v56, -inf  ;;  %v3789_v8 = vadd.f32 %v1039_v4, %v3688_v51  ;;  %v3200_v10 = vpop.f32.mrb[19].mxu1  ;;  %v1440_v12 = vsel %vm1385_vm2, %v3774_v61, -inf }
 0x111   : > { %1435 = vmax.xlane.f32.xlu0 %v1434_v6 }
 0x112   : > { %v1437_v13 = vsel %vm1385_vm2, %v3783_v2, -inf  ;;  %v1443_v17 = vsel %vm1385_vm2, %v3789_v8, -inf }
 0x113   : > { %1438 = vmax.xlane.f32.xlu1 %v1437_v13 }
 0x115   : > { %1441 = vmax.xlane.f32.xlu0 %v1440_v12  ;;  %v1093_v15 = vpop.f32.mrb[20].mxu0  ;;  %v1150_v21 = vpop.f32.mrb[20].mxu1 }
 0x116   : > { %v3801_v18 = vadd.f32 %v1093_v15, %v3683_v49  ;;  %v3205_v19 = vpop.f32.mrb[21].mxu0  ;;  %v3804_v22 = vadd.f32 %v1150_v21, %v3683_v49  ;;  %v3211_v25 = vpop.f32.mrb[21].mxu1 }
 0x117   : > { %1444 = vmax.xlane.f32.xlu1 %v1443_v17  ;;  %v1096_v23 = vpop.f32.mrb[22].mxu0  ;;  %v1153_v29 = vpop.f32.mrb[22].mxu1 }
 0x118   : > { %v3807_v26 = vadd.f32 %v1096_v23, %v3688_v51  ;;  %v3206_v28 = vpop.f32.mrb[23].mxu0  ;;  %v1446_v30 = vsel %vm1385_vm2, %v3801_v18, -inf  ;;  %v3812_v31 = vadd.f32 %v1153_v29, %v3688_v51  ;;  %v3212_v33 = vpop.f32.mrb[23].mxu1  ;;  %v1452_v35 = vsel %vm1385_vm2, %v3804_v22, -inf }
 0x119   : > { %1447 = vmax.xlane.f32.xlu0 %v1446_v30 }
 0x11a   : > { %v1449_v34 = vsel %vm1385_vm2, %v3807_v26, -inf  ;;  %v1455_v38 = vsel %vm1385_vm2, %v3812_v31, -inf }
 0x11b   : > { %1450 = vmax.xlane.f32.xlu1 %v1449_v34 }
 0x11d   : > { %1453 = vmax.xlane.f32.xlu0 %v1452_v35  ;;  %v1207_v37 = vpop.f32.mrb[24].mxu0  ;;  %v1264_v42 = vpop.f32.mrb[24].mxu1 }
 0x11e   : > { %v3821_v39 = vadd.f32 %v1207_v37, %v3683_v49  ;;  %v3217_v41 = vpop.f32.mrb[25].mxu0  ;;  %v3824_v44 = vadd.f32 %v1264_v42, %v3683_v49  ;;  %v3223_v46 = vpop.f32.mrb[25].mxu1 }
 0x11f   : > { %1456 = vmax.xlane.f32.xlu1 %v1455_v38  ;;  %v1210_v45 = vpop.f32.mrb[26].mxu0  ;;  %v1267_v53 = vpop.f32.mrb[26].mxu1 }
 0x120   : > { %v3827_v47 = vadd.f32 %v1210_v45, %v3688_v51  ;;  %v3218_v50 = vpop.f32.mrb[27].mxu0  ;;  %v1458_v54 = vsel %vm1385_vm2, %v3821_v39, -inf  ;;  %v3224_v57 = vpop.f32.mrb[27].mxu1  ;;  %v3832_v59 = vadd.f32 %v1267_v53, %v3688_v51  ;;  %v1464_v63 = vsel %vm1385_vm2, %v3824_v44, -inf }
 0x121   : > { %1459 = vmax.xlane.f32.xlu0 %v1458_v54 }
 0x122   : > { %v1461_v60 = vsel %vm1385_vm2, %v3827_v47, -inf  ;;  %v1467_v7 = vsel %vm1385_vm2, %v3832_v59, -inf }
 0x123   : > { %1462 = vmax.xlane.f32.xlu1 %v1461_v60 }
 0x125   : > { %1465 = vmax.xlane.f32.xlu0 %v1464_v63  ;;  %v1321_v1 = vpop.f32.mrb[28].mxu0  ;;  %v1378_v6 = vpop.f32.mrb[28].mxu1 }
 0x126   : > { %v3839_v3 = vadd.f32 %v1321_v1, %v3683_v49  ;;  %v3229_v4 = vpop.f32.mrb[29].mxu0  ;;  %v3844_v10 = vadd.f32 %v1378_v6, %v3683_v49  ;;  %v3235_v13 = vpop.f32.mrb[29].mxu1 }
 0x127   : > { %1468 = vmax.xlane.f32.xlu1 %v1467_v7  ;;  %v1324_v12 = vpop.f32.mrb[30].mxu0  ;;  %v1381_v17 = vpop.f32.mrb[30].mxu1 }
 0x128   : > { %v3847_v14 = vadd.f32 %v1324_v12, %v3688_v51  ;;  %v3230_v15 = vpop.f32.mrb[31].mxu0  ;;  %v1470_v19 = vsel %vm1385_vm2, %v3839_v3, -inf  ;;  %v3236_v21 = vpop.f32.mrb[31].mxu1  ;;  %v3852_v23 = vadd.f32 %v1381_v17, %v3688_v51  ;;  %v1476_v25 = vsel %vm1385_vm2, %v3844_v10, -inf  ;;  %v3393_v17 = vld [vmem:[%s3780_s10 + $0x10] sm:$0xff]  }
 0x129   : > { %1471 = vmax.xlane.f32.xlu0 %v1470_v19 }
 0x12a   : > { %v1473_v49 = vsel %vm1385_vm2, %v3847_v14, -inf  ;;  %v1479_v28 = vsel %vm1385_vm2, %v3852_v23, -inf }
 0x12b   : > { %1474 = vmax.xlane.f32.xlu1 %v1473_v49 }
 0x12d   : > { %1477 = vmax.xlane.f32.xlu0 %v1476_v25 }
 0x12f   : > { %1480 = vmax.xlane.f32.xlu1 %v1479_v28 }
 0x17e   : > { %v3860_v29 = vpop.xlane.xlu0 %1387  ;;  %v3862_v30 = vpop.xlane.xlu1 %1393 }
 0x17f   : > { %v1482_v51 = vsub.f32 %v3691_v52, %v3860_v29  ;;  %v1484_v33 = vsub.f32 %v3694_v55, %v3862_v30 }
 0x181   : > { %v1514_v34 = vmul.f32 1.442695, %v1482_v51  ;;  %v1518_v35 = vmul.f32 1.442695, %v1484_v33  ;;  %v3394_v51 = vld [vmem:[%s3780_s10 + $0x18] sm:$0xff]  }
 0x182   : > { %v3868_v37 = vpop.xlane.xlu0 %1390  ;;  %v3870_v38 = vpop.xlane.xlu1 %1396 }
 0x183   : > { %3407 = vpow2.f32 %v1514_v34  ;;  %v1483_v41 = vsub.f32 %v3697_v58, %v3868_v37  ;;  %v1485_v42 = vsub.f32 %v3702_v62, %v3870_v38 }
 0x184   : > { %3409 = vpow2.f32 %v1518_v35 }
 0x185   : > { %v1516_v45 = vmul.f32 1.442695, %v1483_v41  ;;  %v1520_v46 = vmul.f32 1.442695, %v1485_v42 }
 0x186   : > { %v3876_v52 = vpop.xlane.xlu0 %1399 }
 0x187   : > { %3411 = vpow2.f32 %v1516_v45  ;;  %v1486_v55 = vsub.f32 %v3711_v5, %v3876_v52 }
 0x188   : > { %3413 = vpow2.f32 %v1520_v46  ;;  %v3880_v50 = vpop.xlane.xlu1 %1402 }
 0x189   : > { %v1522_v53 = vmul.f32 1.442695, %v1486_v55  ;;  %v1487_v54 = vsub.f32 %v3717_v11, %v3880_v50 }
 0x18a   : > { %v3884_v58 = vpop.xlane.xlu0 %1405 }
 0x18b   : > { %3415 = vpow2.f32 %v1522_v53  ;;  %v1524_v62 = vmul.f32 1.442695, %v1487_v54  ;;  %v1488_v57 = vsub.f32 %v3714_v9, %v3884_v58 }
 0x18c   : > { %v3888_v60 = vpop.xlane.xlu1 %1408 }
 0x18d   : > { %v3408_v63 = vpop.eup %3407  ;;  %3417 = vpow2.f32 %v1524_v62  ;;  %v1526_v5 = vmul.f32 1.442695, %v1488_v57  ;;  %v1489_v1 = vsub.f32 %v3722_v16, %v3888_v60 }
 0x18e   : > { %v3892_v4 = vpop.xlane.xlu0 %1411  ;;  %v1578_v11 = vsel %vm1385_vm2, %v3408_v63, 0.0  ;;  %v3410_v6 = vpop.eup %3409 }
 0x18f   : > { %3419 = vpow2.f32 %v1526_v5  ;;  %v1528_v7 = vmul.f32 1.442695, %v1489_v1  ;;  %v1490_v9 = vsub.f32 %v3729_v20, %v3892_v4  ;;  %1579 = vadd.xlane.f32.xlu0 %v1578_v11  ;;  %v1584_v49 = vsel %vm1385_vm2, %v3410_v6, 0.0  ;;  %v3395_v5 = vld [vmem:[%s3780_s10 + $0x20] sm:$0xff]  }
 0x190   : > { %v3897_v12 = vpop.xlane.xlu1 %1414 }
 0x191   : > { %v3412_v13 = vpop.eup %3411  ;;  %3421 = vpow2.f32 %v1528_v7  ;;  %v1530_v15 = vmul.f32 1.442695, %v1490_v9  ;;  %v1491_v16 = vsub.f32 %v3737_v27, %v3897_v12 }
 0x192   : > { %v3414_v19 = vpop.eup %3413  ;;  %v3902_v21 = vpop.xlane.xlu0 %1417  ;;  %v1581_v25 = vsel %vm1385_vm2, %v3412_v13, 0.0  ;;  %v1740_v28 = vpack.c.bf16 %v3412_v13, %v3408_v63 }
 0x193   : > { %3423 = vpow2.f32 %v1530_v15  ;;  %v1532_v20 = vmul.f32 1.442695, %v1491_v16  ;;  %v1492_v33 = vsub.f32 %v3734_v24, %v3902_v21  ;;  %1585 = vadd.xlane.f32.xlu0 %v1584_v49  ;;  %1582 = vadd.xlane.f32.xlu1 %v1581_v25  ;;  %v1741_v34 = vpack.c.bf16 %v3414_v19, %v3410_v6  ;;  %v3396_v15 = vld [vmem:[%s3780_s10 + $0x28] sm:$0xff]  }
 0x194   : > { %3240 = vmatmul.mubr.msk.bf16.vlgmr.msra.gmra.mrb[32].mxu0 %vm1385_vm2, %v1740_v28  ;;  %v3910_v27 = vpop.xlane.xlu1 %1420  ;;  %v1587_v46 = vsel %vm1385_vm2, %v3414_v19, 0.0 }
 0x195   : > { %v3416_v35 = vpop.eup %3415  ;;  %3425 = vpow2.f32 %v1532_v20  ;;  %v1534_v41 = vmul.f32 1.442695, %v1492_v33  ;;  %3246 = vmatmul.mubr.msk.bf16.vlgmr.msra.gmra.mrb[32].mxu1 %vm1385_vm2, %v1741_v34  ;;  %v1493_v42 = vsub.f32 %v3742_v32, %v3910_v27  ;;  %3250 = vmatpush3.bf16.msra.mxu0 %v3393_v17 }
 0x196   : > { %v3915_v45 = vpop.xlane.xlu0 %1423  ;;  %3256 = vmatpush3.bf16.msra.mxu1 %v3394_v51  ;;  %v1590_v24 = vsel %vm1385_vm2, %v3416_v35, 0.0  ;;  %3251 = vmatprep.mubr.msk.bf16.mxu0 %vm3496_vm0, %v3495_v0 }
 0x197   : > { %v3418_v55 = vpop.eup %3417  ;;  %3427 = vpow2.f32 %v1534_v41  ;;  %v1536_v53 = vmul.f32 1.442695, %v1493_v42  ;;  %v1494_v54 = vsub.f32 %v3749_v36, %v3915_v45  ;;  %1591 = vadd.xlane.f32.xlu0 %v1590_v24  ;;  %1588 = vadd.xlane.f32.xlu1 %v1587_v46 }
 0x198   : > { %v3923_v32 = vpop.xlane.xlu1 %1426  ;;  %3257 = vmatprep.mubr.msk.bf16.mxu1 %vm3496_vm0, %v3495_v0  ;;  %3261 = vmatprep.subr.bf16.mxu0 %v3495_v0  ;;  %v1593_v11 = vsel %vm1385_vm2, %v3418_v55, 0.0  ;;  %v1742_v6 = vpack.c.bf16 %v3418_v55, %v3416_v35 }
 0x199   : > { %v3420_v62 = vpop.eup %3419  ;;  %3429 = vpow2.f32 %v1536_v53  ;;  %v1538_v57 = vmul.f32 1.442695, %v1494_v54  ;;  %v1495_v63 = vsub.f32 %v3757_v43, %v3923_v32  ;;  %3267 = vmatprep.subr.bf16.mxu1 %v3495_v0 }
 0x19a   : > { %v3932_v36 = vpop.xlane.xlu0 %1429  ;;  %v1596_v1 = vsel %vm1385_vm2, %v3420_v62, 0.0 }
 0x19b   : > { %v3422_v7 = vpop.eup %3421  ;;  %3431 = vpow2.f32 %v1538_v57  ;;  %v1540_v9 = vmul.f32 1.442695, %v1495_v63  ;;  %v1496_v13 = vsub.f32 %v3754_v40, %v3932_v36  ;;  %1597 = vadd.xlane.f32.xlu0 %v1596_v1  ;;  %1594 = vadd.xlane.f32.xlu1 %v1593_v11  ;;  %v3398_v57 = vld [vmem:[%s3780_s10 + $0x38] sm:$0xff]  }
 0x19c   : > { %3252 = vmatmul.mubr.msk.bf16.vlgmr.msra.gmra.mrb[36].mxu0 %vm1385_vm2, %v1742_v6  ;;  %v3940_v43 = vpop.xlane.xlu1 %1432  ;;  %v1743_v16 = vpack.c.bf16 %v3422_v7, %v3420_v62 }
 0x19d   : > { %v3424_v17 = vpop.eup %3423  ;;  %3433 = vpow2.f32 %v1540_v9  ;;  %v1542_v19 = vmul.f32 1.442695, %v1496_v13  ;;  %v1497_v49 = vsub.f32 %v3762_v48, %v3940_v43  ;;  %3262 = vmatpush3.bf16.msra.mxu0 %v3395_v5  ;;  %3263 = vmatprep.mubr.msk.bf16.mxu0 %vm3496_vm0, %v3495_v0  ;;  %v1599_v48 = vsel %vm1385_vm2, %v3422_v7, 0.0 }
 0x19e   : > { %3258 = vmatmul.mubr.msk.bf16.vlgmr.msra.gmra.mrb[36].mxu1 %vm1385_vm2, %v1743_v16  ;;  %v3947_v40 = vpop.xlane.xlu0 %1435  ;;  %v1602_v25 = vsel %vm1385_vm2, %v3424_v17, 0.0  ;;  %3273 = vmatprep.subr.bf16.mxu0 %v3495_v0 }
 0x19f   : > { %v3426_v28 = vpop.eup %3425  ;;  %3435 = vpow2.f32 %v1542_v19  ;;  %v1544_v51 = vmul.f32 1.442695, %v1497_v49  ;;  %v1498_v20 = vsub.f32 %v3769_v56, %v3947_v40  ;;  %3268 = vmatpush3.bf16.msra.mxu1 %v3396_v15  ;;  %1603 = vadd.xlane.f32.xlu0 %v1602_v25  ;;  %v3397_v56 = vld [vmem:[%s3780_s10 + $0x30] sm:$0xff]  }
 0x1a0   : > { %1600 = vadd.xlane.f32.xlu1 %v1599_v48  ;;  %v3954_v33 = vpop.xlane.xlu1 %1438  ;;  %3269 = vmatprep.mubr.msk.bf16.mxu1 %vm3496_vm0, %v3495_v0  ;;  %v1744_v46 = vpack.c.bf16 %v3426_v28, %v3424_v17  ;;  %v1605_v62 = vsel %vm1385_vm2, %v3426_v28, 0.0 }
 0x1a1   : > { %v3428_v34 = vpop.eup %3427  ;;  %3437 = vpow2.f32 %v1544_v51  ;;  %v1546_v35 = vmul.f32 1.442695, %v1498_v20  ;;  %v1499_v41 = vsub.f32 %v3783_v2, %v3954_v33  ;;  %3279 = vmatprep.subr.bf16.mxu1 %v3495_v0 }
 0x1a2   : > { %v3962_v42 = vpop.xlane.xlu0 %1441  ;;  %v1608_v24 = vsel %vm1385_vm2, %v3428_v34, 0.0 }
 0x1a3   : > { %v3430_v55 = vpop.eup %3429  ;;  %3439 = vpow2.f32 %v1546_v35  ;;  %v1548_v53 = vmul.f32 1.442695, %v1499_v41  ;;  %v1500_v54 = vsub.f32 %v3774_v61, %v3962_v42  ;;  %1609 = vadd.xlane.f32.xlu0 %v1608_v24  ;;  %v3400_v35 = vld [vmem:[%s3780_s10 + $0x48] sm:$0xff]  }
 0x1a4   : > { %1606 = vadd.xlane.f32.xlu1 %v1605_v62  ;;  %3264 = vmatmul.mubr.msk.bf16.vlgmr.msra.gmra.mrb[40].mxu0 %vm1385_vm2, %v1744_v46  ;;  %v3970_v2 = vpop.xlane.xlu1 %1444  ;;  %v1745_v63 = vpack.c.bf16 %v3430_v55, %v3428_v34 }
 0x1a5   : > { %v3432_v5 = vpop.eup %3431  ;;  %3441 = vpow2.f32 %v1548_v53  ;;  %v1550_v1 = vmul.f32 1.442695, %v1500_v54  ;;  %v1501_v11 = vsub.f32 %v3789_v8, %v3970_v2  ;;  %3274 = vmatpush3.bf16.msra.mxu0 %v3397_v56  ;;  %3275 = vmatprep.mubr.msk.bf16.mxu0 %vm3496_vm0, %v3495_v0  ;;  %v1611_v8 = vsel %vm1385_vm2, %v3430_v55, 0.0 }
 0x1a6   : > { %3270 = vmatmul.mubr.msk.bf16.vlgmr.msra.gmra.mrb[40].mxu1 %vm1385_vm2, %v1745_v63  ;;  %v3977_v61 = vpop.xlane.xlu0 %1447  ;;  %v1614_v6 = vsel %vm1385_vm2, %v3432_v5, 0.0  ;;  %3285 = vmatprep.subr.bf16.mxu0 %v3495_v0 }
 0x1a7   : > { %v3434_v7 = vpop.eup %3433  ;;  %3443 = vpow2.f32 %v1550_v1  ;;  %v1552_v9 = vmul.f32 1.442695, %v1501_v11  ;;  %v1502_v13 = vsub.f32 %v3801_v18, %v3977_v61  ;;  %3280 = vmatpush3.bf16.msra.mxu1 %v3398_v57  ;;  %1615 = vadd.xlane.f32.xlu0 %v1614_v6  ;;  %v3399_v18 = vld [vmem:[%s3780_s10 + $0x40] sm:$0xff]  }
 0x1a8   : > { %1612 = vadd.xlane.f32.xlu1 %v1611_v8  ;;  %v3984_v15 = vpop.xlane.xlu1 %1450  ;;  %3281 = vmatprep.mubr.msk.bf16.mxu1 %vm3496_vm0, %v3495_v0  ;;  %v1746_v28 = vpack.c.bf16 %v3434_v7, %v3432_v5  ;;  %v1617_v34 = vsel %vm1385_vm2, %v3434_v7, 0.0 }
 0x1a9   : > { %v3436_v16 = vpop.eup %3435  ;;  %3445 = vpow2.f32 %v1552_v9  ;;  %v1554_v17 = vmul.f32 1.442695, %v1502_v13  ;;  %v1503_v19 = vsub.f32 %v3807_v26, %v3984_v15  ;;  %3291 = vmatprep.subr.bf16.mxu1 %v3495_v0 }
 0x1aa   : > { %v3992_v49 = vpop.xlane.xlu0 %1453  ;;  %v1620_v25 = vsel %vm1385_vm2, %v3436_v16, 0.0 }
 0x1ab   : > { %v3438_v51 = vpop.eup %3437  ;;  %3447 = vpow2.f32 %v1554_v17  ;;  %v1556_v20 = vmul.f32 1.442695, %v1503_v19  ;;  %v1504_v48 = vsub.f32 %v3804_v22, %v3992_v49  ;;  %1621 = vadd.xlane.f32.xlu0 %v1620_v25  ;;  %v3402_v17 = vld [vmem:[%s3780_s10 + $0x58] sm:$0xff]  }
 0x1ac   : > { %1618 = vadd.xlane.f32.xlu1 %v1617_v34  ;;  %3276 = vmatmul.mubr.msk.bf16.vlgmr.msra.gmra.mrb[44].mxu0 %vm1385_vm2, %v1746_v28  ;;  %v4000_v26 = vpop.xlane.xlu1 %1456  ;;  %v1747_v41 = vpack.c.bf16 %v3438_v51, %v3436_v16 }
 0x1ad   : > { %v3440_v56 = vpop.eup %3439  ;;  %3449 = vpow2.f32 %v1556_v20  ;;  %v1558_v24 = vmul.f32 1.442695, %v1504_v48  ;;  %v1505_v46 = vsub.f32 %v3812_v31, %v4000_v26  ;;  %3286 = vmatpush3.bf16.msra.mxu0 %v3399_v18  ;;  %3287 = vmatprep.mubr.msk.bf16.mxu0 %vm3496_vm0, %v3495_v0  ;;  %v1623_v31 = vsel %vm1385_vm2, %v3438_v51, 0.0 }
 0x1ae   : > { %3282 = vmatmul.mubr.msk.bf16.vlgmr.msra.gmra.mrb[44].mxu1 %vm1385_vm2, %v1747_v41  ;;  %v4007_v22 = vpop.xlane.xlu0 %1459  ;;  %v1626_v55 = vsel %vm1385_vm2, %v3440_v56, 0.0  ;;  %3297 = vmatprep.subr.bf16.mxu0 %v3495_v0 }
 0x1af   : > { %v3442_v53 = vpop.eup %3441  ;;  %3451 = vpow2.f32 %v1558_v24  ;;  %v1560_v54 = vmul.f32 1.442695, %v1505_v46  ;;  %v1506_v62 = vsub.f32 %v3821_v39, %v4007_v22  ;;  %3292 = vmatpush3.bf16.msra.mxu1 %v3400_v35  ;;  %1627 = vadd.xlane.f32.xlu0 %v1626_v55  ;;  %v3401_v39 = vld [vmem:[%s3780_s10 + $0x50] sm:$0xff]  }
 0x1b0   : > { %1624 = vadd.xlane.f32.xlu1 %v1623_v31  ;;  %v4014_v57 = vpop.xlane.xlu1 %1462  ;;  %3293 = vmatprep.mubr.msk.bf16.mxu1 %vm3496_vm0, %v3495_v0  ;;  %v1748_v7 = vpack.c.bf16 %v3442_v53, %v3440_v56  ;;  %v1629_v16 = vsel %vm1385_vm2, %v3442_v53, 0.0 }
 0x1b1   : > { %v3444_v63 = vpop.eup %3443  ;;  %3453 = vpow2.f32 %v1560_v54  ;;  %v1562_v5 = vmul.f32 1.442695, %v1506_v62  ;;  %v1507_v1 = vsub.f32 %v3827_v47, %v4014_v57  ;;  %3303 = vmatprep.subr.bf16.mxu1 %v3495_v0 }
 0x1b2   : > { %v4022_v11 = vpop.xlane.xlu0 %1465  ;;  %v1632_v6 = vsel %vm1385_vm2, %v3444_v63, 0.0 }
 0x1b3   : > { %v3446_v9 = vpop.eup %3445  ;;  %3455 = vpow2.f32 %v1562_v5  ;;  %v1564_v13 = vmul.f32 1.442695, %v1507_v1  ;;  %v1508_v8 = vsub.f32 %v3824_v44, %v4022_v11  ;;  %1633 = vadd.xlane.f32.xlu0 %v1632_v6  ;;  %v3404_v5 = vld [vmem:[%s3780_s10 + $0x68] sm:$0xff]  }
 0x1b4   : > { %1630 = vadd.xlane.f32.xlu1 %v1629_v16  ;;  %3288 = vmatmul.mubr.msk.bf16.vlgmr.msra.gmra.mrb[48].mxu0 %vm1385_vm2, %v1748_v7  ;;  %v4030_v47 = vpop.xlane.xlu1 %1468  ;;  %v1749_v19 = vpack.c.bf16 %v3446_v9, %v3444_v63  ;;  %v3405_v16 = vld [vmem:[%s3780_s10 + $0x70] sm:$0xff]  }
 0x1b5   : > { %v3448_v18 = vpop.eup %3447  ;;  %3457 = vpow2.f32 %v1564_v13  ;;  %v1566_v25 = vmul.f32 1.442695, %v1508_v8  ;;  %v1509_v28 = vsub.f32 %v3832_v59, %v4030_v47  ;;  %3298 = vmatpush3.bf16.msra.mxu0 %v3401_v39  ;;  %3299 = vmatprep.mubr.msk.bf16.mxu0 %vm3496_vm0, %v3495_v0  ;;  %v1635_v59 = vsel %vm1385_vm2, %v3446_v9, 0.0 }
 0x1b6   : > { %3294 = vmatmul.mubr.msk.bf16.vlgmr.msra.gmra.mrb[48].mxu1 %vm1385_vm2, %v1749_v19  ;;  %v4037_v44 = vpop.xlane.xlu0 %1471  ;;  %v1638_v51 = vsel %vm1385_vm2, %v3448_v18, 0.0  ;;  %3309 = vmatprep.subr.bf16.mxu0 %v3495_v0 }
 0x1b7   : > { %v3450_v20 = vpop.eup %3449  ;;  %3459 = vpow2.f32 %v1566_v25  ;;  %v1568_v48 = vmul.f32 1.442695, %v1509_v28  ;;  %v1510_v34 = vsub.f32 %v3839_v3, %v4037_v44  ;;  %3304 = vmatpush3.bf16.msra.mxu1 %v3402_v17  ;;  %1639 = vadd.xlane.f32.xlu0 %v1638_v51  ;;  %v3403_v3 = vld [vmem:[%s3780_s10 + $0x60] sm:$0xff]   ;;  %v3406_v28 = vld [vmem:[%s3780_s10 + $0x78] sm:$0xff]  }
 0x1b8   : > { %1636 = vadd.xlane.f32.xlu1 %v1635_v59  ;;  %v4044_v35 = vpop.xlane.xlu1 %1474  ;;  %3305 = vmatprep.mubr.msk.bf16.mxu1 %vm3496_vm0, %v3495_v0  ;;  %v1750_v53 = vpack.c.bf16 %v3450_v20, %v3448_v18  ;;  %v1641_v63 = vsel %vm1385_vm2, %v3450_v20, 0.0 }
 0x1b9   : > { %v3452_v41 = vpop.eup %3451  ;;  %3461 = vpow2.f32 %v1568_v48  ;;  %v1570_v56 = vmul.f32 1.442695, %v1510_v34  ;;  %v1511_v24 = vsub.f32 %v3847_v14, %v4044_v35  ;;  %3315 = vmatprep.subr.bf16.mxu1 %v3495_v0 }
 0x1ba   : > { %v4052_v46 = vpop.xlane.xlu0 %1477  ;;  %v1644_v55 = vsel %vm1385_vm2, %v3452_v41, 0.0 }
 0x1bb   : > { %v3454_v54 = vpop.eup %3453  ;;  %3463 = vpow2.f32 %v1570_v56  ;;  %v1572_v62 = vmul.f32 1.442695, %v1511_v24  ;;  %v1512_v31 = vsub.f32 %v3844_v10, %v4052_v46  ;;  %1645 = vadd.xlane.f32.xlu0 %v1644_v55 }
 0x1bc   : > { %1642 = vadd.xlane.f32.xlu1 %v1641_v63  ;;  %3300 = vmatmul.mubr.msk.bf16.vlgmr.msra.gmra.mrb[52].mxu0 %vm1385_vm2, %v1750_v53  ;;  %v4060_v14 = vpop.xlane.xlu1 %1480  ;;  %v1751_v1 = vpack.c.bf16 %v3454_v54, %v3452_v41  ;;  %v1647_v8 = vsel %vm1385_vm2, %v3454_v54, 0.0 }
 0x1bd   : > { %v3456_v39 = vpop.eup %3455  ;;  %3465 = vpow2.f32 %v1572_v62  ;;  %v1574_v6 = vmul.f32 1.442695, %v1512_v31  ;;  %v1513_v7 = vsub.f32 %v3852_v23, %v4060_v14  ;;  %3310 = vmatpush3.bf16.msra.mxu0 %v3403_v3  ;;  %3311 = vmatprep.mubr.msk.bf16.mxu0 %vm3496_vm0, %v3495_v0 }
 0x1be   : > { %3306 = vmatmul.mubr.msk.bf16.vlgmr.msra.gmra.mrb[52].mxu1 %vm1385_vm2, %v1751_v1  ;;  %v1650_v10 = vsel %vm1385_vm2, %v3456_v39, 0.0  ;;  %3321 = vmatprep.subr.bf16.mxu0 %v3495_v0 }
 0x1bf   : > { %v3458_v9 = vpop.eup %3457  ;;  %3467 = vpow2.f32 %v1574_v6  ;;  %v1576_v13 = vmul.f32 1.442695, %v1513_v7  ;;  %3316 = vmatpush3.bf16.msra.mxu1 %v3404_v5  ;;  %1651 = vadd.xlane.f32.xlu0 %v1650_v10 }
 0x1c0   : > { %1648 = vadd.xlane.f32.xlu1 %v1647_v8  ;;  %3317 = vmatprep.mubr.msk.bf16.mxu1 %vm3496_vm0, %v3495_v0  ;;  %v1752_v19 = vpack.c.bf16 %v3458_v9, %v3456_v39  ;;  %v1653_v25 = vsel %vm1385_vm2, %v3458_v9, 0.0 }
 0x1c1   : > { %v3460_v23 = vpop.eup %3459  ;;  %3469 = vpow2.f32 %v1576_v13  ;;  %3327 = vmatprep.subr.bf16.mxu1 %v3495_v0 }
 0x1c2   : > { %v1656_v17 = vsel %vm1385_vm2, %v3460_v23, 0.0 }
 0x1c3   : > { %v3462_v18 = vpop.eup %3461  ;;  %1657 = vadd.xlane.f32.xlu0 %v1656_v17 }
 0x1c4   : > { %1654 = vadd.xlane.f32.xlu1 %v1653_v25  ;;  %3312 = vmatmul.mubr.msk.bf16.vlgmr.msra.gmra.mrb[56].mxu0 %vm1385_vm2, %v1752_v19  ;;  %v1753_v51 = vpack.c.bf16 %v3462_v18, %v3460_v23  ;;  %v1659_v59 = vsel %vm1385_vm2, %v3462_v18, 0.0 }
 0x1c5   : > { %v3464_v20 = vpop.eup %3463  ;;  %3322 = vmatpush3.bf16.msra.mxu0 %v3405_v16  ;;  %3323 = vmatprep.mubr.msk.bf16.mxu0 %vm3496_vm0, %v3495_v0 }
 0x1c6   : > { %3318 = vmatmul.mubr.msk.bf16.vlgmr.msra.gmra.mrb[56].mxu1 %vm1385_vm2, %v1753_v51  ;;  %v1662_v48 = vsel %vm1385_vm2, %v3464_v20, 0.0 }
 0x1c7   : > { %v3466_v34 = vpop.eup %3465  ;;  %3328 = vmatpush3.bf16.msra.mxu1 %v3406_v28  ;;  %1663 = vadd.xlane.f32.xlu0 %v1662_v48 }
 0x1c8   : > { %1660 = vadd.xlane.f32.xlu1 %v1659_v59  ;;  %3329 = vmatprep.mubr.msk.bf16.mxu1 %vm3496_vm0, %v3495_v0  ;;  %v1754_v24 = vpack.c.bf16 %v3466_v34, %v3464_v20  ;;  %v1665_v55 = vsel %vm1385_vm2, %v3466_v34, 0.0 }
 0x1c9   : > { %v3468_v41 = vpop.eup %3467 }
 0x1ca   : > { %v1668_v56 = vsel %vm1385_vm2, %v3468_v41, 0.0 }
 0x1cb   : > { %v3470_v3 = vpop.eup %3469  ;;  %1669 = vadd.xlane.f32.xlu0 %v1668_v56 }
 0x1cc   : > { %1666 = vadd.xlane.f32.xlu1 %v1665_v55  ;;  %3324 = vmatmul.mubr.msk.bf16.vlgmr.msra.gmra.mrb[60].mxu0 %vm1385_vm2, %v1754_v24  ;;  %v1755_v53 = vpack.c.bf16 %v3470_v3, %v3468_v41  ;;  %v1671_v54 = vsel %vm1385_vm2, %v3470_v3, 0.0 }
 0x1ce   : > { %3330 = vmatmul.mubr.msk.bf16.vlgmr.msra.gmra.mrb[60].mxu1 %vm1385_vm2, %v1755_v53 }
 0x1d0   : > { %1672 = vadd.xlane.f32.xlu1 %v1671_v54 }
 0x21c   : > { %v1580_v0 = vpop.xlane.xlu0 %1579 }
 0x21d   : > { %v1675_v62 = vsel %vm1674_vm3, %v3860_v29, %v1580_v0 }
 0x21e   : > { %1708 = vst.msk [vmem:[%s4094_s14] sm:$0xff] %vm1707_vm4, %v1675_v62 }
 0x220   : > { %v1586_v31 = vpop.xlane.xlu0 %1585  ;;  %v1583_v63 = vpop.xlane.xlu1 %1582 }
 0x221   : > { %v1677_v5 = vsel %vm1674_vm3, %v3862_v30, %v1586_v31  ;;  %v1676_v1 = vsel %vm1674_vm3, %v3868_v37, %v1583_v63 }
 0x222   : > { %1710 = vst.msk [vmem:[%s4094_s14 + $0x10] sm:$0xff] %vm1707_vm4, %v1677_v5  ;;  %1709 = vst.msk [vmem:[%s4094_s14 + $0x8] sm:$0xff] %vm1707_vm4, %v1676_v1 }
 0x224   : > { %v1592_v39 = vpop.xlane.xlu0 %1591  ;;  %v1589_v6 = vpop.xlane.xlu1 %1588 }
 0x225   : > { %v1679_v29 = vsel %vm1674_vm3, %v3876_v52, %v1592_v39  ;;  %v1678_v7 = vsel %vm1674_vm3, %v3870_v38, %v1589_v6 }
 0x226   : > { %1712 = vst.msk [vmem:[%s4094_s14 + $0x20] sm:$0xff] %vm1707_vm4, %v1679_v29  ;;  %1711 = vst.msk [vmem:[%s4094_s14 + $0x18] sm:$0xff] %vm1707_vm4, %v1678_v7 }
 0x228   : > { %v1598_v30 = vpop.xlane.xlu0 %1597  ;;  %v1595_v37 = vpop.xlane.xlu1 %1594 }
 0x229   : > { %v1681_v10 = vsel %vm1674_vm3, %v3884_v58, %v1598_v30  ;;  %v1680_v9 = vsel %vm1674_vm3, %v3880_v50, %v1595_v37 }
 0x22a   : > { %1714 = vst.msk [vmem:[%s4094_s14 + $0x30] sm:$0xff] %vm1707_vm4, %v1681_v10  ;;  %1713 = vst.msk [vmem:[%s4094_s14 + $0x28] sm:$0xff] %vm1707_vm4, %v1680_v9 }
 0x22c   : > { %v1604_v38 = vpop.xlane.xlu0 %1603 }
 0x22d   : > { %v1683_v52 = vsel %vm1674_vm3, %v3892_v4, %v1604_v38  ;;  %v1601_v13 = vpop.xlane.xlu1 %1600 }
 0x22e   : > { %1716 = vst.msk [vmem:[%s4094_s14 + $0x40] sm:$0xff] %vm1707_vm4, %v1683_v52  ;;  %v1682_v8 = vsel %vm1674_vm3, %v3888_v60, %v1601_v13 }
 0x22f   : > { %1715 = vst.msk [vmem:[%s4094_s14 + $0x38] sm:$0xff] %vm1707_vm4, %v1682_v8 }
 0x230   : > { %v1610_v50 = vpop.xlane.xlu0 %1609 }
 0x231   : > { %v1685_v58 = vsel %vm1674_vm3, %v3902_v21, %v1610_v50  ;;  %v1607_v23 = vpop.xlane.xlu1 %1606 }
 0x232   : > { %1718 = vst.msk [vmem:[%s4094_s14 + $0x50] sm:$0xff] %vm1707_vm4, %v1685_v58  ;;  %v1684_v4 = vsel %vm1674_vm3, %v3897_v12, %v1607_v23 }
 0x233   : > { %1717 = vst.msk [vmem:[%s4094_s14 + $0x48] sm:$0xff] %vm1707_vm4, %v1684_v4 }
 0x234   : > { %v1616_v16 = vpop.xlane.xlu0 %1615 }
 0x235   : > { %v1687_v60 = vsel %vm1674_vm3, %v3915_v45, %v1616_v16  ;;  %v1613_v17 = vpop.xlane.xlu1 %1612 }
 0x236   : > { %1720 = vst.msk [vmem:[%s4094_s14 + $0x60] sm:$0xff] %vm1707_vm4, %v1687_v60  ;;  %v1686_v21 = vsel %vm1674_vm3, %v3910_v27, %v1613_v17 }
 0x237   : > { %1719 = vst.msk [vmem:[%s4094_s14 + $0x58] sm:$0xff] %vm1707_vm4, %v1686_v21 }
 0x238   : > { %v1622_v19 = vpop.xlane.xlu0 %1621 }
 0x239   : > { %v1689_v12 = vsel %vm1674_vm3, %v3932_v36, %v1622_v19  ;;  %v1619_v18 = vpop.xlane.xlu1 %1618 }
 0x23a   : > { %1722 = vst.msk [vmem:[%s4094_s14 + $0x70] sm:$0xff] %vm1707_vm4, %v1689_v12  ;;  %v1688_v45 = vsel %vm1674_vm3, %v3923_v32, %v1619_v18 }
 0x23b   : > { %1721 = vst.msk [vmem:[%s4094_s14 + $0x68] sm:$0xff] %vm1707_vm4, %v1688_v45 }
 0x23c   : > { %v1628_v25 = vpop.xlane.xlu0 %1627 }
 0x23d   : > { %v1691_v27 = vsel %vm1674_vm3, %v3947_v40, %v1628_v25  ;;  %v1625_v28 = vpop.xlane.xlu1 %1624 }
 0x23e   : > { %1724 = vst.msk [vmem:[%s4094_s14 + $0x80] sm:$0xff] %vm1707_vm4, %v1691_v27  ;;  %v1690_v36 = vsel %vm1674_vm3, %v3940_v43, %v1625_v28 }
 0x23f   : > { %1723 = vst.msk [vmem:[%s4094_s14 + $0x78] sm:$0xff] %vm1707_vm4, %v1690_v36 }
 0x240   : > { %v1634_v51 = vpop.xlane.xlu0 %1633 }
 0x241   : > { %v1693_v32 = vsel %vm1674_vm3, %v3962_v42, %v1634_v51  ;;  %v1631_v20 = vpop.xlane.xlu1 %1630 }
 0x242   : > { %1726 = vst.msk [vmem:[%s4094_s14 + $0x90] sm:$0xff] %vm1707_vm4, %v1693_v32  ;;  %v1692_v40 = vsel %vm1674_vm3, %v3954_v33, %v1631_v20 }
 0x243   : > { %1725 = vst.msk [vmem:[%s4094_s14 + $0x88] sm:$0xff] %vm1707_vm4, %v1692_v40 }
 0x244   : > { %v1640_v48 = vpop.xlane.xlu0 %1639 }
 0x245   : > { %v1695_v43 = vsel %vm1674_vm3, %v3977_v61, %v1640_v48  ;;  %v1637_v34 = vpop.xlane.xlu1 %1636 }
 0x246   : > { %1728 = vst.msk [vmem:[%s4094_s14 + $0xa0] sm:$0xff] %vm1707_vm4, %v1695_v43  ;;  %v1694_v42 = vsel %vm1674_vm3, %v3970_v2, %v1637_v34 }
 0x247   : > { %1727 = vst.msk [vmem:[%s4094_s14 + $0x98] sm:$0xff] %vm1707_vm4, %v1694_v42 }
 0x248   : > { %v1646_v59 = vpop.xlane.xlu0 %1645 }
 0x249   : > { %v1697_v33 = vsel %vm1674_vm3, %v3992_v49, %v1646_v59  ;;  %v1643_v41 = vpop.xlane.xlu1 %1642 }
 0x24a   : > { %1730 = vst.msk [vmem:[%s4094_s14 + $0xb0] sm:$0xff] %vm1707_vm4, %v1697_v33  ;;  %v1696_v61 = vsel %vm1674_vm3, %v3984_v15, %v1643_v41 }
 0x24b   : > { %1729 = vst.msk [vmem:[%s4094_s14 + $0xa8] sm:$0xff] %vm1707_vm4, %v1696_v61 }
 0x24c   : > { %v1652_v56 = vpop.xlane.xlu0 %1651 }
 0x24d   : > { %v1699_v2 = vsel %vm1674_vm3, %v4007_v22, %v1652_v56  ;;  %v1649_v24 = vpop.xlane.xlu1 %1648 }
 0x24e   : > { %1732 = vst.msk [vmem:[%s4094_s14 + $0xc0] sm:$0xff] %vm1707_vm4, %v1699_v2  ;;  %v1698_v49 = vsel %vm1674_vm3, %v4000_v26, %v1649_v24 }
 0x24f   : > { %1731 = vst.msk [vmem:[%s4094_s14 + $0xb8] sm:$0xff] %vm1707_vm4, %v1698_v49 }
 0x250   : > { %v1658_v3 = vpop.xlane.xlu0 %1657 }
 0x251   : > { %v1701_v15 = vsel %vm1674_vm3, %v4022_v11, %v1658_v3  ;;  %v1655_v55 = vpop.xlane.xlu1 %1654 }
 0x252   : > { %1734 = vst.msk [vmem:[%s4094_s14 + $0xd0] sm:$0xff] %vm1707_vm4, %v1701_v15  ;;  %v1700_v22 = vsel %vm1674_vm3, %v4014_v57, %v1655_v55 }
 0x253   : > { %1733 = vst.msk [vmem:[%s4094_s14 + $0xc8] sm:$0xff] %vm1707_vm4, %v1700_v22 }
 0x254   : > { %v1664_v53 = vpop.xlane.xlu0 %1663 }
 0x255   : > { %v1703_v26 = vsel %vm1674_vm3, %v4037_v44, %v1664_v53  ;;  %v1661_v54 = vpop.xlane.xlu1 %1660 }
 0x256   : > { %1736 = vst.msk [vmem:[%s4094_s14 + $0xe0] sm:$0xff] %vm1707_vm4, %v1703_v26  ;;  %v1702_v11 = vsel %vm1674_vm3, %v4030_v47, %v1661_v54 }
 0x257   : > { %1735 = vst.msk [vmem:[%s4094_s14 + $0xd8] sm:$0xff] %vm1707_vm4, %v1702_v11 }
 0x258   : > { %v1670_v0 = vpop.xlane.xlu0 %1669 }
 0x259   : > { %v1705_v57 = vsel %vm1674_vm3, %v4052_v46, %v1670_v0  ;;  %v1667_v62 = vpop.xlane.xlu1 %1666 }
 0x25a   : > { %1738 = vst.msk [vmem:[%s4094_s14 + $0xf0] sm:$0xff] %vm1707_vm4, %v1705_v57  ;;  %v1704_v31 = vsel %vm1674_vm3, %v4044_v35, %v1667_v62 }
 0x25b   : > { %1737 = vst.msk [vmem:[%s4094_s14 + $0xe8] sm:$0xff] %vm1707_vm4, %v1704_v31 }
 0x25d   : > { %v1673_v44 = vpop.xlane.xlu1 %1672 }
 0x25e   : > { %v1706_v63 = vsel %vm1674_vm3, %v4060_v14, %v1673_v44 }
 0x25f   : > { %1739 = vst.msk [vmem:[%s4094_s14 + $0xf8] sm:$0xff] %vm1707_vm4, %v1706_v63 }
 0x267   : > { %v1799_v47 = vpop.f32.mrb[32].mxu0 }
 0x268   : > { %v3045_v35 = vpack.c.bf16 %v1799_v47, %v1799_v47  ;;  %v1849_v46 = vpop.f32.mrb[32].mxu1  ;;  %v3241_v5 = vpop.f32.mrb[33].mxu0 }
 0x269   : > { %v3047_v1 = vpack.c.bf16 %v1849_v46, %v1849_v46  ;;  %v3247_v39 = vpop.f32.mrb[33].mxu1  ;;  %v1802_v14 = vpop.f32.mrb[34].mxu0 }
 0x26a   : > { %2685 = vst.msk [vmem:[%s4228_s17] sm:$0xf] %vm2684_vm5, %v3045_v35  ;;  %v3046_v6 = vpack.c.bf16 %v1802_v14, %v1802_v14  ;;  %v1852_v29 = vpop.f32.mrb[34].mxu1  ;;  %v3242_v7 = vpop.f32.mrb[35].mxu0 }
 0x26b   : > { %2687 = vst.msk [vmem:[%s4228_s17 + $0x8] sm:$0xf] %vm2684_vm5, %v3047_v1  ;;  %v3048_v30 = vpack.c.bf16 %v1852_v29, %v1852_v29  ;;  %v3248_v37 = vpop.f32.mrb[35].mxu1 }
 0x26c   : > { %2686 = vst.msk [vmem:[%s4228_s17 + $0x4] sm:$0xf] %vm2684_vm5, %v3046_v6 }
 0x26d   : > { %2688 = vst.msk [vmem:[%s4228_s17 + $0xc] sm:$0xf] %vm2684_vm5, %v3048_v30 }
 0x26f   : > { %v1899_v10 = vpop.f32.mrb[36].mxu0 }
 0x270   : > { %v3049_v9 = vpack.c.bf16 %v1899_v10, %v1899_v10  ;;  %v3253_v38 = vpop.f32.mrb[37].mxu0 }
 0x271   : > { %v1902_v52 = vpop.f32.mrb[38].mxu0  ;;  %v1949_v13 = vpop.f32.mrb[36].mxu1 }
 0x272   : > { %2689 = vst.msk [vmem:[%s4228_s17 + $0x10] sm:$0xf] %vm2684_vm5, %v3049_v9  ;;  %v3050_v8 = vpack.c.bf16 %v1902_v52, %v1902_v52  ;;  %v3051_v50 = vpack.c.bf16 %v1949_v13, %v1949_v13  ;;  %v3254_v58 = vpop.f32.mrb[39].mxu0  ;;  %v3259_v23 = vpop.f32.mrb[37].mxu1 }
 0x273   : > { %v1952_v4 = vpop.f32.mrb[38].mxu1 }
 0x274   : > { %2690 = vst.msk [vmem:[%s4228_s17 + $0x14] sm:$0xf] %vm2684_vm5, %v3050_v8  ;;  %2691 = vst.msk [vmem:[%s4228_s17 + $0x18] sm:$0xf] %vm2684_vm5, %v3051_v50  ;;  %v3052_v16 = vpack.c.bf16 %v1952_v4, %v1952_v4  ;;  %v3260_v60 = vpop.f32.mrb[39].mxu1 }
 0x276   : > { %2692 = vst.msk [vmem:[%s4228_s17 + $0x1c] sm:$0xf] %vm2684_vm5, %v3052_v16 }
 0x277   : > { %v1999_v17 = vpop.f32.mrb[40].mxu0 }
 0x278   : > { %v3053_v21 = vpack.c.bf16 %v1999_v17, %v1999_v17  ;;  %v3265_v19 = vpop.f32.mrb[41].mxu0 }
 0x279   : > { %v2002_v12 = vpop.f32.mrb[42].mxu0  ;;  %v2049_v18 = vpop.f32.mrb[40].mxu1 }
 0x27a   : > { %2693 = vst.msk [vmem:[%s4228_s17 + $0x20] sm:$0xf] %vm2684_vm5, %v3053_v21  ;;  %v3054_v45 = vpack.c.bf16 %v2002_v12, %v2002_v12  ;;  %v3055_v25 = vpack.c.bf16 %v2049_v18, %v2049_v18  ;;  %v3266_v27 = vpop.f32.mrb[43].mxu0  ;;  %v3271_v28 = vpop.f32.mrb[41].mxu1 }
 0x27b   : > { %v2052_v36 = vpop.f32.mrb[42].mxu1 }
 0x27c   : > { %2694 = vst.msk [vmem:[%s4228_s17 + $0x24] sm:$0xf] %vm2684_vm5, %v3054_v45  ;;  %2695 = vst.msk [vmem:[%s4228_s17 + $0x28] sm:$0xf] %vm2684_vm5, %v3055_v25  ;;  %v3056_v51 = vpack.c.bf16 %v2052_v36, %v2052_v36  ;;  %v3272_v32 = vpop.f32.mrb[43].mxu1 }
 0x27e   : > { %2696 = vst.msk [vmem:[%s4228_s17 + $0x2c] sm:$0xf] %vm2684_vm5, %v3056_v51 }
 0x27f   : > { %v2099_v20 = vpop.f32.mrb[44].mxu0 }
 0x280   : > { %v3057_v40 = vpack.c.bf16 %v2099_v20, %v2099_v20  ;;  %v3277_v48 = vpop.f32.mrb[45].mxu0 }
 0x281   : > { %v2102_v43 = vpop.f32.mrb[46].mxu0  ;;  %v2149_v34 = vpop.f32.mrb[44].mxu1 }
 0x282   : > { %2697 = vst.msk [vmem:[%s4228_s17 + $0x30] sm:$0xf] %vm2684_vm5, %v3057_v40  ;;  %v3058_v42 = vpack.c.bf16 %v2102_v43, %v2102_v43  ;;  %v3059_v59 = vpack.c.bf16 %v2149_v34, %v2149_v34  ;;  %v3278_v33 = vpop.f32.mrb[47].mxu0  ;;  %v3283_v41 = vpop.f32.mrb[45].mxu1 }
 0x283   : > { %v2152_v61 = vpop.f32.mrb[46].mxu1 }
 0x284   : > { %2698 = vst.msk [vmem:[%s4228_s17 + $0x34] sm:$0xf] %vm2684_vm5, %v3058_v42  ;;  %2699 = vst.msk [vmem:[%s4228_s17 + $0x38] sm:$0xf] %vm2684_vm5, %v3059_v59  ;;  %v3060_v56 = vpack.c.bf16 %v2152_v61, %v2152_v61  ;;  %v3284_v2 = vpop.f32.mrb[47].mxu1 }
 0x286   : > { %2700 = vst.msk [vmem:[%s4228_s17 + $0x3c] sm:$0xf] %vm2684_vm5, %v3060_v56 }
 0x287   : > { %v2199_v24 = vpop.f32.mrb[48].mxu0 }
 0x288   : > { %v3061_v49 = vpack.c.bf16 %v2199_v24, %v2199_v24  ;;  %v3289_v3 = vpop.f32.mrb[49].mxu0 }
 0x289   : > { %v2202_v15 = vpop.f32.mrb[50].mxu0  ;;  %v2249_v55 = vpop.f32.mrb[48].mxu1 }
 0x28a   : > { %2701 = vst.msk [vmem:[%s4228_s17 + $0x40] sm:$0xf] %vm2684_vm5, %v3061_v49  ;;  %v3062_v22 = vpack.c.bf16 %v2202_v15, %v2202_v15  ;;  %v3063_v53 = vpack.c.bf16 %v2249_v55, %v2249_v55  ;;  %v3290_v26 = vpop.f32.mrb[51].mxu0  ;;  %v3295_v54 = vpop.f32.mrb[49].mxu1 }
 0x28b   : > { %v2252_v11 = vpop.f32.mrb[50].mxu1 }
 0x28c   : > { %2702 = vst.msk [vmem:[%s4228_s17 + $0x44] sm:$0xf] %vm2684_vm5, %v3062_v22  ;;  %2703 = vst.msk [vmem:[%s4228_s17 + $0x48] sm:$0xf] %vm2684_vm5, %v3063_v53  ;;  %v3064_v0 = vpack.c.bf16 %v2252_v11, %v2252_v11  ;;  %v3296_v57 = vpop.f32.mrb[51].mxu1 }
 0x28e   : > { %2704 = vst.msk [vmem:[%s4228_s17 + $0x4c] sm:$0xf] %vm2684_vm5, %v3064_v0 }
 0x28f   : > { %v2299_v62 = vpop.f32.mrb[52].mxu0 }
 0x290   : > { %v3065_v31 = vpack.c.bf16 %v2299_v62, %v2299_v62  ;;  %v3301_v44 = vpop.f32.mrb[53].mxu0 }
 0x291   : > { %v2302_v63 = vpop.f32.mrb[54].mxu0  ;;  %v2349_v47 = vpop.f32.mrb[52].mxu1 }
 0x292   : > { %2705 = vst.msk [vmem:[%s4228_s17 + $0x50] sm:$0xf] %vm2684_vm5, %v3065_v31  ;;  %v3066_v35 = vpack.c.bf16 %v2302_v63, %v2302_v63  ;;  %v3067_v46 = vpack.c.bf16 %v2349_v47, %v2349_v47  ;;  %v3302_v5 = vpop.f32.mrb[55].mxu0  ;;  %v3307_v1 = vpop.f32.mrb[53].mxu1 }
 0x293   : > { %v2352_v39 = vpop.f32.mrb[54].mxu1 }
 0x294   : > { %2706 = vst.msk [vmem:[%s4228_s17 + $0x54] sm:$0xf] %vm2684_vm5, %v3066_v35  ;;  %2707 = vst.msk [vmem:[%s4228_s17 + $0x58] sm:$0xf] %vm2684_vm5, %v3067_v46  ;;  %v3068_v14 = vpack.c.bf16 %v2352_v39, %v2352_v39  ;;  %v3308_v6 = vpop.f32.mrb[55].mxu1 }
 0x296   : > { %2708 = vst.msk [vmem:[%s4228_s17 + $0x5c] sm:$0xf] %vm2684_vm5, %v3068_v14 }
 0x297   : > { %v2399_v29 = vpop.f32.mrb[56].mxu0 }
 0x298   : > { %v3069_v7 = vpack.c.bf16 %v2399_v29, %v2399_v29  ;;  %v3313_v30 = vpop.f32.mrb[57].mxu0 }
 0x299   : > { %v2402_v37 = vpop.f32.mrb[58].mxu0  ;;  %v2449_v10 = vpop.f32.mrb[56].mxu1 }
 0x29a   : > { %2709 = vst.msk [vmem:[%s4228_s17 + $0x60] sm:$0xf] %vm2684_vm5, %v3069_v7  ;;  %v3070_v9 = vpack.c.bf16 %v2402_v37, %v2402_v37  ;;  %v3071_v38 = vpack.c.bf16 %v2449_v10, %v2449_v10  ;;  %v3314_v52 = vpop.f32.mrb[59].mxu0  ;;  %v3319_v13 = vpop.f32.mrb[57].mxu1 }
 0x29b   : > { %v2452_v8 = vpop.f32.mrb[58].mxu1 }
 0x29c   : > { %2710 = vst.msk [vmem:[%s4228_s17 + $0x64] sm:$0xf] %vm2684_vm5, %v3070_v9  ;;  %2711 = vst.msk [vmem:[%s4228_s17 + $0x68] sm:$0xf] %vm2684_vm5, %v3071_v38  ;;  %v3072_v50 = vpack.c.bf16 %v2452_v8, %v2452_v8  ;;  %v3320_v58 = vpop.f32.mrb[59].mxu1 }
 0x29e   : > { %2712 = vst.msk [vmem:[%s4228_s17 + $0x6c] sm:$0xf] %vm2684_vm5, %v3072_v50 }
 0x29f   : > { %v2499_v23 = vpop.f32.mrb[60].mxu0 }
 0x2a0   : > { %v3073_v4 = vpack.c.bf16 %v2499_v23, %v2499_v23  ;;  %v3325_v16 = vpop.f32.mrb[61].mxu0 }
 0x2a1   : > { %v2502_v60 = vpop.f32.mrb[62].mxu0  ;;  %v2549_v17 = vpop.f32.mrb[60].mxu1 }
 0x2a2   : > { %2713 = vst.msk [vmem:[%s4228_s17 + $0x70] sm:$0xf] %vm2684_vm5, %v3073_v4  ;;  %v3074_v21 = vpack.c.bf16 %v2502_v60, %v2502_v60  ;;  %v3075_v19 = vpack.c.bf16 %v2549_v17, %v2549_v17  ;;  %v3326_v12 = vpop.f32.mrb[63].mxu0  ;;  %v3331_v18 = vpop.f32.mrb[61].mxu1 }
 0x2a3   : > { %v2552_v45 = vpop.f32.mrb[62].mxu1 }
 0x2a4   : > { %2714 = vst.msk [vmem:[%s4228_s17 + $0x74] sm:$0xf] %vm2684_vm5, %v3074_v21  ;;  %2715 = vst.msk [vmem:[%s4228_s17 + $0x78] sm:$0xf] %vm2684_vm5, %v3075_v19  ;;  %v3076_v25 = vpack.c.bf16 %v2552_v45, %v2552_v45  ;;  %v3332_v27 = vpop.f32.mrb[63].mxu1 }
 0x2a6   : > { %2716 = vst.msk [vmem:[%s4228_s17 + $0x7c] sm:$0xf] %vm2684_vm5, %v3076_v25 }
 0x2a7 PF: > { %s16_s20 = sadd.s32 1, %s3493_s20   ;;  %s4309_s18 = smov %s3489_s19 }
 0x2a8   : > { %p13_p5 = scmp.ge.s32.totalorder %s16_s20, 4   ;;  %s4310_s19 = smov %s4312_s21 }
 0x2aa   :  { %15 = sbr.rel (!%p13_p5) target bundleno = 2 (0x2), region = 84 }

// kernel: eau_forward.4
= control target key start
LH: loop header
LB: loop body
LE: loop exit
PB: predicated region body
PF: predicated region fallthrough
CT: control target
= control target key end

     0   :  { %s4385_s18 = smov 0   ;;  %s6360_s0 = inlined_call_operand.vmem [shape: bf16[2,448,32], index: 0, kind: input, shape index: {}]   ;;  %s6361_s1 = inlined_call_operand.vmem [shape: bf16[3,96,64], index: 1, kind: input, shape index: {}]   ;;  %s6362_s2 = inlined_call_operand.vmem [shape: f32[1,64], index: 2, kind: input, shape index: {}]   ;;  %s6363_s3 = inlined_call_operand.vmem [shape: bf16[2,16,16,32], index: 3, kind: output, shape index: {0}]   ;;  %s6364_s4 = inlined_call_operand.vmem [shape: bf16[2,16,16,32], index: 4, kind: output, shape index: {1}]   ;;  %s6365_s5 = inlined_call_operand.vmem [shape: f32[2,1,32], index: 5, kind: output, shape index: {2}]  }
   0x1 LB: > { %s3591_s19 = sadd.s32 4294967295, %s4350_s18   ;;  %p3595_p0 = scmp.ge.s32.totalorder %s4350_s18, 1  ;;  %s4350_s18 = sphi %s4385_s18, %s16_s18  }
   0x2   : > { %p192_p1 = scmp.lt.s32.totalorder %s4350_s18, 3 }
   0x4   : > { %p193_p2 = pnand %p3595_p0, %p192_p1 }
   0x6   : > { %196 = sbr.rel (%p193_p2) target bundleno = 708 (0x2c4), region = 32 }
   0xd   : > { %p228_p3 = scmp.lt.s32.totalorder %s3591_s19, 1  ;;  %v4289_v0 = vld [vmem:[%s6361_s1 + $0x30] sm:$0xff]   ;;  %v4399_v1 = vld [vmem:[%s6361_s1] sm:$0xff]   ;;  %v4291_v2 = vld [vmem:[%s6361_s1 + $0x38] sm:$0xff]   ;;  %vm770_vm0 = vcmask 1042432   ;;  %s4352_s13 = smov 64  }
   0xe   : > { %3962 = vmatprep.subr.bf16.mxu1 %v4289_v0  ;;  %4022 = vmatprep.subr.bf16.mxu0 %v4399_v1  ;;  %v4292_v3 = vld [vmem:[%s6361_s1 + $0x8] sm:$0xff]   ;;  %v4294_v4 = vld [vmem:[%s6361_s1 + $0x40] sm:$0xff]   ;;  %v4295_v5 = vld [vmem:[%s6361_s1 + $0x10] sm:$0xff]   ;;  %vm468_vm1 = vsmask.f32 3328  ;;  %s4353_s20 = smov 32  }
   0xf   : > { %s6532_s19 = smov (!%p228_p3, %s3591_s19), 1  ;;  %3963 = vmatpush3.bf16.msra.mxu1 %v4289_v0  ;;  %4023 = vmatpush3.bf16.msra.mxu0 %v4399_v1  ;;  %v4298_v25 = vld [vmem:[%s6361_s1 + $0x48] sm:$0xff]   ;;  %v4299_v41 = vld [vmem:[%s6361_s1 + $0x18] sm:$0xff]   ;;  %v4301_v47 = vld [vmem:[%s6361_s1 + $0x50] sm:$0xff]   ;;  %vm882_vm2 = vcmask 261120   ;;  %vm967_vm3 = vcmask 523264  }
  0x10   : > { %s4250_s26 = smul.u32 224, %s6532_s19  ;;  %3964 = vmatprep.subr.bf16.mxu1 %v4291_v2  ;;  %4024 = vmatprep.subr.bf16.mxu0 %v4292_v3  ;;  %v4302_v54 = vld [vmem:[%s6361_s1 + $0x20] sm:$0xff]   ;;  %v4304_v59 = vld [vmem:[%s6361_s1 + $0x58] sm:$0xff]   ;;  %vm1555_vm4 = vsmask.f32 4352  ;;  %vm1257_vm5 = vcmask 785408  }
  0x11   : > { %vm1049_vm6 = vsmask.f32 256  ;;  %vm3187_vm7 = vcmask 1046528   ;;  %vm2560_vm8 = vsmask.f32 7440  ;;  %vm2978_vm9 = vcmask 257024  }
  0x12   : > { %s4418_s8 = scalar_lea.vmem %s6360_s0, %s4250_s26  ;;  %s3822_s30 = sshll.u32 %s6532_s19, 7  ;;  %vm5457_vm10 = vmor %vm468_vm1, %vm2560_vm8  ;;  %vm3476_vm11 = vcmask 253952  }
  0x13   : > { %v4424_v6 = vld [vmem:[%s4418_s8 + $0x4] sm:$0xf]  ;;  %v4427_v7 = vld [vmem:[%s4418_s8 + $0x8] sm:$0xf]  ;;  %v4430_v8 = vld [vmem:[%s4418_s8 + $0xc] sm:$0xf]  ;;  %3965 = vmatpush3.bf16.msra.mxu1 %v4291_v2  ;;  %4025 = vmatpush3.bf16.msra.mxu0 %v4292_v3  ;;  %s5471_s9 = scalar_lea.vmem %s6363_s3, %s3822_s30  ;;  %s6144_s15 = scalar_lea.vmem %s6364_s4, %s3822_s30 }
  0x14   : > { %6416 = vst [vmem:[#allocation2_spill] sm:$0xff] %v4424_v6  ;;  %6417 = vst [vmem:[#allocation3_spill] sm:$0xff] %v4427_v7  ;;  %v3629_v9 = vcombine.low %v4424_v6, %v4427_v7  ;;  %v4435_v10 = vld [vmem:[%s4418_s8 + $0x10] sm:$0xf]  ;;  %v4438_v11 = vld [vmem:[%s4418_s8 + $0x14] sm:$0xf]  ;;  %3966 = vmatprep.subr.bf16.mxu1 %v4294_v4  ;;  %4026 = vmatprep.subr.bf16.mxu0 %v4295_v5 }
  0x15   : > { %6418 = vst [vmem:[#allocation4_spill] sm:$0xff] %v4430_v8  ;;  %6419 = vst [vmem:[#allocation5_spill] sm:$0xff] %v4435_v10  ;;  %v4441_v12 = vld [vmem:[%s4418_s8 + $0x18] sm:$0xf]  ;;  %v4447_v14 = vcombine.low %v4430_v8, %v4435_v10  ;;  %v4454_v16 = vld [vmem:[%s4418_s8 + $0x1c] sm:$0xf] }
  0x16   : > { %6420 = vst [vmem:[#allocation6_spill] sm:$0xff] %v4438_v11  ;;  %v4451_v15 = vcombine.low %v4438_v11, %v4441_v12  ;;  %v4457_v17 = vld [vmem:[%s4418_s8 + $0x20] sm:$0xf]  ;;  %v771_v19 = vrot.slane %v3629_v9, 5  ;;  %v470_v20 = vshrl.u32 %v3629_v9, 16  ;;  %v473_v21 = vshll.u32 %v3629_v9, 16 }
  0x17   : > { %v4463_v22 = vcombine.low %v4454_v16, %v4457_v17  ;;  %v4466_v23 = vld [vmem:[%s4418_s8 + $0x24] sm:$0xf]  ;;  %v4469_v24 = vld [vmem:[%s4418_s8 + $0x28] sm:$0xf]  ;;  %v772_v26 = vrot.slane %v4447_v14, 5  ;;  %v478_v27 = vshrl.u32 %v4447_v14, 16  ;;  %3967 = vmatpush3.bf16.msra.mxu1 %v4294_v4  ;;  %4027 = vmatpush3.bf16.msra.mxu0 %v4295_v5 }
  0x18   : > { %v481_v28 = vshll.u32 %v4447_v14, 16  ;;  %v487_v29 = vshrl.u32 %v4451_v15, 16  ;;  %v4479_v30 = vld [vmem:[%s4418_s8 + $0x2c] sm:$0xf]  ;;  %826 = vrot.lane.b32.xlu0 %v771_v19, %s4352_s13  ;;  %v472_v31 = vrot.slane %v470_v20, 4  ;;  %v475_v32 = vrot.slane %v473_v21, 5  ;;  %3968 = vmatprep.subr.bf16.mxu1 %v4298_v25 }
  0x19   : > { %v490_v33 = vshll.u32 %v4451_v15, 16  ;;  %v496_v34 = vshrl.u32 %v4463_v22, 16  ;;  %v4485_v35 = vld [vmem:[%s4418_s8 + $0x30] sm:$0xf]  ;;  %v773_v36 = vsel %vm770_vm0, %v771_v19, %v772_v26  ;;  %v480_v37 = vrot.slane %v478_v27, 4  ;;  %4028 = vmatprep.subr.bf16.mxu0 %v4299_v41  ;;  %v4305_v19 = vld [vmem:[%s6361_s1 + $0x28] sm:$0xff]  }
  0x1a   : > { %v483_v38 = vrot.slane %v481_v28, 5  ;;  %v489_v39 = vrot.slane %v487_v29, 4  ;;  %v4491_v40 = vld [vmem:[%s4418_s8 + $0x34] sm:$0xf]  ;;  %828 = vrot.lane.b32.xlu1 %v773_v36, %s4352_s13  ;;  %v476_v42 = vor.u32 %v475_v32, %v472_v31  ;;  %v499_v45 = vshll.u32 %v4463_v22, 16  ;;  %s4354_s10 = smov 96  }
  0x1b   : > { %v492_v43 = vrot.slane %v490_v33, 5  ;;  %v498_v44 = vrot.slane %v496_v34, 4  ;;  %v4499_v46 = vld [vmem:[%s4418_s8 + $0x38] sm:$0xf]  ;;  %v4506_v49 = vcombine.low %v4466_v23, %v4469_v24  ;;  %3969 = vmatpush3.bf16.msra.mxu1 %v4298_v25  ;;  %v774_v52 = vrot.slane %v4451_v15, 5  ;;  %4029 = vmatpush3.bf16.msra.mxu0 %v4299_v41 }
  0x1c   : > { %v484_v48 = vor.u32 %v483_v38, %v480_v37  ;;  %711 = vrot.lane.b32.xlu0 %v476_v42, %s4353_s20  ;;  %v501_v51 = vrot.slane %v499_v45, 5  ;;  %v4512_v53 = vcombine.low %v4479_v30, %v4485_v35  ;;  %v776_v56 = vrot.slane %v4463_v22, 5  ;;  %3970 = vmatprep.subr.bf16.mxu1 %v4301_v47  ;;  %v4533_v3 = vld [vmem:[%s4418_s8 + $0x3c] sm:$0xf]  ;;  %v4536_v4 = vld [vmem:[%s4418_s8 + $0x40] sm:$0xf] }
  0x1d   : > { %v493_v50 = vor.u32 %v492_v43, %v489_v39  ;;  %v505_v57 = vshrl.u32 %v4506_v49, 16  ;;  %v4522_v58 = vcombine.low %v4491_v40, %v4499_v46  ;;  %v508_v62 = vshll.u32 %v4506_v49, 16  ;;  %4030 = vmatprep.subr.bf16.mxu0 %v4302_v54  ;;  %v4553_v29 = vld [vmem:[%s4418_s8 + $0x44] sm:$0xf]  ;;  %v4556_v31 = vld [vmem:[%s4418_s8 + $0x48] sm:$0xf] }
  0x1e   : > { %v485_v55 = vsel %vm468_vm1, %v476_v42, %v484_v48  ;;  %v502_v61 = vor.u32 %v501_v51, %v498_v44  ;;  %v514_v63 = vshrl.u32 %v4512_v53, 16  ;;  %v517_v2 = vshll.u32 %v4512_v53, 16  ;;  %v4570_v41 = vld [vmem:[%s4418_s8 + $0x4c] sm:$0xf]  ;;  %v4573_v42 = vld [vmem:[%s4418_s8 + $0x50] sm:$0xf] }
  0x1f   : > { %v494_v60 = vsel %vm468_vm1, %v484_v48, %v493_v50  ;;  %v507_v0 = vrot.slane %v505_v57, 4  ;;  %3971 = vmatpush3.bf16.msra.mxu1 %v4301_v47  ;;  %v510_v9 = vrot.slane %v508_v62, 5  ;;  %4031 = vmatpush3.bf16.msra.mxu0 %v4302_v54  ;;  %v775_v20 = vsel %vm770_vm0, %v772_v26, %v774_v52  ;;  %v4596_v54 = vld [vmem:[%s4418_s8 + $0x58] sm:$0xf]  ;;  %v4602_v57 = vld [vmem:[%s4418_s8 + $0x5c] sm:$0xf] }
  0x20   : > { %715 = vrot.lane.b32.xlu1 %v494_v60, %s4353_s20  ;;  %713 = vrot.lane.b32.xlu0 %v485_v55, %s4353_s20  ;;  %v503_v5 = vsel %vm468_vm1, %v493_v50, %v502_v61  ;;  %v516_v15 = vrot.slane %v514_v63, 4  ;;  %v519_v21 = vrot.slane %v517_v2, 5  ;;  %v523_v22 = vshrl.u32 %v4522_v58, 16  ;;  %v4731_v11 = vld [vmem:[%s4418_s8 + $0xb0] sm:$0xf] }
  0x21   : > { %v526_v25 = vshll.u32 %v4522_v58, 16  ;;  %3972 = vmatprep.subr.bf16.mxu1 %v4304_v59  ;;  %v511_v27 = vor.u32 %v510_v9, %v507_v0  ;;  %v4550_v28 = vcombine.low %v4533_v3, %v4536_v4  ;;  %4032 = vmatprep.subr.bf16.mxu0 %v4305_v19  ;;  %v777_v14 = vsel %vm770_vm0, %v774_v52, %v776_v56 }
  0x22   : > { %v520_v26 = vor.u32 %v519_v21, %v516_v15  ;;  %v778_v32 = vrot.slane %v4506_v49, 5  ;;  %v525_v37 = vrot.slane %v523_v22, 4  ;;  %v4567_v39 = vcombine.low %v4553_v29, %v4556_v31  ;;  %6435 = vst [vmem:[#allocation21_spill] sm:$0xff] %v4731_v11 }
  0x23   : > { %3973 = vmatpush3.bf16.msra.mxu1 %v4304_v59  ;;  %v532_v33 = vshrl.u32 %v4550_v28, 16  ;;  %v535_v34 = vshll.u32 %v4550_v28, 16  ;;  %4033 = vmatpush3.bf16.msra.mxu0 %v4305_v19  ;;  %v512_v36 = vsel %vm468_vm1, %v502_v61, %v511_v27  ;;  %v528_v38 = vrot.slane %v526_v25, 5  ;;  %v4605_v59 = vld [vmem:[%s4418_s8 + $0x60] sm:$0xf] }
  0x24   : > { %717 = vrot.lane.b32.xlu1 %v503_v5, %s4353_s20  ;;  %830 = vrot.lane.b32.xlu0 %v775_v20, %s4352_s13  ;;  %v780_v43 = vrot.slane %v4512_v53, 5  ;;  %v521_v44 = vsel %vm468_vm1, %v511_v27, %v520_v26  ;;  %v4582_v48 = vcombine.low %v4570_v41, %v4573_v42  ;;  %v779_v49 = vsel %vm770_vm0, %v776_v56, %v778_v32  ;;  %v4593_v53 = vld [vmem:[%s4418_s8 + $0x54] sm:$0xf] }
  0x25   : > { %4142 = vmatprep.subr.bf16.mxu1 %v4399_v1  ;;  %v534_v45 = vrot.slane %v532_v33, 4  ;;  %v537_v47 = vrot.slane %v535_v34, 5  ;;  %v4587_v1 = vld [vmem:[%s6361_s1 + $0x60] sm:$0xff]   ;;  %v529_v50 = vor.u32 %v528_v38, %v525_v37  ;;  %v541_v51 = vshrl.u32 %v4567_v39, 16  ;;  %v4633_v33 = vld [vmem:[%s4418_s8 + $0x68] sm:$0xf] }
  0x26   : > { %6421 = vst [vmem:[#allocation7_spill] sm:$0xff] %v4587_v1  ;;  %v544_v52 = vshll.u32 %v4567_v39, 16  ;;  %4082 = vmatprep.subr.bf16.mxu0 %v4587_v1  ;;  %v781_v55 = vsel %vm770_vm0, %v778_v32, %v780_v43  ;;  %v782_v60 = vrot.slane %v4522_v58, 5  ;;  %v550_v61 = vshrl.u32 %v4582_v48, 16  ;;  %v4630_v32 = vld [vmem:[%s4418_s8 + $0x64] sm:$0xf] }
  0x27   : > { %v538_v56 = vor.u32 %v537_v47, %v534_v45  ;;  %v553_v62 = vshll.u32 %v4582_v48, 16  ;;  %v530_v63 = vsel %vm468_vm1, %v520_v26, %v529_v50  ;;  %v543_v0 = vrot.slane %v541_v51, 4  ;;  %v4640_v34 = vld [vmem:[%s4418_s8 + $0x70] sm:$0xf]  ;;  %v4728_v1 = vld [vmem:[%s4418_s8 + $0xac] sm:$0xf] }
  0x28   : > { %832 = vrot.lane.b32.xlu1 %v777_v14, %s4352_s13  ;;  %719 = vrot.lane.b32.xlu0 %v512_v36, %s4353_s20  ;;  %v546_v2 = vrot.slane %v544_v52, 5  ;;  %v4614_v5 = vcombine.low %v4593_v53, %v4596_v54  ;;  %v4618_v9 = vcombine.low %v4602_v57, %v4605_v59  ;;  %v784_v15 = vrot.slane %v4550_v28, 5  ;;  %v4637_v28 = vld [vmem:[%s4418_s8 + $0x6c] sm:$0xf]  ;;  %v4655_v52 = vld [vmem:[%s4418_s8 + $0x74] sm:$0xf] }
  0x29   : > { %v539_v58 = vsel %vm468_vm1, %v529_v50, %v538_v56  ;;  %v552_v19 = vrot.slane %v550_v61, 4  ;;  %v555_v20 = vrot.slane %v553_v62, 5  ;;  %v783_v21 = vsel %vm770_vm0, %v780_v43, %v782_v60  ;;  %v4669_v61 = vld [vmem:[%s4418_s8 + $0x94] sm:$0xf]  ;;  %v4672_v62 = vld [vmem:[%s4418_s8 + $0x98] sm:$0xf] }
  0x2a   : > { %v547_v22 = vor.u32 %v546_v2, %v543_v0  ;;  %v559_v25 = vshrl.u32 %v4614_v5, 16  ;;  %v562_v27 = vshll.u32 %v4614_v5, 16  ;;  %v568_v14 = vshrl.u32 %v4618_v9, 16  ;;  %6424 = vst [vmem:[#allocation10_spill] sm:$0xff] %v4669_v61  ;;  %6425 = vst [vmem:[#allocation11_spill] sm:$0xff] %v4672_v62 }
  0x2b   : > { %v571_v26 = vshll.u32 %v4618_v9, 16  ;;  %v785_v36 = vsel %vm770_vm0, %v782_v60, %v784_v15  ;;  %v556_v37 = vor.u32 %v555_v20, %v552_v19  ;;  %v786_v38 = vrot.slane %v4567_v39, 5  ;;  %v4666_v60 = vld [vmem:[%s4418_s8 + $0x90] sm:$0xf]  ;;  %v4677_v0 = vld [vmem:[%s4418_s8 + $0x9c] sm:$0xf] }
  0x2c   : > { %721 = vrot.lane.b32.xlu1 %v521_v44, %s4353_s20  ;;  %834 = vrot.lane.b32.xlu0 %v779_v49, %s4352_s13  ;;  %v548_v43 = vsel %vm468_vm1, %v538_v56, %v547_v22  ;;  %v561_v44 = vrot.slane %v559_v25, 4  ;;  %v564_v45 = vrot.slane %v562_v27, 5  ;;  %v4648_v47 = vcombine.low %v4630_v32, %v4633_v33  ;;  %v4663_v56 = vld [vmem:[%s4418_s8 + $0x8c] sm:$0xf]  ;;  %6423 = vst [vmem:[#allocation9_spill] sm:$0xff] %v4666_v60 }
  0x2d   : > { %v570_v49 = vrot.slane %v568_v14, 4  ;;  %v573_v50 = vrot.slane %v571_v26, 5  ;;  %v4652_v51 = vcombine.low %v4637_v28, %v4640_v34  ;;  %v788_v39 = vrot.slane %v4582_v48, 5  ;;  %6422 = vst [vmem:[#allocation8_spill] sm:$0xff] %v4663_v56  ;;  %6426 = vst [vmem:[#allocation12_spill] sm:$0xff] %v4677_v0 }
  0x2e   : > { %v787_v48 = vsel %vm770_vm0, %v784_v15, %v786_v38  ;;  %v565_v2 = vor.u32 %v564_v45, %v561_v44  ;;  %v580_v19 = vshll.u32 %v4648_v47, 16  ;;  %v4683_v20 = vld [vmem:[%s4418_s8 + $0xa0] sm:$0xf]  ;;  %v4694_v14 = vld [vmem:[%s4418_s8 + $0x7c] sm:$0xf]  ;;  %v790_v44 = vrot.slane %v4614_v5, 5 }
  0x2f   : > { %6427 = vst [vmem:[#allocation13_spill] sm:$0xff] %v4683_v20  ;;  %v586_v25 = vshrl.u32 %v4652_v51, 16  ;;  %v589_v27 = vshll.u32 %v4652_v51, 16  ;;  %6428 = vst [vmem:[#allocation14_spill] sm:$0xff] %v4694_v14  ;;  %v4697_v26 = vld [vmem:[%s4418_s8 + $0x80] sm:$0xf] }
  0x30   : > { %836 = vrot.lane.b32.xlu1 %v781_v55, %s4352_s13  ;;  %723 = vrot.lane.b32.xlu0 %v530_v63, %s4353_s20  ;;  %v4658_v55 = vld [vmem:[%s4418_s8 + $0x78] sm:$0xf]  ;;  %v557_v63 = vsel %vm468_vm1, %v547_v22, %v556_v37  ;;  %v789_v22 = vsel %vm770_vm0, %v786_v38, %v788_v39  ;;  %6429 = vst [vmem:[#allocation15_spill] sm:$0xff] %v4697_v26  ;;  %v4708_v45 = vld [vmem:[%s4418_s8 + $0x84] sm:$0xf]  ;;  %v792_v5 = vrot.slane %v4618_v9, 5 }
  0x31   : > { %v4691_v15 = vcombine.low %v4655_v52, %v4658_v55  ;;  %6432 = vst [vmem:[#allocation18_spill] sm:$0xff] %v4708_v45  ;;  %v4711_v38 = vld [vmem:[%s4418_s8 + $0x88] sm:$0xf]  ;;  %v582_v13 = vrot.slane %v580_v19, 5  ;;  %6434 = vst [vmem:[#allocation20_spill] sm:$0xff] %v4728_v1  ;;  %v588_v9 = vrot.slane %v586_v25, 4 }
  0x32   : > { %6433 = vst [vmem:[#allocation19_spill] sm:$0xff] %v4711_v38 }
  0x33   : > { %v598_v19 = vshll.u32 %v4691_v15, 16 }
  0x34   : > { %725 = vrot.lane.b32.xlu1 %v539_v58, %s4353_s20  ;;  %838 = vrot.lane.b32.xlu0 %v783_v21, %s4352_s13  ;;  %v577_v58 = vshrl.u32 %v4648_v47, 16  ;;  %v574_v21 = vor.u32 %v573_v50, %v570_v49  ;;  %v4715_v49 = vcombine.low %v4663_v56, %v4666_v60  ;;  %v4719_v50 = vcombine.low %v4669_v61, %v4672_v62 }
  0x35   : > { %v4766_v61 = vcombine.low %v4708_v45, %v4711_v38 }
  0x36   : > { %v579_v18 = vrot.slane %v577_v58, 4  ;;  %v575_v10 = vsel %vm468_vm1, %v565_v2, %v574_v21  ;;  %v6381_v8 = vrot.slane %v4715_v49, 5  ;;  %v806_v7 = vrot.slane %v4719_v50, 5 }
  0x37   : > { %v595_v58 = vshrl.u32 %v4691_v15, 16 }
  0x38   : > { %840 = vrot.lane.b32.xlu1 %v785_v36, %s4352_s13  ;;  %727 = vrot.lane.b32.xlu0 %v548_v43, %s4353_s20  ;;  %v4700_v36 = vld [vmem:[%s4418_s8 + $0xa4] sm:$0xf]  ;;  %v4703_v43 = vld [vmem:[%s4418_s8 + $0xa8] sm:$0xf]  ;;  %v4748_v62 = vsel %vm770_vm0, %v6381_v8, %v806_v7  ;;  %v583_v60 = vor.u32 %v582_v13, %v579_v18  ;;  %v794_v13 = vrot.slane %v4648_v47, 5 }
  0x39   : > { %6430 = vst [vmem:[#allocation16_spill] sm:$0xff] %v4700_v36  ;;  %6431 = vst [vmem:[#allocation17_spill] sm:$0xff] %v4703_v43  ;;  %v4755_v25 = vcombine.low %v4700_v36, %v4703_v43  ;;  %v4769_v8 = vld [vmem:[%s4418_s8 + $0xbc] sm:$0xf]  ;;  %v597_v18 = vrot.slane %v595_v58, 4 }
  0x3a   : > { %6436 = vst [vmem:[#allocation22_spill] sm:$0xff] %v4748_v62  ;;  %6441 = vst [vmem:[#allocation27_spill] sm:$0xff] %v4769_v8  ;;  %v4780_v36 = vld [vmem:[%s4418_s8 + $0xc0] sm:$0xf]  ;;  %v584_v47 = vsel %vm468_vm1, %v574_v21, %v583_v60 }
  0x3b   : > { %6438 = vst [vmem:[#allocation24_spill] sm:$0xff] %v4755_v25  ;;  %v810_v62 = vrot.slane %v4755_v25, 5  ;;  %6443 = vst [vmem:[#allocation29_spill] sm:$0xff] %v4780_v36 }
  0x3c   : > { %729 = vrot.lane.b32.xlu1 %v557_v63, %s4353_s20  ;;  %842 = vrot.lane.b32.xlu0 %v787_v48, %s4352_s13  ;;  %v4723_v63 = vcombine.low %v4677_v0, %v4683_v20  ;;  %v566_v48 = vsel %vm468_vm1, %v556_v37, %v565_v2  ;;  %v591_v37 = vrot.slane %v589_v27, 5  ;;  %v4743_v2 = vcombine.low %v4694_v14, %v4697_v26  ;;  %v4758_v27 = vld [vmem:[%s4418_s8 + $0xb4] sm:$0xf] }
  0x3d   : > { %6439 = vst [vmem:[#allocation25_spill] sm:$0xff] %v4758_v27 }
  0x3e   : > { %v808_v20 = vrot.slane %v4723_v63, 5  ;;  %v592_v43 = vor.u32 %v591_v37, %v588_v9  ;;  %v613_v9 = vshrl.u32 %v4766_v61, 16  ;;  %v616_v37 = vshll.u32 %v4766_v61, 16 }
  0x3f   : > { %v643_v6 = vshll.u32 %v4723_v63, 16 }
  0x40   : > { %844 = vrot.lane.b32.xlu1 %v789_v22, %s4352_s13  ;;  %731 = vrot.lane.b32.xlu0 %v566_v48, %s4353_s20  ;;  %v4751_v0 = vsel %vm770_vm0, %v806_v7, %v808_v20  ;;  %v4761_v22 = vld [vmem:[%s4418_s8 + $0xb8] sm:$0xf]  ;;  %v791_v48 = vsel %vm770_vm0, %v788_v39, %v790_v44  ;;  %v793_v7 = vsel %vm770_vm0, %v790_v44, %v792_v5  ;;  %v600_v39 = vrot.slane %v598_v19, 5 }
  0x41   : > { %6437 = vst [vmem:[#allocation23_spill] sm:$0xff] %v4751_v0  ;;  %6440 = vst [vmem:[#allocation26_spill] sm:$0xff] %v4761_v22  ;;  %v4774_v0 = vcombine.low %v4728_v1, %v4731_v11  ;;  %v604_v44 = vshrl.u32 %v4743_v2, 16  ;;  %v607_v11 = vshll.u32 %v4743_v2, 16  ;;  %v4786_v1 = vsel %vm770_vm0, %v808_v20, %v810_v62 }
  0x42   : > { %6444 = vst [vmem:[#allocation30_spill] sm:$0xff] %v4786_v1  ;;  %v4794_v58 = vcombine.low %v4758_v27, %v4761_v22  ;;  %v4801_v20 = vcombine.low %v4769_v8, %v4780_v36  ;;  %v4807_v1 = vld [vmem:[%s4418_s8 + $0xc8] sm:$0xf]  ;;  %v593_v21 = vsel %vm468_vm1, %v583_v60, %v592_v43  ;;  %v796_v22 = vrot.slane %v4652_v51, 5  ;;  %v6457_v45 = vld [vmem:[#allocation24_spill] sm:$0xff] }
  0x43   : > { %6442 = vst [vmem:[#allocation28_spill] sm:$0xff] %v4774_v0  ;;  %6447 = vst [vmem:[#allocation33_spill] sm:$0xff] %v4807_v1  ;;  %v601_v36 = vor.u32 %v600_v39, %v597_v18  ;;  %v606_v8 = vrot.slane %v604_v44, 4  ;;  %v609_v25 = vrot.slane %v607_v11, 5  ;;  %v615_v60 = vrot.slane %v613_v9, 4 }
  0x44   : > { %733 = vrot.lane.b32.xlu1 %v575_v10, %s4353_s20  ;;  %846 = vrot.lane.b32.xlu0 %v791_v48, %s4352_s13  ;;  %v812_v10 = vrot.slane %v4774_v0, 5  ;;  %6445 = vst [vmem:[#allocation31_spill] sm:$0xff] %v4794_v58  ;;  %v4804_v48 = vld [vmem:[%s4418_s8 + $0xc4] sm:$0xf]  ;;  %v795_v0 = vsel %vm770_vm0, %v792_v5, %v794_v13  ;;  %v814_v27 = vrot.slane %v4794_v58, 5  ;;  %v618_v38 = vrot.slane %v616_v37, 5 }
  0x45   : > { %v622_v5 = vshrl.u32 %v4715_v49, 16  ;;  %v625_v58 = vshll.u32 %v4715_v49, 16  ;;  %v4832_v18 = vcombine.low %v4804_v48, %v4807_v1  ;;  %v4839_v39 = vld [vmem:[%s4418_s8 + $0xd4] sm:$0xf]  ;;  %v301_v44 = vld [vmem:[%s4418_s8 + $0xd8] sm:$0xf]  ;;  %v610_v9 = vor.u32 %v609_v25, %v606_v8 }
  0x46   : > { %v4797_v19 = vsel %vm770_vm0, %v810_v62, %v812_v10  ;;  %v4815_v62 = vld [vmem:[%s4418_s8 + $0xcc] sm:$0xf]  ;;  %v4824_v51 = vsel %vm770_vm0, %v812_v10, %v814_v27  ;;  %v798_v10 = vrot.slane %v4691_v15, 5  ;;  %v619_v1 = vor.u32 %v618_v38, %v615_v60 }
  0x47   : > { %6446 = vst [vmem:[#allocation32_spill] sm:$0xff] %v4797_v19  ;;  %v4818_v19 = vld [vmem:[%s4418_s8 + $0xd0] sm:$0xf]  ;;  %6449 = vst [vmem:[#allocation35_spill] sm:$0xff] %v4824_v51  ;;  %v818_v37 = vrot.slane %v4832_v18, 5  ;;  %v602_v51 = vsel %vm468_vm1, %v592_v43, %v601_v36  ;;  %v4854_v15 = vcombine.low %v4839_v39, %v301_v44  ;;  %v649_v26 = vshrl.u32 %v6457_v45, 16 }
  0x48   : > { %848 = vrot.lane.b32.xlu1 %v793_v7, %s4352_s13  ;;  %6448 = vst [vmem:[#allocation34_spill] sm:$0xff] %v4818_v19  ;;  %735 = vrot.lane.b32.xlu0 %v584_v47, %s4353_s20  ;;  %v816_v7 = vrot.slane %v4801_v20, 5  ;;  %v4836_v11 = vcombine.low %v4815_v62, %v4818_v19  ;;  %v800_v47 = vrot.slane %v4743_v2, 5  ;;  %v4850_v19 = vld [vmem:[%s4418_s8] sm:$0x8]  ;;  %v627_v2 = vrot.slane %v625_v58, 5 }
  0x49   : > { %v799_v25 = vsel %vm770_vm0, %v796_v22, %v798_v10  ;;  %v822_v38 = vrot.slane %v4854_v15, 5  ;;  %v4311_v58 = vld [vmem:[%s4418_s8 + $0xdc] ss:$0 sps:$4 sm:$0x11]  }
  0x4a   : > { %v4828_v56 = vsel %vm770_vm0, %v814_v27, %v816_v7  ;;  %v797_v27 = vsel %vm770_vm0, %v794_v13, %v796_v22  ;;  %v4858_v13 = vsel %vm770_vm0, %v816_v7, %v818_v37  ;;  %v801_v43 = vsel %vm770_vm0, %v798_v10, %v800_v47 }
  0x4b   : > { %6450 = vst [vmem:[#allocation36_spill] sm:$0xff] %v4828_v56  ;;  %v820_v56 = vrot.slane %v4836_v11, 5  ;;  %v611_v7 = vsel %vm468_vm1, %v601_v36, %v610_v9  ;;  %v620_v10 = vsel %vm468_vm1, %v610_v9, %v619_v1  ;;  %v824_v9 = vrot.slane %v4311_v58, 5  ;;  %v6460_v58 = vld [vmem:[#allocation13_spill] sm:$0xff] }
  0x4c   : > { %737 = vrot.lane.b32.xlu1 %v593_v21, %s4353_s20  ;;  %850 = vrot.lane.b32.xlu0 %v795_v0, %s4352_s13  ;;  %v624_v21 = vrot.slane %v622_v5, 4  ;;  %v631_v0 = vshrl.u32 %v4719_v50, 16  ;;  %v634_v5 = vshll.u32 %v4719_v50, 16  ;;  %v640_v50 = vshrl.u32 %v4723_v63, 16 }
  0x4d   : > { %v4861_v8 = vsel %vm770_vm0, %v818_v37, %v820_v56  ;;  %v4880_v37 = vsel %vm770_vm0, %v820_v56, %v822_v38  ;;  %v6459_v56 = vld [vmem:[#allocation16_spill] sm:$0xff] }
  0x4e   : > { %v628_v60 = vor.u32 %v627_v2, %v624_v21  ;;  %v633_v36 = vrot.slane %v631_v0, 4  ;;  %v636_v21 = vrot.slane %v634_v5, 5  ;;  %v6451_v2 = vld [vmem:[#allocation8_spill] sm:$0xff]  ;;  %v6452_v0 = vld [vmem:[#allocation19_spill] sm:$0xff]  ;;  %v642_v44 = vrot.slane %v640_v50, 4 }
  0x4f   : > { %v645_v5 = vrot.slane %v643_v6, 5  ;;  %v6461_v6 = vld [vmem:[#allocation28_spill] sm:$0xff] }
  0x50   : > { %852 = vrot.lane.b32.xlu1 %v797_v27, %s4352_s13  ;;  %739 = vrot.lane.b32.xlu0 %v602_v51, %s4353_s20  ;;  %v802_v27 = vrot.slane %v4766_v61, 5  ;;  %v637_v63 = vor.u32 %v636_v21, %v633_v36  ;;  %v652_v61 = vshll.u32 %v6457_v45, 16  ;;  %v658_v50 = vshrl.u32 %v6461_v6, 16  ;;  %v6462_v36 = vld [vmem:[#allocation20_spill] sm:$0xff]  ;;  %v6463_v21 = vld [vmem:[#allocation17_spill] sm:$0xff] }
  0x51   : > { %v685_v51 = vshrl.u32 %v4832_v18, 16 }
  0x52   : > { %v803_v14 = vsel %vm770_vm0, %v800_v47, %v802_v27  ;;  %v661_v47 = vshll.u32 %v6461_v6, 16  ;;  %v638_v45 = vsel %vm468_vm1, %v628_v60, %v637_v63 }
  0x54   : > { %741 = vrot.lane.b32.xlu1 %v611_v7, %s4353_s20  ;;  %854 = vrot.lane.b32.xlu0 %v799_v25, %s4352_s13  ;;  %v4901_v7 = vsel %vm770_vm0, %v822_v38, %v824_v9  ;;  %v6454_v9 = vld [vmem:[#allocation9_spill] sm:$0xff]  ;;  %v629_v25 = vsel %vm468_vm1, %v619_v1, %v628_v60  ;;  %v646_v1 = vor.u32 %v645_v5, %v642_v44  ;;  %v654_v38 = vrot.slane %v652_v61, 5  ;;  %v6464_v5 = vld [vmem:[#allocation31_spill] sm:$0xff] }
  0x55   : > { %v670_v6 = vshll.u32 %v6464_v5, 16  ;;  %v676_v61 = vshrl.u32 %v4801_v20, 16 }
  0x58   : > { %856 = vrot.lane.b32.xlu1 %v801_v43, %s4352_s13  ;;  %743 = vrot.lane.b32.xlu0 %v620_v10, %s4353_s20  ;;  %v6458_v43 = vrot.slane %v4715_v49, 5  ;;  %v647_v49 = vsel %vm468_vm1, %v637_v63, %v646_v1  ;;  %v6466_v10 = vld [vmem:[#allocation21_spill] sm:$0xff]  ;;  %v679_v63 = vshll.u32 %v4801_v20, 16  ;;  %v688_v20 = vshll.u32 %v4832_v18, 16 }
  0x5a   : > { %v805_v22 = vsel %vm770_vm0, %v802_v27, %v6458_v43  ;;  %v660_v27 = vrot.slane %v658_v50, 4  ;;  %v667_v43 = vshrl.u32 %v6464_v5, 16  ;;  %v6468_v50 = vld [vmem:[#allocation27_spill] sm:$0xff]  ;;  %v672_v5 = vrot.slane %v670_v6, 5  ;;  %v6472_v6 = vld [vmem:[#allocation30_spill] sm:$0xff] }
  0x5b   : > { %v690_v18 = vrot.slane %v688_v20, 5 }
  0x5c   : > { %745 = vrot.lane.b32.xlu1 %v629_v25, %s4353_s20  ;;  %858 = vrot.lane.b32.xlu0 %v803_v14, %s4352_s13  ;;  %v651_v25 = vrot.slane %v649_v26, 4  ;;  %v663_v14 = vrot.slane %v661_v47, 5  ;;  %v6467_v26 = vld [vmem:[#allocation22_spill] sm:$0xff] }
  0x5d   : > { %v6469_v47 = vld [vmem:[#allocation26_spill] sm:$0xff] }
  0x5e   : > { %v655_v44 = vor.u32 %v654_v38, %v651_v25  ;;  %v669_v25 = vrot.slane %v667_v43, 4  ;;  %v703_v38 = vshrl.u32 %v4854_v15, 16 }
  0x60   : > { %860 = vrot.lane.b32.xlu1 %v805_v22, %s4352_s13  ;;  %747 = vrot.lane.b32.xlu0 %v638_v45, %s4353_s20  ;;  %v664_v22 = vor.u32 %v663_v14, %v660_v27  ;;  %v656_v45 = vsel %vm468_vm1, %v646_v1, %v655_v44  ;;  %v681_v27 = vrot.slane %v679_v63, 5  ;;  %v673_v14 = vor.u32 %v672_v5, %v669_v25  ;;  %v6471_v1 = vld [vmem:[#allocation29_spill] sm:$0xff] }
  0x61   : > { %v687_v5 = vrot.slane %v685_v51, 4 }
  0x62   : > { %v665_v60 = vsel %vm468_vm1, %v655_v44, %v664_v22  ;;  %v697_v44 = vshll.u32 %v4836_v11, 16  ;;  %v674_v25 = vsel %vm468_vm1, %v664_v22, %v673_v14  ;;  %v6475_v22 = vld [vmem:[#allocation35_spill] sm:$0xff] }
  0x64   : > { %749 = vrot.lane.b32.xlu1 %v647_v49, %s4353_s20  ;;  %862 = vrot.lane.b32.xlu0 %v6467_v26, %s4352_s13  ;;  %v6470_v49 = vld [vmem:[#allocation23_spill] sm:$0xff]  ;;  %v678_v26 = vrot.slane %v676_v61, 4  ;;  %v6473_v61 = vld [vmem:[#allocation33_spill] sm:$0xff] }
  0x68   : > { %864 = vrot.lane.b32.xlu1 %v6470_v49, %s4352_s13  ;;  %751 = vrot.lane.b32.xlu0 %v656_v45, %s4353_s20  ;;  %v682_v49 = vor.u32 %v681_v27, %v678_v26  ;;  %v694_v45 = vshrl.u32 %v4836_v11, 16  ;;  %v699_v26 = vrot.slane %v697_v44, 5  ;;  %v691_v27 = vor.u32 %v690_v18, %v687_v5 }
  0x69   : > { %v706_v11 = vshll.u32 %v4854_v15, 16 }
  0x6a   : > { %v683_v43 = vsel %vm468_vm1, %v673_v14, %v682_v49  ;;  %v692_v20 = vsel %vm468_vm1, %v682_v49, %v691_v27 }
  0x6b   : > { %v708_v63 = vrot.slane %v706_v11, 5 }
  0x6c   : > { %753 = vrot.lane.b32.xlu1 %v665_v60, %s4353_s20  ;;  %866 = vrot.lane.b32.xlu0 %v6472_v6, %s4352_s13  ;;  %v6474_v60 = vld [vmem:[#allocation32_spill] sm:$0xff]  ;;  %v696_v6 = vrot.slane %v694_v45, 4 }
  0x6d   : > { %v6477_v45 = vld [vmem:[#allocation36_spill] sm:$0xff] }
  0x6e   : > { %v700_v51 = vor.u32 %v699_v26, %v696_v6 }
  0x70   : > { %868 = vrot.lane.b32.xlu1 %v6474_v60, %s4352_s13  ;;  %755 = vrot.lane.b32.xlu0 %v674_v25, %s4353_s20  ;;  %v705_v60 = vrot.slane %v703_v38, 4  ;;  %v6476_v25 = vld [vmem:[#allocation34_spill] sm:$0xff]  ;;  %v701_v15 = vsel %vm468_vm1, %v691_v27, %v700_v51 }
  0x72   : > { %v709_v44 = vor.u32 %v708_v63, %v705_v60  ;;  %v6478_v63 = vld [vmem:[#allocation2_spill] sm:$0xff] }
  0x73   : > { %v6479_v5 = vcombine.low %v4850_v19, %v6478_v63 }
  0x74   : > { %757 = vrot.lane.b32.xlu1 %v683_v43, %s4353_s20  ;;  %870 = vrot.lane.b32.xlu0 %v6475_v22, %s4352_s13  ;;  %v710_v43 = vsel %vm468_vm1, %v700_v51, %v709_v44  ;;  %v6481_v22 = vld [vmem:[#allocation4_spill] sm:$0xff] }
  0x78   : > { %872 = vrot.lane.b32.xlu1 %v6477_v45, %s4352_s13  ;;  %759 = vrot.lane.b32.xlu0 %v692_v20, %s4353_s20 }
  0x7c   : > { %761 = vrot.lane.b32.xlu1 %v701_v15, %s4353_s20  ;;  %874 = vrot.lane.b32.xlu0 %v4858_v13, %s4352_s13 }
  0x80   : > { %876 = vrot.lane.b32.xlu1 %v4861_v8, %s4352_s13  ;;  %763 = vrot.lane.b32.xlu0 %v710_v43, %s4353_s20  ;;  %v6483_v43 = vld [vmem:[#allocation5_spill] sm:$0xff] }
  0x84   : > { %765 = vrot.lane.b32.xlu1 %v709_v44, %s4353_s20  ;;  %878 = vrot.lane.b32.xlu0 %v4880_v37, %s4352_s13  ;;  %v6480_v37 = vld [vmem:[#allocation3_spill] sm:$0xff]  ;;  %s245_s20 = scalar_lea.vmem %s6365_s5, %s6532_s19 }
  0x85   : > { %v6482_v51 = vcombine.low %v6480_v37, %v6481_v22 }
  0x88   : > { %880 = vrot.lane.b32.xlu1 %v4901_v7, %s4352_s13 }
  0x8a   : > { %v827_v38 = vpop.permute.xlu0 %826 }
  0x8c   : > { %v829_v49 = vpop.permute.xlu1 %828 }
  0x8e   : > { %v712_v13 = vpop.permute.xlu0 %711 }
  0x8f   : > { %v885_v8 = vsel %vm882_vm2, %v6479_v5, %v712_v13  ;;  %v6484_v13 = vld [vmem:[#allocation6_spill] sm:$0xff] }
  0x90   : > { %v969_v18 = vsel %vm967_vm3, %v885_v8, %v827_v38  ;;  %v6485_v63 = vcombine.low %v6483_v43, %v6484_v13 }
  0x91   : > { %v1556_v6 = vshrl.u32 %v969_v18, 16  ;;  %v1559_v26 = vshll.u32 %v969_v18, 16 }
  0x92   : > { %v716_v27 = vpop.permute.xlu1 %715  ;;  %v714_v11 = vpop.permute.xlu0 %713 }
  0x93   : > { %v888_v7 = vsel %vm882_vm2, %v6482_v51, %v714_v11  ;;  %v1558_v60 = vrot.slane %v1556_v6, 3  ;;  %v1561_v45 = vrot.slane %v1559_v26, 4  ;;  %v891_v38 = vsel %vm882_vm2, %v6485_v63, %v716_v27 }
  0x94   : > { %v971_v20 = vsel %vm967_vm3, %v888_v7, %v829_v49  ;;  %v6486_v49 = vcombine.low %v4441_v12, %v4454_v16 }
  0x95   : > { %v1050_v15 = vshrl.u32 %v971_v20, 16  ;;  %v1564_v44 = vshll.u32 %v971_v20, 16  ;;  %v1562_v11 = vor.u32 %v1561_v45, %v1558_v60  ;;  %v4310_v45 = vld [vmem:[%s6361_s1 + $0x68] sm:$0xff]  }
  0x96   : > { %v718_v19 = vpop.permute.xlu1 %717  ;;  %v831_v5 = vpop.permute.xlu0 %830 }
  0x97   : > { %v1566_v8 = vrot.slane %v1564_v44, 4  ;;  %v973_v18 = vsel %vm967_vm3, %v891_v38, %v831_v5  ;;  %v1563_v14 = vrot.slane %v1050_v15, 3  ;;  %v894_v6 = vsel %vm882_vm2, %v6486_v49, %v718_v19 }
  0x98   : > { %v1053_v37 = vshrl.u32 %v973_v18, 16  ;;  %v1056_v22 = vshll.u32 %v973_v18, 16  ;;  %v1052_v12 = vrot.slane %v1050_v15, 7 }
  0x99   : > { %v1567_v51 = vor.u32 %v1566_v8, %v1563_v14  ;;  %v6487_v8 = vcombine.low %v4457_v17, %v4466_v23  ;;  %v6489_v17 = vcombine.low %v4469_v24, %v4479_v30 }
  0x9a   : > { %v833_v26 = vpop.permute.xlu1 %832  ;;  %v1055_v7 = vrot.slane %v1053_v37, 7  ;;  %v1569_v20 = vrot.slane %v1053_v37, 3  ;;  %v1570_v27 = vrot.slane %v1056_v22, 4  ;;  %v720_v43 = vpop.permute.xlu0 %719 }
  0x9b   : > { %v975_v44 = vsel %vm967_vm3, %v894_v6, %v833_v26  ;;  %v1568_v38 = vsel %vm1555_vm4, %v1562_v11, %v1567_v51  ;;  %v897_v37 = vsel %vm882_vm2, %v6487_v8, %v720_v43  ;;  %v4337_v8 = vld [vmem:[%s6361_s1 + $0x8] sm:$0xff]  }
  0x9c   : > { %v1060_v13 = vshrl.u32 %v975_v44, 16  ;;  %v1063_v63 = vshll.u32 %v975_v44, 16  ;;  %v1058_v5 = vor.u32 %v1056_v22, %v1055_v7  ;;  %v1571_v18 = vor.u32 %v1570_v27, %v1569_v20  ;;  %4034 = vmatprep.mubr.msk.bf16.mxu0 %vm1257_vm5, %v1568_v38  ;;  %v6488_v44 = vld [vmem:[#allocation7_spill] sm:$0xff] }
  0x9e   : > { %v1062_v16 = vrot.slane %v1060_v13, 7  ;;  %v1573_v19 = vrot.slane %v1060_v13, 3  ;;  %v1574_v60 = vrot.slane %v1063_v63, 4  ;;  %v722_v14 = vpop.permute.xlu1 %721  ;;  %v835_v49 = vpop.permute.xlu0 %834  ;;  %v1059_v22 = vsel %vm1049_vm6, %v1052_v12, %v1058_v5 }
  0x9f   : > { %v1572_v6 = vsel %vm1555_vm4, %v1567_v51, %v1571_v18  ;;  %v977_v11 = vsel %vm967_vm3, %v897_v37, %v835_v49  ;;  %3974 = vmatprep.mubr.msk.bf16.mxu1 %vm1257_vm5, %v1059_v22  ;;  %v900_v23 = vsel %vm882_vm2, %v6489_v17, %v722_v14 }
  0xa0   : > { %v1065_v26 = vor.u32 %v1063_v63, %v1062_v16  ;;  %v1575_v15 = vor.u32 %v1574_v60, %v1573_v19  ;;  %4035 = vmatmul.mubr.msk.bf16.vlgmr.msra.gmra.mrb[0].mxu0 %vm1257_vm5, %v1572_v6  ;;  %v1067_v20 = vshrl.u32 %v977_v11, 16  ;;  %v1070_v27 = vshll.u32 %v977_v11, 16  ;;  %v4314_v63 = vld [vmem:[%s6361_s1 + $0x70] sm:$0xff]  }
  0xa1   : > { %4083 = vmatpush3.bf16.msra.mxu0 %v6488_v44  ;;  %v6490_v11 = vcombine.low %v4485_v35, %v4491_v40  ;;  %v6491_v35 = vcombine.low %v4499_v46, %v4533_v3 }
  0xa2   : > { %v837_v43 = vpop.permute.xlu1 %836  ;;  %v1066_v51 = vsel %vm1049_vm6, %v1055_v7, %v1065_v26  ;;  %v1576_v13 = vsel %vm1555_vm4, %v1571_v18, %v1575_v15  ;;  %4084 = vmatprep.subr.bf16.mxu0 %v4310_v45  ;;  %v1069_v38 = vrot.slane %v1067_v20, 7  ;;  %v1577_v5 = vrot.slane %v1067_v20, 3  ;;  %v724_v24 = vpop.permute.xlu0 %723  ;;  %v4336_v7 = vld [vmem:[%s6361_s1] sm:$0xff]   ;;  %v4317_v26 = vld [vmem:[%s6361_s1 + $0x78] sm:$0xff]  }
  0xa3   : > { %v1578_v12 = vrot.slane %v1070_v27, 4  ;;  %v979_v19 = vsel %vm967_vm3, %v900_v23, %v837_v43  ;;  %3975 = vmatmul.mubr.msk.bf16.vlgmr.msra.gmra.mrb[0].mxu1 %vm1257_vm5, %v1066_v51  ;;  %4038 = vmatprep.mubr.msk.bf16.mxu0 %vm1257_vm5, %v1576_v13  ;;  %v903_v20 = vsel %vm882_vm2, %v6490_v11, %v724_v24  ;;  %v4339_v11 = vld [vmem:[%s6361_s1 + $0x18] sm:$0xff]  }
  0xa4   : > { %v1074_v30 = vshrl.u32 %v979_v19, 16  ;;  %v1077_v60 = vshll.u32 %v979_v19, 16  ;;  %4148 = vmatpush3.bf16.msra.mxu1 %v4336_v7  ;;  %v1072_v18 = vor.u32 %v1070_v27, %v1069_v38 }
  0xa5   : > { %v1579_v14 = vor.u32 %v1578_v12, %v1577_v5  ;;  %4085 = vmatpush3.bf16.msra.mxu0 %v4310_v45  ;;  %4143 = vmatprep.subr.bf16.mxu1 %v4337_v8  ;;  %v4338_v12 = vld [vmem:[%s6361_s1 + $0x10] sm:$0xff]  }
  0xa6   : > { %v1076_v37 = vrot.slane %v1074_v30, 7  ;;  %v1581_v49 = vrot.slane %v1074_v30, 3  ;;  %v1582_v22 = vrot.slane %v1077_v60, 4  ;;  %v726_v6 = vpop.permute.xlu1 %725  ;;  %4086 = vmatprep.subr.bf16.mxu0 %v4314_v63  ;;  %v839_v45 = vpop.permute.xlu0 %838  ;;  %v1073_v27 = vsel %vm1049_vm6, %v1062_v16, %v1072_v18 }
  0xa7   : > { %v5058_v44 = vsel %vm1555_vm4, %v1575_v15, %v1579_v14  ;;  %v981_v43 = vsel %vm967_vm3, %v903_v20, %v839_v45  ;;  %3978 = vmatprep.mubr.msk.bf16.mxu1 %vm1257_vm5, %v1073_v27  ;;  %v906_v40 = vsel %vm882_vm2, %v6491_v35, %v726_v6  ;;  %v4323_v6 = vld [vmem:[%s6361_s1 + $0x88] sm:$0xff]   ;;  %v6492_v20 = vcombine.low %v4536_v4, %v4553_v29 }
  0xa8   : > { %v1079_v17 = vor.u32 %v1077_v60, %v1076_v37  ;;  %v1583_v23 = vor.u32 %v1582_v22, %v1581_v49  ;;  %4039 = vmatmul.mubr.msk.bf16.gmra.mrb[4].mxu0 %vm1257_vm5, %v5058_v44  ;;  %v1081_v51 = vshrl.u32 %v981_v43, 16  ;;  %v1084_v13 = vshll.u32 %v981_v43, 16  ;;  %4149 = vmatpush3.bf16.msra.mxu1 %v4337_v8 }
  0xa9   : > { %4087 = vmatpush3.bf16.msra.mxu0 %v4314_v63  ;;  %4144 = vmatprep.subr.bf16.mxu1 %v4338_v12  ;;  %v4320_v63 = vld [vmem:[%s6361_s1 + $0x80] sm:$0xff]   ;;  %v6493_v4 = vcombine.low %v4556_v31, %v4570_v41 }
  0xaa   : > { %v841_v16 = vpop.permute.xlu1 %840  ;;  %v1080_v15 = vsel %vm1049_vm6, %v1069_v38, %v1079_v17  ;;  %v5070_v5 = vsel %vm1555_vm4, %v1579_v14, %v1583_v23  ;;  %4088 = vmatprep.subr.bf16.mxu0 %v4317_v26  ;;  %v1083_v19 = vrot.slane %v1081_v51, 7  ;;  %v1585_v46 = vrot.slane %v1081_v51, 3  ;;  %v728_v38 = vpop.permute.xlu0 %727 }
  0xab   : > { %v1586_v3 = vrot.slane %v1084_v13, 4  ;;  %v983_v24 = vsel %vm967_vm3, %v906_v40, %v841_v16  ;;  %3979 = vmatmul.mubr.msk.bf16.gmra.mrb[4].mxu1 %vm1257_vm5, %v1080_v15  ;;  %4042 = vmatprep.mubr.msk.bf16.mxu0 %vm1257_vm5, %v5070_v5  ;;  %v4340_v15 = vld [vmem:[%s6361_s1 + $0x20] sm:$0xff]  }
  0xac   : > { %v1088_v30 = vshrl.u32 %v983_v24, 16  ;;  %v1091_v60 = vshll.u32 %v983_v24, 16  ;;  %v1086_v7 = vor.u32 %v1084_v13, %v1083_v19  ;;  %4150 = vmatpush3.bf16.msra.mxu1 %v4338_v12 }
  0xad   : > { %v1587_v18 = vor.u32 %v1586_v3, %v1585_v46  ;;  %4089 = vmatpush3.bf16.msra.mxu0 %v4317_v26  ;;  %4145 = vmatprep.subr.bf16.mxu1 %v4339_v11  ;;  %v909_v26 = vsel %vm882_vm2, %v6492_v20, %v728_v38 }
  0xae   : > { %v1090_v14 = vrot.slane %v1088_v30, 7  ;;  %v1589_v8 = vrot.slane %v1088_v30, 3  ;;  %v1590_v49 = vrot.slane %v1091_v60, 4  ;;  %v730_v22 = vpop.permute.xlu1 %729  ;;  %4090 = vmatprep.subr.bf16.mxu0 %v4320_v63  ;;  %v843_v45 = vpop.permute.xlu0 %842  ;;  %v1087_v27 = vsel %vm1049_vm6, %v1076_v37, %v1086_v7 }
  0xaf   : > { %v5094_v17 = vsel %vm1555_vm4, %v1583_v23, %v1587_v18  ;;  %v985_v13 = vsel %vm967_vm3, %v909_v26, %v843_v45  ;;  %3982 = vmatprep.mubr.msk.bf16.mxu1 %vm1257_vm5, %v1087_v27  ;;  %v912_v29 = vsel %vm882_vm2, %v6493_v4, %v730_v22 }
  0xb0   : > { %v1093_v43 = vor.u32 %v1091_v60, %v1090_v14  ;;  %v1591_v51 = vor.u32 %v1590_v49, %v1589_v8  ;;  %4043 = vmatmul.mubr.msk.bf16.gmra.mrb[8].mxu0 %vm1257_vm5, %v5094_v17  ;;  %v1095_v35 = vshrl.u32 %v985_v13, 16  ;;  %v1098_v40 = vshll.u32 %v985_v13, 16  ;;  %4151 = vmatpush3.bf16.msra.mxu1 %v4339_v11  ;;  %v4341_v8 = vld [vmem:[%s6361_s1 + $0x28] sm:$0xff]  }
  0xb1   : > { %4091 = vmatpush3.bf16.msra.mxu0 %v4320_v63  ;;  %4146 = vmatprep.subr.bf16.mxu1 %v4340_v15  ;;  %v6494_v49 = vcombine.low %v4573_v42, %v4593_v53  ;;  %v6495_v42 = vcombine.low %v4596_v54, %v4602_v57 }
  0xb2   : > { %v845_v37 = vpop.permute.xlu1 %844  ;;  %v1094_v23 = vsel %vm1049_vm6, %v1083_v19, %v1093_v43  ;;  %v5106_v16 = vsel %vm1555_vm4, %v1587_v18, %v1591_v51  ;;  %4092 = vmatprep.subr.bf16.mxu0 %v4323_v6  ;;  %v1097_v12 = vrot.slane %v1095_v35, 7  ;;  %v1593_v63 = vrot.slane %v1095_v35, 3  ;;  %v732_v31 = vpop.permute.xlu0 %731 }
  0xb3   : > { %v1594_v46 = vrot.slane %v1098_v40, 4  ;;  %v987_v3 = vsel %vm967_vm3, %v912_v29, %v845_v37  ;;  %3983 = vmatmul.mubr.msk.bf16.gmra.mrb[8].mxu1 %vm1257_vm5, %v1094_v23  ;;  %4046 = vmatprep.mubr.msk.bf16.mxu0 %vm1257_vm5, %v5106_v16  ;;  %v915_v22 = vsel %vm882_vm2, %v6494_v49, %v732_v31 }
  0xb4   : > { %v1102_v41 = vshrl.u32 %v987_v3, 16  ;;  %v1105_v19 = vshll.u32 %v987_v3, 16  ;;  %v1100_v24 = vor.u32 %v1098_v40, %v1097_v12  ;;  %4152 = vmatpush3.bf16.msra.mxu1 %v4340_v15 }
  0xb5   : > { %v1595_v38 = vor.u32 %v1594_v46, %v1593_v63  ;;  %4093 = vmatpush3.bf16.msra.mxu0 %v4323_v6  ;;  %4147 = vmatprep.subr.bf16.mxu1 %v4341_v8 }
  0xb6   : > { %v1104_v30 = vrot.slane %v1102_v41, 7  ;;  %v1597_v60 = vrot.slane %v1102_v41, 3  ;;  %v1598_v7 = vrot.slane %v1105_v19, 4  ;;  %v734_v18 = vpop.permute.xlu1 %733  ;;  %v847_v11 = vpop.permute.xlu0 %846  ;;  %v1101_v20 = vsel %vm1049_vm6, %v1090_v14, %v1100_v24 }
  0xb7   : > { %v5124_v6 = vsel %vm1555_vm4, %v1591_v51, %v1595_v38  ;;  %v989_v27 = vsel %vm967_vm3, %v915_v22, %v847_v11  ;;  %3986 = vmatprep.mubr.msk.bf16.mxu1 %vm1257_vm5, %v1101_v20  ;;  %v918_v53 = vsel %vm882_vm2, %v6495_v42, %v734_v18  ;;  %v6496_v41 = vcombine.low %v4605_v59, %v4630_v32 }
  0xb8   : > { %v1107_v26 = vor.u32 %v1105_v19, %v1104_v30  ;;  %v1599_v45 = vor.u32 %v1598_v7, %v1597_v60  ;;  %4047 = vmatmul.mubr.msk.bf16.gmra.mrb[12].mxu0 %vm1257_vm5, %v5124_v6  ;;  %v1109_v43 = vshrl.u32 %v989_v27, 16  ;;  %v1112_v13 = vshll.u32 %v989_v27, 16  ;;  %4153 = vmatpush3.bf16.msra.mxu1 %v4341_v8 }
  0xb9   : > { %v6497_v59 = vcombine.low %v4633_v33, %v4637_v28 }
  0xba   : > { %v849_v14 = vpop.permute.xlu1 %848  ;;  %v1108_v51 = vsel %vm1049_vm6, %v1097_v12, %v1107_v26  ;;  %v5136_v35 = vsel %vm1555_vm4, %v1595_v38, %v1599_v45  ;;  %v1111_v40 = vrot.slane %v1109_v43, 7  ;;  %v1601_v4 = vrot.slane %v1109_v43, 3  ;;  %v736_v23 = vpop.permute.xlu0 %735 }
  0xbb   : > { %v1602_v29 = vrot.slane %v1112_v13, 4  ;;  %v991_v37 = vsel %vm967_vm3, %v918_v53, %v849_v14  ;;  %3987 = vmatmul.mubr.msk.bf16.gmra.mrb[12].mxu1 %vm1257_vm5, %v1108_v51  ;;  %4050 = vmatprep.mubr.msk.bf16.mxu0 %vm1257_vm5, %v5136_v35  ;;  %v921_v19 = vsel %vm882_vm2, %v6496_v41, %v736_v23 }
  0xbc   : > { %v1116_v54 = vshrl.u32 %v991_v37, 16  ;;  %v1119_v57 = vshll.u32 %v991_v37, 16  ;;  %v1114_v15 = vor.u32 %v1112_v13, %v1111_v40 }
  0xbd   : > { %v1603_v63 = vor.u32 %v1602_v29, %v1601_v4  ;;  %v6498_v29 = vcombine.low %v4640_v34, %v4655_v52  ;;  %v6499_v34 = vld [vmem:[#allocation14_spill] sm:$0xff] }
  0xbe   : > { %v1118_v46 = vrot.slane %v1116_v54, 7  ;;  %v1605_v12 = vrot.slane %v1116_v54, 3  ;;  %v1606_v3 = vrot.slane %v1119_v57, 4  ;;  %v738_v31 = vpop.permute.xlu1 %737  ;;  %v851_v24 = vpop.permute.xlu0 %850  ;;  %v1115_v38 = vsel %vm1049_vm6, %v1104_v30, %v1114_v15 }
  0xbf   : > { %v5148_v60 = vsel %vm1555_vm4, %v1599_v45, %v1603_v63  ;;  %v993_v8 = vsel %vm967_vm3, %v921_v19, %v851_v24  ;;  %3990 = vmatprep.mubr.msk.bf16.mxu1 %vm1257_vm5, %v1115_v38  ;;  %v924_v32 = vsel %vm882_vm2, %v6497_v59, %v738_v31  ;;  %v6500_v52 = vcombine.low %v4658_v55, %v6499_v34 }
  0xc0   : > { %v1121_v7 = vor.u32 %v1119_v57, %v1118_v46  ;;  %v1607_v18 = vor.u32 %v1606_v3, %v1605_v12  ;;  %4051 = vmatmul.mubr.msk.bf16.gmra.mrb[16].mxu0 %vm1257_vm5, %v5148_v60  ;;  %v1123_v49 = vshrl.u32 %v993_v8, 16  ;;  %v1126_v22 = vshll.u32 %v993_v8, 16 }
  0xc2   : > { %v853_v30 = vpop.permute.xlu1 %852  ;;  %v1122_v11 = vsel %vm1049_vm6, %v1111_v40, %v1121_v7  ;;  %v5160_v20 = vsel %vm1555_vm4, %v1603_v63, %v1607_v18  ;;  %v1125_v26 = vrot.slane %v1123_v49, 7  ;;  %v1609_v45 = vrot.slane %v1123_v49, 3  ;;  %v740_v13 = vpop.permute.xlu0 %739 }
  0xc3   : > { %v1610_v27 = vrot.slane %v1126_v22, 4  ;;  %v995_v43 = vsel %vm967_vm3, %v924_v32, %v853_v30  ;;  %3991 = vmatmul.mubr.msk.bf16.gmra.mrb[16].mxu1 %vm1257_vm5, %v1122_v11  ;;  %4054 = vmatprep.mubr.msk.bf16.mxu0 %vm1257_vm5, %v5160_v20  ;;  %v927_v37 = vsel %vm882_vm2, %v6498_v29, %v740_v13 }
  0xc4   : > { %v1130_v33 = vshrl.u32 %v995_v43, 16  ;;  %v1133_v28 = vshll.u32 %v995_v43, 16  ;;  %v1128_v42 = vor.u32 %v1126_v22, %v1125_v26 }
  0xc5   : > { %v1611_v53 = vor.u32 %v1610_v27, %v1609_v45  ;;  %v6502_v27 = vld [vmem:[#allocation18_spill] sm:$0xff] }
  0xc6   : > { %v1132_v14 = vrot.slane %v1130_v33, 7  ;;  %v1613_v51 = vrot.slane %v1130_v33, 3  ;;  %v1614_v40 = vrot.slane %v1133_v28, 4  ;;  %v742_v4 = vpop.permute.xlu1 %741  ;;  %v855_v23 = vpop.permute.xlu0 %854  ;;  %v1129_v54 = vsel %vm1049_vm6, %v1118_v46, %v1128_v42 }
  0xc7   : > { %v5172_v57 = vsel %vm1555_vm4, %v1607_v18, %v1611_v53  ;;  %v997_v12 = vsel %vm967_vm3, %v927_v37, %v855_v23  ;;  %3994 = vmatprep.mubr.msk.bf16.mxu1 %vm1257_vm5, %v1129_v54  ;;  %v930_v46 = vsel %vm882_vm2, %v6500_v52, %v742_v4 }
  0xc8   : > { %v1135_v15 = vor.u32 %v1133_v28, %v1132_v14  ;;  %v1615_v63 = vor.u32 %v1614_v40, %v1613_v51  ;;  %4055 = vmatmul.mubr.msk.bf16.gmra.mrb[20].mxu0 %vm1257_vm5, %v5172_v57  ;;  %v1137_v3 = vshrl.u32 %v997_v12, 16  ;;  %v1140_v31 = vshll.u32 %v997_v12, 16 }
  0xc9   : > { %4094 = vmatprep.mubr.msk.bf16.mxu0 %vm1257_vm5, %v5058_v44 }
  0xca   : > { %v857_v41 = vpop.permute.xlu1 %856  ;;  %v1136_v19 = vsel %vm1049_vm6, %v1125_v26, %v1135_v15  ;;  %v5186_v24 = vsel %vm1555_vm4, %v1611_v53, %v1615_v63  ;;  %v1139_v38 = vrot.slane %v1137_v3, 7  ;;  %v1617_v7 = vrot.slane %v1137_v3, 3  ;;  %v744_v49 = vpop.permute.xlu0 %743  ;;  %v6501_v26 = vld [vmem:[#allocation15_spill] sm:$0xff] }
  0xcb   : > { %v1618_v18 = vrot.slane %v1140_v31, 4  ;;  %v999_v8 = vsel %vm967_vm3, %v930_v46, %v857_v41  ;;  %3995 = vmatmul.mubr.msk.bf16.gmra.mrb[20].mxu1 %vm1257_vm5, %v1136_v19  ;;  %v6503_v43 = vcombine.low %v6501_v26, %v6502_v27 }
  0xcc   : > { %v1144_v44 = vshrl.u32 %v999_v8, 16  ;;  %v1147_v22 = vshll.u32 %v999_v8, 16  ;;  %v1142_v59 = vor.u32 %v1140_v31, %v1139_v38 }
  0xcd   : > { %v1619_v55 = vor.u32 %v1618_v18, %v1617_v7  ;;  %v933_v13 = vsel %vm882_vm2, %v6503_v43, %v744_v49 }
  0xce   : > { %v1146_v32 = vrot.slane %v1144_v44, 7  ;;  %v1621_v30 = vrot.slane %v1144_v44, 3  ;;  %v1622_v11 = vrot.slane %v1147_v22, 4  ;;  %v746_v45 = vpop.permute.xlu1 %745  ;;  %v859_v33 = vpop.permute.xlu0 %858  ;;  %v1143_v28 = vsel %vm1049_vm6, %v1132_v14, %v1142_v59 }
  0xcf   : > { %v5196_v42 = vsel %vm1555_vm4, %v1615_v63, %v1619_v55  ;;  %v1001_v40 = vsel %vm967_vm3, %v933_v13, %v859_v33  ;;  %3998 = vmatprep.mubr.msk.bf16.mxu1 %vm1257_vm5, %v1143_v28  ;;  %v6504_v14 = vcombine.low %v6452_v0, %v6451_v2 }
  0xd0   : > { %v1149_v53 = vor.u32 %v1147_v22, %v1146_v32  ;;  %v1623_v51 = vor.u32 %v1622_v11, %v1621_v30  ;;  %4095 = vmatmul.mubr.msk.bf16.vlgmr.msra.gmra.mrb[0].mxu0 %vm1257_vm5, %v5070_v5  ;;  %v1151_v4 = vshrl.u32 %v1001_v40, 16  ;;  %v1154_v29 = vshll.u32 %v1001_v40, 16 }
  0xd1   : > { %4098 = vmatprep.mubr.msk.bf16.mxu0 %vm1257_vm5, %v5094_v17  ;;  %v936_v37 = vsel %vm882_vm2, %v6504_v14, %v746_v45  ;;  %v6508_v45 = vld [vmem:[#allocation12_spill] sm:$0xff] }
  0xd2   : > { %v861_v23 = vpop.permute.xlu1 %860  ;;  %v1150_v54 = vsel %vm1049_vm6, %v1139_v38, %v1149_v53  ;;  %v5210_v15 = vsel %vm1555_vm4, %v1619_v55, %v1623_v51  ;;  %v1153_v63 = vrot.slane %v1151_v4, 7  ;;  %v1625_v12 = vrot.slane %v1151_v4, 3  ;;  %v748_v31 = vpop.permute.xlu0 %747  ;;  %v6505_v38 = vld [vmem:[#allocation10_spill] sm:$0xff] }
  0xd3   : > { %v1626_v3 = vrot.slane %v1154_v29, 4  ;;  %v1003_v5 = vsel %vm967_vm3, %v936_v37, %v861_v23  ;;  %3999 = vmatmul.mubr.msk.bf16.gmra.mrb[24].mxu1 %vm1257_vm5, %v1150_v54  ;;  %v6506_v7 = vcombine.low %v6454_v9, %v6505_v38  ;;  %v6507_v9 = vld [vmem:[#allocation11_spill] sm:$0xff] }
  0xd4   : > { %v1158_v17 = vshrl.u32 %v1003_v5, 16  ;;  %v1161_v34 = vshll.u32 %v1003_v5, 16  ;;  %v1156_v52 = vor.u32 %v1154_v29, %v1153_v63 }
  0xd5   : > { %v1627_v2 = vor.u32 %v1626_v3, %v1625_v12  ;;  %v939_v18 = vsel %vm882_vm2, %v6506_v7, %v748_v31 }
  0xd6   : > { %v1160_v0 = vrot.slane %v1158_v17, 7  ;;  %v1629_v46 = vrot.slane %v1158_v17, 3  ;;  %v1630_v41 = vrot.slane %v1161_v34, 4  ;;  %v750_v19 = vpop.permute.xlu1 %749  ;;  %v863_v8 = vpop.permute.xlu0 %862  ;;  %v1157_v49 = vsel %vm1049_vm6, %v1146_v32, %v1156_v52 }
  0xd7   : > { %v5220_v44 = vsel %vm1555_vm4, %v1623_v51, %v1627_v2  ;;  %v1005_v55 = vsel %vm967_vm3, %v939_v18, %v863_v8  ;;  %4002 = vmatprep.mubr.msk.bf16.mxu1 %vm1257_vm5, %v1157_v49  ;;  %v6509_v32 = vcombine.low %v6507_v9, %v6508_v45 }
  0xd8   : > { %v1163_v22 = vor.u32 %v1161_v34, %v1160_v0  ;;  %v1631_v59 = vor.u32 %v1630_v41, %v1629_v46  ;;  %4099 = vmatmul.mubr.msk.bf16.gmra.mrb[4].mxu0 %vm1257_vm5, %v5106_v16  ;;  %v1165_v30 = vshrl.u32 %v1005_v55, 16  ;;  %v1168_v11 = vshll.u32 %v1005_v55, 16 }
  0xd9   : > { %4102 = vmatprep.mubr.msk.bf16.mxu0 %vm1257_vm5, %v5124_v6  ;;  %v942_v26 = vsel %vm882_vm2, %v6509_v32, %v750_v19 }
  0xda   : > { %v865_v27 = vpop.permute.xlu1 %864  ;;  %v1164_v43 = vsel %vm1049_vm6, %v1153_v63, %v1163_v22  ;;  %v5234_v13 = vsel %vm1555_vm4, %v1627_v2, %v1631_v59  ;;  %v1167_v33 = vrot.slane %v1165_v30, 7  ;;  %v1633_v28 = vrot.slane %v1165_v30, 3  ;;  %v752_v51 = vpop.permute.xlu0 %751 }
  0xdb   : > { %v1634_v53 = vrot.slane %v1168_v11, 4  ;;  %v1007_v16 = vsel %vm967_vm3, %v942_v26, %v865_v27  ;;  %4003 = vmatmul.mubr.msk.bf16.gmra.mrb[28].mxu1 %vm1257_vm5, %v1164_v43  ;;  %v6510_v63 = vcombine.low %v6460_v58, %v6459_v56  ;;  %v6511_v56 = vcombine.low %v6463_v21, %v6462_v36 }
  0xdc   : > { %v1172_v6 = vshrl.u32 %v1007_v16, 16  ;;  %v1175_v40 = vshll.u32 %v1007_v16, 16  ;;  %v1170_v4 = vor.u32 %v1168_v11, %v1167_v33  ;;  %v6512_v11 = vld [vmem:[#allocation25_spill] sm:$0xff] }
  0xdd   : > { %v1635_v29 = vor.u32 %v1634_v53, %v1633_v28  ;;  %v945_v12 = vsel %vm882_vm2, %v6510_v63, %v752_v51  ;;  %v6513_v9 = vcombine.low %v6466_v10, %v6512_v11  ;;  %v6514_v10 = vcombine.low %v6469_v47, %v6468_v50 }
  0xde   : > { %v1174_v14 = vrot.slane %v1172_v6, 7  ;;  %v1637_v37 = vrot.slane %v1172_v6, 3  ;;  %v1638_v23 = vrot.slane %v1175_v40, 4  ;;  %v754_v54 = vpop.permute.xlu1 %753  ;;  %v867_v3 = vpop.permute.xlu0 %866  ;;  %v1171_v5 = vsel %vm1049_vm6, %v1160_v0, %v1170_v4 }
  0xdf   : > { %v5244_v31 = vsel %vm1555_vm4, %v1631_v59, %v1635_v29  ;;  %v1009_v52 = vsel %vm967_vm3, %v945_v12, %v867_v3  ;;  %4006 = vmatprep.mubr.msk.bf16.mxu1 %vm1257_vm5, %v1171_v5  ;;  %v948_v58 = vsel %vm882_vm2, %v6511_v56, %v754_v54 }
  0xe0   : > { %v1177_v17 = vor.u32 %v1175_v40, %v1174_v14  ;;  %v1639_v34 = vor.u32 %v1638_v23, %v1637_v37  ;;  %4103 = vmatmul.mubr.msk.bf16.gmra.mrb[8].mxu0 %vm1257_vm5, %v5136_v35  ;;  %v1179_v2 = vshrl.u32 %v1009_v52, 16  ;;  %v1182_v46 = vshll.u32 %v1009_v52, 16 }
  0xe1   : > { %4106 = vmatprep.mubr.msk.bf16.mxu0 %vm1257_vm5, %v5148_v60 }
  0xe2   : > { %v869_v0 = vpop.permute.xlu1 %868  ;;  %v1178_v41 = vsel %vm1049_vm6, %v1167_v33, %v1177_v17  ;;  %v5258_v19 = vsel %vm1555_vm4, %v1635_v29, %v1639_v34  ;;  %v1181_v38 = vrot.slane %v1179_v2, 7  ;;  %v1641_v7 = vrot.slane %v1179_v2, 3  ;;  %v756_v8 = vpop.permute.xlu0 %755 }
  0xe3   : > { %v1642_v18 = vrot.slane %v1182_v46, 4  ;;  %v1011_v35 = vsel %vm967_vm3, %v948_v58, %v869_v0  ;;  %4007 = vmatmul.mubr.msk.bf16.gmra.mrb[32].mxu1 %vm1257_vm5, %v1178_v41  ;;  %v951_v45 = vsel %vm882_vm2, %v6513_v9, %v756_v8  ;;  %v6515_v17 = vcombine.low %v6471_v1, %v4804_v48 }
  0xe4   : > { %v1186_v60 = vshrl.u32 %v1011_v35, 16  ;;  %v1189_v49 = vshll.u32 %v1011_v35, 16  ;;  %v1184_v22 = vor.u32 %v1182_v46, %v1181_v38  ;;  %v6516_v48 = vcombine.low %v6473_v61, %v4815_v62 }
  0xe5   : > { %v1643_v36 = vor.u32 %v1642_v18, %v1641_v7  ;;  %v6517_v61 = vcombine.low %v6476_v25, %v4839_v39 }
  0xe6   : > { %v1188_v21 = vrot.slane %v1186_v60, 7  ;;  %v1645_v59 = vrot.slane %v1186_v60, 3  ;;  %v1646_v55 = vrot.slane %v1189_v49, 4  ;;  %v758_v30 = vpop.permute.xlu1 %757  ;;  %v871_v32 = vpop.permute.xlu0 %870  ;;  %v1185_v26 = vsel %vm1049_vm6, %v1174_v14, %v1184_v22 }
  0xe7   : > { %v5268_v27 = vsel %vm1555_vm4, %v1639_v34, %v1643_v36  ;;  %v1013_v28 = vsel %vm967_vm3, %v951_v45, %v871_v32  ;;  %4010 = vmatprep.mubr.msk.bf16.mxu1 %vm1257_vm5, %v1185_v26  ;;  %v954_v51 = vsel %vm882_vm2, %v6514_v10, %v758_v30 }
  0xe8   : > { %v1191_v43 = vor.u32 %v1189_v49, %v1188_v21  ;;  %v1647_v33 = vor.u32 %v1646_v55, %v1645_v59  ;;  %4107 = vmatmul.mubr.msk.bf16.gmra.mrb[12].mxu0 %vm1257_vm5, %v5160_v20  ;;  %v1193_v53 = vshrl.u32 %v1013_v28, 16  ;;  %v1196_v16 = vshll.u32 %v1013_v28, 16 }
  0xe9   : > { %4110 = vmatprep.mubr.msk.bf16.mxu0 %vm1257_vm5, %v5172_v57 }
  0xea   : > { %v873_v6 = vpop.permute.xlu1 %872  ;;  %v1192_v40 = vsel %vm1049_vm6, %v1181_v38, %v1191_v43  ;;  %v5282_v4 = vsel %vm1555_vm4, %v1643_v36, %v1647_v33  ;;  %v1195_v29 = vrot.slane %v1193_v53, 7  ;;  %v1649_v14 = vrot.slane %v1193_v53, 3  ;;  %v760_v23 = vpop.permute.xlu0 %759 }
  0xeb   : > { %v1650_v37 = vrot.slane %v1196_v16, 4  ;;  %v1015_v20 = vsel %vm967_vm3, %v954_v51, %v873_v6  ;;  %4011 = vmatmul.mubr.msk.bf16.gmra.mrb[36].mxu1 %vm1257_vm5, %v1192_v40  ;;  %v957_v34 = vsel %vm882_vm2, %v6515_v17, %v760_v23 }
  0xec   : > { %v1200_v57 = vshrl.u32 %v1015_v20, 16  ;;  %v1203_v54 = vshll.u32 %v1015_v20, 16  ;;  %v1198_v63 = vor.u32 %v1196_v16, %v1195_v29 }
  0xed   : > { %v1651_v50 = vor.u32 %v1650_v37, %v1649_v14 }
  0xee   : > { %v1202_v47 = vrot.slane %v1200_v57, 7  ;;  %v1653_v12 = vrot.slane %v1200_v57, 3  ;;  %v1654_v3 = vrot.slane %v1203_v54, 4  ;;  %v762_v5 = vpop.permute.xlu1 %761  ;;  %v875_v52 = vpop.permute.xlu0 %874  ;;  %v1199_v2 = vsel %vm1049_vm6, %v1188_v21, %v1198_v63 }
  0xef   : > { %v5292_v46 = vsel %vm1555_vm4, %v1647_v33, %v1651_v50  ;;  %v1017_v0 = vsel %vm967_vm3, %v957_v34, %v875_v52  ;;  %4014 = vmatprep.mubr.msk.bf16.mxu1 %vm1257_vm5, %v1199_v2  ;;  %v960_v1 = vsel %vm882_vm2, %v6516_v48, %v762_v5 }
  0xf0   : > { %v1205_v56 = vor.u32 %v1203_v54, %v1202_v47  ;;  %v1655_v58 = vor.u32 %v1654_v3, %v1653_v12  ;;  %4111 = vmatmul.mubr.msk.bf16.gmra.mrb[16].mxu0 %vm1257_vm5, %v5186_v24  ;;  %v1207_v41 = vshrl.u32 %v1017_v0, 16  ;;  %v1210_v38 = vshll.u32 %v1017_v0, 16 }
  0xf1   : > { %4114 = vmatprep.mubr.msk.bf16.mxu0 %vm1257_vm5, %v5196_v42 }
  0xf2   : > { %v877_v7 = vpop.permute.xlu1 %876  ;;  %v1206_v18 = vsel %vm1049_vm6, %v1195_v29, %v1205_v56  ;;  %v5306_v35 = vsel %vm1555_vm4, %v1651_v50, %v1655_v58  ;;  %v1209_v8 = vrot.slane %v1207_v41, 7  ;;  %v1657_v60 = vrot.slane %v1207_v41, 3  ;;  %v764_v36 = vpop.permute.xlu0 %763 }
  0xf3   : > { %v1658_v49 = vrot.slane %v1210_v38, 4  ;;  %v1019_v22 = vsel %vm967_vm3, %v960_v1, %v877_v7  ;;  %4015 = vmatmul.mubr.msk.bf16.gmra.mrb[40].mxu1 %vm1257_vm5, %v1206_v18  ;;  %v963_v30 = vsel %vm882_vm2, %v6517_v61, %v764_v36 }
  0xf4   : > { %v1214_v21 = vshrl.u32 %v1019_v22, 16  ;;  %v1217_v59 = vshll.u32 %v1019_v22, 16  ;;  %v1212_v55 = vor.u32 %v1210_v38, %v1209_v8 }
  0xf5   : > { %v1659_v62 = vor.u32 %v1658_v49, %v1657_v60  ;;  %v5412_v60 = vld [vmem:[%s6362_s2] ss:$0 sm:$0xff] }
  0xf6   : > { %v1216_v11 = vrot.slane %v1214_v21, 7  ;;  %v2007_v9 = vrot.slane %v1214_v21, 3  ;;  %v2008_v45 = vrot.slane %v1217_v59, 4  ;;  %v879_v32 = vpop.permute.xlu0 %878  ;;  %v1213_v26 = vsel %vm1049_vm6, %v1202_v47, %v1212_v55 }
  0xf7   : > { %v1660_v43 = vsel %vm1555_vm4, %v1655_v58, %v1659_v62  ;;  %v1021_v53 = vsel %vm967_vm3, %v963_v30, %v879_v32  ;;  %4018 = vmatprep.mubr.msk.bf16.mxu1 %vm1257_vm5, %v1213_v26 }
  0xf8   : > { %v1219_v33 = vor.u32 %v1217_v59, %v1216_v11  ;;  %v2009_v28 = vor.u32 %v2008_v45, %v2007_v9  ;;  %4115 = vmatmul.mubr.msk.bf16.gmra.mrb[20].mxu0 %vm1257_vm5, %v5210_v15  ;;  %v2011_v39 = vshrl.u32 %v1021_v53, 16  ;;  %v2014_v25 = vshll.u32 %v1021_v53, 16 }
  0xf9   : > { %4118 = vmatprep.mubr.msk.bf16.mxu0 %vm1257_vm5, %v5220_v44 }
  0xfa   : > { %v1220_v16 = vsel %vm1049_vm6, %v1209_v8, %v1219_v33  ;;  %v2010_v10 = vsel %vm1555_vm4, %v1659_v62, %v2009_v28  ;;  %v2013_v51 = vrot.slane %v2011_v39, 3  ;;  %v2016_v6 = vrot.slane %v2014_v25, 4 }
  0xfb   : > { %4019 = vmatmul.mubr.msk.bf16.gmra.mrb[44].mxu1 %vm1257_vm5, %v1220_v16 }
  0xfc   : > { %4058 = vmatprep.mubr.msk.bf16.mxu1 %vm1257_vm5, %v5186_v24  ;;  %v2017_v40 = vor.u32 %v2016_v6, %v2013_v51  ;;  %v766_v24 = vpop.permute.xlu1 %765 }
  0xfe   : > { %v2018_v29 = vsel %vm1555_vm4, %v2009_v28, %v2017_v40 }
 0x100   : > { %4119 = vmatmul.mubr.msk.bf16.gmra.mrb[24].mxu0 %vm1257_vm5, %v5234_v13  ;;  %v881_v14 = vpop.permute.xlu1 %880 }
 0x101   : > { %4122 = vmatprep.mubr.msk.bf16.mxu0 %vm1257_vm5, %v5244_v31 }
 0x103   : > { %4059 = vmatmul.mubr.msk.bf16.vlgmr.msra.gmra.mrb[24].mxu1 %vm1257_vm5, %v5196_v42  ;;  %v4342_v42 = vld [vmem:[%s4418_s8 + $0xd8] sm:$0xf] }
 0x104   : > { %4062 = vmatprep.mubr.msk.bf16.mxu1 %vm1257_vm5, %v5210_v15  ;;  %v3628_v15 = vcombine.low %v4342_v42, %v4342_v42 }
 0x108   : > { %4123 = vmatmul.mubr.msk.bf16.gmra.mrb[28].mxu0 %vm1257_vm5, %v5258_v19 }
 0x109   : > { %4126 = vmatprep.mubr.msk.bf16.mxu0 %vm1257_vm5, %v5268_v27 }
 0x10b   : > { %4063 = vmatmul.mubr.msk.bf16.gmra.mrb[28].mxu1 %vm1257_vm5, %v5220_v44  ;;  %v966_v44 = vsel %vm882_vm2, %v3628_v15, %v766_v24 }
 0x10c   : > { %4066 = vmatprep.mubr.msk.bf16.mxu1 %vm1257_vm5, %v5234_v13  ;;  %v1023_v13 = vsel %vm967_vm3, %v966_v44, %v881_v14 }
 0x10d   : > { %v2019_v37 = vshrl.u32 %v1023_v13, 16  ;;  %v2022_v20 = vshll.u32 %v1023_v13, 16 }
 0x110   : > { %4127 = vmatmul.mubr.msk.bf16.gmra.mrb[32].mxu0 %vm1257_vm5, %v5282_v4 }
 0x111   : > { %4130 = vmatprep.mubr.msk.bf16.mxu0 %vm1257_vm5, %v5292_v46 }
 0x113   : > { %4067 = vmatmul.mubr.msk.bf16.gmra.mrb[32].mxu1 %vm1257_vm5, %v5244_v31  ;;  %v2021_v31 = vrot.slane %v2019_v37, 3 }
 0x114   : > { %4070 = vmatprep.mubr.msk.bf16.mxu1 %vm1257_vm5, %v5258_v19  ;;  %v2024_v19 = vrot.slane %v2022_v20, 4 }
 0x116   : > { %v2025_v23 = vor.u32 %v2024_v19, %v2021_v31 }
 0x118   : > { %4131 = vmatmul.mubr.msk.bf16.gmra.mrb[36].mxu0 %vm1257_vm5, %v5306_v35 }
 0x119   : > { %4134 = vmatprep.mubr.msk.bf16.mxu0 %vm1257_vm5, %v1660_v43 }
 0x11b   : > { %4071 = vmatmul.mubr.msk.bf16.gmra.mrb[36].mxu1 %vm1257_vm5, %v5268_v27  ;;  %v2026_v27 = vsel %vm1555_vm4, %v2017_v40, %v2025_v23 }
 0x11c   : > { %4074 = vmatprep.mubr.msk.bf16.mxu1 %vm1257_vm5, %v5282_v4 }
 0x120   : > { %4135 = vmatmul.mubr.msk.bf16.gmra.mrb[40].mxu0 %vm1257_vm5, %v2010_v10 }
 0x121   : > { %4138 = vmatprep.mubr.msk.bf16.mxu0 %vm1257_vm5, %v2018_v29 }
 0x123   : > { %4075 = vmatmul.mubr.msk.bf16.gmra.mrb[40].mxu1 %vm1257_vm5, %v5292_v46 }
 0x124   : > { %4078 = vmatprep.mubr.msk.bf16.mxu1 %vm1257_vm5, %v5306_v35 }
 0x128   : > { %4139 = vmatmul.mubr.msk.bf16.gmra.mrb[44].mxu0 %vm1257_vm5, %v2026_v27 }
 0x12b   : > { %4079 = vmatmul.mubr.msk.bf16.gmra.mrb[44].mxu1 %vm1257_vm5, %v1660_v43 }
 0x176   : > { %v3976_v4 = vpop.f32.mrb[0].mxu1 }
 0x177   : > { %v1364_v57 = vpop.f32.mrb[1].mxu1 }
 0x178   : > { %v3977_v54 = vpop.f32.mrb[2].mxu1 }
 0x179   : > { %v1367_v63 = vpop.f32.mrb[3].mxu1 }
 0x17e   : > { %v3980_v50 = vpop.f32.mrb[4].mxu1 }
 0x17f   : > { %v5371_v47 = vpop.f32.mrb[5].mxu1 }
 0x180   : > { %v5373_v12 = vpop.f32.mrb[6].mxu1 }
 0x181   : > { %v5375_v3 = vpop.f32.mrb[7].mxu1 }
 0x186   : > { %v5377_v5 = vpop.f32.mrb[8].mxu1 }
 0x187   : > { %v5379_v17 = vpop.f32.mrb[9].mxu1 }
 0x188   : > { %v5381_v34 = vpop.f32.mrb[10].mxu1 }
 0x189   : > { %v5383_v52 = vpop.f32.mrb[11].mxu1 }
 0x18e   : > { %v5385_v2 = vpop.f32.mrb[12].mxu1 }
 0x18f   : > { %v5387_v46 = vpop.f32.mrb[13].mxu1 }
 0x190   : > { %v5389_v56 = vpop.f32.mrb[14].mxu1 }
 0x191   : > { %v5391_v58 = vpop.f32.mrb[15].mxu1 }
 0x196   : > { %v5393_v0 = vpop.f32.mrb[16].mxu1 }
 0x197   : > { %v5395_v41 = vpop.f32.mrb[17].mxu1 }
 0x198   : > { %v5397_v38 = vpop.f32.mrb[18].mxu1 }
 0x199   : > { %v5399_v48 = vpop.f32.mrb[19].mxu1 }
 0x19e   : > { %v5401_v1 = vpop.f32.mrb[20].mxu1 }
 0x19f   : > { %v5403_v7 = vpop.f32.mrb[21].mxu1 }
 0x1a0   : > { %v5405_v18 = vpop.f32.mrb[22].mxu1 }
 0x1a1   : > { %v5407_v35 = vpop.f32.mrb[23].mxu1 }
 0x1a3   : > { %v4096_v8 = vpop.f32.mrb[0].mxu0 }
 0x1a4   : > { %v4154_v49 = vadd.f32 %v4096_v8, %v3976_v4  ;;  %v2106_v22 = vpop.f32.mrb[1].mxu0 }
 0x1a5   : > { %v4155_v36 = vadd.f32 %v2106_v22, %v1364_v57  ;;  %v4097_v21 = vpop.f32.mrb[2].mxu0 }
 0x1a6   : > { %v2354_v59 = vadd.f32 %v4154_v49, %v5412_v60  ;;  %v4156_v55 = vadd.f32 %v4097_v21, %v3977_v54  ;;  %v2109_v62 = vpop.f32.mrb[3].mxu0 }
 0x1a7   : > { %v2352_v61 = vadd.f32 %v4155_v36, %v5412_v60  ;;  %v4157_v30 = vadd.f32 %v2109_v62, %v1367_v63 }
 0x1a8   : > { %v3826_v11 = vpack.c.bf16 %v2354_v59, %v2354_v59  ;;  %v5417_v9 = vadd.f32 %v4156_v55, %v5412_v60  ;;  %v3191_v43 = vrot.slane %v2354_v59, 1 }
 0x1a9   : > { %v3824_v45 = vpack.c.bf16 %v2352_v61, %v2352_v61  ;;  %v2353_v32 = vadd.f32 %v4157_v30, %v5412_v60  ;;  %v3188_v10 = vrot.slane %v2352_v61, 1 }
 0x1aa   : > { %v5420_v26 = vshll.u32 %v3826_v11, 16  ;;  %v3827_v33 = vpack.c.bf16 %v5417_v9, %v5417_v9  ;;  %v3193_v6 = vrot.slane %v5417_v9, 1 }
 0x1ab   : > { %v2563_v28 = vshrl.u32 %v3824_v45, 16  ;;  %v2566_v53 = vshll.u32 %v3824_v45, 16  ;;  %v3825_v39 = vpack.c.bf16 %v2353_v32, %v2353_v32  ;;  %v3189_v25 = vrot.slane %v2353_v32, 1  ;;  %v4100_v16 = vpop.f32.mrb[4].mxu0 }
 0x1ac   : > { %v2587_v51 = vshrl.u32 %v3827_v33, 16  ;;  %v4158_v40 = vadd.f32 %v4100_v16, %v3980_v50  ;;  %v2122_v29 = vpop.f32.mrb[5].mxu0  ;;  %v2584_v13 = vrot.slane %v5420_v26, 5  ;;  %v2590_v37 = vshll.u32 %v3827_v33, 16 }
 0x1ad   : > { %v2565_v24 = vrot.slane %v2563_v28, 4  ;;  %v2568_v42 = vrot.slane %v2566_v53, 5  ;;  %v2572_v15 = vshll.u32 %v3825_v39, 16  ;;  %v2576_v44 = vshrl.u32 %v3825_v39, 16  ;;  %v4101_v14 = vpop.f32.mrb[6].mxu0 }
 0x1ae   : > { %v3190_v20 = vsel %vm3187_vm7, %v3188_v10, %v3189_v25  ;;  %v3192_v31 = vsel %vm3187_vm7, %v3189_v25, %v3191_v43  ;;  %v2125_v19 = vpop.f32.mrb[7].mxu0  ;;  %v5428_v23 = vrot.slane %v2587_v51, 4  ;;  %v2358_v57 = vadd.f32 %v4158_v40, %v5412_v60 }
 0x1af   : > { %v3300_v27 = vsel %vm882_vm2, %v3190_v20, 0.0  ;;  %v3301_v4 = vsel %vm882_vm2, %v3192_v31, 0.0  ;;  %v4159_v63 = vadd.f32 %v2122_v29, %v5371_v47  ;;  %v4160_v50 = vadd.f32 %v4101_v14, %v5373_v12 }
 0x1b0   : > { %v3302_v54 = vadd.f32 %v3301_v4, %v3300_v27  ;;  %v4161_v8 = vadd.f32 %v2125_v19, %v5375_v3  ;;  %v2578_v49 = vrot.slane %v2576_v44, 4  ;;  %v3830_v22 = vpack.c.bf16 %v2358_v57, %v2358_v57 }
 0x1b1   : > { %v2569_v36 = vor.u32 %v2568_v42, %v2565_v24  ;;  %v2574_v21 = vrot.slane %v2572_v15, 5  ;;  %v2356_v55 = vadd.f32 %v4159_v63, %v5412_v60  ;;  %v5438_v62 = vadd.f32 %v4160_v50, %v5412_v60 }
 0x1b2   : > { %v3303_v59 = vrot.slane %v3302_v54, 4  ;;  %v2357_v61 = vadd.f32 %v4161_v8, %v5412_v60  ;;  %v5441_v30 = vrot.slane %v2590_v37, 5  ;;  %v2611_v47 = vshrl.u32 %v3830_v22, 16 }
 0x1b3   : > { %v2614_v11 = vshll.u32 %v3830_v22, 16  ;;  %v3198_v12 = vrot.slane %v2358_v57, 1  ;;  %v4104_v9 = vpop.f32.mrb[8].mxu0  ;;  %v5443_v45 = vpack.c.bf16 %v2356_v55, %v2356_v55  ;;  %v3194_v32 = vrot.slane %v2356_v55, 1 }
 0x1b4   : > { %v3304_v3 = vadd.f32 %v3303_v59, %v3302_v54  ;;  %v5447_v43 = vpack.c.bf16 %v5438_v62, %v5438_v62  ;;  %v2138_v33 = vpop.f32.mrb[9].mxu0  ;;  %v5450_v28 = vrot.slane %v2611_v47, 4  ;;  %v3199_v53 = vrot.slane %v5438_v62, 1 }
 0x1b5   : > { %v2570_v39 = vrot.slane %v2569_v36, 4  ;;  %v4105_v25 = vpop.f32.mrb[10].mxu0  ;;  %v2579_v16 = vor.u32 %v2578_v49, %v2574_v21  ;;  %v2600_v51 = vshrl.u32 %v5443_v45, 16  ;;  %v3195_v40 = vsel %vm3187_vm7, %v3193_v6, %v3194_v32 }
 0x1b6   : > { %v3305_v10 = vrot.slane %v3304_v3, 2  ;;  %v3829_v29 = vpack.c.bf16 %v2357_v61, %v2357_v61  ;;  %v2141_v42 = vpop.f32.mrb[11].mxu0  ;;  %v5461_v15 = vrot.slane %v2614_v11, 5  ;;  %v2596_v44 = vshll.u32 %v5443_v45, 16 }
 0x1b7   : > { %v3309_v14 = vsel %vm882_vm2, %v3195_v40, 0.0  ;;  %v3200_v37 = vsel %vm3187_vm7, %v3198_v12, %v3199_v53  ;;  %v5473_v20 = vrot.slane %v2600_v51, 4  ;;  %v2620_v31 = vshll.u32 %v5447_v43, 16 }
 0x1b8   : > { %v3306_v6 = vadd.f32 %v3305_v10, %v3304_v3  ;;  %v2624_v19 = vshrl.u32 %v5447_v43, 16  ;;  %v3318_v27 = vsel %vm882_vm2, %v3200_v37, 0.0  ;;  %v3196_v4 = vrot.slane %v2357_v61, 1 }
 0x1b9   : > { %v4162_v57 = vadd.f32 %v4104_v9, %v5377_v5  ;;  %v2575_v54 = vsel %vm5457_vm10, %v2570_v39, %v2574_v21  ;;  %v5481_v50 = vshll.u32 %v3829_v29, 16  ;;  %v4163_v8 = vadd.f32 %v2138_v33, %v5379_v17 }
 0x1ba   : > { %v3307_v63 = vrot.slane %v3306_v6, 1  ;;  %3011 = vrot.lane.b32.xlu0 %v2575_v54, %s4354_s10  ;;  %2979 = vst.msk [vmem:[%s5471_s9] sm:$0xf] %vm2978_vm9, %v2575_v54  ;;  %v4164_v49 = vadd.f32 %v4105_v25, %v5381_v34  ;;  %v3197_v22 = vsel %vm3187_vm7, %v3194_v32, %v3196_v4  ;;  %v2580_v5 = vrot.slane %v2579_v16, 4 }
 0x1bb   : > { %v2362_v36 = vadd.f32 %v4162_v57, %v5412_v60  ;;  %v4165_v59 = vadd.f32 %v2141_v42, %v5383_v52  ;;  %v4108_v21 = vpop.f32.mrb[12].mxu0  ;;  %v3310_v62 = vsel %vm882_vm2, %v3197_v22, 0.0  ;;  %v2360_v61 = vadd.f32 %v4163_v8, %v5412_v60 }
 0x1bc   : > { %v3308_v55 = vadd.f32 %v3307_v63, %v3306_v6  ;;  %v2363_v47 = vadd.f32 %v4164_v49, %v5412_v60  ;;  %v5494_v11 = vpop.f32.mrb[13].mxu0  ;;  %v5496_v17 = vrot.slane %v2624_v19, 4  ;;  %v3311_v34 = vadd.f32 %v3310_v62, %v3309_v14 }
 0x1bd   : > { %v3834_v12 = vpack.c.bf16 %v2362_v36, %v2362_v36  ;;  %v2585_v52 = vsel %vm5457_vm10, %v2580_v5, %v2584_v13  ;;  %v5502_v9 = vpop.f32.mrb[14].mxu0  ;;  %v2608_v3 = vrot.slane %v5481_v50, 5  ;;  %v3832_v32 = vpack.c.bf16 %v2360_v61, %v2360_v61 }
 0x1be   : > { %v3201_v33 = vrot.slane %v2360_v61, 1  ;;  %v3835_v39 = vpack.c.bf16 %v2363_v47, %v2363_v47  ;;  %3013 = vrot.lane.b32.xlu1 %v2585_v52, %s4354_s10  ;;  %2980 = vst.msk [vmem:[%s5471_s9 + $0x4] sm:$0xf] %vm2978_vm9, %v2585_v52  ;;  %v5508_v25 = vpop.f32.mrb[15].mxu0  ;;  %v3312_v16 = vrot.slane %v3311_v34, 4  ;;  %v3206_v26 = vrot.slane %v2363_v47, 1 }
 0x1bf   : > { %v2644_v10 = vshll.u32 %v3834_v12, 16  ;;  %v2648_v51 = vshrl.u32 %v3834_v12, 16  ;;  %v3444_v40 = vsel %vm882_vm2, %v3308_v55, 0.0  ;;  %v3204_v13 = vrot.slane %v2362_v36, 1 }
 0x1c0   : > { %v3202_v29 = vsel %vm3187_vm7, %v3199_v53, %v3201_v33  ;;  %v2361_v42 = vadd.f32 %v4165_v59, %v5412_v60  ;;  %v3313_v14 = vadd.f32 %v3312_v16, %v3311_v34  ;;  %v5513_v37 = vshll.u32 %v3832_v32, 16 }
 0x1c1   : > { %v3319_v6 = vsel %vm882_vm2, %v3202_v29, 0.0  ;;  %v5516_v19 = vshll.u32 %v3835_v39, 16  ;;  %v5518_v4 = vrot.slane %v2644_v10, 5  ;;  %v5520_v57 = vrot.slane %v2648_v51, 4 }
 0x1c2   : > { %v3320_v54 = vadd.f32 %v3319_v6, %v3318_v27  ;;  %v3207_v63 = vsel %vm3187_vm7, %v3204_v13, %v3206_v26  ;;  %v3314_v8 = vrot.slane %v3313_v14, 2  ;;  %v3833_v53 = vpack.c.bf16 %v2361_v42, %v2361_v42 }
 0x1c3   : > { %v3328_v49 = vsel %vm882_vm2, %v3207_v63, 0.0  ;;  %v3203_v22 = vrot.slane %v2361_v42, 1  ;;  %v5524_v36 = vpop.f32.mrb[16].mxu0  ;;  %v2593_v59 = vor.u32 %v5441_v30, %v5428_v23  ;;  %v2598_v55 = vrot.slane %v2596_v44, 5 }
 0x1c4   : > { %v3321_v5 = vrot.slane %v3320_v54, 4  ;;  %v4166_v62 = vadd.f32 %v4108_v21, %v5385_v2  ;;  %v5531_v61 = vpop.f32.mrb[17].mxu0  ;;  %v3315_v27 = vadd.f32 %v3314_v8, %v3313_v14  ;;  %v2635_v47 = vshrl.u32 %v3833_v53, 16 }
 0x1c5   : > { %v2638_v34 = vshll.u32 %v3833_v53, 16  ;;  %v3205_v12 = vsel %vm3187_vm7, %v3203_v22, %v3204_v13  ;;  %v5534_v52 = vpop.f32.mrb[18].mxu0  ;;  %v2594_v39 = vrot.slane %v2593_v59, 4  ;;  %v2632_v45 = vrot.slane %v5513_v37, 5 }
 0x1c6   : > { %v3322_v32 = vadd.f32 %v3321_v5, %v3320_v54  ;;  %v3327_v33 = vsel %vm882_vm2, %v3205_v12, 0.0  ;;  %v5538_v23 = vadd.f32 %v4166_v62, %v5412_v60  ;;  %v5540_v30 = vpop.f32.mrb[19].mxu0  ;;  %v3316_v2 = vrot.slane %v3315_v27, 1 }
 0x1c7   : > { %v2656_v44 = vrot.slane %v5516_v19, 5  ;;  %v3329_v21 = vadd.f32 %v3328_v49, %v3327_v33  ;;  %v5544_v10 = vrot.slane %v2635_v47, 4  ;;  %v2599_v51 = vsel %vm5457_vm10, %v2594_v39, %v2598_v55 }
 0x1c8   : > { %v3323_v16 = vrot.slane %v3322_v32, 2  ;;  %v3838_v26 = vpack.c.bf16 %v5538_v23, %v5538_v23  ;;  %v3317_v13 = vadd.f32 %v3316_v2, %v3315_v27  ;;  %v5550_v29 = vrot.slane %v2638_v34, 5  ;;  %3015 = vrot.lane.b32.xlu0 %v2599_v51, %s4354_s10  ;;  %2981 = vst.msk [vmem:[%s5471_s9 + $0x8] sm:$0xf] %vm2978_vm9, %v2599_v51 }
 0x1c9   : > { %v3330_v42 = vrot.slane %v3329_v21, 4  ;;  %v2617_v14 = vor.u32 %v5461_v15, %v5450_v28  ;;  %v2622_v6 = vrot.slane %v2620_v31, 5  ;;  %v2603_v54 = vor.u32 %v5473_v20, %v2598_v55 }
 0x1ca   : > { %v3324_v37 = vadd.f32 %v3323_v16, %v3322_v32  ;;  %v4167_v63 = vadd.f32 %v5494_v11, %v5387_v46  ;;  %v3445_v8 = vsel %vm882_vm2, %v3317_v13, 0.0  ;;  %v4168_v22 = vadd.f32 %v5502_v9, %v5389_v56 }
 0x1cb   : > { %v3331_v49 = vadd.f32 %v3330_v42, %v3329_v21  ;;  %v2618_v53 = vrot.slane %v2617_v14, 4  ;;  %v5565_v5 = vpop.f32.mrb[20].mxu0  ;;  %v3446_v28 = vadd.f32 %v3445_v8, %v3444_v40  ;;  %v5567_v59 = vshll.u32 %v3838_v26, 16 }
 0x1cc   : > { %v3325_v15 = vrot.slane %v3324_v37, 1  ;;  %v2604_v43 = vrot.slane %v2603_v54, 4  ;;  %v5569_v31 = vpop.f32.mrb[21].mxu0  ;;  %v2364_v11 = vadd.f32 %v4167_v63, %v5412_v60  ;;  %v5575_v55 = vadd.f32 %v4168_v22, %v5412_v60 }
 0x1cd   : > { %v3332_v20 = vrot.slane %v3331_v49, 2  ;;  %v2623_v46 = vsel %vm5457_vm10, %v2618_v53, %v2622_v6  ;;  %v5577_v56 = vpop.f32.mrb[22].mxu0  ;;  %v4169_v62 = vadd.f32 %v5508_v25, %v5391_v58  ;;  %v2627_v27 = vor.u32 %v5496_v17, %v2622_v6 }
 0x1ce   : > { %v3326_v9 = vadd.f32 %v3325_v15, %v3324_v37  ;;  %3019 = vrot.lane.b32.xlu0 %v2623_v46, %s4354_s10  ;;  %2983 = vst.msk [vmem:[%s5471_s9 + $0x10] sm:$0xf] %vm2978_vm9, %v2623_v46  ;;  %v2609_v40 = vsel %vm5457_vm10, %v2604_v43, %v2608_v3  ;;  %v5589_v47 = vpop.f32.mrb[23].mxu0  ;;  %v3211_v12 = vrot.slane %v5538_v23, 1  ;;  %v3836_v32 = vpack.c.bf16 %v2364_v11, %v2364_v11 }
 0x1cf   : > { %v3333_v34 = vadd.f32 %v3332_v20, %v3331_v49  ;;  %3017 = vrot.lane.b32.xlu1 %v2609_v40, %s4354_s10  ;;  %2982 = vst.msk [vmem:[%s5471_s9 + $0xc] sm:$0xf] %vm2978_vm9, %v2609_v40  ;;  %v3839_v50 = vpack.c.bf16 %v5575_v55, %v5575_v55  ;;  %v2680_v33 = vrot.slane %v5567_v59, 5  ;;  %v2365_v58 = vadd.f32 %v4169_v62, %v5412_v60 }
 0x1d0   : > { %v3447_v3 = vsel %vm882_vm2, %v3326_v9, 0.0  ;;  %v2628_v17 = vrot.slane %v2627_v27, 4  ;;  %v2659_v2 = vshrl.u32 %v3836_v32, 16  ;;  %v2662_v23 = vshll.u32 %v3836_v32, 16 }
 0x1d1   : > { %v3448_v25 = vadd.f32 %v3447_v3, %v3446_v28  ;;  %v3334_v39 = vrot.slane %v3333_v34, 1  ;;  %v2683_v21 = vshrl.u32 %v3839_v50, 16  ;;  %v2686_v16 = vshll.u32 %v3839_v50, 16 }
 0x1d2   : > { %v5600_v51 = vpack.c.bf16 %v2365_v58, %v2365_v58  ;;  %v3209_v26 = vrot.slane %v2365_v58, 1  ;;  %v3208_v42 = vrot.slane %v2364_v11, 1  ;;  %v3213_v14 = vrot.slane %v5575_v55, 1 }
 0x1d3   : > { %v3335_v13 = vadd.f32 %v3334_v39, %v3333_v34  ;;  %v2633_v37 = vsel %vm5457_vm10, %v2628_v17, %v2632_v45  ;;  %v5605_v6 = vpop.f32.mrb[24].mxu0  ;;  %v5607_v54 = vrot.slane %v2659_v2, 4  ;;  %v5609_v63 = vrot.slane %v2662_v23, 5 }
 0x1d4   : > { %v5611_v8 = vrot.slane %v2683_v21, 4  ;;  %v5613_v49 = vrot.slane %v2686_v16, 5  ;;  %3021 = vrot.lane.b32.xlu1 %v2633_v37, %s4354_s10  ;;  %2984 = vst.msk [vmem:[%s5471_s9 + $0x14] sm:$0xf] %vm2978_vm9, %v2633_v37  ;;  %v5618_v53 = vpop.f32.mrb[25].mxu0  ;;  %v3210_v45 = vsel %vm3187_vm7, %v3208_v42, %v3209_v26  ;;  %v3212_v28 = vsel %vm3187_vm7, %v3209_v26, %v3211_v12 }
 0x1d5   : > { %v3449_v22 = vsel %vm882_vm2, %v3335_v13, 0.0  ;;  %v4170_v15 = vadd.f32 %v5524_v36, %v5393_v0  ;;  %v5625_v43 = vpop.f32.mrb[26].mxu0  ;;  %v2668_v46 = vshll.u32 %v5600_v51, 16  ;;  %v3336_v11 = vsel %vm882_vm2, %v3210_v45, 0.0 }
 0x1d6   : > { %v5627_v20 = vadd.f32 %v3449_v22, %v3448_v25  ;;  %v3337_v55 = vsel %vm882_vm2, %v3212_v28, 0.0  ;;  %v5632_v9 = vpop.f32.mrb[24].mxu1  ;;  %v5634_v40 = vpop.f32.mrb[27].mxu0  ;;  %v2651_v0 = vor.u32 %v5520_v57, %v5518_v4  ;;  %v4171_v36 = vadd.f32 %v5531_v61, %v5395_v41 }
 0x1d7   : > { %v3338_v62 = vadd.f32 %v3337_v55, %v3336_v11  ;;  %v2370_v27 = vadd.f32 %v4170_v15, %v5412_v60  ;;  %v5641_v34 = vpop.f32.mrb[25].mxu1  ;;  %v4172_v12 = vadd.f32 %v5534_v52, %v5397_v38  ;;  %v2641_v32 = vor.u32 %v5550_v29, %v5544_v10 }
 0x1d8   : > { %v4173_v50 = vadd.f32 %v5540_v30, %v5399_v48  ;;  %v4174_v3 = vadd.f32 %v5565_v5, %v5401_v1  ;;  %v5651_v58 = vpop.f32.mrb[26].mxu1  ;;  %v2672_v57 = vshrl.u32 %v5600_v51, 16  ;;  %v2652_v17 = vrot.slane %v2651_v0, 4 }
 0x1d9   : > { %v3339_v41 = vrot.slane %v3338_v62, 4  ;;  %v3842_v61 = vpack.c.bf16 %v2370_v27, %v2370_v27  ;;  %v5654_v25 = vpop.f32.mrb[27].mxu1  ;;  %v2368_v38 = vadd.f32 %v4171_v36, %v5412_v60  ;;  %v5658_v52 = vadd.f32 %v4172_v12, %v5412_v60 }
 0x1da   : > { %v2642_v10 = vrot.slane %v2641_v32, 4  ;;  %v2369_v48 = vadd.f32 %v4173_v50, %v5412_v60  ;;  %v2657_v5 = vsel %vm5457_vm10, %v2652_v17, %v2656_v44  ;;  %v5679_v26 = vrot.slane %v2672_v57, 4 }
 0x1db   : > { %v3340_v30 = vadd.f32 %v3339_v41, %v3338_v62  ;;  %v2707_v1 = vshrl.u32 %v3842_v61, 16  ;;  %v2710_v29 = vshll.u32 %v3842_v61, 16  ;;  %v5665_v39 = vpop.f32.mrb[28].mxu0  ;;  %3025 = vrot.lane.b32.xlu1 %v2657_v5, %s4354_s10  ;;  %2986 = vst.msk [vmem:[%s5471_s9 + $0x1c] sm:$0xf] %vm2978_vm9, %v2657_v5  ;;  %v5670_v2 = vpack.c.bf16 %v2368_v38, %v2368_v38 }
 0x1dc   : > { %v3214_v23 = vrot.slane %v2368_v38, 1  ;;  %v5674_v21 = vpack.c.bf16 %v5658_v52, %v5658_v52  ;;  %v3219_v16 = vrot.slane %v5658_v52, 1  ;;  %v5677_v19 = vpop.f32.mrb[29].mxu0  ;;  %v3218_v13 = vrot.slane %v2370_v27, 1 }
 0x1dd   : > { %v3341_v44 = vrot.slane %v3340_v30, 2  ;;  %v2647_v42 = vsel %vm5457_vm10, %v2642_v10, %v5518_v4  ;;  %v5684_v37 = vpop.f32.mrb[30].mxu0  ;;  %v5686_v22 = vrot.slane %v2707_v1, 4  ;;  %v5688_v45 = vrot.slane %v2710_v29, 5 }
 0x1de   : > { %v2696_v28 = vshrl.u32 %v5670_v2, 16  ;;  %v3215_v15 = vsel %vm3187_vm7, %v3213_v14, %v3214_v23  ;;  %3023 = vrot.lane.b32.xlu0 %v2647_v42, %s4354_s10  ;;  %2985 = vst.msk [vmem:[%s5471_s9 + $0x18] sm:$0xf] %vm2978_vm9, %v2647_v42  ;;  %v5695_v11 = vpop.f32.mrb[28].mxu1  ;;  %v5697_v55 = vpop.f32.mrb[31].mxu0  ;;  %v2692_v4 = vshll.u32 %v5670_v2, 16  ;;  %v3220_v0 = vsel %vm3187_vm7, %v3218_v13, %v3219_v16 }
 0x1df   : > { %v3342_v62 = vadd.f32 %v3341_v44, %v3340_v30  ;;  %v2720_v27 = vshrl.u32 %v5674_v21, 16  ;;  %v5704_v36 = vpop.f32.mrb[29].mxu1  ;;  %v3345_v14 = vsel %vm882_vm2, %v3215_v15, 0.0  ;;  %v2716_v12 = vshll.u32 %v5674_v21, 16 }
 0x1e0   : > { %v3841_v32 = vpack.c.bf16 %v2369_v48, %v2369_v48  ;;  %v3216_v50 = vrot.slane %v2369_v48, 1  ;;  %v5708_v57 = vpop.f32.mrb[30].mxu1  ;;  %v5710_v61 = vrot.slane %v2696_v28, 4  ;;  %v5713_v17 = vadd.f32 %v4174_v3, %v5412_v60 }
 0x1e1   : > { %v3343_v41 = vrot.slane %v3342_v62, 1  ;;  %v2665_v38 = vor.u32 %v5609_v63, %v5607_v54  ;;  %v5717_v10 = vpop.f32.mrb[31].mxu1  ;;  %v5719_v30 = vrot.slane %v2720_v27, 4  ;;  %v3354_v1 = vsel %vm882_vm2, %v3220_v0, 0.0 }
 0x1e2   : > { %v3217_v29 = vsel %vm3187_vm7, %v3214_v23, %v3216_v50  ;;  %v4175_v48 = vadd.f32 %v5569_v31, %v5403_v7  ;;  %v5725_v44 = vshll.u32 %v3841_v32, 16  ;;  %v3846_v13 = vpack.c.bf16 %v5713_v17, %v5713_v17 }
 0x1e3   : > { %v3344_v5 = vadd.f32 %v3343_v41, %v3342_v62  ;;  %v3346_v3 = vsel %vm882_vm2, %v3217_v29, 0.0  ;;  %v5730_v54 = vpop.f32.mrb[32].mxu0  ;;  %v2666_v42 = vrot.slane %v2665_v38, 4  ;;  %v2670_v28 = vrot.slane %v2668_v46, 5 }
 0x1e4   : > { %v3347_v63 = vadd.f32 %v3346_v3, %v3345_v14  ;;  %v2372_v23 = vadd.f32 %v4175_v48, %v5412_v60  ;;  %v5735_v15 = vpop.f32.mrb[33].mxu0  ;;  %v2740_v31 = vshll.u32 %v3846_v13, 16  ;;  %v3224_v62 = vrot.slane %v5713_v17, 1 }
 0x1e5   : > { %v3451_v7 = vsel %vm882_vm2, %v3344_v5, 0.0  ;;  %v4176_v27 = vadd.f32 %v5577_v56, %v5405_v18  ;;  %v5741_v0 = vpop.f32.mrb[34].mxu0  ;;  %v2744_v46 = vshrl.u32 %v3846_v13, 16  ;;  %v2671_v32 = vsel %vm5457_vm10, %v2666_v42, %v2670_v28 }
 0x1e6   : > { %v5744_v14 = vadd.f32 %v3451_v7, %v5627_v20  ;;  %v3348_v51 = vrot.slane %v3347_v63, 4  ;;  %v5748_v50 = vpop.f32.mrb[32].mxu1  ;;  %v5750_v41 = vpop.f32.mrb[35].mxu0  ;;  %v2704_v38 = vrot.slane %v5725_v44, 5  ;;  %3027 = vrot.lane.b32.xlu0 %v2671_v32, %s4354_s10  ;;  %2987 = vst.msk [vmem:[%s5471_s9 + $0x20] sm:$0xf] %vm2978_vm9, %v2671_v32  ;;  %v3844_v18 = vpack.c.bf16 %v2372_v23, %v2372_v23 }
 0x1e7   : > { %v3221_v56 = vrot.slane %v2372_v23, 1  ;;  %v2375_v20 = vadd.f32 %v4176_v27, %v5412_v60  ;;  %v5757_v17 = vpop.f32.mrb[33].mxu1  ;;  %v5759_v48 = vrot.slane %v2740_v31, 5  ;;  %v2675_v5 = vor.u32 %v5679_v26, %v2670_v28 }
 0x1e8   : > { %v3349_v29 = vadd.f32 %v3348_v51, %v3347_v63  ;;  %v4177_v3 = vadd.f32 %v5589_v47, %v5407_v35  ;;  %v5764_v13 = vpop.f32.mrb[34].mxu1  ;;  %v2689_v27 = vor.u32 %v5613_v49, %v5611_v8  ;;  %v5773_v31 = vrot.slane %v2744_v46, 4 }
 0x1e9   : > { %v3222_v42 = vsel %vm3187_vm7, %v3219_v16, %v3221_v56  ;;  %v3847_v7 = vpack.c.bf16 %v2375_v20, %v2375_v20  ;;  %v3226_v23 = vrot.slane %v2375_v20, 1  ;;  %v5771_v32 = vpop.f32.mrb[35].mxu1  ;;  %v2676_v35 = vrot.slane %v2675_v5, 4 }
 0x1ea   : > { %v3350_v63 = vrot.slane %v3349_v29, 2  ;;  %v3355_v26 = vsel %vm882_vm2, %v3222_v42, 0.0  ;;  %v5776_v47 = vshll.u32 %v3844_v18, 16  ;;  %v2373_v16 = vadd.f32 %v4177_v3, %v5412_v60 }
 0x1eb   : > { %v3356_v28 = vadd.f32 %v3355_v26, %v3354_v1  ;;  %v3227_v52 = vsel %vm3187_vm7, %v3224_v62, %v3226_v23  ;;  %v5780_v51 = vpop.f32.mrb[36].mxu0  ;;  %v5782_v8 = vshll.u32 %v3847_v7, 16  ;;  %v2681_v46 = vsel %vm5457_vm10, %v2676_v35, %v2680_v33 }
 0x1ec   : > { %v3351_v56 = vadd.f32 %v3350_v63, %v3349_v29  ;;  %v3364_v49 = vsel %vm882_vm2, %v3227_v52, 0.0  ;;  %v5789_v20 = vpop.f32.mrb[37].mxu0  ;;  %3029 = vrot.lane.b32.xlu1 %v2681_v46, %s4354_s10  ;;  %2988 = vst.msk [vmem:[%s5471_s9 + $0x24] sm:$0xf] %vm2978_vm9, %v2681_v46  ;;  %v3845_v1 = vpack.c.bf16 %v2373_v16, %v2373_v16  ;;  %v3223_v5 = vrot.slane %v2373_v16, 1 }
 0x1ed   : > { %v3357_v18 = vrot.slane %v3356_v28, 4  ;;  %v2690_v3 = vrot.slane %v2689_v27, 4  ;;  %v5794_v29 = vpop.f32.mrb[38].mxu0  ;;  %v2694_v7 = vrot.slane %v2692_v4, 5  ;;  %v4178_v59 = vadd.f32 %v5605_v6, %v5632_v9 }
 0x1ee   : > { %v3352_v42 = vrot.slane %v3351_v56, 1  ;;  %v2713_v33 = vor.u32 %v5688_v45, %v5686_v22  ;;  %v5802_v23 = vpop.f32.mrb[36].mxu1  ;;  %v5804_v63 = vpop.f32.mrb[39].mxu0  ;;  %v2731_v35 = vshrl.u32 %v3845_v1, 16  ;;  %v3225_v52 = vsel %vm3187_vm7, %v3223_v5, %v3224_v62 }
 0x1ef   : > { %v3358_v27 = vadd.f32 %v3357_v18, %v3356_v28  ;;  %v5808_v16 = vpop.f32.mrb[37].mxu1  ;;  %v3363_v4 = vsel %vm882_vm2, %v3225_v52, 0.0  ;;  %v2695_v6 = vsel %vm5457_vm10, %v2690_v3, %v2694_v7  ;;  %v5814_v9 = vadd.f32 %v4178_v59, %v5412_v60 }
 0x1f0   : > { %v3353_v2 = vadd.f32 %v3352_v42, %v3351_v56  ;;  %v5816_v22 = vpop.f32.mrb[38].mxu1  ;;  %v2734_v28 = vshll.u32 %v3845_v1, 16  ;;  %v3365_v18 = vadd.f32 %v3364_v49, %v3363_v4  ;;  %3031 = vrot.lane.b32.xlu0 %v2695_v6, %s4354_s10  ;;  %2989 = vst.msk [vmem:[%s5471_s9 + $0x28] sm:$0xf] %vm2978_vm9, %v2695_v6  ;;  %v5825_v5 = vrot.slane %v2731_v35, 4 }
 0x1f1   : > { %v3359_v45 = vrot.slane %v3358_v27, 2  ;;  %v5822_v62 = vpop.f32.mrb[39].mxu1  ;;  %v3850_v3 = vpack.c.bf16 %v5814_v9, %v5814_v9  ;;  %v2714_v42 = vrot.slane %v2713_v33, 4  ;;  %v2718_v49 = vrot.slane %v2716_v12, 5 }
 0x1f2   : > { %v3453_v56 = vsel %vm882_vm2, %v3353_v2, 0.0  ;;  %v3366_v1 = vrot.slane %v3365_v18, 4  ;;  %v2699_v2 = vor.u32 %v5710_v61, %v2694_v7  ;;  %v4179_v35 = vadd.f32 %v5618_v53, %v5641_v34 }
 0x1f3   : > { %v3454_v59 = vadd.f32 %v3453_v56, %v5744_v14  ;;  %v3360_v52 = vadd.f32 %v3359_v45, %v3358_v27  ;;  %v5832_v4 = vpop.f32.mrb[40].mxu0  ;;  %v5834_v6 = vshll.u32 %v3850_v3, 16  ;;  %v4180_v33 = vadd.f32 %v5625_v43, %v5651_v58 }
 0x1f4   : > { %v5841_v46 = vpop.f32.mrb[41].mxu0  ;;  %v3367_v27 = vadd.f32 %v3366_v1, %v3365_v18  ;;  %v2719_v21 = vsel %vm5457_vm10, %v2714_v42, %v2718_v49  ;;  %v4181_v12 = vadd.f32 %v5634_v40, %v5654_v25  ;;  %v5849_v56 = vrot.slane %v2734_v28, 5 }
 0x1f5   : > { %v3361_v14 = vrot.slane %v3360_v52, 1  ;;  %v5847_v45 = vpop.f32.mrb[42].mxu0  ;;  %3035 = vrot.lane.b32.xlu0 %v2719_v21, %s4354_s10  ;;  %2991 = vst.msk [vmem:[%s5471_s9 + $0x30] sm:$0xf] %vm2978_vm9, %v2719_v21  ;;  %v2700_v53 = vrot.slane %v2699_v2, 4  ;;  %v2376_v43 = vadd.f32 %v4179_v35, %v5412_v60  ;;  %v5856_v34 = vadd.f32 %v4180_v33, %v5412_v60 }
 0x1f6   : > { %6520 = vst [vmem:[#allocation8_spill] sm:$0xff] %v5847_v45  ;;  %v5858_v58 = vpop.f32.mrb[40].mxu1  ;;  %v5860_v61 = vpop.f32.mrb[43].mxu0  ;;  %v3368_v25 = vrot.slane %v3367_v27, 2  ;;  %v3231_v7 = vrot.slane %v5814_v9, 1  ;;  %v2377_v28 = vadd.f32 %v4181_v12, %v5412_v60  ;;  %v2723_v44 = vor.u32 %v5719_v30, %v2718_v49 }
 0x1f7   : > { %6521 = vst [vmem:[#allocation19_spill] sm:$0xff] %v5860_v61  ;;  %v3362_v40 = vadd.f32 %v3361_v14, %v3360_v52  ;;  %v5864_v18 = vpop.f32.mrb[41].mxu1  ;;  %v2705_v42 = vsel %vm5457_vm10, %v2700_v53, %v2704_v38  ;;  %v3848_v1 = vpack.c.bf16 %v2376_v43, %v2376_v43  ;;  %v3851_v2 = vpack.c.bf16 %v5856_v34, %v5856_v34 }
 0x1f8   : > { %v5873_v35 = vpop.f32.mrb[42].mxu1  ;;  %v3369_v9 = vadd.f32 %v3368_v25, %v3367_v27  ;;  %3033 = vrot.lane.b32.xlu1 %v2705_v42, %s4354_s10  ;;  %2990 = vst.msk [vmem:[%s5471_s9 + $0x2c] sm:$0xf] %vm2978_vm9, %v2705_v42  ;;  %v5879_v33 = vpack.c.bf16 %v2377_v28, %v2377_v28  ;;  %v3228_v26 = vrot.slane %v2376_v43, 1  ;;  %v3229_v30 = vrot.slane %v2377_v28, 1 }
 0x1f9   : > { %v3455_v52 = vsel %vm882_vm2, %v3362_v40, 0.0  ;;  %v5882_v14 = vpop.f32.mrb[43].mxu1  ;;  %v2755_v21 = vshrl.u32 %v3848_v1, 16  ;;  %v2758_v12 = vshll.u32 %v3848_v1, 16  ;;  %v2779_v53 = vshrl.u32 %v3851_v2, 16 }
 0x1fa   : > { %v3456_v38 = vadd.f32 %v3455_v52, %v3454_v59  ;;  %v3370_v3 = vrot.slane %v3369_v9, 1  ;;  %v2782_v61 = vshll.u32 %v3851_v2, 16  ;;  %v3233_v40 = vrot.slane %v5856_v34, 1 }
 0x1fb   : > { %v5885_v27 = vpop.f32.mrb[44].mxu0  ;;  %v5887_v25 = vrot.slane %v2755_v21, 4  ;;  %v2768_v45 = vshrl.u32 %v5879_v33, 16  ;;  %v5893_v52 = vrot.slane %v2758_v12, 5  ;;  %v5895_v1 = vrot.slane %v2779_v53, 4 }
 0x1fc   : > { %v5891_v49 = vpop.f32.mrb[45].mxu0  ;;  %v3371_v59 = vadd.f32 %v3370_v3, %v3369_v9  ;;  %v2724_v43 = vrot.slane %v2723_v44, 4  ;;  %v3230_v34 = vsel %vm3187_vm7, %v3228_v26, %v3229_v30  ;;  %v3232_v21 = vsel %vm3187_vm7, %v3229_v30, %v3231_v7 }
 0x1fd   : > { %6522 = vst [vmem:[#allocation9_spill] sm:$0xff] %v5891_v49  ;;  %v5897_v2 = vpop.f32.mrb[46].mxu0  ;;  %v4182_v42 = vadd.f32 %v5665_v39, %v5695_v11  ;;  %v2747_v28 = vor.u32 %v5773_v31, %v5759_v48  ;;  %v3372_v44 = vsel %vm882_vm2, %v3230_v34, 0.0  ;;  %v3373_v12 = vsel %vm882_vm2, %v3232_v21, 0.0 }
 0x1fe   : > { %v5905_v49 = vpop.f32.mrb[44].mxu1  ;;  %v5907_v3 = vpop.f32.mrb[47].mxu0  ;;  %v3457_v9 = vsel %vm882_vm2, %v3371_v59, 0.0  ;;  %v6523_v26 = vrot.slane %v5776_v47, 5  ;;  %v3374_v11 = vadd.f32 %v3373_v12, %v3372_v44  ;;  %v4183_v47 = vadd.f32 %v5677_v19, %v5704_v36 }
 0x1ff   : > { %v5916_v53 = vpop.f32.mrb[45].mxu1  ;;  %v5918_v39 = vadd.f32 %v3457_v9, %v3456_v38  ;;  %v2382_v31 = vadd.f32 %v4182_v42, %v5412_v60  ;;  %v2748_v30 = vrot.slane %v2747_v28, 4  ;;  %v2737_v38 = vor.u32 %v5849_v56, %v5825_v5 }
 0x200   : > { %v2729_v7 = vsel %vm5457_vm10, %v2724_v43, %v6523_v26  ;;  %v5924_v59 = vpop.f32.mrb[46].mxu1  ;;  %v4184_v43 = vadd.f32 %v5684_v37, %v5708_v57  ;;  %v4185_v34 = vadd.f32 %v5697_v55, %v5717_v10  ;;  %v5936_v9 = vrot.slane %v2782_v61, 5 }
 0x201   : > { %3037 = vrot.lane.b32.xlu1 %v2729_v7, %s4354_s10  ;;  %2992 = vst.msk [vmem:[%s5471_s9 + $0x34] sm:$0xf] %vm2978_vm9, %v2729_v7  ;;  %v5934_v21 = vpop.f32.mrb[47].mxu1  ;;  %v3375_v42 = vrot.slane %v3374_v11, 4  ;;  %v3854_v28 = vpack.c.bf16 %v2382_v31, %v2382_v31  ;;  %v6524_v44 = vrot.slane %v5782_v8, 5  ;;  %v2380_v37 = vadd.f32 %v4183_v47, %v5412_v60 }
 0x202   : > { %v5946_v36 = vadd.f32 %v4184_v43, %v5412_v60  ;;  %v2738_v57 = vrot.slane %v2737_v38, 4  ;;  %v2381_v55 = vadd.f32 %v4185_v34, %v5412_v60  ;;  %v4186_v8 = vadd.f32 %v5730_v54, %v5748_v50 }
 0x203   : > { %v2753_v19 = vsel %vm5457_vm10, %v2748_v30, %v6524_v44  ;;  %v3376_v10 = vadd.f32 %v3375_v42, %v3374_v11  ;;  %v2803_v5 = vshrl.u32 %v3854_v28, 16  ;;  %v2806_v56 = vshll.u32 %v3854_v28, 16 }
 0x204   : > { %2994 = vst.msk [vmem:[%s5471_s9 + $0x3c] sm:$0xf] %vm2978_vm9, %v2753_v19  ;;  %v5952_v61 = vpack.c.bf16 %v2380_v37, %v2380_v37  ;;  %v3234_v12 = vrot.slane %v2380_v37, 1  ;;  %v5956_v26 = vpack.c.bf16 %v5946_v36, %v5946_v36  ;;  %v3239_v7 = vrot.slane %v5946_v36, 1 }
 0x205   : > { %3041 = vrot.lane.b32.xlu1 %v2753_v19, %s4354_s10  ;;  %v5959_v30 = vrot.slane %v2768_v45, 4  ;;  %v3377_v11 = vrot.slane %v3376_v10, 2  ;;  %v3238_v47 = vrot.slane %v2382_v31, 1  ;;  %v2743_v43 = vsel %vm5457_vm10, %v2738_v57, %v5759_v48 }
 0x206   : > { %v5964_v38 = vrot.slane %v2803_v5, 4  ;;  %v5966_v54 = vrot.slane %v2806_v56, 5  ;;  %v2792_v50 = vshrl.u32 %v5952_v61, 16  ;;  %v3235_v34 = vsel %vm3187_vm7, %v3233_v40, %v3234_v12  ;;  %3039 = vrot.lane.b32.xlu0 %v2743_v43, %s4354_s10  ;;  %2993 = vst.msk [vmem:[%s5471_s9 + $0x38] sm:$0xf] %vm2978_vm9, %v2743_v43 }
 0x207   : > { %v3378_v45 = vadd.f32 %v3377_v11, %v3376_v10  ;;  %v2788_v42 = vshll.u32 %v5952_v61, 16  ;;  %v2816_v31 = vshrl.u32 %v5956_v26, 16  ;;  %v3240_v28 = vsel %vm3187_vm7, %v3238_v47, %v3239_v7 }
 0x208   : > { %v3381_v48 = vsel %vm882_vm2, %v3235_v34, 0.0  ;;  %v3853_v19 = vpack.c.bf16 %v2381_v55, %v2381_v55  ;;  %v3236_v37 = vrot.slane %v2381_v55, 1  ;;  %v5978_v57 = vrot.slane %v2792_v50, 4 }
 0x209   : > { %v3379_v36 = vrot.slane %v3378_v45, 1  ;;  %v2386_v40 = vadd.f32 %v4186_v8, %v5412_v60  ;;  %v4187_v10 = vadd.f32 %v5735_v15, %v5757_v17  ;;  %v5983_v5 = vrot.slane %v2816_v31, 4  ;;  %v5995_v60 = vld [vmem:[%s6362_s2] ss:$0 sm:$0xff] }
 0x20a   : > { %v3390_v56 = vsel %vm882_vm2, %v3240_v28, 0.0  ;;  %v3237_v11 = vsel %vm3187_vm7, %v3234_v12, %v3236_v37  ;;  %v2761_v47 = vor.u32 %v5893_v52, %v5887_v25  ;;  %v5989_v34 = vshll.u32 %v3853_v19, 16 }
 0x20b   : > { %v3380_v43 = vadd.f32 %v3379_v36, %v3378_v45  ;;  %v3382_v55 = vsel %vm882_vm2, %v3237_v11, 0.0  ;;  %v3858_v50 = vpack.c.bf16 %v2386_v40, %v2386_v40  ;;  %v2384_v15 = vadd.f32 %v5995_v60, %v4187_v10 }
 0x20c   : > { %v3383_v44 = vadd.f32 %v3382_v55, %v3381_v48  ;;  %v2762_v17 = vrot.slane %v2761_v47, 4  ;;  %v6525_v8 = vshll.u32 %v5879_v33, 16  ;;  %v3244_v45 = vrot.slane %v2386_v40, 1 }
 0x20d   : > { %v3459_v25 = vsel %vm882_vm2, %v3380_v43, 0.0  ;;  %v2836_v52 = vshll.u32 %v3858_v50, 16  ;;  %v4188_v31 = vadd.f32 %v5741_v0, %v5764_v13  ;;  %v3856_v19 = vpack.c.bf16 %v2384_v15, %v2384_v15 }
 0x20e   : > { %v2766_v12 = vrot.slane %v6525_v8, 5  ;;  %v3460_v28 = vadd.f32 %v3459_v25, %v5918_v39  ;;  %v3384_v48 = vrot.slane %v3383_v44, 4  ;;  %v3241_v37 = vrot.slane %v2384_v15, 1 }
 0x20f   : > { %v2800_v36 = vrot.slane %v5989_v34, 5  ;;  %v2840_v10 = vshrl.u32 %v3858_v50, 16  ;;  %v2387_v11 = vadd.f32 %v5995_v60, %v4188_v31  ;;  %v6008_v43 = vshll.u32 %v3856_v19, 16 }
 0x210   : > { %v2767_v33 = vsel %vm5457_vm10, %v2762_v17, %v2766_v12  ;;  %v3385_v47 = vadd.f32 %v3384_v48, %v3383_v44  ;;  %v3242_v40 = vsel %vm3187_vm7, %v3239_v7, %v3241_v37  ;;  %v4189_v0 = vadd.f32 %v5750_v41, %v5771_v32 }
 0x211   : > { %3043 = vrot.lane.b32.xlu0 %v2767_v33, %s4354_s10  ;;  %2995 = vst.msk [vmem:[%s5471_s9 + $0x40] sm:$0xf] %vm2978_vm9, %v2767_v33  ;;  %v3391_v13 = vsel %vm882_vm2, %v3242_v40, 0.0  ;;  %v3859_v39 = vpack.c.bf16 %v2387_v11, %v2387_v11  ;;  %v3246_v55 = vrot.slane %v2387_v11, 1  ;;  %v2771_v50 = vor.u32 %v5959_v30, %v2766_v12 }
 0x212   : > { %v3386_v15 = vrot.slane %v3385_v47, 2  ;;  %v6018_v17 = vrot.slane %v2836_v52, 5  ;;  %v3392_v44 = vadd.f32 %v3391_v13, %v3390_v56  ;;  %v2385_v8 = vadd.f32 %v5995_v60, %v4189_v0 }
 0x213   : > { %v6021_v7 = vrot.slane %v2840_v10, 4  ;;  %v3247_v25 = vsel %vm3187_vm7, %v3244_v45, %v3246_v55  ;;  %v2772_v31 = vrot.slane %v2771_v50, 4  ;;  %v2785_v41 = vor.u32 %v5936_v9, %v5895_v1 }
 0x214   : > { %v3387_v32 = vadd.f32 %v3386_v15, %v3385_v47  ;;  %v3393_v48 = vrot.slane %v3392_v44, 4  ;;  %v6026_v19 = vshll.u32 %v3859_v39, 16  ;;  %v3857_v30 = vpack.c.bf16 %v2385_v8, %v2385_v8 }
 0x215   : > { %v2824_v12 = vrot.slane %v6008_v43, 5  ;;  %v3400_v56 = vsel %vm882_vm2, %v3247_v25, 0.0  ;;  %v3243_v52 = vrot.slane %v2385_v8, 1  ;;  %v6526_v37 = vrot.slane %v5834_v6, 5 }
 0x216   : > { %v3388_v33 = vrot.slane %v3387_v32, 1  ;;  %v3394_v11 = vadd.f32 %v3393_v48, %v3392_v44  ;;  %v2827_v40 = vshrl.u32 %v3857_v30, 16  ;;  %v2786_v1 = vrot.slane %v2785_v41, 4 }
 0x217   : > { %v2777_v10 = vsel %vm5457_vm10, %v2772_v31, %v6526_v37  ;;  %v3245_v9 = vsel %vm3187_vm7, %v3243_v52, %v3244_v45  ;;  %v2790_v47 = vrot.slane %v2788_v42, 5  ;;  %v4190_v6 = vadd.f32 %v5780_v51, %v5802_v23 }
 0x218   : > { %3045 = vrot.lane.b32.xlu1 %v2777_v10, %s4354_s10  ;;  %2996 = vst.msk [vmem:[%s5471_s9 + $0x44] sm:$0xf] %vm2978_vm9, %v2777_v10  ;;  %v4191_v0 = vadd.f32 %v5789_v20, %v5808_v16  ;;  %v3389_v13 = vadd.f32 %v3388_v33, %v3387_v32  ;;  %v3395_v39 = vrot.slane %v3394_v11, 2  ;;  %v2848_v55 = vrot.slane %v6026_v19, 5 }
 0x219   : > { %v2830_v50 = vshll.u32 %v3857_v30, 16  ;;  %v3399_v15 = vsel %vm882_vm2, %v3245_v9, 0.0  ;;  %v2791_v45 = vsel %vm5457_vm10, %v2786_v1, %v2790_v47  ;;  %v6049_v61 = vadd.f32 %v5995_v60, %v4190_v6 }
 0x21a   : > { %v6052_v42 = vadd.f32 %v5995_v60, %v4191_v0  ;;  %v3461_v51 = vsel %vm882_vm2, %v3389_v13, 0.0  ;;  %v3396_v23 = vadd.f32 %v3395_v39, %v3394_v11  ;;  %v3401_v20 = vadd.f32 %v3400_v56, %v3399_v15  ;;  %3047 = vrot.lane.b32.xlu0 %v2791_v45, %s4354_s10  ;;  %2997 = vst.msk [vmem:[%s5471_s9 + $0x48] sm:$0xf] %vm2978_vm9, %v2791_v45 }
 0x21b   : > { %v2809_v16 = vor.u32 %v5966_v54, %v5964_v38  ;;  %v3462_v44 = vadd.f32 %v3461_v51, %v3460_v28  ;;  %v6060_v8 = vrot.slane %v2827_v40, 4  ;;  %v3862_v25 = vpack.c.bf16 %v6049_v61, %v6049_v61 }
 0x21c   : > { %v3860_v31 = vpack.c.bf16 %v6052_v42, %v6052_v42  ;;  %v3397_v41 = vrot.slane %v3396_v23, 1  ;;  %v6066_v32 = vrot.slane %v2830_v50, 5  ;;  %v3402_v48 = vrot.slane %v3401_v20, 4 }
 0x21d   : > { %v2810_v30 = vrot.slane %v2809_v16, 4  ;;  %v6068_v56 = vshll.u32 %v3862_v25, 16  ;;  %v3251_v52 = vrot.slane %v6049_v61, 1  ;;  %v6527_v54 = vshll.u32 %v5956_v26, 16 }
 0x21e   : > { %v2851_v38 = vshrl.u32 %v3860_v31, 16  ;;  %v3398_v37 = vadd.f32 %v3397_v41, %v3396_v23  ;;  %v3403_v10 = vadd.f32 %v3402_v48, %v3401_v20  ;;  %v2795_v33 = vor.u32 %v5978_v57, %v2790_v47 }
 0x21f   : > { %v2814_v28 = vrot.slane %v6527_v54, 5  ;;  %v4192_v11 = vadd.f32 %v5794_v29, %v5816_v22  ;;  %v2872_v40 = vrot.slane %v6068_v56, 5  ;;  %v2854_v1 = vshll.u32 %v3860_v31, 16 }
 0x220   : > { %v3248_v9 = vrot.slane %v6052_v42, 1  ;;  %v3463_v0 = vsel %vm882_vm2, %v3398_v37, 0.0  ;;  %v3404_v26 = vrot.slane %v3403_v10, 2  ;;  %v2796_v57 = vrot.slane %v2795_v33, 4 }
 0x221   : > { %v2815_v6 = vsel %vm5457_vm10, %v2810_v30, %v2814_v28  ;;  %v6085_v47 = vadd.f32 %v5995_v60, %v4192_v11  ;;  %v3464_v29 = vadd.f32 %v3463_v0, %v3462_v44  ;;  %v4193_v22 = vadd.f32 %v5804_v63, %v5822_v62 }
 0x222   : > { %3051 = vrot.lane.b32.xlu0 %v2815_v6, %s4354_s10  ;;  %2999 = vst.msk [vmem:[%s5471_s9 + $0x50] sm:$0xf] %vm2978_vm9, %v2815_v6  ;;  %v2819_v13 = vor.u32 %v5983_v5, %v2814_v28  ;;  %v4194_v39 = vadd.f32 %v5832_v4, %v5858_v58  ;;  %v3405_v50 = vadd.f32 %v3404_v26, %v3403_v10  ;;  %v6092_v15 = vrot.slane %v2851_v38, 4  ;;  %v6529_v26 = vld [vmem:[#allocation19_spill] sm:$0xff] }
 0x223   : > { %v2801_v45 = vsel %vm5457_vm10, %v2796_v57, %v2800_v36  ;;  %v3863_v61 = vpack.c.bf16 %v6085_v47, %v6085_v47  ;;  %v2389_v63 = vadd.f32 %v5995_v60, %v4193_v22  ;;  %v4195_v58 = vadd.f32 %v5841_v46, %v5864_v18 }
 0x224   : > { %3049 = vrot.lane.b32.xlu1 %v2801_v45, %s4354_s10  ;;  %2998 = vst.msk [vmem:[%s5471_s9 + $0x4c] sm:$0xf] %vm2978_vm9, %v2801_v45  ;;  %v2820_v62 = vrot.slane %v2819_v13, 4  ;;  %v6105_v4 = vadd.f32 %v5995_v60, %v4194_v39  ;;  %v3406_v5 = vrot.slane %v3405_v50, 1  ;;  %v6109_v34 = vrot.slane %v2854_v1, 5  ;;  %v6528_v1 = vld [vmem:[#allocation8_spill] sm:$0xff] }
 0x225   : > { %v2875_v36 = vshrl.u32 %v3863_v61, 16  ;;  %v2878_v42 = vshll.u32 %v3863_v61, 16  ;;  %v6111_v51 = vpack.c.bf16 %v2389_v63, %v2389_v63  ;;  %v3249_v23 = vrot.slane %v2389_v63, 1 }
 0x226   : > { %v2825_v20 = vsel %vm5457_vm10, %v2820_v62, %v2824_v12  ;;  %v3866_v16 = vpack.c.bf16 %v6105_v4, %v6105_v4  ;;  %v3407_v44 = vadd.f32 %v3406_v5, %v3405_v50  ;;  %v3253_v46 = vrot.slane %v6085_v47, 1 }
 0x227   : > { %v6119_v25 = vrot.slane %v2875_v36, 4  ;;  %3000 = vst.msk [vmem:[%s5471_s9 + $0x54] sm:$0xf] %vm2978_vm9, %v2825_v20  ;;  %v2843_v18 = vor.u32 %v6021_v7, %v6018_v17  ;;  %v6126_v31 = vrot.slane %v2878_v42, 5  ;;  %v2864_v43 = vshrl.u32 %v6111_v51, 16 }
 0x228   : > { %v3250_v12 = vsel %vm3187_vm7, %v3248_v9, %v3249_v23  ;;  %v3252_v41 = vsel %vm3187_vm7, %v3249_v23, %v3251_v52  ;;  %3053 = vrot.lane.b32.xlu1 %v2825_v20, %s4354_s10  ;;  %v3465_v48 = vsel %vm882_vm2, %v3407_v44, 0.0  ;;  %v3258_v54 = vrot.slane %v6105_v4, 1 }
 0x229   : > { %v3408_v30 = vsel %vm882_vm2, %v3250_v12, 0.0  ;;  %v3409_v38 = vsel %vm882_vm2, %v3252_v41, 0.0  ;;  %v6136_v28 = vadd.f32 %v3465_v48, %v3464_v29  ;;  %v2860_v7 = vshll.u32 %v6111_v51, 16 }
 0x22a   : > { %v3410_v37 = vadd.f32 %v3409_v38, %v3408_v30  ;;  %v2899_v10 = vshrl.u32 %v3866_v16, 16  ;;  %v6146_v52 = vrot.slane %v2864_v43, 4  ;;  %v2392_v33 = vadd.f32 %v5995_v60, %v4195_v58 }
 0x22b   : > { %v2844_v11 = vrot.slane %v2843_v18, 4  ;;  %v4196_v9 = vadd.f32 %v6528_v1, %v5873_v35  ;;  %v2902_v0 = vshll.u32 %v3866_v16, 16  ;;  %v4197_v57 = vadd.f32 %v6529_v26, %v5882_v14 }
 0x22c   : > { %v3411_v6 = vrot.slane %v3410_v37, 4  ;;  %v2833_v47 = vor.u32 %v6066_v32, %v6060_v8  ;;  %v3012_v29 = vpop.permute.xlu0 %3011  ;;  %v6155_v22 = vpack.c.bf16 %v2392_v33, %v2392_v33  ;;  %v3254_v13 = vrot.slane %v2392_v33, 1 }
 0x22d   : > { %v2849_v39 = vsel %vm5457_vm10, %v2844_v11, %v2848_v55  ;;  %v2395_v50 = vadd.f32 %v5995_v60, %v4196_v9  ;;  %3107 = vst.msk [vmem:[%s6144_s15] sm:$0xf] %vm2978_vm9, %v3012_v29  ;;  %v2393_v14 = vadd.f32 %v5995_v60, %v4197_v57  ;;  %v4198_v32 = vadd.f32 %v5885_v27, %v5905_v49 }
 0x22e   : > { %v3412_v35 = vadd.f32 %v3411_v6, %v3410_v37  ;;  %3057 = vrot.lane.b32.xlu1 %v2849_v39, %s4354_s10  ;;  %3002 = vst.msk [vmem:[%s5471_s9 + $0x5c] sm:$0xf] %vm2978_vm9, %v2849_v39  ;;  %v2834_v8 = vrot.slane %v2833_v47, 4  ;;  %v6170_v19 = vrot.slane %v2899_v10, 4  ;;  %v2888_v55 = vshrl.u32 %v6155_v22, 16 }
 0x22f   : > { %v3255_v45 = vsel %vm3187_vm7, %v3253_v46, %v3254_v13  ;;  %v6174_v61 = vpack.c.bf16 %v2395_v50, %v2395_v50  ;;  %v6176_v62 = vrot.slane %v2902_v0, 5  ;;  %v3259_v4 = vrot.slane %v2395_v50, 1 }
 0x230   : > { %v3413_v63 = vrot.slane %v3412_v35, 2  ;;  %v3865_v58 = vpack.c.bf16 %v2393_v14, %v2393_v14  ;;  %v3014_v5 = vpop.permute.xlu1 %3013  ;;  %v2884_v36 = vshll.u32 %v6155_v22, 16  ;;  %v3417_v42 = vsel %vm882_vm2, %v3255_v45, 0.0 }
 0x231   : > { %v2912_v27 = vshrl.u32 %v6174_v61, 16  ;;  %v3256_v49 = vrot.slane %v2393_v14, 1  ;;  %3108 = vst.msk [vmem:[%s6144_s15 + $0x4] sm:$0xf] %vm2978_vm9, %v3014_v5  ;;  %v6183_v23 = vrot.slane %v2888_v55, 4  ;;  %v3260_v20 = vsel %vm3187_vm7, %v3258_v54, %v3259_v4 }
 0x232   : > { %v3414_v51 = vadd.f32 %v3413_v63, %v3412_v35  ;;  %v2839_v16 = vsel %vm5457_vm10, %v2834_v8, %v6018_v17  ;;  %v2908_v44 = vshll.u32 %v6174_v61, 16  ;;  %v6190_v46 = vshll.u32 %v3865_v58, 16  ;;  %v6530_v17 = vld [vmem:[#allocation9_spill] sm:$0xff] }
 0x233   : > { %v3257_v18 = vsel %vm3187_vm7, %v3254_v13, %v3256_v49  ;;  %3055 = vrot.lane.b32.xlu0 %v2839_v16, %s4354_s10  ;;  %3001 = vst.msk [vmem:[%s5471_s9 + $0x58] sm:$0xf] %vm2978_vm9, %v2839_v16  ;;  %v6197_v43 = vadd.f32 %v5995_v60, %v4198_v32  ;;  %v6199_v41 = vrot.slane %v2912_v27, 4  ;;  %v4199_v30 = vadd.f32 %v6530_v17, %v5916_v53 }
 0x234   : > { %v3415_v12 = vrot.slane %v3414_v51, 1  ;;  %v3418_v48 = vsel %vm882_vm2, %v3257_v18, 0.0  ;;  %v3426_v38 = vsel %vm882_vm2, %v3260_v20, 0.0  ;;  %v2857_v10 = vor.u32 %v6109_v34, %v6092_v15 }
 0x235   : > { %v3419_v54 = vadd.f32 %v3418_v48, %v3417_v42  ;;  %v3870_v37 = vpack.c.bf16 %v6197_v43, %v6197_v43  ;;  %v2396_v11 = vadd.f32 %v5995_v60, %v4199_v30  ;;  %v2862_v1 = vrot.slane %v2860_v7, 5 }
 0x236   : > { %v3416_v33 = vadd.f32 %v3415_v12, %v3414_v51  ;;  %v4200_v9 = vadd.f32 %v5897_v2, %v5924_v59  ;;  %v2858_v53 = vrot.slane %v2857_v10, 4  ;;  %v2896_v34 = vrot.slane %v6190_v46, 5 }
 0x237   : > { %v3420_v6 = vrot.slane %v3419_v54, 4  ;;  %v2932_v0 = vshll.u32 %v3870_v37, 16  ;;  %v2936_v26 = vshrl.u32 %v3870_v37, 16  ;;  %v3868_v47 = vpack.c.bf16 %v2396_v11, %v2396_v11 }
 0x238   : > { %v3467_v57 = vsel %vm882_vm2, %v3416_v33, 0.0  ;;  %v3261_v29 = vrot.slane %v2396_v11, 1  ;;  %v2399_v13 = vadd.f32 %v5995_v60, %v4200_v9  ;;  %v3264_v7 = vrot.slane %v6197_v43, 1 }
 0x239   : > { %v3468_v15 = vadd.f32 %v3467_v57, %v6136_v28  ;;  %v3421_v39 = vadd.f32 %v3420_v6, %v3419_v54  ;;  %v6217_v2 = vshll.u32 %v3868_v47, 16  ;;  %v2863_v50 = vsel %vm5457_vm10, %v2858_v53, %v2862_v1 }
 0x23a   : > { %v3262_v59 = vsel %vm3187_vm7, %v3259_v4, %v3261_v29  ;;  %v3871_v35 = vpack.c.bf16 %v2399_v13, %v2399_v13  ;;  %3059 = vrot.lane.b32.xlu0 %v2863_v50, %s4354_s10  ;;  %3003 = vst.msk [vmem:[%s5471_s9 + $0x60] sm:$0xf] %vm2978_vm9, %v2863_v50  ;;  %v3266_v28 = vrot.slane %v2399_v13, 1  ;;  %v4201_v32 = vadd.f32 %v5907_v3, %v5934_v21  ;;  %v3016_v55 = vpop.permute.xlu0 %3015 }
 0x23b   : > { %v3422_v14 = vrot.slane %v3421_v39, 2  ;;  %v3427_v8 = vsel %vm882_vm2, %v3262_v59, 0.0  ;;  %v6228_v45 = vrot.slane %v2932_v0, 5  ;;  %v2938_v63 = vrot.slane %v2936_v26, 4  ;;  %3109 = vst.msk [vmem:[%s6144_s15 + $0x8] sm:$0xf] %vm2978_vm9, %v3016_v55 }
 0x23c   : > { %v2920_v4 = vrot.slane %v6217_v2, 5  ;;  %v3428_v58 = vadd.f32 %v3427_v8, %v3426_v38  ;;  %v3267_v42 = vsel %vm3187_vm7, %v3264_v7, %v3266_v28  ;;  %v2397_v27 = vadd.f32 %v5995_v60, %v4201_v32 }
 0x23d   : > { %v3423_v5 = vadd.f32 %v3422_v14, %v3421_v39  ;;  %v2867_v49 = vor.u32 %v6146_v52, %v2862_v1  ;;  %v2942_v20 = vshll.u32 %v3871_v35, 16  ;;  %v3436_v3 = vsel %vm882_vm2, %v3267_v42, 0.0 }
 0x23e   : > { %v3429_v51 = vrot.slane %v3428_v58, 4  ;;  %v2881_v21 = vor.u32 %v6126_v31, %v6119_v25  ;;  %v3869_v18 = vpack.c.bf16 %v2397_v27, %v2397_v27  ;;  %v3263_v43 = vrot.slane %v2397_v27, 1 }
 0x23f   : > { %v3424_v16 = vrot.slane %v3423_v5, 1  ;;  %v2868_v12 = vrot.slane %v2867_v49, 4  ;;  %v2886_v60 = vrot.slane %v2884_v36, 5  ;;  %v2905_v52 = vor.u32 %v6176_v62, %v6170_v19 }
 0x240   : > { %v3430_v48 = vadd.f32 %v3429_v51, %v3428_v58  ;;  %v2882_v17 = vrot.slane %v2881_v21, 4  ;;  %v3020_v30 = vpop.permute.xlu0 %3019  ;;  %v2923_v54 = vshrl.u32 %v3869_v18, 16  ;;  %v2926_v37 = vshll.u32 %v3869_v18, 16 }
 0x241   : > { %v3425_v38 = vadd.f32 %v3424_v16, %v3423_v5  ;;  %v3265_v25 = vsel %vm3187_vm7, %v3263_v43, %v3264_v7  ;;  %3111 = vst.msk [vmem:[%s6144_s15 + $0x10] sm:$0xf] %vm2978_vm9, %v3020_v30  ;;  %v3018_v31 = vpop.permute.xlu1 %3017  ;;  %v2873_v22 = vsel %vm5457_vm10, %v2868_v12, %v2872_v40  ;;  %v2906_v9 = vrot.slane %v2905_v52, 4 }
 0x242   : > { %v3431_v10 = vrot.slane %v3430_v48, 2  ;;  %v3435_v33 = vsel %vm882_vm2, %v3265_v25, 0.0  ;;  %v2887_v19 = vsel %vm5457_vm10, %v2882_v17, %v2886_v60  ;;  %3110 = vst.msk [vmem:[%s6144_s15 + $0xc] sm:$0xf] %vm2978_vm9, %v3018_v31  ;;  %v2925_v36 = vrot.slane %v2923_v54, 4  ;;  %3061 = vrot.lane.b32.xlu1 %v2873_v22, %s4354_s10 }
 0x243   : > { %v3469_v62 = vsel %vm882_vm2, %v3425_v38, 0.0  ;;  %v2928_v11 = vrot.slane %v2926_v37, 5  ;;  %v3437_v1 = vadd.f32 %v3436_v3, %v3435_v33  ;;  %3004 = vst.msk [vmem:[%s5471_s9 + $0x64] sm:$0xf] %vm2978_vm9, %v2873_v22  ;;  %3063 = vrot.lane.b32.xlu0 %v2887_v19, %s4354_s10  ;;  %3005 = vst.msk [vmem:[%s5471_s9 + $0x68] sm:$0xf] %vm2978_vm9, %v2887_v19  ;;  %v2891_v26 = vor.u32 %v6183_v23, %v2886_v60 }
 0x244   : > { %v3470_v56 = vadd.f32 %v3469_v62, %v3468_v15  ;;  %v3432_v40 = vadd.f32 %v3431_v10, %v3430_v48  ;;  %v2910_v6 = vrot.slane %v2908_v44, 5  ;;  %v2939_v53 = vor.u32 %v2938_v63, %v6228_v45 }
 0x245   : > { %v3438_v0 = vrot.slane %v3437_v1, 4  ;;  %v2929_v57 = vor.u32 %v2928_v11, %v2925_v36  ;;  %v2944_v29 = vrot.slane %v2942_v20, 5  ;;  %v2892_v61 = vrot.slane %v2891_v26, 4 }
 0x246   : > { %v3433_v47 = vrot.slane %v3432_v40, 1  ;;  %v2911_v13 = vsel %vm5457_vm10, %v2906_v9, %v2910_v6  ;;  %v2915_v39 = vor.u32 %v6199_v41, %v2910_v6  ;;  %v3022_v15 = vpop.permute.xlu1 %3021  ;;  %v2940_v23 = vrot.slane %v2939_v53, 4 }
 0x247   : > { %v3439_v7 = vadd.f32 %v3438_v0, %v3437_v1  ;;  %3067 = vrot.lane.b32.xlu0 %v2911_v13, %s4354_s10  ;;  %3007 = vst.msk [vmem:[%s5471_s9 + $0x70] sm:$0xf] %vm2978_vm9, %v2911_v13  ;;  %v2930_v44 = vrot.slane %v2929_v57, 4  ;;  %3112 = vst.msk [vmem:[%s6144_s15 + $0x14] sm:$0xf] %vm2978_vm9, %v3022_v15  ;;  %v2897_v41 = vsel %vm5457_vm10, %v2892_v61, %v2896_v34 }
 0x248   : > { %v3434_v59 = vadd.f32 %v3433_v47, %v3432_v40  ;;  %v2916_v50 = vrot.slane %v2915_v39, 4  ;;  %v2945_v14 = vsel %vm5457_vm10, %v2940_v23, %v2944_v29  ;;  %3065 = vrot.lane.b32.xlu1 %v2897_v41, %s4354_s10  ;;  %3006 = vst.msk [vmem:[%s5471_s9 + $0x6c] sm:$0xf] %vm2978_vm9, %v2897_v41 }
 0x249   : > { %v3440_v35 = vrot.slane %v3439_v7, 2  ;;  %v2935_v8 = vsel %vm5457_vm10, %v2930_v44, %v6228_v45  ;;  %3010 = vst.msk [vmem:[%s5471_s9 + $0x7c] sm:$0xf] %vm2978_vm9, %v2945_v14 }
 0x24a   : > { %v3471_v28 = vsel %vm882_vm2, %v3434_v59, 0.0  ;;  %v2921_v46 = vsel %vm5457_vm10, %v2916_v50, %v2920_v4  ;;  %3009 = vst.msk [vmem:[%s5471_s9 + $0x78] sm:$0xf] %vm2978_vm9, %v2935_v8 }
 0x24b   : > { %v3472_v34 = vadd.f32 %v3471_v28, %v3470_v56  ;;  %v3441_v32 = vadd.f32 %v3440_v35, %v3439_v7  ;;  %3008 = vst.msk [vmem:[%s5471_s9 + $0x74] sm:$0xf] %vm2978_vm9, %v2921_v46  ;;  %3071 = vrot.lane.b32.xlu0 %v2935_v8, %s4354_s10 }
 0x24c   : > { %3069 = vrot.lane.b32.xlu1 %v2921_v46, %s4354_s10 }
 0x24d   : > { %v3442_v55 = vrot.slane %v3441_v32, 1  ;;  %v3026_v2 = vpop.permute.xlu1 %3025 }
 0x24e   : > { %3114 = vst.msk [vmem:[%s6144_s15 + $0x1c] sm:$0xf] %vm2978_vm9, %v3026_v2 }
 0x24f   : > { %v3443_v45 = vadd.f32 %v3442_v55, %v3441_v32 }
 0x250   : > { %v3024_v24 = vpop.permute.xlu0 %3023  ;;  %3073 = vrot.lane.b32.xlu1 %v2945_v14, %s4354_s10 }
 0x251   : > { %v3473_v63 = vsel %vm882_vm2, %v3443_v45, 0.0  ;;  %3113 = vst.msk [vmem:[%s6144_s15 + $0x18] sm:$0xf] %vm2978_vm9, %v3024_v24 }
 0x252   : > { %v3474_v4 = vadd.f32 %v3473_v63, %v3472_v34 }
 0x254   : > { %v3475_v58 = vmul.f32 0.00390625, %v3474_v4 }
 0x256   : > { %3477 = vst.msk [vmem:[%s245_s20] sm:$0x1] %vm3476_vm11, %v3475_v58 }
 0x258   : > { %v3028_v5 = vpop.permute.xlu0 %3027 }
 0x259   : > { %3115 = vst.msk [vmem:[%s6144_s15 + $0x20] sm:$0xf] %vm2978_vm9, %v3028_v5 }
 0x25e   : > { %v3030_v42 = vpop.permute.xlu1 %3029 }
 0x25f   : > { %3116 = vst.msk [vmem:[%s6144_s15 + $0x24] sm:$0xf] %vm2978_vm9, %v3030_v42 }
 0x262   : > { %v3032_v27 = vpop.permute.xlu0 %3031 }
 0x263   : > { %3117 = vst.msk [vmem:[%s6144_s15 + $0x28] sm:$0xf] %vm2978_vm9, %v3032_v27 }
 0x267   : > { %v3036_v49 = vpop.permute.xlu0 %3035 }
 0x268   : > { %3119 = vst.msk [vmem:[%s6144_s15 + $0x30] sm:$0xf] %vm2978_vm9, %v3036_v49 }
 0x26a   : > { %v3034_v51 = vpop.permute.xlu1 %3033 }
 0x26b   : > { %3118 = vst.msk [vmem:[%s6144_s15 + $0x2c] sm:$0xf] %vm2978_vm9, %v3034_v51 }
 0x273   : > { %v3038_v20 = vpop.permute.xlu1 %3037 }
 0x274   : > { %3120 = vst.msk [vmem:[%s6144_s15 + $0x34] sm:$0xf] %vm2978_vm9, %v3038_v20 }
 0x277   : > { %v3042_v3 = vpop.permute.xlu1 %3041 }
 0x278   : > { %3122 = vst.msk [vmem:[%s6144_s15 + $0x3c] sm:$0xf] %vm2978_vm9, %v3042_v3  ;;  %v3040_v21 = vpop.permute.xlu0 %3039 }
 0x279   : > { %3121 = vst.msk [vmem:[%s6144_s15 + $0x38] sm:$0xf] %vm2978_vm9, %v3040_v21 }
 0x283   : > { %v3044_v16 = vpop.permute.xlu0 %3043 }
 0x284   : > { %3123 = vst.msk [vmem:[%s6144_s15 + $0x40] sm:$0xf] %vm2978_vm9, %v3044_v16 }
 0x28a   : > { %v3046_v18 = vpop.permute.xlu1 %3045 }
 0x28b   : > { %3124 = vst.msk [vmem:[%s6144_s15 + $0x44] sm:$0xf] %vm2978_vm9, %v3046_v18 }
 0x28c   : > { %v3048_v43 = vpop.permute.xlu0 %3047 }
 0x28d   : > { %3125 = vst.msk [vmem:[%s6144_s15 + $0x48] sm:$0xf] %vm2978_vm9, %v3048_v43 }
 0x294   : > { %v3052_v12 = vpop.permute.xlu0 %3051 }
 0x295   : > { %3127 = vst.msk [vmem:[%s6144_s15 + $0x50] sm:$0xf] %vm2978_vm9, %v3052_v12 }
 0x296   : > { %v3050_v48 = vpop.permute.xlu1 %3049 }
 0x297   : > { %3126 = vst.msk [vmem:[%s6144_s15 + $0x4c] sm:$0xf] %vm2978_vm9, %v3050_v48 }
 0x29a   : > { %v3054_v17 = vpop.permute.xlu1 %3053 }
 0x29b   : > { %3128 = vst.msk [vmem:[%s6144_s15 + $0x54] sm:$0xf] %vm2978_vm9, %v3054_v17 }
 0x2a0   : > { %v3058_v60 = vpop.permute.xlu1 %3057 }
 0x2a1   : > { %3130 = vst.msk [vmem:[%s6144_s15 + $0x5c] sm:$0xf] %vm2978_vm9, %v3058_v60 }
 0x2a5   : > { %v3056_v52 = vpop.permute.xlu0 %3055 }
 0x2a6   : > { %3129 = vst.msk [vmem:[%s6144_s15 + $0x58] sm:$0xf] %vm2978_vm9, %v3056_v52 }
 0x2ac   : > { %v3060_v30 = vpop.permute.xlu0 %3059 }
 0x2ad   : > { %3131 = vst.msk [vmem:[%s6144_s15 + $0x60] sm:$0xf] %vm2978_vm9, %v3060_v30 }
 0x2b4   : > { %v3062_v38 = vpop.permute.xlu1 %3061 }
 0x2b5   : > { %v3064_v54 = vpop.permute.xlu0 %3063  ;;  %3132 = vst.msk [vmem:[%s6144_s15 + $0x64] sm:$0xf] %vm2978_vm9, %v3062_v38 }
 0x2b6   : > { %3133 = vst.msk [vmem:[%s6144_s15 + $0x68] sm:$0xf] %vm2978_vm9, %v3064_v54 }
 0x2b9   : > { %v3068_v37 = vpop.permute.xlu0 %3067 }
 0x2ba   : > { %3135 = vst.msk [vmem:[%s6144_s15 + $0x70] sm:$0xf] %vm2978_vm9, %v3068_v37  ;;  %v3066_v25 = vpop.permute.xlu1 %3065 }
 0x2bb   : > { %3134 = vst.msk [vmem:[%s6144_s15 + $0x6c] sm:$0xf] %vm2978_vm9, %v3066_v25 }
 0x2bd   : > { %v3072_v31 = vpop.permute.xlu0 %3071 }
 0x2be   : > { %3137 = vst.msk [vmem:[%s6144_s15 + $0x78] sm:$0xf] %vm2978_vm9, %v3072_v31  ;;  %v3070_v10 = vpop.permute.xlu1 %3069 }
 0x2bf   : > { %3136 = vst.msk [vmem:[%s6144_s15 + $0x74] sm:$0xf] %vm2978_vm9, %v3070_v10 }
 0x2c2   : > { %v3074_v33 = vpop.permute.xlu1 %3073 }
 0x2c3   : > { %3138 = vst.msk [vmem:[%s6144_s15 + $0x7c] sm:$0xf] %vm2978_vm9, %v3074_v33 }
 0x2c4 PF: > { %s16_s18 = sadd.s32 1, %s4350_s18  }
 0x2c5   : > { %p13_p4 = scmp.ge.s32.totalorder %s16_s18, 4  }
 0x2c7   :  { %15 = sbr.rel (!%p13_p4) target bundleno = 1 (0x1), region = 88 }

// kernel: eau_forward.7
= control target key start
LH: loop header
LB: loop body
LE: loop exit
PB: predicated region body
PF: predicated region fallthrough
CT: control target
= control target key end

     0   :  { %s6837_s0 = inlined_call_operand.<no memory space> [shape: f32[1], index: 0, kind: input, shape index: {}]   ;;  %s6838_s1 = inlined_call_operand.vmem [shape: f32[2,1,32], index: 1, kind: input, shape index: {}]   ;;  %s6839_s2 = inlined_call_operand.vmem [shape: bf16[2,16,16,4], index: 2, kind: input, shape index: {}]   ;;  %s6840_s3 = inlined_call_operand.vmem [shape: bf16[2,16,16,4], index: 3, kind: input, shape index: {}]   ;;  %s6841_s4 = inlined_call_operand.vmem [shape: bf16[2,16,16,32], index: 4, kind: input, shape index: {}]   ;;  %s6842_s5 = inlined_call_operand.vmem [shape: f32[2,16,16,2], index: 5, kind: input, shape index: {}]   ;;  %s6843_s6 = inlined_call_operand.vmem [shape: bf16[2,16,16,32], index: 6, kind: input, shape index: {}]   ;;  %s6844_s7 = inlined_call_operand.vmem [shape: bf16[2,16,16,32], index: 7, kind: input, shape index: {}]   ;;  %s6845_s8 = inlined_call_operand.vmem [shape: bf16[2,16,16,32], index: 8, kind: input, shape index: {}]   ;;  %s6846_s9 = inlined_call_operand.hbm [shape: f32[2,16,16,32], index: 9, kind: output, shape index: {}]  }
   0x1   :  { %14 = sst [smem:[#allocation2]] %s6837_s0 }
   0x2   :  { %15 = vsyncpa [#allocation4], 0 }
   0x3   :  { %17 = vsyncpa [#allocation4 + $0x1], 0  ;;  %s5303_s11 = smov 0   ;;  %s5305_s12 = smov 0  }
   0x4   :  { %s5307_s13 = smov 0   ;;  %s5309_s14 = smov 0  }
   0x5   :  { %s5311_s15 = smov 0   ;;  %s5313_s16 = smov 0  }
   0x6 LB: > { %s4253_s0 = sadd.s32 4294967295, %s5241_s16   ;;  %s4254_s17 = sadd.s32 4294967294, %s5241_s16   ;;  %s5241_s16 = sphi %s5313_s16, %s23_s16   ;;  %s5237_s15 = sphi %s5311_s15, %s7054_s15   ;;  %s5233_s14 = sphi %s5309_s14, %s7053_s14   ;;  %s5229_s13 = sphi %s5307_s13, %s7052_s13   ;;  %s5225_s12 = sphi %s5305_s12, %s7051_s12   ;;  %s5221_s11 = sphi %s5303_s11, %s7050_s11  }
   0x7   : > { %s35_s18 = sadd.s32 1, %s5237_s15  ;;  %s287_s19 = sadd.s32 1, %s5229_s13 }
   0x8   : > { %p37_p0 = scmp.ge.s32.totalorder %s35_s18, 2  ;;  %p297_p1 = scmp.ne.s32.totalorder %s5229_s13, %s5225_s12 }
   0x9   : > { %p298_p2 = scmp.eq.s32.totalorder %s4253_s0, 1  ;;  %p303_p3 = scmp.ne.s32.totalorder %s5225_s12, %s5221_s11 }
   0xa   : > { %s7056_s18 = smov (%p37_p0, %s35_s18), 0  ;;  %p304_p5 = scmp.eq.s32.totalorder %s4254_s17, 1 }
   0xb   : > { %p5343_p4 = por %p298_p2, %p297_p1  ;;  %s282_s21 = ssub.s32 %s5237_s15, %s7056_s18 }
   0xc   : > { %p4257_p6 = scmp.ge.s32.totalorder %s5241_s16, 1  ;;  %p285_p7 = scmp.eq.s32.totalorder %s282_s21, 0 }
   0xd   : > { %p5350_p8 = por %p304_p5, %p303_p3  ;;  %p429_p9 = scmp.lt.s32.totalorder %s5241_s16, 3 }
   0xe   : > { %s5356_s23 = scalar_select %p285_p7, %s5229_s13, %s287_s19  }
   0xf   : > { %p430_p10 = pnand %p4257_p6, %p429_p9 }
  0x11   : > { %433 = sbr.rel (%p430_p10) target bundleno = 935 (0x3a7), region = 56 }
  0x18   : > { %p533_p11 = scmp.lt.s32.totalorder %s5233_s14, 1  ;;  %v6847_v0 = vmov 0.0   ;;  %vm5244_vm0 = vmmov 0   ;;  %vm721_vm1 = vcmask 31744   ;;  %s5245_s26 = smov 127   ;;  %vm1656_vm2 = vcmask 130048  }
  0x19   : > { %4668 = vmatprep.subr.bf16.mxu0 %v6847_v0  ;;  %4674 = vmatprep.subr.bf16.mxu1 %v6847_v0  ;;  %s3721_s17 = sld [smem:[#allocation2]]  ;;  %s530_s19 = sand.u32 1, %s5225_s12   ;;  %vm3986_vm3 = vcmask 261120  }
  0x1a   : > { %s5362_s24 = scalar_select %p533_p11, %s5233_s14, 1  ;;  %4670 = vmatprep.mubr.msk.bf16.mxu0 %vm5244_vm0, %v6847_v0  ;;  %4676 = vmatprep.mubr.msk.bf16.mxu1 %vm5244_vm0, %v6847_v0 }
  0x1b   : > { %s5247_s30 = smov [#allocation3]  }
  0x1c   : > { %s5369_s25 = sshll.u32 %s5362_s24, 7  ;;  %s4362_s0 = sshll.u32 %s5362_s24, 8 }
  0x1d   : > { %s5375_s28 = scalar_lea.vmem %s6840_s3, %s5369_s25  ;;  %s5383_s10 = scalar_lea.vmem %s6839_s2, %s5369_s25 }
  0x1e   : > { %v4923_v1 = vld [vmem:[%s5375_s28] sm:$0xff]   ;;  %v4924_v2 = vld [vmem:[%s5375_s28 + $0x8] sm:$0xff]   ;;  %v4927_v5 = vld [vmem:[%s5375_s28 + $0x10] sm:$0xff]   ;;  %s5436_s21 = scalar_lea.vmem %s6842_s5, %s4362_s0  ;;  %s5874_s29 = scalar_lea.vmem %s6841_s4, %s5369_s25 }
  0x1f   : > { %v726_v3 = vsel %vm721_vm1, %v4923_v1, 0  ;;  %v783_v4 = vsel %vm721_vm1, %v4924_v2, 0  ;;  %v4928_v6 = vld [vmem:[%s5375_s28 + $0x18] sm:$0xff]   ;;  %v4925_v7 = vld [vmem:[%s5383_s10] sm:$0xff]   ;;  %v4926_v8 = vld [vmem:[%s5383_s10 + $0x8] sm:$0xff]   ;;  %v840_v9 = vsel %vm721_vm1, %v4927_v5, 0  ;;  %s6433_s0 = scalar_lea.vmem %s6843_s6, %s5369_s25 }
  0x20   : > { %4669 = vmatpush3.bf16.xpose.msra.mxu0 %v726_v3  ;;  %4675 = vmatpush3.bf16.xpose.msra.mxu1 %v783_v4  ;;  %v897_v10 = vsel %vm721_vm1, %v4928_v6, 0  ;;  %v4930_v11 = vld [vmem:[%s5375_s28 + $0x20] sm:$0xff]   ;;  %v4932_v12 = vld [vmem:[%s5375_s28 + $0x28] sm:$0xff]   ;;  %v4929_v13 = vld [vmem:[%s5383_s10 + $0x10] sm:$0xff]  }
  0x21   : > { %4680 = vmatprep.subr.bf16.mxu0 %v6847_v0  ;;  %4686 = vmatprep.subr.bf16.mxu1 %v6847_v0  ;;  %v4931_v14 = vld [vmem:[%s5383_s10 + $0x18] sm:$0xff]   ;;  %v954_v15 = vsel %vm721_vm1, %v4930_v11, 0  ;;  %v1011_v16 = vsel %vm721_vm1, %v4932_v12, 0  ;;  %v4934_v17 = vld [vmem:[%s5375_s28 + $0x30] sm:$0xff]   ;;  %v4933_v19 = vld [vmem:[%s5383_s10 + $0x20] sm:$0xff]  }
  0x22   : > { %v4936_v18 = vld [vmem:[%s5375_s28 + $0x38] sm:$0xff]   ;;  %v4935_v20 = vld [vmem:[%s5383_s10 + $0x28] sm:$0xff]   ;;  %v1068_v21 = vsel %vm721_vm1, %v4934_v17, 0  ;;  %v4938_v23 = vld [vmem:[%s5375_s28 + $0x40] sm:$0xff]  }
  0x23   : > { %v1125_v22 = vsel %vm721_vm1, %v4936_v18, 0  ;;  %v4940_v24 = vld [vmem:[%s5375_s28 + $0x48] sm:$0xff]   ;;  %v4937_v25 = vld [vmem:[%s5383_s10 + $0x30] sm:$0xff]   ;;  %v4939_v26 = vld [vmem:[%s5383_s10 + $0x38] sm:$0xff]   ;;  %v1182_v27 = vsel %vm721_vm1, %v4938_v23, 0 }
  0x24   : > { %v5443_v28 = vld [vmem:[%s5436_s21 + $0x8] sm:$0xff]  ;;  %v1239_v29 = vsel %vm721_vm1, %v4940_v24, 0  ;;  %v5449_v30 = vld [vmem:[%s5436_s21] sm:$0xff]  ;;  %v5456_v31 = vld [vmem:[%s5436_s21 + $0x10] sm:$0xff] }
  0x25   : > { %2267 = vrot.lane.b32.xlu1 %v5443_v28, %s5245_s26  ;;  %2265 = vrot.lane.b32.xlu0 %v5449_v30, %s5245_s26  ;;  %v4942_v32 = vld [vmem:[%s5375_s28 + $0x50] sm:$0xff]   ;;  %v5462_v33 = vld [vmem:[%s5436_s21 + $0x18] sm:$0xff] }
  0x26   : > { %v4944_v34 = vld [vmem:[%s5375_s28 + $0x58] sm:$0xff]   ;;  %v4941_v35 = vld [vmem:[%s5383_s10 + $0x40] sm:$0xff]   ;;  %v4943_v36 = vld [vmem:[%s5383_s10 + $0x48] sm:$0xff]   ;;  %v1296_v38 = vsel %vm721_vm1, %v4942_v32, 0 }
  0x27   : > { %4671 = vmatmul.mubr.msk.bf16.vlgmr.msra.gmra.mrb[0].mxu0 %vm721_vm1, %v4925_v7  ;;  %4677 = vmatmul.mubr.msk.bf16.vlgmr.msra.gmra.mrb[0].mxu1 %vm721_vm1, %v4926_v8  ;;  %v5474_v37 = vld [vmem:[%s5436_s21 + $0x20] sm:$0xff]  ;;  %v1353_v39 = vsel %vm721_vm1, %v4944_v34, 0  ;;  %v5485_v40 = vld [vmem:[%s5436_s21 + $0x30] sm:$0xff]  ;;  %v5491_v42 = vld [vmem:[%s5436_s21 + $0x28] sm:$0xff] }
  0x28   : > { %4681 = vmatpush3.bf16.xpose.msra.mxu0 %v840_v9  ;;  %4687 = vmatpush3.bf16.xpose.msra.mxu1 %v897_v10  ;;  %v4946_v41 = vld [vmem:[%s5375_s28 + $0x60] sm:$0xff]   ;;  %v4948_v43 = vld [vmem:[%s5375_s28 + $0x68] sm:$0xff]   ;;  %v4945_v44 = vld [vmem:[%s5383_s10 + $0x50] sm:$0xff]  }
  0x29   : > { %4682 = vmatprep.mubr.msk.bf16.mxu0 %vm5244_vm0, %v6847_v0  ;;  %4692 = vmatprep.subr.bf16.mxu0 %v6847_v0  ;;  %v4947_v45 = vld [vmem:[%s5383_s10 + $0x58] sm:$0xff]   ;;  %v5503_v46 = vld [vmem:[%s5436_s21 + $0x40] sm:$0xff]  ;;  %v1410_v47 = vsel %vm721_vm1, %v4946_v41, 0  ;;  %v1467_v48 = vsel %vm721_vm1, %v4948_v43, 0  ;;  %v5514_v49 = vld [vmem:[%s5436_s21 + $0x50] sm:$0xff] }
  0x2a   : > { %4688 = vmatprep.mubr.msk.bf16.mxu1 %vm5244_vm0, %v6847_v0  ;;  %4698 = vmatprep.subr.bf16.mxu1 %v6847_v0  ;;  %v4950_v50 = vld [vmem:[%s5375_s28 + $0x70] sm:$0xff]   ;;  %v5520_v51 = vld [vmem:[%s5436_s21 + $0x38] sm:$0xff]  ;;  %v4949_v53 = vld [vmem:[%s5383_s10 + $0x60] sm:$0xff]  }
  0x2b   : > { %2269 = vrot.lane.b32.xlu1 %v5456_v31, %s5245_s26  ;;  %2271 = vrot.lane.b32.xlu0 %v5462_v33, %s5245_s26  ;;  %v4952_v52 = vld [vmem:[%s5375_s28 + $0x78] sm:$0xff]   ;;  %v4951_v54 = vld [vmem:[%s5383_s10 + $0x68] sm:$0xff]   ;;  %v1524_v56 = vsel %vm721_vm1, %v4950_v50, 0 }
  0x2c   : > { %v5534_v55 = vld [vmem:[%s5436_s21 + $0x60] sm:$0xff]  ;;  %v1581_v57 = vsel %vm721_vm1, %v4952_v52, 0  ;;  %v5542_v58 = vld [vmem:[%s5436_s21 + $0x48] sm:$0xff]  ;;  %v5546_v59 = vld [vmem:[%s5436_s21 + $0x70] sm:$0xff] }
  0x2d   : > { %v4953_v60 = vld [vmem:[%s5383_s10 + $0x70] sm:$0xff]   ;;  %v5558_v61 = vld [vmem:[%s5436_s21 + $0x58] sm:$0xff]  ;;  %v5563_v63 = vld [vmem:[%s5436_s21 + $0x80] sm:$0xff] }
  0x2e   : > { %v4954_v62 = vld [vmem:[%s5383_s10 + $0x78] sm:$0xff]   ;;  %v5572_v1 = vld [vmem:[%s5436_s21 + $0x68] sm:$0xff]  ;;  %v5576_v2 = vld [vmem:[%s5436_s21 + $0x90] sm:$0xff]  ;;  %s5167_s10 = sshll.u32 %s5247_s30, 4  ;;  %s5168_s10 = int_to_ptr.vmem [resolvable:$false] %s5167_s10 }
  0x2f   : > { %4683 = vmatmul.mubr.msk.bf16.vlgmr.msra.gmra.mrb[4].mxu0 %vm721_vm1, %v4929_v13  ;;  %4689 = vmatmul.mubr.msk.bf16.vlgmr.msra.gmra.mrb[4].mxu1 %vm721_vm1, %v4931_v14  ;;  %v5587_v3 = vld [vmem:[%s5436_s21 + $0x78] sm:$0xff]  ;;  %v5590_v4 = vld [vmem:[%s5436_s21 + $0xa0] sm:$0xff]  ;;  %v5597_v5 = vld [vmem:[%s5436_s21 + $0x88] sm:$0xff] }
  0x30   : > { %4693 = vmatpush3.bf16.xpose.msra.mxu0 %v954_v15  ;;  %4699 = vmatpush3.bf16.xpose.msra.mxu1 %v1011_v16  ;;  %v5600_v6 = vld [vmem:[%s5436_s21 + $0xb0] sm:$0xff]  ;;  %v5607_v7 = vld [vmem:[%s5436_s21 + $0x98] sm:$0xff]  ;;  %v5610_v8 = vld [vmem:[%s5436_s21 + $0xc0] sm:$0xff] }
  0x31   : > { %4694 = vmatprep.mubr.msk.bf16.mxu0 %vm5244_vm0, %v6847_v0  ;;  %4704 = vmatprep.subr.bf16.mxu0 %v6847_v0  ;;  %v5617_v9 = vld [vmem:[%s5436_s21 + $0xa8] sm:$0xff]  ;;  %v5620_v10 = vld [vmem:[%s5436_s21 + $0xd0] sm:$0xff]  ;;  %v5627_v11 = vld [vmem:[%s5436_s21 + $0xb8] sm:$0xff] }
  0x32   : > { %4700 = vmatprep.mubr.msk.bf16.mxu1 %vm5244_vm0, %v6847_v0  ;;  %4710 = vmatprep.subr.bf16.mxu1 %v6847_v0  ;;  %v5630_v12 = vld [vmem:[%s5436_s21 + $0xe0] sm:$0xff]  ;;  %v5637_v13 = vld [vmem:[%s5436_s21 + $0xc8] sm:$0xff]  ;;  %v5640_v14 = vld [vmem:[%s5436_s21 + $0xf0] sm:$0xff] }
  0x33   : > { %2273 = vrot.lane.b32.xlu1 %v5474_v37, %s5245_s26  ;;  %2275 = vrot.lane.b32.xlu0 %v5491_v42, %s5245_s26  ;;  %v5647_v15 = vld [vmem:[%s5436_s21 + $0xd8] sm:$0xff]  ;;  %v5652_v16 = vld [vmem:[%s5436_s21 + $0xe8] sm:$0xff] }
  0x37   : > { %4695 = vmatmul.mubr.msk.bf16.vlgmr.msra.gmra.mrb[8].mxu0 %vm721_vm1, %v4933_v19  ;;  %4701 = vmatmul.mubr.msk.bf16.vlgmr.msra.gmra.mrb[8].mxu1 %vm721_vm1, %v4935_v20 }
  0x38   : > { %4705 = vmatpush3.bf16.xpose.msra.mxu0 %v1068_v21  ;;  %4711 = vmatpush3.bf16.xpose.msra.mxu1 %v1125_v22 }
  0x39   : > { %4706 = vmatprep.mubr.msk.bf16.mxu0 %vm5244_vm0, %v6847_v0  ;;  %4716 = vmatprep.subr.bf16.mxu0 %v6847_v0 }
  0x3a   : > { %4712 = vmatprep.mubr.msk.bf16.mxu1 %vm5244_vm0, %v6847_v0  ;;  %4722 = vmatprep.subr.bf16.mxu1 %v6847_v0 }
  0x3b   : > { %2277 = vrot.lane.b32.xlu1 %v5485_v40, %s5245_s26  ;;  %2279 = vrot.lane.b32.xlu0 %v5520_v51, %s5245_s26 }
  0x3f   : > { %4707 = vmatmul.mubr.msk.bf16.vlgmr.msra.gmra.mrb[12].mxu0 %vm721_vm1, %v4937_v25  ;;  %4713 = vmatmul.mubr.msk.bf16.vlgmr.msra.gmra.mrb[12].mxu1 %vm721_vm1, %v4939_v26 }
  0x40   : > { %4717 = vmatpush3.bf16.xpose.msra.mxu0 %v1182_v27  ;;  %4723 = vmatpush3.bf16.xpose.msra.mxu1 %v1239_v29 }
  0x41   : > { %4718 = vmatprep.mubr.msk.bf16.mxu0 %vm5244_vm0, %v6847_v0  ;;  %4728 = vmatprep.subr.bf16.mxu0 %v6847_v0 }
  0x42   : > { %4724 = vmatprep.mubr.msk.bf16.mxu1 %vm5244_vm0, %v6847_v0  ;;  %4734 = vmatprep.subr.bf16.mxu1 %v6847_v0 }
  0x43   : > { %2281 = vrot.lane.b32.xlu1 %v5503_v46, %s5245_s26  ;;  %2283 = vrot.lane.b32.xlu0 %v5542_v58, %s5245_s26 }
  0x47   : > { %4719 = vmatmul.mubr.msk.bf16.vlgmr.msra.gmra.mrb[16].mxu0 %vm721_vm1, %v4941_v35  ;;  %4725 = vmatmul.mubr.msk.bf16.vlgmr.msra.gmra.mrb[16].mxu1 %vm721_vm1, %v4943_v36 }
  0x48   : > { %4729 = vmatpush3.bf16.xpose.msra.mxu0 %v1296_v38  ;;  %4735 = vmatpush3.bf16.xpose.msra.mxu1 %v1353_v39 }
  0x49   : > { %4730 = vmatprep.mubr.msk.bf16.mxu0 %vm5244_vm0, %v6847_v0  ;;  %4740 = vmatprep.subr.bf16.mxu0 %v6847_v0 }
  0x4a   : > { %4736 = vmatprep.mubr.msk.bf16.mxu1 %vm5244_vm0, %v6847_v0  ;;  %4746 = vmatprep.subr.bf16.mxu1 %v6847_v0 }
  0x4b   : > { %2285 = vrot.lane.b32.xlu1 %v5514_v49, %s5245_s26  ;;  %2287 = vrot.lane.b32.xlu0 %v5558_v61, %s5245_s26 }
  0x4f   : > { %4731 = vmatmul.mubr.msk.bf16.vlgmr.msra.gmra.mrb[20].mxu0 %vm721_vm1, %v4945_v44  ;;  %4737 = vmatmul.mubr.msk.bf16.vlgmr.msra.gmra.mrb[20].mxu1 %vm721_vm1, %v4947_v45 }
  0x50   : > { %4741 = vmatpush3.bf16.xpose.msra.mxu0 %v1410_v47  ;;  %4747 = vmatpush3.bf16.xpose.msra.mxu1 %v1467_v48 }
  0x51   : > { %4742 = vmatprep.mubr.msk.bf16.mxu0 %vm5244_vm0, %v6847_v0  ;;  %4752 = vmatprep.subr.bf16.mxu0 %v6847_v0 }
  0x52   : > { %4748 = vmatprep.mubr.msk.bf16.mxu1 %vm5244_vm0, %v6847_v0  ;;  %4758 = vmatprep.subr.bf16.mxu1 %v6847_v0 }
  0x53   : > { %2289 = vrot.lane.b32.xlu1 %v5534_v55, %s5245_s26  ;;  %2291 = vrot.lane.b32.xlu0 %v5572_v1, %s5245_s26 }
  0x57   : > { %4743 = vmatmul.mubr.msk.bf16.vlgmr.msra.gmra.mrb[24].mxu0 %vm721_vm1, %v4949_v53  ;;  %4749 = vmatmul.mubr.msk.bf16.vlgmr.msra.gmra.mrb[24].mxu1 %vm721_vm1, %v4951_v54 }
  0x58   : > { %4753 = vmatpush3.bf16.xpose.msra.mxu0 %v1524_v56  ;;  %4759 = vmatpush3.bf16.xpose.msra.mxu1 %v1581_v57 }
  0x59   : > { %4754 = vmatprep.mubr.msk.bf16.mxu0 %vm5244_vm0, %v6847_v0  ;;  %4760 = vmatprep.mubr.msk.bf16.mxu1 %vm5244_vm0, %v6847_v0 }
  0x5a   : > { %2293 = vrot.lane.b32.xlu1 %v5546_v59, %s5245_s26  ;;  %4764 = vmatprep.subr.bf16.mxu0 %v6847_v0 }
  0x5b   : > { %4770 = vmatprep.subr.bf16.mxu1 %v6847_v0  ;;  %2295 = vrot.lane.b32.xlu0 %v5587_v3, %s5245_s26 }
  0x5e   : > { %2297 = vrot.lane.b32.xlu1 %v5563_v63, %s5245_s26 }
  0x5f   : > { %4755 = vmatmul.mubr.msk.bf16.vlgmr.msra.gmra.mrb[28].mxu0 %vm721_vm1, %v4953_v60  ;;  %4761 = vmatmul.mubr.msk.bf16.vlgmr.msra.gmra.mrb[28].mxu1 %vm721_vm1, %v4954_v62  ;;  %v5246_v60 = vmov 0  }
  0x60   : > { %4766 = vmatprep.mubr.msk.bf16.mxu0 %vm5244_vm0, %v6847_v0  ;;  %4772 = vmatprep.mubr.msk.bf16.mxu1 %vm5244_vm0, %v6847_v0 }
  0x61   : > { %2299 = vrot.lane.b32.xlu0 %v5597_v5, %s5245_s26  ;;  %4922 = vset.pattern.permute.xlu1 %v5246_v60 }
  0x62   : > { %2301 = vrot.lane.b32.xlu1 %v5576_v2, %s5245_s26  ;;  %4921 = vset.pattern.permute.xlu0 %v5246_v60 }
  0x65   : > { %2303 = vrot.lane.b32.xlu0 %v5607_v7, %s5245_s26 }
  0x66   : > { %2305 = vrot.lane.b32.xlu1 %v5590_v4, %s5245_s26 }
  0x69   : > { %2307 = vrot.lane.b32.xlu0 %v5617_v9, %s5245_s26 }
  0x6a   : > { %2309 = vrot.lane.b32.xlu1 %v5600_v6, %s5245_s26 }
  0x6d   : > { %2311 = vrot.lane.b32.xlu0 %v5627_v11, %s5245_s26 }
  0x6e   : > { %2313 = vrot.lane.b32.xlu1 %v5610_v8, %s5245_s26 }
  0x71   : > { %2315 = vrot.lane.b32.xlu0 %v5637_v13, %s5245_s26 }
  0x72   : > { %2317 = vrot.lane.b32.xlu1 %v5620_v10, %s5245_s26 }
  0x75   : > { %2319 = vrot.lane.b32.xlu0 %v5647_v15, %s5245_s26 }
  0x76   : > { %2321 = vrot.lane.b32.xlu1 %v5630_v12, %s5245_s26 }
  0x79   : > { %2323 = vrot.lane.b32.xlu0 %v5652_v16, %s5245_s26 }
  0x7a   : > { %2325 = vrot.lane.b32.xlu1 %v5640_v14, %s5245_s26 }
  0xfa   : > { %v5656_v17 = vpop.f32.mrb[0].mxu0  ;;  %v5658_v18 = vpop.f32.mrb[0].mxu1 }
  0xfb   : > { %v4672_v19 = vpop.f32.mrb[1].mxu0  ;;  %v1657_v20 = vsel %vm1656_vm2, %v5656_v17, -inf  ;;  %v4678_v21 = vpop.f32.mrb[1].mxu1  ;;  %v1663_v22 = vsel %vm1656_vm2, %v5658_v18, -inf }
  0xfc   : > { %1658 = vmax.xlane.f32.xlu0 %v1657_v20  ;;  %v5664_v23 = vpop.f32.mrb[2].mxu0  ;;  %1664 = vmax.xlane.f32.xlu1 %v1663_v22  ;;  %v5666_v24 = vpop.f32.mrb[2].mxu1 }
  0xfd   : > { %6884 = vst [vmem:[#allocation6_spill] sm:$0xff] %v5664_v23  ;;  %6885 = vst [vmem:[#allocation7_spill] sm:$0xff] %v5666_v24  ;;  %v4673_v25 = vpop.f32.mrb[3].mxu0  ;;  %v4679_v26 = vpop.f32.mrb[3].mxu1  ;;  %v1660_v27 = vsel %vm1656_vm2, %v5664_v23, -inf  ;;  %v1666_v29 = vsel %vm1656_vm2, %v5666_v24, -inf }
 0x100   : > { %1661 = vmax.xlane.f32.xlu0 %v1660_v27  ;;  %1667 = vmax.xlane.f32.xlu1 %v1666_v29 }
 0x102   : > { %v5672_v32 = vpop.f32.mrb[4].mxu0  ;;  %v5676_v36 = vpop.f32.mrb[4].mxu1 }
 0x103   : > { %6886 = vst [vmem:[#allocation8_spill] sm:$0xff] %v5672_v32  ;;  %v4684_v34 = vpop.f32.mrb[5].mxu0  ;;  %v1669_v35 = vsel %vm1656_vm2, %v5672_v32, -inf  ;;  %6887 = vst [vmem:[#allocation9_spill] sm:$0xff] %v5676_v36  ;;  %v4690_v39 = vpop.f32.mrb[5].mxu1  ;;  %v1675_v45 = vsel %vm1656_vm2, %v5676_v36, -inf }
 0x104   : > { %1670 = vmax.xlane.f32.xlu0 %v1669_v35  ;;  %v5678_v38 = vpop.f32.mrb[6].mxu0  ;;  %v5682_v44 = vpop.f32.mrb[6].mxu1 }
 0x105   : > { %6888 = vst [vmem:[#allocation10_spill] sm:$0xff] %v5678_v38  ;;  %v1672_v41 = vsel %vm1656_vm2, %v5678_v38, -inf  ;;  %v4685_v43 = vpop.f32.mrb[7].mxu0  ;;  %6889 = vst [vmem:[#allocation11_spill] sm:$0xff] %v5682_v44  ;;  %v4691_v47 = vpop.f32.mrb[7].mxu1  ;;  %v1678_v48 = vsel %vm1656_vm2, %v5682_v44, -inf }
 0x106   : > { %1673 = vmax.xlane.f32.xlu1 %v1672_v41 }
 0x108   : > { %1676 = vmax.xlane.f32.xlu0 %v1675_v45 }
 0x10a   : > { %1679 = vmax.xlane.f32.xlu1 %v1678_v48  ;;  %v5688_v50 = vpop.f32.mrb[8].mxu0  ;;  %v5692_v54 = vpop.f32.mrb[8].mxu1 }
 0x10b   : > { %6890 = vst [vmem:[#allocation12_spill] sm:$0xff] %v5688_v50  ;;  %v4696_v52 = vpop.f32.mrb[9].mxu0  ;;  %v1681_v53 = vsel %vm1656_vm2, %v5688_v50, -inf  ;;  %6891 = vst [vmem:[#allocation13_spill] sm:$0xff] %v5692_v54  ;;  %v4702_v57 = vpop.f32.mrb[9].mxu1  ;;  %v1687_v20 = vsel %vm1656_vm2, %v5692_v54, -inf }
 0x10c   : > { %1682 = vmax.xlane.f32.xlu0 %v1681_v53  ;;  %v5694_v56 = vpop.f32.mrb[10].mxu0  ;;  %v5698_v19 = vpop.f32.mrb[10].mxu1 }
 0x10d   : > { %6892 = vst [vmem:[#allocation14_spill] sm:$0xff] %v5694_v56  ;;  %v1684_v62 = vsel %vm1656_vm2, %v5694_v56, -inf  ;;  %6893 = vst [vmem:[#allocation15_spill] sm:$0xff] %v5698_v19  ;;  %v4697_v21 = vpop.f32.mrb[11].mxu0  ;;  %v4703_v22 = vpop.f32.mrb[11].mxu1  ;;  %v1690_v25 = vsel %vm1656_vm2, %v5698_v19, -inf }
 0x10e   : > { %1685 = vmax.xlane.f32.xlu1 %v1684_v62 }
 0x110   : > { %1688 = vmax.xlane.f32.xlu0 %v1687_v20 }
 0x112   : > { %1691 = vmax.xlane.f32.xlu1 %v1690_v25  ;;  %v5704_v26 = vpop.f32.mrb[12].mxu0  ;;  %v5708_v34 = vpop.f32.mrb[12].mxu1 }
 0x113   : > { %6894 = vst [vmem:[#allocation16_spill] sm:$0xff] %v5704_v26  ;;  %v4708_v27 = vpop.f32.mrb[13].mxu0  ;;  %v1693_v29 = vsel %vm1656_vm2, %v5704_v26, -inf  ;;  %6895 = vst [vmem:[#allocation17_spill] sm:$0xff] %v5708_v34  ;;  %v4714_v39 = vpop.f32.mrb[13].mxu1  ;;  %v1699_v45 = vsel %vm1656_vm2, %v5708_v34, -inf }
 0x114   : > { %1694 = vmax.xlane.f32.xlu0 %v1693_v29  ;;  %v5710_v35 = vpop.f32.mrb[14].mxu0  ;;  %v5714_v43 = vpop.f32.mrb[14].mxu1  ;;  %v4956_v34 = vld [vmem:[%s5874_s29 + $0x8] sm:$0xff]  }
 0x115   : > { %6896 = vst [vmem:[#allocation18_spill] sm:$0xff] %v5710_v35  ;;  %v1696_v41 = vsel %vm1656_vm2, %v5710_v35, -inf  ;;  %6897 = vst [vmem:[#allocation19_spill] sm:$0xff] %v5714_v43  ;;  %v4709_v47 = vpop.f32.mrb[15].mxu0  ;;  %v4715_v48 = vpop.f32.mrb[15].mxu1  ;;  %v1702_v52 = vsel %vm1656_vm2, %v5714_v43, -inf  ;;  %4771 = vmatpush3.bf16.msra.mxu1 %v4956_v34 }
 0x116   : > { %1697 = vmax.xlane.f32.xlu1 %v1696_v41 }
 0x118   : > { %1700 = vmax.xlane.f32.xlu0 %v1699_v45 }
 0x11a   : > { %1703 = vmax.xlane.f32.xlu1 %v1702_v52  ;;  %v5720_v53 = vpop.f32.mrb[16].mxu0  ;;  %v5724_v62 = vpop.f32.mrb[16].mxu1 }
 0x11b   : > { %6898 = vst [vmem:[#allocation20_spill] sm:$0xff] %v5720_v53  ;;  %v4720_v57 = vpop.f32.mrb[17].mxu0  ;;  %v1705_v60 = vsel %vm1656_vm2, %v5720_v53, -inf  ;;  %6899 = vst [vmem:[#allocation21_spill] sm:$0xff] %v5724_v62  ;;  %v4726_v21 = vpop.f32.mrb[17].mxu1  ;;  %v1711_v27 = vsel %vm1656_vm2, %v5724_v62, -inf }
 0x11c   : > { %1706 = vmax.xlane.f32.xlu0 %v1705_v60  ;;  %v5726_v20 = vpop.f32.mrb[18].mxu0  ;;  %v5730_v25 = vpop.f32.mrb[18].mxu1 }
 0x11d   : > { %6900 = vst [vmem:[#allocation22_spill] sm:$0xff] %v5726_v20  ;;  %v1708_v22 = vsel %vm1656_vm2, %v5726_v20, -inf  ;;  %6901 = vst [vmem:[#allocation23_spill] sm:$0xff] %v5730_v25  ;;  %v4721_v29 = vpop.f32.mrb[19].mxu0  ;;  %v4727_v39 = vpop.f32.mrb[19].mxu1  ;;  %v1714_v41 = vsel %vm1656_vm2, %v5730_v25, -inf }
 0x11e   : > { %1709 = vmax.xlane.f32.xlu1 %v1708_v22 }
 0x120   : > { %1712 = vmax.xlane.f32.xlu0 %v1711_v27 }
 0x122   : > { %1715 = vmax.xlane.f32.xlu1 %v1714_v41  ;;  %v5736_v45 = vpop.f32.mrb[20].mxu0  ;;  %v5740_v52 = vpop.f32.mrb[20].mxu1 }
 0x123   : > { %6902 = vst [vmem:[#allocation24_spill] sm:$0xff] %v5736_v45  ;;  %v4732_v47 = vpop.f32.mrb[21].mxu0  ;;  %v1717_v48 = vsel %vm1656_vm2, %v5736_v45, -inf  ;;  %6903 = vst [vmem:[#allocation25_spill] sm:$0xff] %v5740_v52  ;;  %v4738_v60 = vpop.f32.mrb[21].mxu1  ;;  %v1723_v27 = vsel %vm1656_vm2, %v5740_v52, -inf }
 0x124   : > { %1718 = vmax.xlane.f32.xlu0 %v1717_v48  ;;  %v5742_v57 = vpop.f32.mrb[22].mxu0  ;;  %v5746_v22 = vpop.f32.mrb[22].mxu1 }
 0x125   : > { %6904 = vst [vmem:[#allocation26_spill] sm:$0xff] %v5742_v57  ;;  %v1720_v21 = vsel %vm1656_vm2, %v5742_v57, -inf  ;;  %6905 = vst [vmem:[#allocation27_spill] sm:$0xff] %v5746_v22  ;;  %v4733_v29 = vpop.f32.mrb[23].mxu0  ;;  %v4739_v39 = vpop.f32.mrb[23].mxu1  ;;  %v1726_v41 = vsel %vm1656_vm2, %v5746_v22, -inf }
 0x126   : > { %1721 = vmax.xlane.f32.xlu1 %v1720_v21  ;;  %v5752_v47 = vpop.permute.xlu1 %2267 }
 0x127   : > { %6906 = vst [vmem:[#allocation28_spill] sm:$0xff] %v5752_v47 }
 0x128   : > { %1724 = vmax.xlane.f32.xlu0 %v1723_v27 }
 0x12a   : > { %1727 = vmax.xlane.f32.xlu1 %v1726_v41  ;;  %v5754_v48 = vpop.f32.mrb[24].mxu0  ;;  %v5758_v45 = vpop.f32.mrb[24].mxu1 }
 0x12b   : > { %6907 = vst [vmem:[#allocation29_spill] sm:$0xff] %v5754_v48  ;;  %v4744_v60 = vpop.f32.mrb[25].mxu0  ;;  %v1729_v0 = vsel %vm1656_vm2, %v5754_v48, -inf  ;;  %6908 = vst [vmem:[#allocation30_spill] sm:$0xff] %v5758_v45  ;;  %v4750_v21 = vpop.f32.mrb[25].mxu1  ;;  %v1735_v27 = vsel %vm1656_vm2, %v5758_v45, -inf }
 0x12c   : > { %1730 = vmax.xlane.f32.xlu0 %v1729_v0  ;;  %v5760_v52 = vpop.f32.mrb[26].mxu0  ;;  %v5764_v39 = vpop.f32.mrb[26].mxu1 }
 0x12d   : > { %6909 = vst [vmem:[#allocation31_spill] sm:$0xff] %v5760_v52  ;;  %v1732_v29 = vsel %vm1656_vm2, %v5760_v52, -inf  ;;  %6910 = vst [vmem:[#allocation32_spill] sm:$0xff] %v5764_v39  ;;  %v4745_v41 = vpop.f32.mrb[27].mxu0  ;;  %v4751_v60 = vpop.f32.mrb[27].mxu1  ;;  %v1738_v47 = vsel %vm1656_vm2, %v5764_v39, -inf }
 0x12e   : > { %1733 = vmax.xlane.f32.xlu1 %v1732_v29  ;;  %v5770_v48 = vpop.permute.xlu0 %2265  ;;  %v5772_v0 = vpop.permute.xlu1 %2269 }
 0x12f   : > { %6911 = vst [vmem:[#allocation33_spill] sm:$0xff] %v5770_v48  ;;  %6912 = vst [vmem:[#allocation34_spill] sm:$0xff] %v5772_v0 }
 0x130   : > { %1736 = vmax.xlane.f32.xlu0 %v1735_v27 }
 0x132   : > { %1739 = vmax.xlane.f32.xlu1 %v1738_v47  ;;  %v5774_v21 = vpop.f32.mrb[28].mxu0  ;;  %v5778_v62 = vpop.f32.mrb[28].mxu1 }
 0x133   : > { %6913 = vst [vmem:[#allocation35_spill] sm:$0xff] %v5774_v21  ;;  %v4756_v52 = vpop.f32.mrb[29].mxu0  ;;  %v1741_v22 = vsel %vm1656_vm2, %v5774_v21, -inf  ;;  %6914 = vst [vmem:[#allocation36_spill] sm:$0xff] %v5778_v62  ;;  %v4762_v41 = vpop.f32.mrb[29].mxu1  ;;  %v1747_v60 = vsel %vm1656_vm2, %v5778_v62, -inf }
 0x134   : > { %1742 = vmax.xlane.f32.xlu0 %v1741_v22  ;;  %v5780_v29 = vpop.f32.mrb[30].mxu0  ;;  %v5786_v0 = vpop.f32.mrb[30].mxu1 }
 0x135   : > { %6915 = vst [vmem:[#allocation37_spill] sm:$0xff] %v5780_v29  ;;  %v1744_v27 = vsel %vm1656_vm2, %v5780_v29, -inf  ;;  %6916 = vst [vmem:[#allocation38_spill] sm:$0xff] %v5786_v0  ;;  %v4757_v47 = vpop.f32.mrb[31].mxu0  ;;  %v4763_v52 = vpop.f32.mrb[31].mxu1  ;;  %v1750_v21 = vsel %vm1656_vm2, %v5786_v0, -inf }
 0x136   : > { %1745 = vmax.xlane.f32.xlu1 %v1744_v27  ;;  %v5788_v48 = vpop.permute.xlu0 %2271  ;;  %v5792_v22 = vpop.permute.xlu1 %2273 }
 0x137   : > { %6917 = vst [vmem:[#allocation39_spill] sm:$0xff] %v5788_v48  ;;  %6918 = vst [vmem:[#allocation40_spill] sm:$0xff] %v5792_v22 }
 0x138   : > { %1748 = vmax.xlane.f32.xlu0 %v1747_v60 }
 0x13a   : > { %1751 = vmax.xlane.f32.xlu1 %v1750_v21  ;;  %v5794_v41 = vpop.permute.xlu0 %2275  ;;  %v5796_v45 = vpop.permute.xlu1 %2277 }
 0x13b   : > { %6919 = vst [vmem:[#allocation41_spill] sm:$0xff] %v5794_v41  ;;  %6920 = vst [vmem:[#allocation42_spill] sm:$0xff] %v5796_v45 }
 0x13e   : > { %v5798_v29 = vpop.permute.xlu0 %2279  ;;  %v5800_v62 = vpop.permute.xlu1 %2281 }
 0x13f   : > { %6921 = vst [vmem:[#allocation43_spill] sm:$0xff] %v5798_v29  ;;  %6922 = vst [vmem:[#allocation44_spill] sm:$0xff] %v5800_v62 }
 0x142   : > { %v5802_v47 = vpop.permute.xlu0 %2283  ;;  %v5804_v27 = vpop.permute.xlu1 %2285 }
 0x143   : > { %6923 = vst [vmem:[#allocation45_spill] sm:$0xff] %v5802_v47  ;;  %6924 = vst [vmem:[#allocation46_spill] sm:$0xff] %v5804_v27 }
 0x146   : > { %v5806_v52 = vpop.permute.xlu0 %2287  ;;  %v5808_v48 = vpop.permute.xlu1 %2289 }
 0x147   : > { %6925 = vst [vmem:[#allocation47_spill] sm:$0xff] %v5806_v52  ;;  %6926 = vst [vmem:[#allocation48_spill] sm:$0xff] %v5808_v48 }
 0x14a   : > { %v5810_v0 = vpop.permute.xlu0 %2291  ;;  %v5812_v60 = vpop.permute.xlu1 %2293 }
 0x14b   : > { %6927 = vst [vmem:[#allocation49_spill] sm:$0xff] %v5810_v0  ;;  %6928 = vst [vmem:[#allocation50_spill] sm:$0xff] %v5812_v60 }
 0x14e   : > { %v5814_v21 = vpop.permute.xlu0 %2295  ;;  %v5816_v41 = vpop.permute.xlu1 %2297 }
 0x14f   : > { %6929 = vst [vmem:[#allocation51_spill] sm:$0xff] %v5814_v21  ;;  %6930 = vst [vmem:[#allocation52_spill] sm:$0xff] %v5816_v41 }
 0x152   : > { %v5818_v45 = vpop.permute.xlu0 %2299  ;;  %v5820_v29 = vpop.permute.xlu1 %2301 }
 0x153   : > { %6931 = vst [vmem:[#allocation53_spill] sm:$0xff] %v5818_v45  ;;  %6932 = vst [vmem:[#allocation54_spill] sm:$0xff] %v5820_v29 }
 0x156   : > { %v5822_v62 = vpop.permute.xlu0 %2303  ;;  %v5824_v47 = vpop.permute.xlu1 %2305 }
 0x157   : > { %6933 = vst [vmem:[#allocation55_spill] sm:$0xff] %v5822_v62  ;;  %6934 = vst [vmem:[#allocation56_spill] sm:$0xff] %v5824_v47 }
 0x15a   : > { %v5826_v27 = vpop.permute.xlu0 %2307  ;;  %v5828_v52 = vpop.permute.xlu1 %2309 }
 0x15b   : > { %6935 = vst [vmem:[#allocation57_spill] sm:$0xff] %v5826_v27  ;;  %6936 = vst [vmem:[#allocation58_spill] sm:$0xff] %v5828_v52 }
 0x15e   : > { %v5830_v0 = vpop.permute.xlu0 %2311  ;;  %v5832_v60 = vpop.permute.xlu1 %2313 }
 0x15f   : > { %6937 = vst [vmem:[#allocation59_spill] sm:$0xff] %v5830_v0  ;;  %6938 = vst [vmem:[#allocation60_spill] sm:$0xff] %v5832_v60 }
 0x162   : > { %v5834_v21 = vpop.permute.xlu0 %2315  ;;  %v5836_v41 = vpop.permute.xlu1 %2317 }
 0x163   : > { %6939 = vst [vmem:[#allocation61_spill] sm:$0xff] %v5834_v21  ;;  %6940 = vst [vmem:[#allocation62_spill] sm:$0xff] %v5836_v41  ;;  %v5852_v41 = vld [vmem:[%s5436_s21 + $0xf8] sm:$0xff] }
 0x166   : > { %v5838_v45 = vpop.permute.xlu0 %2319  ;;  %v5840_v29 = vpop.permute.xlu1 %2321 }
 0x167   : > { %6941 = vst [vmem:[#allocation63_spill] sm:$0xff] %v5838_v45  ;;  %6942 = vst [vmem:[#allocation64_spill] sm:$0xff] %v5840_v29 }
 0x16a   : > { %v5842_v62 = vpop.permute.xlu0 %2323  ;;  %v5844_v47 = vpop.permute.xlu1 %2325 }
 0x16b   : > { %6943 = vst [vmem:[#allocation65_spill] sm:$0xff] %v5842_v62  ;;  %6944 = vst [vmem:[#allocation66_spill] sm:$0xff] %v5844_v47 }
 0x189   : > { %v1659_v27 = vpop.xlane.xlu0 %1658  ;;  %v1665_v48 = vpop.xlane.xlu1 %1664 }
 0x18a   : > { %v1753_v52 = vmax.f32 %v1659_v27, %v5449_v30  ;;  %v5848_v0 = vmax.f32 %v1665_v48, %v5456_v31 }
 0x18c   : > { %1787 = vperm.xlu0 %4921, %v1753_v52   ;;  %1797 = vperm.xlu1 %4922, %v5848_v0  }
 0x18d   : > { %v1662_v21 = vpop.xlane.xlu0 %1661  ;;  %v1668_v29 = vpop.xlane.xlu1 %1667 }
 0x18e   : > { %v1754_v45 = vmax.f32 %v1662_v21, %v5443_v28  ;;  %v5859_v48 = vmax.f32 %v1668_v29, %v5462_v33  ;;  %v2041_v21 = vsub.f32 %v5449_v30, %v1753_v52 }
 0x190   : > { %v2042_v62 = vsub.f32 %v5443_v28, %v1754_v45  ;;  %2327 = vrot.lane.b32.xlu0 %v5852_v41, %s5245_s26  ;;  %1792 = vperm.xlu1 %4922, %v1754_v45   ;;  %v2073_v57 = vmul.f32 1.442695, %v2041_v21  ;;  %v6946_v21 = vmov 0.0   ;;  %s6565_s26 = scalar_lea.vmem %s6845_s8, %s5369_s25 }
 0x191   : > { %v1671_v27 = vpop.xlane.xlu0 %1670  ;;  %4782 = vmatprep.subr.bf16.mxu1 %v6946_v21 }
 0x192   : > { %v2075_v47 = vmul.f32 1.442695, %v2042_v62  ;;  %v5864_v39 = vmax.f32 %v1671_v27, %v5474_v37 }
 0x193   : > { %v1674_v60 = vpop.xlane.xlu1 %1673 }
 0x194   : > { %4971 = vpow2.f32 %v2075_v47  ;;  %1802 = vperm.xlu1 %4922, %v5859_v48   ;;  %v4955_v47 = vld [vmem:[%s5874_s29] sm:$0xff]   ;;  %v5881_v27 = vmax.f32 %v1674_v60, %v5491_v42 }
 0x195   : > { %v1677_v22 = vpop.xlane.xlu0 %1676  ;;  %4973 = vpow2.f32 %v2073_v57  ;;  %4765 = vmatpush3.bf16.msra.mxu0 %v4955_v47 }
 0x196   : > { %v5868_v62 = vmax.f32 %v1677_v22, %v5485_v40  ;;  %4776 = vmatprep.subr.bf16.mxu0 %v6946_v21 }
 0x197   : > { %v1680_v28 = vpop.xlane.xlu1 %1679 }
 0x198   : > { %1807 = vperm.xlu1 %4922, %v5864_v39   ;;  %v5891_v20 = vmax.f32 %v1680_v28, %v5520_v51 }
 0x199   : > { %v1683_v45 = vpop.xlane.xlu0 %1682 }
 0x19a   : > { %v5907_v34 = vmax.f32 %v1683_v45, %v5503_v46 }
 0x19b   : > { %v1686_v29 = vpop.xlane.xlu1 %1685 }
 0x19c   : > { %1817 = vperm.xlu1 %4922, %v5868_v62   ;;  %v5886_v53 = vmax.f32 %v1686_v29, %v5542_v58 }
 0x19d   : > { %v1689_v30 = vpop.xlane.xlu0 %1688 }
 0x19e   : > { %v5878_v52 = vpop.eup %4971  ;;  %v5915_v54 = vmax.f32 %v1689_v30, %v5514_v49 }
 0x19f   : > { %6945 = vst [vmem:[#allocation67_spill] sm:$0xff] %v5878_v52  ;;  %v1692_v22 = vpop.xlane.xlu1 %1691  ;;  %2544 = vperm.xlu0 %4921, %v5878_v52   ;;  %v5900_v52 = vpop.eup %4973 }
 0x1a0   : > { %1812 = vperm.xlu1 %4922, %v5881_v27   ;;  %v5896_v60 = vmax.f32 %v1692_v22, %v5558_v61  ;;  %6947 = vst [vmem:[#allocation68_spill] sm:$0xff] %v5900_v52 }
 0x1a1   : > { %v1695_v25 = vpop.xlane.xlu0 %1694 }
 0x1a2   : > { %v5923_v45 = vmax.f32 %v1695_v25, %v5534_v55 }
 0x1a3   : > { %v1698_v57 = vpop.xlane.xlu1 %1697  ;;  %1832 = vperm.xlu0 %4921, %v5886_v53  }
 0x1a4   : > { %1822 = vperm.xlu1 %4922, %v5891_v20   ;;  %v5903_v28 = vmax.f32 %v1698_v57, %v5572_v1 }
 0x1a5   : > { %v1701_v29 = vpop.xlane.xlu0 %1700 }
 0x1a6   : > { %v5931_v19 = vmax.f32 %v1701_v29, %v5546_v59 }
 0x1a7   : > { %v1704_v47 = vpop.xlane.xlu1 %1703  ;;  %1842 = vperm.xlu0 %4921, %v5896_v60  }
 0x1a8   : > { %2539 = vperm.xlu1 %4922, %v5900_v52   ;;  %v5911_v22 = vmax.f32 %v1704_v47, %v5587_v3 }
 0x1a9   : > { %v1707_v26 = vpop.xlane.xlu0 %1706 }
 0x1aa   : > { %v5939_v25 = vmax.f32 %v1707_v26, %v5563_v63 }
 0x1ab   : > { %v1710_v43 = vpop.xlane.xlu1 %1709  ;;  %1852 = vperm.xlu0 %4921, %v5903_v28  }
 0x1ac   : > { %1827 = vperm.xlu1 %4922, %v5907_v34   ;;  %v5919_v52 = vmax.f32 %v1710_v43, %v5597_v5 }
 0x1ad   : > { %v1713_v57 = vpop.xlane.xlu0 %1712 }
 0x1ae   : > { %v5947_v29 = vmax.f32 %v1713_v57, %v5576_v2  ;;  %v2046_v57 = vsub.f32 %v5491_v42, %v5881_v27 }
 0x1af   : > { %v1716_v35 = vpop.xlane.xlu1 %1715  ;;  %1862 = vperm.xlu0 %4921, %v5911_v22  }
 0x1b0   : > { %1837 = vperm.xlu1 %4922, %v5915_v54   ;;  %v5927_v47 = vmax.f32 %v1716_v35, %v5607_v7 }
 0x1b1   : > { %v1719_v30 = vpop.xlane.xlu0 %1718 }
 0x1b3   : > { %v1722_v50 = vpop.xlane.xlu1 %1721  ;;  %1872 = vperm.xlu0 %4921, %v5919_v52  }
 0x1b4   : > { %1847 = vperm.xlu1 %4922, %v5923_v45   ;;  %v5935_v43 = vmax.f32 %v1722_v50, %v5617_v9  ;;  %v2044_v50 = vsub.f32 %v5462_v33, %v5859_v48  ;;  %v2048_v48 = vsub.f32 %v5520_v51, %v5891_v20  ;;  %v2050_v20 = vsub.f32 %v5542_v58, %v5886_v53 }
 0x1b5   : > { %v1725_v35 = vpop.xlane.xlu0 %1724 }
 0x1b6   : > { %v2079_v32 = vmul.f32 1.442695, %v2044_v50  ;;  %v5967_v33 = vmax.f32 %v1725_v35, %v5600_v6  ;;  %v2087_v51 = vmul.f32 1.442695, %v2048_v48  ;;  %v2045_v35 = vsub.f32 %v5474_v37, %v5864_v39 }
 0x1b7   : > { %v1728_v56 = vpop.xlane.xlu1 %1727  ;;  %1882 = vperm.xlu0 %4921, %v5927_v47   ;;  %v2047_v37 = vsub.f32 %v5485_v40, %v5868_v62  ;;  %v2054_v48 = vsub.f32 %v5572_v1, %v5903_v28  ;;  %v2049_v40 = vsub.f32 %v5503_v46, %v5907_v34  ;;  %v2056_v1 = vsub.f32 %v5587_v3, %v5911_v22 }
 0x1b8   : > { %1857 = vperm.xlu1 %4922, %v5931_v19   ;;  %v5943_v21 = vmax.f32 %v1728_v56, %v5627_v11  ;;  %v5957_v56 = vmax.f32 %v1719_v30, %v5590_v4  ;;  %4975 = vpow2.f32 %v2079_v32  ;;  %v2081_v53 = vmul.f32 1.442695, %v2045_v35 }
 0x1b9   : > { %v1731_v36 = vpop.xlane.xlu0 %1730  ;;  %v2103_v34 = vmul.f32 1.442695, %v2056_v1  ;;  %v2060_v35 = vsub.f32 %v5607_v7, %v5927_v47 }
 0x1ba   : > { %v5979_v27 = vmax.f32 %v1731_v36, %v5610_v8 }
 0x1bb   : > { %v1734_v44 = vpop.xlane.xlu1 %1733  ;;  %1892 = vperm.xlu0 %4921, %v5935_v43  }
 0x1bc   : > { %1867 = vperm.xlu1 %4922, %v5939_v25   ;;  %v5953_v26 = vmax.f32 %v1734_v44, %v5637_v13  ;;  %v2083_v44 = vmul.f32 1.442695, %v2046_v57  ;;  %v2052_v57 = vsub.f32 %v5558_v61, %v5896_v60 }
 0x1bd   : > { %v1737_v30 = vpop.xlane.xlu0 %1736 }
 0x1be   : > { %4977 = vpow2.f32 %v2083_v44  ;;  %v5991_v36 = vmax.f32 %v1737_v30, %v5620_v10  ;;  %v2095_v44 = vmul.f32 1.442695, %v2052_v57  ;;  %v2085_v30 = vmul.f32 1.442695, %v2047_v37 }
 0x1bf   : > { %v1740_v38 = vpop.xlane.xlu1 %1739  ;;  %1902 = vperm.xlu0 %4921, %v5943_v21   ;;  %4979 = vpow2.f32 %v2087_v51  ;;  %v2051_v51 = vsub.f32 %v5514_v49, %v5915_v54  ;;  %v2057_v57 = vsub.f32 %v5563_v63, %v5939_v25  ;;  %v2059_v37 = vsub.f32 %v5576_v2, %v5947_v29 }
 0x1c0   : > { %1877 = vperm.xlu1 %4922, %v5947_v29   ;;  %v5963_v23 = vmax.f32 %v1740_v38, %v5647_v15  ;;  %v2043_v38 = vsub.f32 %v5456_v31, %v5848_v0  ;;  %v2091_v0 = vmul.f32 1.442695, %v2050_v20  ;;  %v2058_v20 = vsub.f32 %v5597_v5, %v5919_v52 }
 0x1c1   : > { %v1743_v31 = vpop.xlane.xlu0 %1742  ;;  %v2093_v22 = vmul.f32 1.442695, %v2051_v51 }
 0x1c2   : > { %v5997_v58 = vpop.eup %4975  ;;  %v6002_v39 = vmax.f32 %v1743_v31, %v5630_v12  ;;  %v2107_v54 = vmul.f32 1.442695, %v2058_v20  ;;  %v2055_v31 = vsub.f32 %v5546_v59, %v5931_v19 }
 0x1c3   : > { %1912 = vperm.xlu0 %4921, %v5953_v26   ;;  %v1746_v24 = vpop.xlane.xlu1 %1745 }
 0x1c4   : > { %1887 = vperm.xlu1 %4922, %v5957_v56   ;;  %v5973_v42 = vmax.f32 %v1746_v24, %v5652_v16  ;;  %v2077_v24 = vmul.f32 1.442695, %v2043_v38  ;;  %v2089_v38 = vmul.f32 1.442695, %v2049_v40  ;;  %v2101_v47 = vmul.f32 1.442695, %v2055_v31 }
 0x1c5   : > { %v1749_v61 = vpop.xlane.xlu0 %1748 }
 0x1c6   : > { %4981 = vpow2.f32 %v2077_v24  ;;  %v6013_v62 = vmax.f32 %v1749_v61, %v5640_v14  ;;  %v2053_v24 = vsub.f32 %v5534_v55, %v5923_v45  ;;  %v2111_v45 = vmul.f32 1.442695, %v2060_v35 }
 0x1c7   : > { %1922 = vperm.xlu0 %4921, %v5963_v23   ;;  %v1752_v50 = vpop.xlane.xlu1 %1751  ;;  %4983 = vpow2.f32 %v2091_v0  ;;  %v2062_v0 = vsub.f32 %v5617_v9, %v5935_v43  ;;  %v2105_v43 = vmul.f32 1.442695, %v2057_v57  ;;  %v2068_v61 = vsub.f32 %v5647_v15, %v5963_v23  ;;  %v6948_v57 = vld [vmem:[#allocation6_spill] sm:$0xff] }
 0x1c8   : > { %1897 = vperm.xlu1 %4922, %v5967_v33   ;;  %v5983_v32 = vmax.f32 %v1752_v50, %v5852_v41  ;;  %v6008_v60 = vpop.eup %4977  ;;  %4985 = vpow2.f32 %v2081_v53  ;;  %v2099_v50 = vmul.f32 1.442695, %v2054_v48  ;;  %v2097_v52 = vmul.f32 1.442695, %v2053_v24 }
 0x1c9   : > { %4987 = vpow2.f32 %v2095_v44  ;;  %v6019_v28 = vpop.eup %4979  ;;  %v2115_v19 = vmul.f32 1.442695, %v2062_v0  ;;  %v2064_v53 = vsub.f32 %v5627_v11, %v5943_v21  ;;  %v2066_v44 = vsub.f32 %v5637_v13, %v5953_v26 }
 0x1ca   : > { %4989 = vpow2.f32 %v2085_v30  ;;  %v2109_v21 = vmul.f32 1.442695, %v2059_v37  ;;  %v2061_v48 = vsub.f32 %v5590_v4, %v5957_v56  ;;  %v2063_v30 = vsub.f32 %v5600_v6, %v5967_v33 }
 0x1cb   : > { %1932 = vperm.xlu0 %4921, %v5973_v42   ;;  %4991 = vpow2.f32 %v2099_v50  ;;  %v2119_v25 = vmul.f32 1.442695, %v2064_v53  ;;  %v2123_v29 = vmul.f32 1.442695, %v2066_v44  ;;  %v2127_v56 = vmul.f32 1.442695, %v2068_v61 }
 0x1cc   : > { %1907 = vperm.xlu1 %4922, %v5979_v27   ;;  %4993 = vpow2.f32 %v2089_v38  ;;  %v2113_v26 = vmul.f32 1.442695, %v2061_v48  ;;  %v2070_v40 = vsub.f32 %v5652_v16, %v5973_v42  ;;  %v2117_v23 = vmul.f32 1.442695, %v2063_v30 }
 0x1cd   : > { %4995 = vpow2.f32 %v2103_v34  ;;  %v2065_v50 = vsub.f32 %v5610_v8, %v5979_v27  ;;  %v2072_v1 = vsub.f32 %v5852_v41, %v5983_v32  ;;  %v2067_v38 = vsub.f32 %v5620_v10, %v5991_v36 }
 0x1ce   : > { %4997 = vpow2.f32 %v2093_v22  ;;  %v2131_v33 = vmul.f32 1.442695, %v2070_v40  ;;  %v2071_v20 = vsub.f32 %v5640_v14, %v6013_v62 }
 0x1cf   : > { %1942 = vperm.xlu0 %4921, %v5983_v32   ;;  %4999 = vpow2.f32 %v2107_v54  ;;  %v2121_v42 = vmul.f32 1.442695, %v2065_v50  ;;  %v2135_v27 = vmul.f32 1.442695, %v2072_v1  ;;  %v2125_v41 = vmul.f32 1.442695, %v2067_v38 }
 0x1d0   : > { %1917 = vperm.xlu1 %4922, %v5991_v36   ;;  %v6024_v46 = vpop.eup %4981  ;;  %5001 = vpow2.f32 %v2097_v52  ;;  %v2069_v32 = vsub.f32 %v5630_v12, %v6002_v39 }
 0x1d1   : > { %v6029_v3 = vpop.eup %4983  ;;  %5003 = vpow2.f32 %v2111_v45 }
 0x1d2   : > { %v6034_v49 = vpop.eup %4985  ;;  %5005 = vpow2.f32 %v2101_v47  ;;  %v2129_v36 = vmul.f32 1.442695, %v2069_v32 }
 0x1d3   : > { %2554 = vperm.xlu0 %4921, %v5997_v58   ;;  %v6039_v5 = vpop.eup %4987  ;;  %5007 = vpow2.f32 %v2115_v19 }
 0x1d4   : > { %1927 = vperm.xlu1 %4922, %v6002_v39   ;;  %v6044_v55 = vpop.eup %4989  ;;  %5009 = vpow2.f32 %v2105_v43  ;;  %v2133_v39 = vmul.f32 1.442695, %v2071_v20 }
 0x1d5   : > { %v6049_v7 = vpop.eup %4991  ;;  %5011 = vpow2.f32 %v2119_v25  ;;  %v6949_v25 = vld [vmem:[#allocation7_spill] sm:$0xff] }
 0x1d6   : > { %v6054_v59 = vpop.eup %4993  ;;  %5013 = vpow2.f32 %v2109_v21 }
 0x1d7   : > { %2564 = vperm.xlu0 %4921, %v6008_v60   ;;  %v6059_v9 = vpop.eup %4995  ;;  %5015 = vpow2.f32 %v2123_v29  ;;  %v6950_v29 = vld [vmem:[#allocation8_spill] sm:$0xff] }
 0x1d8   : > { %1937 = vperm.xlu1 %4922, %v6013_v62   ;;  %v6064_v63 = vpop.eup %4997  ;;  %5017 = vpow2.f32 %v2113_v26 }
 0x1d9   : > { %v6069_v11 = vpop.eup %4999  ;;  %5019 = vpow2.f32 %v2127_v56 }
 0x1da   : > { %v6074_v2 = vpop.eup %5001  ;;  %5021 = vpow2.f32 %v2117_v23  ;;  %v4957_v23 = vld [vmem:[%s5874_s29 + $0x10] sm:$0xff]  }
 0x1db   : > { %2574 = vperm.xlu0 %4921, %v6019_v28   ;;  %v6079_v13 = vpop.eup %5003  ;;  %5023 = vpow2.f32 %v2131_v33  ;;  %v6952_v33 = vld [vmem:[#allocation9_spill] sm:$0xff] }
 0x1dc   : > { %2549 = vperm.xlu1 %4922, %v6024_v46   ;;  %v6084_v4 = vpop.eup %5005  ;;  %5025 = vpow2.f32 %v2121_v42 }
 0x1dd   : > { %v6089_v15 = vpop.eup %5007  ;;  %5027 = vpow2.f32 %v2135_v27  ;;  %v6953_v27 = vld [vmem:[#allocation10_spill] sm:$0xff] }
 0x1de   : > { %v6094_v6 = vpop.eup %5009  ;;  %5029 = vpow2.f32 %v2125_v41 }
 0x1df   : > { %2584 = vperm.xlu0 %4921, %v6029_v3   ;;  %v6099_v16 = vpop.eup %5011  ;;  %5031 = vpow2.f32 %v2129_v36 }
 0x1e0   : > { %2559 = vperm.xlu1 %4922, %v6034_v49   ;;  %v6104_v8 = vpop.eup %5013  ;;  %5033 = vpow2.f32 %v2133_v39 }
 0x1e1   : > { %v6107_v51 = vpop.eup %5015 }
 0x1e2   : > { %v6112_v34 = vpop.eup %5017 }
 0x1e3   : > { %2594 = vperm.xlu0 %4921, %v6039_v5   ;;  %v6115_v10 = vpop.eup %5019 }
 0x1e4   : > { %2569 = vperm.xlu1 %4922, %v6044_v55   ;;  %v6120_v22 = vpop.eup %5021 }
 0x1e5   : > { %v6123_v12 = vpop.eup %5023 }
 0x1e6   : > { %v6126_v24 = vpop.eup %5025 }
 0x1e7   : > { %2604 = vperm.xlu0 %4921, %v6049_v7   ;;  %v6129_v54 = vpop.eup %5027 }
 0x1e8   : > { %2579 = vperm.xlu1 %4922, %v6054_v59   ;;  %v6132_v62 = vpop.eup %5029 }
 0x1e9   : > { %v6136_v31 = vpop.eup %5031 }
 0x1ea   : > { %v6141_v43 = vpop.eup %5033 }
 0x1eb   : > { %2614 = vperm.xlu0 %4921, %v6059_v9  }
 0x1ec   : > { %2589 = vperm.xlu1 %4922, %v6064_v63  }
 0x1ef   : > { %2624 = vperm.xlu0 %4921, %v6069_v11  }
 0x1f0   : > { %2599 = vperm.xlu1 %4922, %v6074_v2  }
 0x1f3   : > { %2634 = vperm.xlu0 %4921, %v6079_v13  }
 0x1f4   : > { %2609 = vperm.xlu1 %4922, %v6084_v4  }
 0x1f7   : > { %2644 = vperm.xlu0 %4921, %v6089_v15  }
 0x1f8   : > { %2619 = vperm.xlu1 %4922, %v6094_v6  }
 0x1fb   : > { %2654 = vperm.xlu0 %4921, %v6099_v16  }
 0x1fc   : > { %2629 = vperm.xlu1 %4922, %v6104_v8  }
 0x1ff   : > { %2664 = vperm.xlu0 %4921, %v6107_v51  }
 0x200   : > { %2639 = vperm.xlu1 %4922, %v6112_v34  }
 0x203   : > { %2674 = vperm.xlu0 %4921, %v6115_v10  }
 0x204   : > { %2649 = vperm.xlu1 %4922, %v6120_v22  }
 0x207   : > { %2684 = vperm.xlu0 %4921, %v6123_v12  }
 0x208   : > { %2659 = vperm.xlu1 %4922, %v6126_v24  }
 0x20b   : > { %v1788_v14 = vpop.permute.xlu0 %1787  ;;  %2694 = vperm.xlu0 %4921, %v6129_v54   ;;  %v1798_v52 = vpop.permute.xlu1 %1797 }
 0x20c   : > { %v1945_v35 = vsub.f32 %v5656_v17, %v1788_v14  ;;  %2669 = vperm.xlu1 %4922, %v6132_v62   ;;  %v1947_v0 = vsub.f32 %v5658_v18, %v1798_v52  ;;  %v6954_v14 = vmov 0.0  }
 0x20e   : > { %v1977_v45 = vmul.f32 1.442695, %v1945_v35  ;;  %v1981_v37 = vmul.f32 1.442695, %v1947_v0  ;;  %v4958_v35 = vld [vmem:[%s5874_s29 + $0x18] sm:$0xff]  }
 0x20f   : > { %v1793_v47 = vpop.permute.xlu1 %1792  ;;  %v6145_v48 = vpop.permute.xlu0 %2327 }
 0x210   : > { %v1946_v19 = vsub.f32 %v6948_v57, %v1793_v47  ;;  %2679 = vperm.xlu1 %4922, %v6136_v31   ;;  %5035 = vpow2.f32 %v1977_v45  ;;  %v6955_v47 = vld [vmem:[#allocation11_spill] sm:$0xff] }
 0x212   : > { %v1979_v53 = vmul.f32 1.442695, %v1946_v19 }
 0x213   : > { %v1803_v17 = vpop.permute.xlu1 %1802 }
 0x214   : > { %5037 = vpow2.f32 %v1979_v53  ;;  %v1948_v44 = vsub.f32 %v6949_v25, %v1803_v17  ;;  %2689 = vperm.xlu1 %4922, %v6141_v43  }
 0x215   : > { %5039 = vpow2.f32 %v1981_v37  ;;  %v6956_v37 = vld [vmem:[#allocation14_spill] sm:$0xff] }
 0x216   : > { %v1983_v21 = vmul.f32 1.442695, %v1948_v44 }
 0x217   : > { %v1808_v18 = vpop.permute.xlu1 %1807 }
 0x218   : > { %5041 = vpow2.f32 %v1983_v21  ;;  %v1949_v61 = vsub.f32 %v6950_v29, %v1808_v18  ;;  %v6958_v29 = vld [vmem:[#allocation15_spill] sm:$0xff] }
 0x21a   : > { %v6148_v30 = vpop.eup %5035  ;;  %v1985_v50 = vmul.f32 1.442695, %v1949_v61 }
 0x21b   : > { %v1818_v26 = vpop.permute.xlu1 %1817 }
 0x21c   : > { %v1951_v1 = vsub.f32 %v6952_v33, %v1818_v26  ;;  %5043 = vpow2.f32 %v1985_v50 }
 0x21e   : > { %v6150_v56 = vpop.permute.xlu0 %2544  ;;  %v5038_v40 = vpop.eup %5037  ;;  %v1989_v52 = vmul.f32 1.442695, %v1951_v1 }
 0x21f   : > { %6951 = vst [vmem:[#allocation6_spill] sm:$0xff] %v6150_v56  ;;  %v1813_v42 = vpop.permute.xlu1 %1812  ;;  %v2457_v38 = vpack.c.bf16 %v5038_v40, %v6148_v30  ;;  %v5040_v32 = vpop.eup %5039  ;;  %v2140_v33 = vsel %vm1656_vm2, %v5038_v40, 0.0 }
 0x220   : > { %v1950_v41 = vsub.f32 %v6953_v27, %v1813_v42  ;;  %v2143_v44 = vsel %vm1656_vm2, %v5040_v32, 0.0 }
 0x221   : > { %4767 = vmatmul.mubr.msk.bf16.vlgmr.msra.gmra.mrb[32].mxu0 %vm1656_vm2, %v2457_v38 }
 0x222   : > { %v1833_v36 = vpop.permute.xlu0 %1832  ;;  %v6157_v20 = vpop.eup %5041  ;;  %v1987_v39 = vmul.f32 1.442695, %v1950_v41  ;;  %4777 = vmatpush3.bf16.msra.mxu0 %v4957_v23  ;;  %4778 = vmatprep.mubr.msk.bf16.mxu0 %vm5244_vm0, %v6954_v14  ;;  %v6959_v23 = vld [vmem:[#allocation12_spill] sm:$0xff]  ;;  %v4959_v41 = vld [vmem:[%s5874_s29 + $0x20] sm:$0xff]  }
 0x223   : > { %v1823_v45 = vpop.permute.xlu1 %1822  ;;  %v2458_v0 = vpack.c.bf16 %v6157_v20, %v5040_v32  ;;  %4788 = vmatprep.subr.bf16.mxu0 %v6954_v14  ;;  %v1954_v17 = vsub.f32 %v6956_v37, %v1833_v36  ;;  %v6960_v32 = vld [vmem:[#allocation18_spill] sm:$0xff] }
 0x224   : > { %5045 = vpow2.f32 %v1987_v39  ;;  %v1952_v57 = vsub.f32 %v6955_v47, %v1823_v45  ;;  %v6961_v45 = vld [vmem:[#allocation13_spill] sm:$0xff] }
 0x225   : > { %4773 = vmatmul.mubr.msk.bf16.vlgmr.msra.gmra.mrb[32].mxu1 %vm1656_vm2, %v2458_v0  ;;  %5047 = vpow2.f32 %v1989_v52  ;;  %v1995_v18 = vmul.f32 1.442695, %v1954_v17 }
 0x226   : > { %v1843_v19 = vpop.permute.xlu0 %1842  ;;  %v1991_v53 = vmul.f32 1.442695, %v1952_v57  ;;  %4783 = vmatpush3.bf16.msra.mxu1 %v4958_v35  ;;  %4784 = vmatprep.mubr.msk.bf16.mxu1 %vm5244_vm0, %v6954_v14  ;;  %v5044_v1 = vpop.eup %5043 }
 0x227   : > { %v6169_v25 = vpop.permute.xlu1 %2539  ;;  %4794 = vmatprep.subr.bf16.mxu1 %v6954_v14  ;;  %v1956_v61 = vsub.f32 %v6958_v29, %v1843_v19  ;;  %v2149_v40 = vsel %vm1656_vm2, %v5044_v1, 0.0 }
 0x228   : > { %6957 = vst [vmem:[#allocation7_spill] sm:$0xff] %v6169_v25  ;;  %5049 = vpow2.f32 %v1991_v53  ;;  %v6962_v53 = vld [vmem:[#allocation19_spill] sm:$0xff] }
 0x229   : > { %5051 = vpow2.f32 %v1995_v18  ;;  %v1999_v36 = vmul.f32 1.442695, %v1956_v61  ;;  %v6963_v61 = vld [vmem:[#allocation16_spill] sm:$0xff] }
 0x22a   : > { %v1853_v21 = vpop.permute.xlu0 %1852  ;;  %2144 = vadd.xlane.f32.xlu0 %v2143_v44  ;;  %v4960_v44 = vld [vmem:[%s5874_s29 + $0x28] sm:$0xff]  }
 0x22b   : > { %v1828_v26 = vpop.permute.xlu1 %1827  ;;  %v1958_v39 = vsub.f32 %v6960_v32, %v1853_v21  ;;  %v6965_v32 = vld [vmem:[#allocation17_spill] sm:$0xff] }
 0x22c   : > { %v1953_v50 = vsub.f32 %v6959_v23, %v1828_v26 }
 0x22d   : > { %v2003_v21 = vmul.f32 1.442695, %v1958_v39 }
 0x22e   : > { %v1863_v42 = vpop.permute.xlu0 %1862  ;;  %2141 = vadd.xlane.f32.xlu0 %v2140_v33  ;;  %v6176_v38 = vpop.eup %5045  ;;  %v1993_v27 = vmul.f32 1.442695, %v1953_v50 }
 0x22f   : > { %v1838_v35 = vpop.permute.xlu1 %1837  ;;  %v2459_v52 = vpack.c.bf16 %v6176_v38, %v5044_v1  ;;  %v5048_v47 = vpop.eup %5047  ;;  %v1960_v37 = vsub.f32 %v6962_v53, %v1863_v42  ;;  %v6964_v42 = vld [vmem:[#allocation22_spill] sm:$0xff]  ;;  %v6966_v53 = vld [vmem:[#allocation23_spill] sm:$0xff] }
 0x230   : > { %5053 = vpow2.f32 %v1993_v27  ;;  %v1955_v0 = vsub.f32 %v6961_v45, %v1838_v35  ;;  %v2155_v23 = vsel %vm1656_vm2, %v5048_v47, 0.0 }
 0x231   : > { %4779 = vmatmul.mubr.msk.bf16.vlgmr.msra.gmra.mrb[36].mxu0 %vm1656_vm2, %v2459_v52  ;;  %5055 = vpow2.f32 %v1999_v36  ;;  %v2007_v33 = vmul.f32 1.442695, %v1960_v37  ;;  %v2137_v36 = vsel %vm1656_vm2, %v6148_v30, 0.0 }
 0x232   : > { %v1873_v57 = vpop.permute.xlu0 %1872  ;;  %2150 = vadd.xlane.f32.xlu0 %v2149_v40  ;;  %v6184_v19 = vpop.eup %5049  ;;  %v1997_v17 = vmul.f32 1.442695, %v1955_v0  ;;  %4789 = vmatpush3.bf16.msra.mxu0 %v4959_v41  ;;  %v2146_v40 = vsel %vm1656_vm2, %v6157_v20, 0.0 }
 0x233   : > { %4790 = vmatprep.mubr.msk.bf16.mxu0 %vm5244_vm0, %v6954_v14  ;;  %v1848_v18 = vpop.permute.xlu1 %1847  ;;  %v2460_v29 = vpack.c.bf16 %v6184_v19, %v5048_v47  ;;  %4800 = vmatprep.subr.bf16.mxu0 %v6954_v14  ;;  %v1962_v27 = vsub.f32 %v6964_v42, %v1873_v57  ;;  %v5052_v35 = vpop.eup %5051  ;;  %v4961_v47 = vld [vmem:[%s5874_s29 + $0x30] sm:$0xff]  }
 0x234   : > { %5057 = vpow2.f32 %v1997_v17  ;;  %v1957_v26 = vsub.f32 %v6963_v61, %v1848_v18 }
 0x235   : > { %4785 = vmatmul.mubr.msk.bf16.vlgmr.msra.gmra.mrb[36].mxu1 %vm1656_vm2, %v2460_v29  ;;  %5059 = vpow2.f32 %v2003_v21  ;;  %v2011_v57 = vmul.f32 1.442695, %v1962_v27  ;;  %v6967_v21 = vld [vmem:[#allocation20_spill] sm:$0xff] }
 0x236   : > { %v1883_v50 = vpop.permute.xlu0 %1882  ;;  %2156 = vadd.xlane.f32.xlu0 %v2155_v23  ;;  %v2001_v1 = vmul.f32 1.442695, %v1957_v26  ;;  %4795 = vmatpush3.bf16.msra.mxu1 %v4960_v44  ;;  %v6968_v26 = vld [vmem:[#allocation26_spill] sm:$0xff] }
 0x237   : > { %4796 = vmatprep.mubr.msk.bf16.mxu1 %vm5244_vm0, %v6954_v14  ;;  %v1858_v41 = vpop.permute.xlu1 %1857  ;;  %4806 = vmatprep.subr.bf16.mxu1 %v6954_v14  ;;  %v1964_v37 = vsub.f32 %v6966_v53, %v1883_v50  ;;  %v2152_v50 = vsel %vm1656_vm2, %v6176_v38, 0.0  ;;  %v6970_v53 = vld [vmem:[#allocation27_spill] sm:$0xff] }
 0x238   : > { %5061 = vpow2.f32 %v2001_v1  ;;  %v1959_v39 = vsub.f32 %v6965_v32, %v1858_v41  ;;  %2138 = vadd.xlane.f32.xlu1 %v2137_v36  ;;  %v4962_v1 = vld [vmem:[%s5874_s29 + $0x38] sm:$0xff]  }
 0x239   : > { %5063 = vpow2.f32 %v2007_v33  ;;  %v2015_v42 = vmul.f32 1.442695, %v1964_v37  ;;  %v6969_v32 = vld [vmem:[#allocation21_spill] sm:$0xff] }
 0x23a   : > { %v1893_v52 = vpop.permute.xlu0 %1892  ;;  %v5054_v45 = vpop.eup %5053  ;;  %v2005_v0 = vmul.f32 1.442695, %v1959_v39 }
 0x23b   : > { %v1868_v17 = vpop.permute.xlu1 %1867  ;;  %v2161_v30 = vsel %vm1656_vm2, %v5054_v45, 0.0  ;;  %v2461_v44 = vpack.c.bf16 %v5052_v35, %v5054_v45  ;;  %v6208_v29 = vpop.eup %5055  ;;  %v1966_v23 = vsub.f32 %v6968_v26, %v1893_v52 }
 0x23c   : > { %5065 = vpow2.f32 %v2005_v0  ;;  %v1961_v18 = vsub.f32 %v6967_v21, %v1868_v17  ;;  %2147 = vadd.xlane.f32.xlu1 %v2146_v40  ;;  %2162 = vadd.xlane.f32.xlu0 %v2161_v30 }
 0x23d   : > { %4791 = vmatmul.mubr.msk.bf16.vlgmr.msra.gmra.mrb[40].mxu0 %vm1656_vm2, %v2461_v44  ;;  %5067 = vpow2.f32 %v2011_v57  ;;  %v2019_v0 = vmul.f32 1.442695, %v1966_v23  ;;  %v4963_v57 = vld [vmem:[%s5874_s29 + $0x40] sm:$0xff]   ;;  %v2164_v23 = vsel %vm1656_vm2, %v5052_v35, 0.0 }
 0x23e   : > { %v1903_v61 = vpop.permute.xlu0 %1902  ;;  %v5058_v20 = vpop.eup %5057  ;;  %v2009_v33 = vmul.f32 1.442695, %v1961_v18  ;;  %4801 = vmatpush3.bf16.msra.mxu0 %v4961_v47  ;;  %4802 = vmatprep.mubr.msk.bf16.mxu0 %vm5244_vm0, %v6954_v14  ;;  %v2158_v47 = vsel %vm1656_vm2, %v6184_v19, 0.0  ;;  %v6971_v19 = vld [vmem:[#allocation24_spill] sm:$0xff] }
 0x23f   : > { %v1878_v27 = vpop.permute.xlu1 %1877  ;;  %v2167_v41 = vsel %vm1656_vm2, %v5058_v20, 0.0  ;;  %v2462_v36 = vpack.c.bf16 %v6208_v29, %v5058_v20  ;;  %4812 = vmatprep.subr.bf16.mxu0 %v6954_v14  ;;  %v6221_v38 = vpop.eup %5059  ;;  %v1968_v37 = vsub.f32 %v6970_v53, %v1903_v61  ;;  %v4965_v53 = vld [vmem:[%s5874_s29 + $0x50] sm:$0xff]  }
 0x240   : > { %5069 = vpow2.f32 %v2009_v33  ;;  %v1963_v39 = vsub.f32 %v6969_v32, %v1878_v27  ;;  %2153 = vadd.xlane.f32.xlu1 %v2152_v50  ;;  %2168 = vadd.xlane.f32.xlu0 %v2167_v41  ;;  %v4964_v33 = vld [vmem:[%s5874_s29 + $0x48] sm:$0xff]   ;;  %v6973_v32 = vld [vmem:[#allocation25_spill] sm:$0xff] }
 0x241   : > { %4797 = vmatmul.mubr.msk.bf16.vlgmr.msra.gmra.mrb[40].mxu1 %vm1656_vm2, %v2462_v36  ;;  %5071 = vpow2.f32 %v2015_v42  ;;  %v2023_v50 = vmul.f32 1.442695, %v1968_v37 }
 0x242   : > { %v1913_v52 = vpop.permute.xlu0 %1912  ;;  %v5062_v45 = vpop.eup %5061  ;;  %v2013_v40 = vmul.f32 1.442695, %v1963_v39  ;;  %4807 = vmatpush3.bf16.msra.mxu1 %v4962_v1  ;;  %4808 = vmatprep.mubr.msk.bf16.mxu1 %vm5244_vm0, %v6954_v14  ;;  %v6972_v1 = vld [vmem:[#allocation31_spill] sm:$0xff] }
 0x243   : > { %v1888_v17 = vpop.permute.xlu1 %1887  ;;  %v2173_v30 = vsel %vm1656_vm2, %v5062_v45, 0.0  ;;  %v2463_v44 = vpack.c.bf16 %v6221_v38, %v5062_v45  ;;  %4818 = vmatprep.subr.bf16.mxu1 %v6954_v14  ;;  %v6233_v21 = vpop.eup %5063  ;;  %v1970_v42 = vsub.f32 %v6972_v1, %v1913_v52 }
 0x244   : > { %5073 = vpow2.f32 %v2013_v40  ;;  %v1965_v18 = vsub.f32 %v6971_v19, %v1888_v17  ;;  %2159 = vadd.xlane.f32.xlu1 %v2158_v47  ;;  %2174 = vadd.xlane.f32.xlu0 %v2173_v30  ;;  %v6975_v19 = vld [vmem:[#allocation29_spill] sm:$0xff] }
 0x245   : > { %4803 = vmatmul.mubr.msk.bf16.vlgmr.msra.gmra.mrb[44].mxu0 %vm1656_vm2, %v2463_v44  ;;  %5075 = vpow2.f32 %v2019_v0  ;;  %v6974_v0 = vld [vmem:[#allocation32_spill] sm:$0xff]  ;;  %v2027_v37 = vmul.f32 1.442695, %v1970_v42 }
 0x246   : > { %v1923_v20 = vpop.permute.xlu0 %1922  ;;  %v5066_v26 = vpop.eup %5065  ;;  %v2017_v61 = vmul.f32 1.442695, %v1965_v18  ;;  %4813 = vmatpush3.bf16.msra.mxu0 %v4963_v57  ;;  %4814 = vmatprep.mubr.msk.bf16.mxu0 %vm5244_vm0, %v6954_v14  ;;  %v2170_v57 = vsel %vm1656_vm2, %v6208_v29, 0.0 }
 0x247   : > { %v1898_v27 = vpop.permute.xlu1 %1897  ;;  %v2179_v41 = vsel %vm1656_vm2, %v5066_v26, 0.0  ;;  %v2464_v36 = vpack.c.bf16 %v6233_v21, %v5066_v26  ;;  %4824 = vmatprep.subr.bf16.mxu0 %v6954_v14  ;;  %v6246_v35 = vpop.eup %5067  ;;  %v1972_v52 = vsub.f32 %v6974_v0, %v1923_v20 }
 0x248   : > { %5077 = vpow2.f32 %v2017_v61  ;;  %v1967_v39 = vsub.f32 %v6973_v32, %v1898_v27  ;;  %2165 = vadd.xlane.f32.xlu1 %v2164_v23  ;;  %2180 = vadd.xlane.f32.xlu0 %v2179_v41  ;;  %v2176_v23 = vsel %vm1656_vm2, %v6221_v38, 0.0  ;;  %v6977_v32 = vld [vmem:[#allocation30_spill] sm:$0xff] }
 0x249   : > { %4809 = vmatmul.mubr.msk.bf16.vlgmr.msra.gmra.mrb[44].mxu1 %vm1656_vm2, %v2464_v36  ;;  %5079 = vpow2.f32 %v2023_v50  ;;  %v2031_v26 = vmul.f32 1.442695, %v1972_v52  ;;  %v6976_v50 = vld [vmem:[#allocation37_spill] sm:$0xff]  ;;  %v2182_v52 = vsel %vm1656_vm2, %v6233_v21, 0.0 }
 0x24a   : > { %v5070_v45 = vpop.eup %5069  ;;  %v2021_v40 = vmul.f32 1.442695, %v1967_v39  ;;  %v1933_v47 = vpop.permute.xlu0 %1932  ;;  %4819 = vmatpush3.bf16.msra.mxu1 %v4964_v33  ;;  %4820 = vmatprep.mubr.msk.bf16.mxu1 %vm5244_vm0, %v6954_v14  ;;  %v4966_v33 = vld [vmem:[%s5874_s29 + $0x58] sm:$0xff]  }
 0x24b   : > { %v1908_v17 = vpop.permute.xlu1 %1907  ;;  %v2185_v30 = vsel %vm1656_vm2, %v5070_v45, 0.0  ;;  %v2465_v44 = vpack.c.bf16 %v6246_v35, %v5070_v45  ;;  %4830 = vmatprep.subr.bf16.mxu1 %v6954_v14  ;;  %v6259_v29 = vpop.eup %5071  ;;  %v1974_v1 = vsub.f32 %v6976_v50, %v1933_v47 }
 0x24c   : > { %5081 = vpow2.f32 %v2021_v40  ;;  %v1969_v18 = vsub.f32 %v6975_v19, %v1908_v17  ;;  %2171 = vadd.xlane.f32.xlu1 %v2170_v57  ;;  %2186 = vadd.xlane.f32.xlu0 %v2185_v30  ;;  %v4967_v40 = vld [vmem:[%s5874_s29 + $0x60] sm:$0xff]  }
 0x24d   : > { %4815 = vmatmul.mubr.msk.bf16.vlgmr.msra.gmra.mrb[48].mxu0 %vm1656_vm2, %v2465_v44  ;;  %5083 = vpow2.f32 %v2027_v37  ;;  %v2035_v47 = vmul.f32 1.442695, %v1974_v1  ;;  %v6978_v57 = vld [vmem:[#allocation38_spill] sm:$0xff]  ;;  %v6979_v44 = vld [vmem:[#allocation35_spill] sm:$0xff] }
 0x24e   : > { %v5074_v20 = vpop.eup %5073  ;;  %v2025_v61 = vmul.f32 1.442695, %v1969_v18  ;;  %4825 = vmatpush3.bf16.msra.mxu0 %v4965_v53  ;;  %4826 = vmatprep.mubr.msk.bf16.mxu0 %vm5244_vm0, %v6954_v14  ;;  %v1943_v38 = vpop.permute.xlu0 %1942 }
 0x24f   : > { %v1918_v42 = vpop.permute.xlu1 %1917  ;;  %v2191_v27 = vsel %vm1656_vm2, %v5074_v20, 0.0  ;;  %v2466_v41 = vpack.c.bf16 %v6259_v29, %v5074_v20  ;;  %4836 = vmatprep.subr.bf16.mxu0 %v6954_v14  ;;  %v6271_v36 = vpop.eup %5075  ;;  %v1976_v53 = vsub.f32 %v6978_v57, %v1943_v38  ;;  %v4970_v57 = vld [vmem:[%s5874_s29 + $0x78] sm:$0xff]  }
 0x250   : > { %5085 = vpow2.f32 %v2025_v61  ;;  %v1971_v39 = vsub.f32 %v6977_v32, %v1918_v42  ;;  %2177 = vadd.xlane.f32.xlu1 %v2176_v23  ;;  %2192 = vadd.xlane.f32.xlu0 %v2191_v27  ;;  %v4968_v61 = vld [vmem:[%s5874_s29 + $0x68] sm:$0xff]   ;;  %v6980_v42 = vld [vmem:[#allocation36_spill] sm:$0xff] }
 0x251   : > { %4821 = vmatmul.mubr.msk.bf16.vlgmr.msra.gmra.mrb[48].mxu1 %vm1656_vm2, %v2466_v41  ;;  %5087 = vpow2.f32 %v2031_v26  ;;  %v2188_v26 = vsel %vm1656_vm2, %v6246_v35, 0.0  ;;  %v2039_v23 = vmul.f32 1.442695, %v1976_v53  ;;  %v4969_v32 = vld [vmem:[%s5874_s29 + $0x70] sm:$0xff]   ;;  %s6571_s29 = scalar_lea.vmem %s6844_s7, %s5369_s25  ;;  %s4258_s25 = sshll.u32 %s530_s19, 8 }
 0x252   : > { %v5078_v45 = vpop.eup %5077  ;;  %v2029_v0 = vmul.f32 1.442695, %v1971_v39  ;;  %4831 = vmatpush3.bf16.msra.mxu1 %v4966_v33  ;;  %4832 = vmatprep.mubr.msk.bf16.mxu1 %vm5244_vm0, %v6954_v14  ;;  %v2194_v39 = vsel %vm1656_vm2, %v6259_v29, 0.0  ;;  %v2200_v29 = vsel %vm1656_vm2, %v6271_v36, 0.0 }
 0x253   : > { %v1928_v37 = vpop.permute.xlu1 %1927  ;;  %v2197_v17 = vsel %vm1656_vm2, %v5078_v45, 0.0  ;;  %v2467_v30 = vpack.c.bf16 %v6271_v36, %v5078_v45  ;;  %4842 = vmatprep.subr.bf16.mxu1 %v6954_v14  ;;  %v5080_v21 = vpop.eup %5079 }
 0x254   : > { %5089 = vpow2.f32 %v2029_v0  ;;  %v1973_v19 = vsub.f32 %v6979_v44, %v1928_v37  ;;  %2183 = vadd.xlane.f32.xlu1 %v2182_v52  ;;  %2198 = vadd.xlane.f32.xlu0 %v2197_v17  ;;  %v2206_v44 = vsel %vm1656_vm2, %v5080_v21, 0.0 }
 0x255   : > { %4827 = vmatmul.mubr.msk.bf16.vlgmr.msra.gmra.mrb[52].mxu0 %vm1656_vm2, %v2467_v30  ;;  %5091 = vpow2.f32 %v2035_v47  ;;  %v6303_v47 = vpop.permute.xlu0 %2554 }
 0x256   : > { %v5082_v18 = vpop.eup %5081  ;;  %v2033_v20 = vmul.f32 1.442695, %v1973_v19  ;;  %4837 = vmatpush3.bf16.msra.mxu0 %v4967_v40  ;;  %4838 = vmatprep.mubr.msk.bf16.mxu0 %vm5244_vm0, %v6954_v14 }
 0x257   : > { %v1938_v33 = vpop.permute.xlu1 %1937  ;;  %v2203_v50 = vsel %vm1656_vm2, %v5082_v18, 0.0  ;;  %v2468_v1 = vpack.c.bf16 %v5080_v21, %v5082_v18  ;;  %4848 = vmatprep.subr.bf16.mxu0 %v6954_v14  ;;  %v5084_v35 = vpop.eup %5083 }
 0x258   : > { %5093 = vpow2.f32 %v2033_v20  ;;  %v1975_v27 = vsub.f32 %v6980_v42, %v1938_v33  ;;  %2189 = vadd.xlane.f32.xlu1 %v2188_v26  ;;  %2204 = vadd.xlane.f32.xlu0 %v2203_v50 }
 0x259   : > { %4833 = vmatmul.mubr.msk.bf16.vlgmr.msra.gmra.mrb[52].mxu1 %vm1656_vm2, %v2468_v1  ;;  %5095 = vpow2.f32 %v2039_v23  ;;  %v6316_v20 = vpop.permute.xlu0 %2564 }
 0x25a   : > { %v5086_v41 = vpop.eup %5085  ;;  %v2037_v38 = vmul.f32 1.442695, %v1975_v27  ;;  %4843 = vmatpush3.bf16.msra.mxu1 %v4968_v61  ;;  %4844 = vmatprep.mubr.msk.bf16.mxu1 %vm5244_vm0, %v6954_v14  ;;  %v2212_v61 = vsel %vm1656_vm2, %v5084_v35, 0.0 }
 0x25b   : > { %v2209_v45 = vsel %vm1656_vm2, %v5086_v41, 0.0  ;;  %v2469_v0 = vpack.c.bf16 %v5084_v35, %v5086_v41  ;;  %4854 = vmatprep.subr.bf16.mxu1 %v6954_v14  ;;  %v5088_v52 = vpop.eup %5087  ;;  %v6325_v50 = vpop.permute.xlu1 %2549 }
 0x25c   : > { %5097 = vpow2.f32 %v2037_v38  ;;  %2195 = vadd.xlane.f32.xlu1 %v2194_v39  ;;  %2210 = vadd.xlane.f32.xlu0 %v2209_v45  ;;  %v2218_v21 = vsel %vm1656_vm2, %v5088_v52, 0.0 }
 0x25d   : > { %4839 = vmatmul.mubr.msk.bf16.vlgmr.msra.gmra.mrb[56].mxu0 %vm1656_vm2, %v2469_v0 }
 0x25e   : > { %v5090_v40 = vpop.eup %5089  ;;  %4849 = vmatpush3.bf16.msra.mxu0 %v4969_v32  ;;  %4850 = vmatprep.mubr.msk.bf16.mxu0 %vm5244_vm0, %v6954_v14 }
 0x25f   : > { %v2215_v53 = vsel %vm1656_vm2, %v5090_v40, 0.0  ;;  %v2470_v37 = vpack.c.bf16 %v5088_v52, %v5090_v40  ;;  %v5092_v17 = vpop.eup %5091  ;;  %v6330_v27 = vpop.permute.xlu1 %2559 }
 0x260   : > { %2201 = vadd.xlane.f32.xlu1 %v2200_v29  ;;  %2216 = vadd.xlane.f32.xlu0 %v2215_v53  ;;  %v2224_v1 = vsel %vm1656_vm2, %v5092_v17, 0.0 }
 0x261   : > { %4845 = vmatmul.mubr.msk.bf16.vlgmr.msra.gmra.mrb[56].mxu1 %vm1656_vm2, %v2470_v37 }
 0x262   : > { %v5094_v30 = vpop.eup %5093  ;;  %4855 = vmatpush3.bf16.msra.mxu1 %v4970_v57  ;;  %4856 = vmatprep.mubr.msk.bf16.mxu1 %vm5244_vm0, %v6954_v14  ;;  %v6322_v14 = vpop.permute.xlu0 %2574 }
 0x263   : > { %v2221_v19 = vsel %vm1656_vm2, %v5094_v30, 0.0  ;;  %v2471_v18 = vpack.c.bf16 %v5092_v17, %v5094_v30  ;;  %v5096_v36 = vpop.eup %5095  ;;  %v6335_v38 = vpop.permute.xlu1 %2569 }
 0x264   : > { %2207 = vadd.xlane.f32.xlu1 %v2206_v44  ;;  %2222 = vadd.xlane.f32.xlu0 %v2221_v19  ;;  %v2230_v35 = vsel %vm1656_vm2, %v5096_v36, 0.0 }
 0x265   : > { %4851 = vmatmul.mubr.msk.bf16.vlgmr.msra.gmra.mrb[60].mxu0 %vm1656_vm2, %v2471_v18 }
 0x266   : > { %v5098_v26 = vpop.eup %5097  ;;  %v6328_v42 = vpop.permute.xlu0 %2584 }
 0x267   : > { %v2227_v23 = vsel %vm1656_vm2, %v5098_v26, 0.0  ;;  %v2472_v33 = vpack.c.bf16 %v5096_v36, %v5098_v26  ;;  %v6339_v39 = vpop.permute.xlu1 %2579 }
 0x268   : > { %2213 = vadd.xlane.f32.xlu1 %v2212_v61  ;;  %2228 = vadd.xlane.f32.xlu0 %v2227_v23 }
 0x269   : > { %4857 = vmatmul.mubr.msk.bf16.vlgmr.msra.gmra.mrb[60].mxu1 %vm1656_vm2, %v2472_v33 }
 0x26a   : > { %v6333_v41 = vpop.permute.xlu0 %2594 }
 0x26b   : > { %v6343_v0 = vpop.permute.xlu1 %2589 }
 0x26c   : > { %2219 = vadd.xlane.f32.xlu1 %v2218_v21 }
 0x26e   : > { %v6337_v32 = vpop.permute.xlu0 %2604 }
 0x26f   : > { %v6347_v40 = vpop.permute.xlu1 %2599 }
 0x270   : > { %2225 = vadd.xlane.f32.xlu1 %v2224_v1  ;;  %v6996_v1 = vld [vmem:[#allocation28_spill] sm:$0xff] }
 0x272   : > { %v6341_v45 = vpop.permute.xlu0 %2614 }
 0x273   : > { %6981 = vst [vmem:[#allocation8_spill] sm:$0xff] %v6341_v45  ;;  %v6351_v29 = vpop.permute.xlu1 %2609 }
 0x274   : > { %2231 = vadd.xlane.f32.xlu1 %v2230_v35  ;;  %v6997_v35 = vld [vmem:[#allocation67_spill] sm:$0xff] }
 0x275   : > { %v2362_v25 = vmul.f32 %v6997_v35, %v6996_v1  ;;  %v7003_v1 = vld [vmem:[#allocation39_spill] sm:$0xff]  ;;  %v7004_v35 = vld [vmem:[#allocation40_spill] sm:$0xff] }
 0x276   : > { %v6345_v52 = vpop.permute.xlu0 %2624 }
 0x277   : > { %6982 = vst [vmem:[#allocation9_spill] sm:$0xff] %v6345_v52  ;;  %v6355_v37 = vpop.permute.xlu1 %2619 }
 0x278   : > { %6985 = vst [vmem:[#allocation14_spill] sm:$0xff] %v6355_v37 }
 0x27a   : > { %v6349_v57 = vpop.permute.xlu0 %2634 }
 0x27b   : > { %6983 = vst [vmem:[#allocation10_spill] sm:$0xff] %v6349_v57  ;;  %v6359_v30 = vpop.permute.xlu1 %2629 }
 0x27c   : > { %6987 = vst [vmem:[#allocation12_spill] sm:$0xff] %v6359_v30 }
 0x27e   : > { %v6353_v53 = vpop.permute.xlu0 %2644 }
 0x27f   : > { %6984 = vst [vmem:[#allocation11_spill] sm:$0xff] %v6353_v53  ;;  %v6363_v19 = vpop.permute.xlu1 %2639 }
 0x280   : > { %6989 = vst [vmem:[#allocation13_spill] sm:$0xff] %v6363_v19 }
 0x282   : > { %v6357_v17 = vpop.permute.xlu0 %2654 }
 0x283   : > { %6986 = vst [vmem:[#allocation15_spill] sm:$0xff] %v6357_v17  ;;  %v6367_v36 = vpop.permute.xlu1 %2649 }
 0x284   : > { %6991 = vst [vmem:[#allocation16_spill] sm:$0xff] %v6367_v36  ;;  %v7000_v36 = vld [vmem:[#allocation33_spill] sm:$0xff] }
 0x286   : > { %v6361_v44 = vpop.permute.xlu0 %2664 }
 0x287   : > { %6988 = vst [vmem:[#allocation18_spill] sm:$0xff] %v6361_v44  ;;  %v6371_v61 = vpop.permute.xlu1 %2659 }
 0x288   : > { %6993 = vst [vmem:[#allocation17_spill] sm:$0xff] %v6371_v61 }
 0x28a   : > { %v6365_v18 = vpop.permute.xlu0 %2674 }
 0x28b   : > { %6990 = vst [vmem:[#allocation19_spill] sm:$0xff] %v6365_v18  ;;  %v6375_v33 = vpop.permute.xlu1 %2669 }
 0x28c   : > { %6995 = vst [vmem:[#allocation20_spill] sm:$0xff] %v6375_v33 }
 0x28e   : > { %v6369_v26 = vpop.permute.xlu0 %2684 }
 0x28f   : > { %6992 = vst [vmem:[#allocation22_spill] sm:$0xff] %v6369_v26  ;;  %v6379_v44 = vpop.permute.xlu1 %2679  ;;  %v7001_v26 = vld [vmem:[#allocation68_spill] sm:$0xff] }
 0x290   : > { %6998 = vst [vmem:[#allocation26_spill] sm:$0xff] %v6379_v44  ;;  %v2361_v19 = vmul.f32 %v7001_v26, %v7000_v36  ;;  %v7005_v26 = vld [vmem:[#allocation41_spill] sm:$0xff] }
 0x291   : > { %v2366_v45 = vmul.f32 %v6008_v60, %v7005_v26 }
 0x292   : > { %v6373_v23 = vpop.permute.xlu0 %2694 }
 0x293   : > { %6994 = vst [vmem:[#allocation23_spill] sm:$0xff] %v6373_v23  ;;  %v6381_v53 = vpop.permute.xlu1 %2689  ;;  %v7002_v23 = vld [vmem:[#allocation34_spill] sm:$0xff] }
 0x294   : > { %6999 = vst [vmem:[#allocation21_spill] sm:$0xff] %v6381_v53  ;;  %v2363_v33 = vmul.f32 %v6024_v46, %v7002_v23  ;;  %v2365_v53 = vmul.f32 %v6034_v49, %v7004_v35  ;;  %v7007_v23 = vld [vmem:[#allocation43_spill] sm:$0xff] }
 0x2b7   : > { %v2145_v21 = vpop.xlane.xlu0 %2144 }
 0x2b8   : > { %v2395_v37 = vadd.f32 %v2363_v33, %v2145_v21  ;;  %v2368_v33 = vmul.f32 %v6019_v28, %v7007_v23 }
 0x2bb   : > { %v2142_v56 = vpop.xlane.xlu0 %2141 }
 0x2bc   : > { %v2394_v17 = vadd.f32 %v2362_v25, %v2142_v56  ;;  %v2364_v56 = vmul.f32 %v5997_v58, %v7003_v1  ;;  %v7009_v1 = vld [vmem:[#allocation45_spill] sm:$0xff] }
 0x2be   : > { %5099 = vrcp.f32 %v2394_v17 }
 0x2bf   : > { %v2151_v18 = vpop.xlane.xlu0 %2150 }
 0x2c0   : > { %v2397_v36 = vadd.f32 %v2365_v53, %v2151_v18  ;;  %v7008_v53 = vld [vmem:[#allocation44_spill] sm:$0xff] }
 0x2c1   : > { %v2369_v18 = vmul.f32 %v6054_v59, %v7008_v53  ;;  %v7011_v59 = vld [vmem:[#allocation47_spill] sm:$0xff]  ;;  %v7014_v53 = vld [vmem:[#allocation50_spill] sm:$0xff] }
 0x2c3   : > { %v2157_v61 = vpop.xlane.xlu0 %2156 }
 0x2c5   : > { %v2139_v57 = vpop.xlane.xlu1 %2138 }
 0x2c6   : > { %v2393_v30 = vadd.f32 %v2361_v19, %v2139_v57  ;;  %v7006_v19 = vld [vmem:[#allocation42_spill] sm:$0xff] }
 0x2c8   : > { %v5100_v52 = vpop.eup %5099  ;;  %5101 = vrcp.f32 %v2393_v30 }
 0x2c9   : > { %3536 = vperm.xlu0 %4921, %v5100_v52   ;;  %v2163_v25 = vpop.xlane.xlu0 %2162  ;;  %v2148_v17 = vpop.xlane.xlu1 %2147  ;;  %5103 = vrcp.f32 %v2395_v37  ;;  %v2367_v52 = vmul.f32 %v6044_v55, %v7006_v19  ;;  %v2370_v55 = vmul.f32 %v6029_v3, %v7009_v1  ;;  %v7015_v1 = vld [vmem:[#allocation51_spill] sm:$0xff] }
 0x2ca   : > { %v2396_v44 = vadd.f32 %v2364_v56, %v2148_v17  ;;  %v7010_v17 = vld [vmem:[#allocation46_spill] sm:$0xff] }
 0x2cb   : > { %v2399_v58 = vadd.f32 %v2367_v52, %v2157_v61  ;;  %v2371_v28 = vmul.f32 %v6064_v63, %v7010_v17  ;;  %v7012_v52 = vld [vmem:[#allocation48_spill] sm:$0xff] }
 0x2cc   : > { %5105 = vrcp.f32 %v2396_v44  ;;  %v2401_v44 = vadd.f32 %v2369_v18, %v2163_v25  ;;  %v2375_v18 = vmul.f32 %v6084_v4, %v7014_v53 }
 0x2cd   : > { %v2169_v46 = vpop.xlane.xlu0 %2168  ;;  %v2154_v57 = vpop.xlane.xlu1 %2153  ;;  %5107 = vrcp.f32 %v2397_v36 }
 0x2ce   : > { %v2398_v30 = vadd.f32 %v2366_v45, %v2154_v57  ;;  %v2403_v26 = vadd.f32 %v2371_v28, %v2169_v46  ;;  %v2372_v57 = vmul.f32 %v6039_v5, %v7011_v59 }
 0x2d0   : > { %5109 = vrcp.f32 %v2398_v30  ;;  %v2373_v30 = vmul.f32 %v6074_v2, %v7012_v52 }
 0x2d1   : > { %v2175_v49 = vpop.xlane.xlu0 %2174  ;;  %v2160_v21 = vpop.xlane.xlu1 %2159  ;;  %5111 = vrcp.f32 %v2399_v58 }
 0x2d2   : > { %v5102_v37 = vpop.eup %5101  ;;  %v2400_v60 = vadd.f32 %v2368_v33, %v2160_v21  ;;  %v2405_v63 = vadd.f32 %v2373_v30, %v2175_v49  ;;  %v7013_v33 = vld [vmem:[#allocation49_spill] sm:$0xff]  ;;  %v2376_v49 = vmul.f32 %v6059_v9, %v7015_v1  ;;  %v7019_v30 = vld [vmem:[#allocation55_spill] sm:$0xff] }
 0x2d3   : > { %3531 = vperm.xlu1 %4922, %v5102_v37   ;;  %v5104_v56 = vpop.eup %5103  ;;  %v2374_v46 = vmul.f32 %v6049_v7, %v7013_v33 }
 0x2d4   : > { %5113 = vrcp.f32 %v2400_v60 }
 0x2d5   : > { %v2181_v45 = vpop.xlane.xlu0 %2180  ;;  %v2166_v61 = vpop.xlane.xlu1 %2165  ;;  %5115 = vrcp.f32 %v2401_v44 }
 0x2d6   : > { %v2402_v35 = vadd.f32 %v2370_v55, %v2166_v61  ;;  %v5106_v36 = vpop.eup %5105  ;;  %v2407_v2 = vadd.f32 %v2375_v18, %v2181_v45  ;;  %v7022_v18 = vld [vmem:[#allocation58_spill] sm:$0xff] }
 0x2d7   : > { %3541 = vperm.xlu1 %4922, %v5104_v56   ;;  %3546 = vperm.xlu0 %4921, %v5106_v36   ;;  %v5108_v3 = vpop.eup %5107  ;;  %v7016_v56 = vld [vmem:[#allocation52_spill] sm:$0xff]  ;;  %v7017_v36 = vld [vmem:[#allocation53_spill] sm:$0xff] }
 0x2d8   : > { %5117 = vrcp.f32 %v2402_v35  ;;  %v2377_v17 = vmul.f32 %v6094_v6, %v7016_v56  ;;  %v2378_v45 = vmul.f32 %v6069_v11, %v7017_v36  ;;  %v7020_v11 = vld [vmem:[#allocation56_spill] sm:$0xff]  ;;  %v7025_v36 = vld [vmem:[#allocation61_spill] sm:$0xff] }
 0x2d9   : > { %v2187_v25 = vpop.xlane.xlu0 %2186  ;;  %v2172_v19 = vpop.xlane.xlu1 %2171  ;;  %5119 = vrcp.f32 %v2403_v26 }
 0x2da   : > { %v2404_v58 = vadd.f32 %v2372_v57, %v2172_v19  ;;  %v5110_v23 = vpop.eup %5109  ;;  %v2409_v4 = vadd.f32 %v2377_v17, %v2187_v25  ;;  %v7018_v57 = vld [vmem:[#allocation54_spill] sm:$0xff]  ;;  %v2380_v25 = vmul.f32 %v6079_v13, %v7019_v30 }
 0x2db   : > { %3551 = vperm.xlu1 %4922, %v5108_v3   ;;  %3556 = vperm.xlu0 %4921, %v5110_v23   ;;  %v5112_v5 = vpop.eup %5111  ;;  %v2379_v19 = vmul.f32 %v6104_v8, %v7018_v57 }
 0x2dc   : > { %5121 = vrcp.f32 %v2404_v58 }
 0x2dd   : > { %v2193_v21 = vpop.xlane.xlu0 %2192  ;;  %v2178_v37 = vpop.xlane.xlu1 %2177  ;;  %5123 = vrcp.f32 %v2405_v63  ;;  %v2381_v63 = vmul.f32 %v6112_v34, %v7020_v11  ;;  %v7027_v11 = vld [vmem:[#allocation63_spill] sm:$0xff] }
 0x2de   : > { %v2406_v60 = vadd.f32 %v2374_v46, %v2178_v37  ;;  %v5114_v44 = vpop.eup %5113  ;;  %v2411_v6 = vadd.f32 %v2379_v19, %v2193_v21 }
 0x2df   : > { %3561 = vperm.xlu1 %4922, %v5112_v5   ;;  %3566 = vperm.xlu0 %4921, %v5114_v44   ;;  %v5116_v7 = vpop.eup %5115  ;;  %v7021_v5 = vld [vmem:[#allocation57_spill] sm:$0xff] }
 0x2e0   : > { %5125 = vrcp.f32 %v2406_v60  ;;  %v2382_v21 = vmul.f32 %v6089_v15, %v7021_v5  ;;  %v2383_v60 = vmul.f32 %v6120_v22, %v7022_v18  ;;  %v4559_v22 = vld [vmem:[%s6433_s0 + $0x8] sm:$0xff]  }
 0x2e1   : > { %v2199_v55 = vpop.xlane.xlu0 %2198  ;;  %v2184_v61 = vpop.xlane.xlu1 %2183  ;;  %5127 = vrcp.f32 %v2407_v2 }
 0x2e2   : > { %v2408_v28 = vadd.f32 %v2376_v49, %v2184_v61  ;;  %v5118_v35 = vpop.eup %5117  ;;  %v2413_v8 = vadd.f32 %v2381_v63, %v2199_v55  ;;  %v7023_v49 = vld [vmem:[#allocation59_spill] sm:$0xff] }
 0x2e3   : > { %3571 = vperm.xlu1 %4922, %v5116_v7   ;;  %3576 = vperm.xlu0 %4921, %v5118_v35   ;;  %v5120_v9 = vpop.eup %5119  ;;  %v2384_v55 = vmul.f32 %v6099_v16, %v7023_v49  ;;  %v7024_v7 = vld [vmem:[#allocation60_spill] sm:$0xff]  ;;  %v4373_v35 = vunpack.c.l.bf16 %v4559_v22 }
 0x2e4   : > { %5129 = vrcp.f32 %v2408_v28  ;;  %v2385_v56 = vmul.f32 %v6126_v24, %v7024_v7 }
 0x2e5   : > { %v2205_v26 = vpop.xlane.xlu0 %2204  ;;  %v2190_v59 = vpop.xlane.xlu1 %2189  ;;  %5131 = vrcp.f32 %v2409_v4  ;;  %v2699_v30 = vmul.f32 %v4373_v35, %v6325_v50  ;;  %v4561_v35 = vld [vmem:[%s6433_s0 + $0x18] sm:$0xff]  }
 0x2e6   : > { %v2410_v3 = vadd.f32 %v2378_v45, %v2190_v59  ;;  %v5122_v52 = vpop.eup %5121  ;;  %v2415_v34 = vadd.f32 %v2383_v60, %v2205_v26  ;;  %v2386_v45 = vmul.f32 %v6107_v51, %v7025_v36  ;;  %v4374_v26 = vunpack.c.h.bf16 %v4559_v22  ;;  %v7026_v59 = vld [vmem:[#allocation62_spill] sm:$0xff] }
 0x2e7   : > { %3581 = vperm.xlu1 %4922, %v5120_v9   ;;  %3586 = vperm.xlu0 %4921, %v5122_v52   ;;  %v5124_v23 = vpop.eup %5123  ;;  %v2387_v9 = vmul.f32 %v6132_v62, %v7026_v59  ;;  %v2388_v62 = vmul.f32 %v6115_v10, %v7027_v11  ;;  %v4562_v11 = vld [vmem:[%s6433_s0 + $0x20] sm:$0xff]  }
 0x2e8   : > { %5133 = vrcp.f32 %v2410_v3  ;;  %v2700_v63 = vmul.f32 %v4374_v26, %v6303_v47 }
 0x2e9   : > { %v2196_v58 = vpop.xlane.xlu1 %2195  ;;  %v2211_v33 = vpop.xlane.xlu0 %2210  ;;  %5135 = vrcp.f32 %v2411_v6 }
 0x2ea   : > { %v2412_v46 = vadd.f32 %v2380_v25, %v2196_v58  ;;  %v5126_v37 = vpop.eup %5125  ;;  %v2417_v4 = vadd.f32 %v2385_v56, %v2211_v33  ;;  %v7028_v33 = vld [vmem:[#allocation64_spill] sm:$0xff]  ;;  %v2392_v56 = vmul.f32 %v6129_v54, %v6145_v48  ;;  %v4382_v54 = vunpack.c.h.bf16 %v4561_v35 }
 0x2eb   : > { %3591 = vperm.xlu1 %4922, %v5124_v23   ;;  %3596 = vperm.xlu0 %4921, %v5126_v37   ;;  %v5128_v13 = vpop.eup %5127 }
 0x2ec   : > { %5137 = vrcp.f32 %v2412_v46  ;;  %v2389_v46 = vmul.f32 %v6136_v31, %v7028_v33  ;;  %v7029_v31 = vld [vmem:[#allocation65_spill] sm:$0xff] }
 0x2ed   : > { %v2202_v53 = vpop.xlane.xlu1 %2201  ;;  %5139 = vrcp.f32 %v2413_v8  ;;  %v2217_v1 = vpop.xlane.xlu0 %2216 }
 0x2ee   : > { %v2414_v44 = vadd.f32 %v2382_v21, %v2202_v53  ;;  %v5130_v2 = vpop.eup %5129  ;;  %v2419_v25 = vadd.f32 %v2387_v9, %v2217_v1 }
 0x2ef   : > { %3601 = vperm.xlu1 %4922, %v5128_v13   ;;  %3606 = vperm.xlu0 %4921, %v5130_v2   ;;  %v5132_v61 = vpop.eup %5131  ;;  %v7030_v2 = vld [vmem:[#allocation66_spill] sm:$0xff] }
 0x2f0   : > { %5141 = vrcp.f32 %v2414_v44  ;;  %v2390_v44 = vmul.f32 %v6123_v12, %v7029_v31  ;;  %v4564_v31 = vld [vmem:[%s6433_s0 + $0x30] sm:$0xff]  }
 0x2f1   : > { %v2208_v15 = vpop.xlane.xlu1 %2207  ;;  %5143 = vrcp.f32 %v2415_v34  ;;  %v2223_v24 = vpop.xlane.xlu0 %2222  ;;  %v2391_v34 = vmul.f32 %v6141_v43, %v7030_v2 }
 0x2f2   : > { %v2416_v17 = vadd.f32 %v2384_v55, %v2208_v15  ;;  %v5134_v28 = vpop.eup %5133  ;;  %v2421_v18 = vadd.f32 %v2389_v46, %v2223_v24  ;;  %v4560_v55 = vld [vmem:[%s6433_s0 + $0x10] sm:$0xff]  }
 0x2f3   : > { %3611 = vperm.xlu1 %4922, %v5132_v61   ;;  %3616 = vperm.xlu0 %4921, %v5134_v28   ;;  %v5136_v19 = vpop.eup %5135  ;;  %v4377_v22 = vunpack.c.l.bf16 %v4560_v55 }
 0x2f4   : > { %v6438_v16 = vpop.f32.mrb[32].mxu0  ;;  %5145 = vrcp.f32 %v2416_v17  ;;  %v4378_v17 = vunpack.c.h.bf16 %v4560_v55 }
 0x2f5   : > { %v2214_v57 = vpop.xlane.xlu1 %2213  ;;  %v4768_v52 = vpop.f32.mrb[33].mxu0  ;;  %5147 = vrcp.f32 %v2417_v4  ;;  %v2701_v36 = vmul.f32 %v4377_v22, %v6330_v27  ;;  %v4565_v22 = vld [vmem:[%s6433_s0 + $0x38] sm:$0xff]  }
 0x2f6   : > { %v2418_v3 = vadd.f32 %v2386_v45, %v2214_v57  ;;  %v5138_v6 = vpop.eup %5137  ;;  %v6445_v58 = vpop.f32.mrb[34].mxu0  ;;  %v4381_v45 = vunpack.c.l.bf16 %v4561_v35  ;;  %v2702_v9 = vmul.f32 %v4378_v17, %v6316_v20  ;;  %v4397_v17 = vunpack.c.l.bf16 %v4565_v22 }
 0x2f7   : > { %3621 = vperm.xlu1 %4922, %v5136_v19   ;;  %3626 = vperm.xlu0 %4921, %v5138_v6   ;;  %v4769_v51 = vpop.f32.mrb[35].mxu0  ;;  %v5140_v5 = vpop.eup %5139 }
 0x2f8   : > { %v2822_v23 = vpop.f32.mrb[32].mxu1  ;;  %5149 = vrcp.f32 %v2418_v3  ;;  %v2229_v47 = vpop.xlane.xlu0 %2228  ;;  %v2703_v3 = vmul.f32 %v4381_v45, %v6335_v38 }
 0x2f9   : > { %v6452_v37 = vadd.f32 %v2822_v23, %v2699_v30  ;;  %v4774_v50 = vpop.f32.mrb[33].mxu1  ;;  %v2220_v8 = vpop.xlane.xlu1 %2219  ;;  %5151 = vrcp.f32 %v2419_v25  ;;  %v2423_v7 = vadd.f32 %v2391_v34, %v2229_v47  ;;  %v2704_v25 = vmul.f32 %v4382_v54, %v6322_v14 }
 0x2fa   : > { %v2420_v21 = vadd.f32 %v2388_v62, %v2220_v8  ;;  %v2825_v53 = vpop.f32.mrb[34].mxu1  ;;  %v5142_v13 = vpop.eup %5141  ;;  %v4386_v50 = vunpack.c.h.bf16 %v4562_v11  ;;  %v4393_v34 = vunpack.c.l.bf16 %v4564_v31 }
 0x2fb   : > { %v6454_v60 = vadd.f32 %v2825_v53, %v2700_v63  ;;  %v4775_v10 = vpop.f32.mrb[35].mxu1  ;;  %3631 = vperm.xlu1 %4922, %v5140_v5   ;;  %3636 = vperm.xlu0 %4921, %v5142_v13   ;;  %v5144_v49 = vpop.eup %5143  ;;  %v4385_v63 = vunpack.c.l.bf16 %v4562_v11  ;;  %v4563_v5 = vld [vmem:[%s6433_s0 + $0x28] sm:$0xff]  }
 0x2fc   : > { %5153 = vrcp.f32 %v2420_v21  ;;  %v4389_v14 = vunpack.c.l.bf16 %v4563_v5  ;;  %v2706_v13 = vmul.f32 %v4386_v50, %v6328_v42 }
 0x2fd   : > { %v2226_v1 = vpop.xlane.xlu1 %2225  ;;  %5155 = vrcp.f32 %v2421_v18  ;;  %v2705_v21 = vmul.f32 %v4385_v63, %v6339_v39  ;;  %v4390_v18 = vunpack.c.h.bf16 %v4563_v5 }
 0x2fe   : > { %v2422_v15 = vadd.f32 %v2390_v44, %v2226_v1  ;;  %v5146_v61 = vpop.eup %5145  ;;  %v2707_v2 = vmul.f32 %v4389_v14, %v6343_v0 }
 0x2ff   : > { %3641 = vperm.xlu1 %4922, %v5144_v49   ;;  %3646 = vperm.xlu0 %4921, %v5146_v61   ;;  %v5148_v28 = vpop.eup %5147  ;;  %v2708_v55 = vmul.f32 %v4390_v18, %v6333_v41 }
 0x300   : > { %5157 = vrcp.f32 %v2422_v15  ;;  %v4394_v15 = vunpack.c.h.bf16 %v4564_v31  ;;  %v7035_v31 = vld [vmem:[#allocation10_spill] sm:$0xff] }
 0x301   : > { %v2232_v12 = vpop.xlane.xlu1 %2231  ;;  %5159 = vrcp.f32 %v2423_v7 }
 0x302   : > { %v2424_v43 = vadd.f32 %v2392_v56, %v2232_v12  ;;  %v5150_v4 = vpop.eup %5149  ;;  %v2709_v56 = vmul.f32 %v4393_v34, %v6347_v40  ;;  %v2710_v35 = vmul.f32 %v4394_v15, %v6337_v32  ;;  %v7036_v15 = vld [vmem:[#allocation13_spill] sm:$0xff] }
 0x303   : > { %3651 = vperm.xlu1 %4922, %v5148_v28   ;;  %3656 = vperm.xlu0 %4921, %v5150_v4   ;;  %v5152_v59 = vpop.eup %5151 }
 0x304   : > { %5161 = vrcp.f32 %v2424_v43  ;;  %v2872_v26 = vpop.f32.mrb[36].mxu0  ;;  %v4398_v43 = vunpack.c.h.bf16 %v4565_v22 }
 0x305   : > { %v6466_v48 = vadd.f32 %v2872_v26, %v2701_v36  ;;  %v4780_v57 = vpop.f32.mrb[37].mxu0  ;;  %v4566_v36 = vld [vmem:[%s6433_s0 + $0x40] sm:$0xff]   ;;  %v2711_v26 = vmul.f32 %v4397_v17, %v6351_v29 }
 0x306   : > { %v5154_v19 = vpop.eup %5153  ;;  %v2875_v24 = vpop.f32.mrb[38].mxu0  ;;  %v7031_v57 = vld [vmem:[#allocation8_spill] sm:$0xff] }
 0x307   : > { %v6469_v52 = vadd.f32 %v2875_v24, %v2702_v9  ;;  %3661 = vperm.xlu1 %4922, %v5152_v59   ;;  %v4781_v27 = vpop.f32.mrb[39].mxu0  ;;  %3666 = vperm.xlu0 %4921, %v5154_v19   ;;  %v5156_v30 = vpop.eup %5155  ;;  %v4401_v59 = vunpack.c.l.bf16 %v4566_v36  ;;  %v2712_v19 = vmul.f32 %v4398_v43, %v7031_v57  ;;  %v4402_v24 = vunpack.c.h.bf16 %v4566_v36  ;;  %v4570_v36 = vld [vmem:[%s6433_s0 + $0x60] sm:$0xff]  }
 0x308   : > { %v2922_v6 = vpop.f32.mrb[36].mxu1  ;;  %v4567_v27 = vld [vmem:[%s6433_s0 + $0x48] sm:$0xff]  }
 0x309   : > { %v6472_v20 = vadd.f32 %v2922_v6, %v2703_v3  ;;  %v4786_v51 = vpop.f32.mrb[37].mxu1 }
 0x30a   : > { %v5158_v23 = vpop.eup %5157  ;;  %v2925_v62 = vpop.f32.mrb[38].mxu1  ;;  %v4405_v51 = vunpack.c.l.bf16 %v4567_v27 }
 0x30b   : > { %v6475_v33 = vadd.f32 %v2925_v62, %v2704_v25  ;;  %v4787_v38 = vpop.f32.mrb[39].mxu1  ;;  %3671 = vperm.xlu1 %4922, %v5156_v30   ;;  %3676 = vperm.xlu0 %4921, %v5158_v23   ;;  %v5160_v46 = vpop.eup %5159  ;;  %v7032_v30 = vld [vmem:[#allocation14_spill] sm:$0xff]  ;;  %v7033_v62 = vld [vmem:[#allocation9_spill] sm:$0xff] }
 0x30c   : > { %v2713_v25 = vmul.f32 %v4401_v59, %v7032_v30  ;;  %v2714_v63 = vmul.f32 %v4402_v24, %v7033_v62  ;;  %v4406_v38 = vunpack.c.h.bf16 %v4567_v27  ;;  %v7039_v24 = vld [vmem:[#allocation15_spill] sm:$0xff]  ;;  %v4418_v27 = vunpack.c.h.bf16 %v4570_v36 }
 0x30e   : > { %v5162_v8 = vpop.eup %5161 }
 0x30f   : > { %3681 = vperm.xlu1 %4922, %v5160_v46   ;;  %3686 = vperm.xlu0 %4921, %v5162_v8   ;;  %v4568_v8 = vld [vmem:[%s6433_s0 + $0x50] sm:$0xff]  }
 0x310   : > { %v2972_v53 = vpop.f32.mrb[40].mxu0 }
 0x311   : > { %v6480_v10 = vadd.f32 %v2972_v53, %v2705_v21  ;;  %v4792_v47 = vpop.f32.mrb[41].mxu0  ;;  %v7034_v21 = vld [vmem:[#allocation12_spill] sm:$0xff]  ;;  %v4409_v53 = vunpack.c.l.bf16 %v4568_v8 }
 0x312   : > { %v2975_v44 = vpop.f32.mrb[42].mxu0  ;;  %v2715_v14 = vmul.f32 %v4405_v51, %v7034_v21 }
 0x313   : > { %v6484_v1 = vadd.f32 %v2975_v44, %v2706_v13  ;;  %v4793_v49 = vpop.f32.mrb[43].mxu0  ;;  %v2716_v44 = vmul.f32 %v4406_v38, %v7035_v31  ;;  %v7042_v31 = vld [vmem:[#allocation20_spill] sm:$0xff] }
 0x314   : > { %v3022_v39 = vpop.f32.mrb[40].mxu1 }
 0x315   : > { %v6487_v61 = vadd.f32 %v3022_v39, %v2707_v2  ;;  %v4798_v42 = vpop.f32.mrb[41].mxu1  ;;  %v4410_v2 = vunpack.c.h.bf16 %v4568_v8  ;;  %v4569_v39 = vld [vmem:[%s6433_s0 + $0x58] sm:$0xff]   ;;  %v7041_v8 = vld [vmem:[#allocation18_spill] sm:$0xff] }
 0x316   : > { %v3025_v7 = vpop.f32.mrb[42].mxu1  ;;  %v2717_v42 = vmul.f32 %v4409_v53, %v7036_v15  ;;  %v4413_v22 = vunpack.c.l.bf16 %v4569_v39  ;;  %v7043_v15 = vld [vmem:[#allocation19_spill] sm:$0xff] }
 0x317   : > { %v6491_v12 = vadd.f32 %v3025_v7, %v2708_v55  ;;  %v4799_v0 = vpop.f32.mrb[43].mxu1 }
 0x318   : > { %v3072_v28 = vpop.f32.mrb[44].mxu0  ;;  %v7037_v0 = vld [vmem:[#allocation11_spill] sm:$0xff] }
 0x319   : > { %v6494_v4 = vadd.f32 %v3072_v28, %v2709_v56  ;;  %v4804_v41 = vpop.f32.mrb[45].mxu0  ;;  %v2718_v28 = vmul.f32 %v4410_v2, %v7037_v0  ;;  %v4573_v0 = vld [vmem:[%s6433_s0 + $0x78] sm:$0xff]  }
 0x31a   : > { %v3075_v45 = vpop.f32.mrb[46].mxu0 }
 0x31b   : > { %v6498_v9 = vadd.f32 %v3075_v45, %v2710_v35  ;;  %v4805_v40 = vpop.f32.mrb[47].mxu0  ;;  %v4414_v35 = vunpack.c.h.bf16 %v4569_v39 }
 0x31c   : > { %v3122_v54 = vpop.f32.mrb[44].mxu1  ;;  %v4417_v40 = vunpack.c.l.bf16 %v4570_v36  ;;  %v4429_v36 = vunpack.c.l.bf16 %v4573_v0 }
 0x31d   : > { %v6501_v3 = vadd.f32 %v3122_v54, %v2711_v26  ;;  %v4810_v32 = vpop.f32.mrb[45].mxu1  ;;  %v7038_v26 = vld [vmem:[#allocation16_spill] sm:$0xff] }
 0x31e   : > { %v3125_v6 = vpop.f32.mrb[46].mxu1  ;;  %v2719_v59 = vmul.f32 %v4413_v22, %v7038_v26  ;;  %v2720_v32 = vmul.f32 %v4414_v35, %v7039_v24  ;;  %v7044_v35 = vld [vmem:[#allocation26_spill] sm:$0xff] }
 0x31f   : > { %v6505_v23 = vadd.f32 %v3125_v6, %v2712_v19  ;;  %v4811_v29 = vpop.f32.mrb[47].mxu1 }
 0x320   : > { %v3172_v11 = vpop.f32.mrb[48].mxu0  ;;  %v7040_v29 = vld [vmem:[#allocation17_spill] sm:$0xff] }
 0x321   : > { %v6508_v46 = vadd.f32 %v3172_v11, %v2713_v25  ;;  %v4816_v50 = vpop.f32.mrb[49].mxu0  ;;  %v4571_v25 = vld [vmem:[%s6433_s0 + $0x68] sm:$0xff]   ;;  %v2721_v11 = vmul.f32 %v4417_v40, %v7040_v29  ;;  %v7045_v40 = vld [vmem:[#allocation22_spill] sm:$0xff] }
 0x322   : > { %v3175_v5 = vpop.f32.mrb[50].mxu0  ;;  %v4421_v62 = vunpack.c.l.bf16 %v4571_v25  ;;  %v4422_v21 = vunpack.c.h.bf16 %v4571_v25 }
 0x323   : > { %v6512_v13 = vadd.f32 %v3175_v5, %v2714_v63  ;;  %v4817_v18 = vpop.f32.mrb[51].mxu0  ;;  %v2722_v5 = vmul.f32 %v4418_v27, %v7041_v8 }
 0x324   : > { %v3222_v47 = vpop.f32.mrb[48].mxu1  ;;  %v4572_v18 = vld [vmem:[%s6433_s0 + $0x70] sm:$0xff]  }
 0x325   : > { %v6515_v34 = vadd.f32 %v3222_v47, %v2715_v14  ;;  %v4822_v49 = vpop.f32.mrb[49].mxu1  ;;  %v4425_v2 = vunpack.c.l.bf16 %v4572_v18  ;;  %v4426_v22 = vunpack.c.h.bf16 %v4572_v18 }
 0x326   : > { %v3225_v55 = vpop.f32.mrb[50].mxu1 }
 0x327   : > { %v6519_v7 = vadd.f32 %v3225_v55, %v2716_v44  ;;  %v4823_v56 = vpop.f32.mrb[51].mxu1  ;;  %v2723_v44 = vmul.f32 %v4421_v62, %v7042_v31  ;;  %v4368_v62 = vld [vmem:[%s6433_s0] sm:$0xff]   ;;  %s535_s0 = scalar_lea.vmem %s6838_s1, %s5362_s24  ;;  %s6591_s24 = scalar_lea.vmem [#allocation3], %s4258_s25 }
 0x328   : > { %v3272_v17 = vpop.f32.mrb[52].mxu0  ;;  %v4496_v31 = vld [vmem:[%s6565_s26] sm:$0xff]   ;;  %s4036_s21 = sshll.u32 %s6591_s24, 4  ;;  %s6783_s21 = int_to_ptr.vmem [resolvable:$true] %s4036_s21 }
 0x329   : > { %v6522_v43 = vadd.f32 %v3272_v17, %v2717_v42  ;;  %v4828_v41 = vpop.f32.mrb[53].mxu0  ;;  %v2724_v42 = vmul.f32 %v4422_v21, %v7043_v15  ;;  %v4498_v15 = vunpack.c.h.bf16 %v4496_v31  ;;  %p5170_p1 = scmp.lt.s32.totalorder %s6783_s21, %s5168_s10 }
 0x32a   : > { %v3275_v45 = vpop.f32.mrb[54].mxu0  ;;  %v2725_v41 = vmul.f32 %v4425_v2, %v7044_v35 }
 0x32b   : > { %v6526_v54 = vadd.f32 %v3275_v45, %v2718_v28  ;;  %v4829_v57 = vpop.f32.mrb[55].mxu0 }
 0x32c   : > { %v3322_v19 = vpop.f32.mrb[52].mxu1  ;;  %v2726_v57 = vmul.f32 %v4426_v22, %v7045_v40 }
 0x32d   : > { %v6529_v6 = vadd.f32 %v3322_v19, %v2719_v59  ;;  %v4834_v30 = vpop.f32.mrb[53].mxu1  ;;  %v4430_v19 = vunpack.c.h.bf16 %v4573_v0 }
 0x32e   : > { %v3325_v51 = vpop.f32.mrb[54].mxu1  ;;  %v7046_v30 = vld [vmem:[#allocation21_spill] sm:$0xff] }
 0x32f   : > { %v6533_v63 = vadd.f32 %v3325_v51, %v2720_v32  ;;  %v4835_v38 = vpop.f32.mrb[55].mxu1  ;;  %v2727_v25 = vmul.f32 %v4429_v36, %v7046_v30  ;;  %v4369_v36 = vunpack.c.l.bf16 %v4368_v62 }
 0x330   : > { %v3372_v50 = vpop.f32.mrb[56].mxu0  ;;  %v7047_v38 = vld [vmem:[#allocation23_spill] sm:$0xff] }
 0x331   : > { %v6536_v14 = vadd.f32 %v3372_v50, %v2721_v11  ;;  %v4840_v53 = vpop.f32.mrb[57].mxu0  ;;  %v2728_v50 = vmul.f32 %v4430_v19, %v7047_v38  ;;  %v4497_v19 = vunpack.c.l.bf16 %v4496_v31 }
 0x332   : > { %v3375_v47 = vpop.f32.mrb[58].mxu0 }
 0x333   : > { %v6540_v49 = vadd.f32 %v3375_v47, %v2722_v5  ;;  %v4841_v39 = vpop.f32.mrb[59].mxu0  ;;  %v4370_v47 = vunpack.c.h.bf16 %v4368_v62 }
 0x334   : > { %v3422_v55 = vpop.f32.mrb[56].mxu1  ;;  %v4432_v39 = vld [vmem:[%s6571_s29] sm:$0xff]  }
 0x335   : > { %v6543_v56 = vadd.f32 %v3422_v55, %v2723_v44  ;;  %v4846_v17 = vpop.f32.mrb[57].mxu1  ;;  %v7048_v44 = vld [vmem:[#allocation6_spill] sm:$0xff]  ;;  %v4434_v0 = vunpack.c.h.bf16 %v4432_v39  ;;  %v4433_v30 = vunpack.c.l.bf16 %v4432_v39  ;;  %v4575_v39 = vld [vmem:[%s6571_s29 + $0x10] sm:$0xff]  }
 0x336   : > { %v3425_v28 = vpop.f32.mrb[58].mxu1  ;;  %v2698_v2 = vmul.f32 %v4370_v47, %v7048_v44  ;;  %v6584_v17 = vld [vmem:[%s535_s0] ss:$0 sm:$0xff]  ;;  %s5169_s0 = scalar_lea.vmem %s5168_s10, 8192 }
 0x337   : > { %v6547_v45 = vadd.f32 %v3425_v28, %v2724_v42  ;;  %v4847_v26 = vpop.f32.mrb[59].mxu1  ;;  %v6581_v42 = vstv %s3721_s17  ;;  %v3922_v62 = vmul.f32 %v4497_v19, %v6584_v17  ;;  %s4366_s17 = sshll.u32 %s5233_s14, 12  ;;  %s6791_s14 = scalar_lea.sflag [#allocation4], %s530_s19 }
 0x338   : > { %v3472_v59 = vpop.f32.mrb[60].mxu0  ;;  %v2776_v55 = vadd.f32 %v6445_v58, %v2698_v2  ;;  %s6781_s28 = scalar_lea.hbm %s6846_s9, %s4366_s17 }
 0x339   : > { %v6550_v24 = vadd.f32 %v3472_v59, %v2725_v41  ;;  %v4852_v32 = vpop.f32.mrb[61].mxu0  ;;  %v3923_v41 = vmul.f32 %v4498_v15, %v6584_v17  ;;  %v7049_v59 = vld [vmem:[#allocation7_spill] sm:$0xff] }
 0x33a   : > { %v3475_v27 = vpop.f32.mrb[62].mxu0  ;;  %v2697_v40 = vmul.f32 %v4369_v36, %v7049_v59 }
 0x33b   : > { %v6553_v51 = vadd.f32 %v3475_v27, %v2726_v57  ;;  %v4853_v29 = vpop.f32.mrb[63].mxu0  ;;  %v4589_v27 = vld [vmem:[%s6565_s26 + $0x8] sm:$0xff]  }
 0x33c   : > { %v3522_v11 = vpop.f32.mrb[60].mxu1  ;;  %v2773_v57 = vadd.f32 %v6438_v16, %v2697_v40  ;;  %v4574_v29 = vld [vmem:[%s6571_s29 + $0x8] sm:$0xff]   ;;  %v4501_v38 = vunpack.c.l.bf16 %v4589_v27 }
 0x33d   : > { %v6557_v8 = vadd.f32 %v3522_v11, %v2727_v25  ;;  %v4858_v5 = vpop.f32.mrb[61].mxu1  ;;  %v4437_v16 = vunpack.c.l.bf16 %v4574_v29  ;;  %v4438_v44 = vunpack.c.h.bf16 %v4574_v29 }
 0x33e   : > { %v3525_v21 = vpop.f32.mrb[62].mxu1 }
 0x33f   : > { %v6559_v53 = vadd.f32 %v3525_v21, %v2728_v50  ;;  %v4859_v18 = vpop.f32.mrb[63].mxu1  ;;  %v4502_v50 = vunpack.c.h.bf16 %v4589_v27  ;;  %v4590_v21 = vld [vmem:[%s6565_s26 + $0x10] sm:$0xff]  }
 0x348   : > { %v3537_v22 = vpop.permute.xlu0 %3536 }
 0x349   : > { %v3690_v28 = vmul.f32 %v3537_v22, %v2776_v55  ;;  %v3924_v22 = vmul.f32 %v4501_v38, %v6584_v17 }
 0x34b   : > { %v3724_v35 = vmul.f32 %v6581_v42, %v3690_v28 }
 0x34d   : > { %v3820_v26 = vadd.f32 %v4434_v0, %v3724_v35  ;;  %v4505_v0 = vunpack.c.l.bf16 %v4590_v21  ;;  %v3925_v35 = vmul.f32 %v4502_v50, %v6584_v17 }
 0x34f   : > { %v3955_v58 = vadd.f32 %v3923_v41, %v3820_v26  ;;  %v4506_v41 = vunpack.c.h.bf16 %v4590_v21  ;;  %v4591_v26 = vld [vmem:[%s6565_s26 + $0x18] sm:$0xff]  }
 0x350   : > { %v4509_v29 = vunpack.c.l.bf16 %v4591_v26  ;;  %v4510_v50 = vunpack.c.h.bf16 %v4591_v26 }
 0x351   : > { %3988 = vst.msk [vmem:[%s6591_s24 + $0x8] sm:$0xff] %vm3986_vm3, %v3955_v58  ;;  %v3927_v38 = vmul.f32 %v4506_v41, %v6584_v17 }
 0x352   : > { %v3532_v32 = vpop.permute.xlu1 %3531 }
 0x353   : > { %v3689_v25 = vmul.f32 %v3532_v32, %v2773_v57  ;;  %v4442_v57 = vunpack.c.h.bf16 %v4575_v39  ;;  %v4576_v32 = vld [vmem:[%s6571_s29 + $0x18] sm:$0xff]  }
 0x355   : > { %v3723_v11 = vmul.f32 %v6581_v42, %v3689_v25  ;;  %v3926_v25 = vmul.f32 %v4505_v0, %v6584_v17 }
 0x356   : > { %v3542_v5 = vpop.permute.xlu1 %3541  ;;  %v3547_v47 = vpop.permute.xlu0 %3546 }
 0x357   : > { %v3819_v18 = vadd.f32 %v4433_v30, %v3723_v11  ;;  %v3691_v31 = vmul.f32 %v3542_v5, %v6452_v37  ;;  %v3692_v2 = vmul.f32 %v3547_v47, %v6454_v60  ;;  %v4441_v60 = vunpack.c.l.bf16 %v4575_v39  ;;  %v4592_v5 = vld [vmem:[%s6565_s26 + $0x20] sm:$0xff]  }
 0x359   : > { %v3954_v55 = vadd.f32 %v3922_v62, %v3819_v18  ;;  %v3725_v15 = vmul.f32 %v6581_v42, %v3691_v31  ;;  %v3726_v28 = vmul.f32 %v6581_v42, %v3692_v2  ;;  %v4445_v18 = vunpack.c.l.bf16 %v4576_v32  ;;  %v4577_v2 = vld [vmem:[%s6571_s29 + $0x20] sm:$0xff]  }
 0x35a   : > { %v3552_v36 = vpop.permute.xlu1 %3551  ;;  %v3557_v58 = vpop.permute.xlu0 %3556  ;;  %v4446_v31 = vunpack.c.h.bf16 %v4576_v32 }
 0x35b   : > { %3987 = vst.msk [vmem:[%s6591_s24] sm:$0xff] %vm3986_vm3, %v3954_v55  ;;  %v3821_v37 = vadd.f32 %v4437_v16, %v3725_v15  ;;  %v3693_v59 = vmul.f32 %v3552_v36, %v6466_v48  ;;  %v3822_v40 = vadd.f32 %v4438_v44, %v3726_v28  ;;  %v3694_v19 = vmul.f32 %v3557_v58, %v6469_v52  ;;  %v4593_v36 = vld [vmem:[%s6565_s26 + $0x28] sm:$0xff]  }
 0x35c   : > { %v3928_v15 = vmul.f32 %v4509_v29, %v6584_v17 }
 0x35d   : > { %v3956_v27 = vadd.f32 %v3924_v22, %v3821_v37  ;;  %v3727_v30 = vmul.f32 %v6581_v42, %v3693_v59  ;;  %v3957_v11 = vadd.f32 %v3925_v35, %v3822_v40  ;;  %v3728_v62 = vmul.f32 %v6581_v42, %v3694_v19 }
 0x35e   : > { %v3562_v48 = vpop.permute.xlu1 %3561  ;;  %v3567_v21 = vpop.permute.xlu0 %3566  ;;  %v4513_v22 = vunpack.c.l.bf16 %v4592_v5  ;;  %v4514_v35 = vunpack.c.h.bf16 %v4592_v5  ;;  %v4449_v37 = vunpack.c.l.bf16 %v4577_v2  ;;  %v4450_v59 = vunpack.c.h.bf16 %v4577_v2 }
 0x35f   : > { %3989 = vst.msk [vmem:[%s6591_s24 + $0x10] sm:$0xff] %vm3986_vm3, %v3956_v27  ;;  %v3823_v52 = vadd.f32 %v4441_v60, %v3727_v30  ;;  %v3695_v47 = vmul.f32 %v3562_v48, %v6472_v20  ;;  %3990 = vst.msk [vmem:[%s6591_s24 + $0x18] sm:$0xff] %vm3986_vm3, %v3957_v11  ;;  %v3824_v16 = vadd.f32 %v4442_v57, %v3728_v62  ;;  %v4578_v57 = vld [vmem:[%s6571_s29 + $0x28] sm:$0xff]   ;;  %v4517_v30 = vunpack.c.l.bf16 %v4593_v36 }
 0x360   : > { %v3696_v44 = vmul.f32 %v3567_v21, %v6475_v33  ;;  %v3929_v20 = vmul.f32 %v4510_v50, %v6584_v17  ;;  %v3930_v27 = vmul.f32 %v4513_v22, %v6584_v17  ;;  %v4518_v11 = vunpack.c.h.bf16 %v4593_v36 }
 0x361   : > { %v3958_v39 = vadd.f32 %v3926_v25, %v3823_v52  ;;  %v3729_v55 = vmul.f32 %v6581_v42, %v3695_v47  ;;  %v3959_v0 = vadd.f32 %v3927_v38, %v3824_v16  ;;  %v4594_v38 = vld [vmem:[%s6565_s26 + $0x30] sm:$0xff]   ;;  %v4453_v48 = vunpack.c.l.bf16 %v4578_v57 }
 0x362   : > { %v3730_v28 = vmul.f32 %v6581_v42, %v3696_v44  ;;  %v3572_v41 = vpop.permute.xlu1 %3571  ;;  %v3577_v26 = vpop.permute.xlu0 %3576  ;;  %v4454_v21 = vunpack.c.h.bf16 %v4578_v57  ;;  %v4579_v47 = vld [vmem:[%s6571_s29 + $0x30] sm:$0xff]   ;;  %v3932_v44 = vmul.f32 %v4517_v30, %v6584_v17  ;;  %v4521_v2 = vunpack.c.l.bf16 %v4594_v38 }
 0x363   : > { %3991 = vst.msk [vmem:[%s6591_s24 + $0x20] sm:$0xff] %vm3986_vm3, %v3958_v39  ;;  %v3825_v33 = vadd.f32 %v4445_v18, %v3729_v55  ;;  %v3697_v58 = vmul.f32 %v3572_v41, %v6480_v10  ;;  %3992 = vst.msk [vmem:[%s6591_s24 + $0x28] sm:$0xff] %vm3986_vm3, %v3959_v0  ;;  %v3698_v40 = vmul.f32 %v3577_v26, %v6484_v1  ;;  %v4595_v0 = vld [vmem:[%s6565_s26 + $0x38] sm:$0xff]   ;;  %v4458_v36 = vunpack.c.h.bf16 %v4579_v47 }
 0x364   : > { %v3826_v60 = vadd.f32 %v4446_v31, %v3730_v28  ;;  %v3931_v10 = vmul.f32 %v4514_v35, %v6584_v17  ;;  %v4580_v26 = vld [vmem:[%s6571_s29 + $0x38] sm:$0xff]  }
 0x365   : > { %v3960_v19 = vadd.f32 %v3928_v15, %v3825_v33  ;;  %v3731_v32 = vmul.f32 %v6581_v42, %v3697_v58  ;;  %v3732_v29 = vmul.f32 %v6581_v42, %v3698_v40  ;;  %v4522_v15 = vunpack.c.h.bf16 %v4594_v38  ;;  %v4581_v38 = vld [vmem:[%s6571_s29 + $0x40] sm:$0xff]  }
 0x366   : > { %v3961_v25 = vadd.f32 %v3929_v20, %v3826_v60  ;;  %v3582_v62 = vpop.permute.xlu1 %3581  ;;  %v3587_v50 = vpop.permute.xlu0 %3586  ;;  %v4457_v20 = vunpack.c.l.bf16 %v4579_v47  ;;  %v3934_v60 = vmul.f32 %v4521_v2, %v6584_v17 }
 0x367   : > { %3993 = vst.msk [vmem:[%s6591_s24 + $0x30] sm:$0xff] %vm3986_vm3, %v3960_v19  ;;  %v3827_v1 = vadd.f32 %v4449_v37, %v3731_v32  ;;  %v3699_v5 = vmul.f32 %v3582_v62, %v6487_v61  ;;  %v3828_v52 = vadd.f32 %v4450_v59, %v3732_v29  ;;  %v3700_v18 = vmul.f32 %v3587_v50, %v6491_v12 }
 0x368   : > { %3994 = vst.msk [vmem:[%s6591_s24 + $0x38] sm:$0xff] %vm3986_vm3, %v3961_v25  ;;  %v3933_v61 = vmul.f32 %v4518_v11, %v6584_v17  ;;  %v4525_v59 = vunpack.c.l.bf16 %v4595_v0  ;;  %v4526_v19 = vunpack.c.h.bf16 %v4595_v0  ;;  %v4461_v25 = vunpack.c.l.bf16 %v4580_v26 }
 0x369   : > { %v3962_v16 = vadd.f32 %v3930_v27, %v3827_v1  ;;  %v3733_v31 = vmul.f32 %v6581_v42, %v3699_v5  ;;  %v3963_v39 = vadd.f32 %v3931_v10, %v3828_v52  ;;  %v3734_v55 = vmul.f32 %v6581_v42, %v3700_v18  ;;  %v4596_v27 = vld [vmem:[%s6565_s26 + $0x40] sm:$0xff]  }
 0x36a   : > { %v3592_v22 = vpop.permute.xlu1 %3591  ;;  %v3597_v28 = vpop.permute.xlu0 %3596  ;;  %v4462_v11 = vunpack.c.h.bf16 %v4580_v26  ;;  %v4529_v5 = vunpack.c.l.bf16 %v4596_v27  ;;  %v4530_v18 = vunpack.c.h.bf16 %v4596_v27 }
 0x36b   : > { %3995 = vst.msk [vmem:[%s6591_s24 + $0x40] sm:$0xff] %vm3986_vm3, %v3962_v16  ;;  %v3829_v12 = vadd.f32 %v4453_v48, %v3733_v31  ;;  %v3701_v35 = vmul.f32 %v3592_v22, %v6494_v4  ;;  %3996 = vst.msk [vmem:[%s6591_s24 + $0x48] sm:$0xff] %vm3986_vm3, %v3963_v39  ;;  %v3830_v41 = vadd.f32 %v4454_v21, %v3734_v55  ;;  %v4597_v16 = vld [vmem:[%s6565_s26 + $0x48] sm:$0xff]   ;;  %v4466_v55 = vunpack.c.h.bf16 %v4581_v38 }
 0x36c   : > { %v3702_v33 = vmul.f32 %v3597_v28, %v6498_v9  ;;  %v3935_v4 = vmul.f32 %v4522_v15, %v6584_v17  ;;  %v3936_v48 = vmul.f32 %v4525_v59, %v6584_v17  ;;  %v4582_v15 = vld [vmem:[%s6571_s29 + $0x48] sm:$0xff]   ;;  %v4533_v28 = vunpack.c.l.bf16 %v4597_v16 }
 0x36d   : > { %v3964_v37 = vadd.f32 %v3932_v44, %v3829_v12  ;;  %v3735_v58 = vmul.f32 %v6581_v42, %v3701_v35  ;;  %v3965_v40 = vadd.f32 %v3933_v61, %v3830_v41  ;;  %v4465_v44 = vunpack.c.l.bf16 %v4581_v38 }
 0x36e   : > { %v3736_v57 = vmul.f32 %v6581_v42, %v3702_v33  ;;  %v3602_v32 = vpop.permute.xlu1 %3601  ;;  %v3607_v30 = vpop.permute.xlu0 %3606  ;;  %v3938_v12 = vmul.f32 %v4529_v5, %v6584_v17  ;;  %v4534_v41 = vunpack.c.h.bf16 %v4597_v16  ;;  %v4598_v33 = vld [vmem:[%s6565_s26 + $0x50] sm:$0xff]   ;;  %v4470_v59 = vunpack.c.h.bf16 %v4582_v15  ;;  %v4584_v5 = vld [vmem:[%s6571_s29 + $0x58] sm:$0xff]  }
 0x36f   : > { %3997 = vst.msk [vmem:[%s6591_s24 + $0x50] sm:$0xff] %vm3986_vm3, %v3964_v37  ;;  %v3831_v9 = vadd.f32 %v4457_v20, %v3735_v58  ;;  %v3703_v29 = vmul.f32 %v3602_v32, %v6501_v3  ;;  %3998 = vst.msk [vmem:[%s6591_s24 + $0x58] sm:$0xff] %vm3986_vm3, %v3965_v40  ;;  %v3704_v62 = vmul.f32 %v3607_v30, %v6505_v23  ;;  %v4469_v37 = vunpack.c.l.bf16 %v4582_v15 }
 0x370   : > { %v3832_v10 = vadd.f32 %v4458_v36, %v3736_v57  ;;  %v3937_v3 = vmul.f32 %v4526_v19, %v6584_v17  ;;  %v4583_v57 = vld [vmem:[%s6571_s29 + $0x50] sm:$0xff]   ;;  %v3940_v32 = vmul.f32 %v4533_v28, %v6584_v17  ;;  %v4537_v27 = vunpack.c.l.bf16 %v4598_v33 }
 0x371   : > { %v3966_v1 = vadd.f32 %v3934_v60, %v3831_v9  ;;  %v3737_v50 = vmul.f32 %v6581_v42, %v3703_v29  ;;  %v3738_v21 = vmul.f32 %v6581_v42, %v3704_v62  ;;  %v4473_v62 = vunpack.c.l.bf16 %v4583_v57 }
 0x372   : > { %v3967_v52 = vadd.f32 %v3935_v4, %v3832_v10  ;;  %v3612_v47 = vpop.permute.xlu1 %3611  ;;  %v3617_v31 = vpop.permute.xlu0 %3616  ;;  %v4599_v10 = vld [vmem:[%s6565_s26 + $0x58] sm:$0xff]   ;;  %v4478_v15 = vunpack.c.h.bf16 %v4584_v5 }
 0x373   : > { %3999 = vst.msk [vmem:[%s6591_s24 + $0x60] sm:$0xff] %vm3986_vm3, %v3966_v1  ;;  %v3833_v23 = vadd.f32 %v4461_v25, %v3737_v50  ;;  %v3705_v2 = vmul.f32 %v3612_v47, %v6508_v46  ;;  %v3834_v39 = vadd.f32 %v4462_v11, %v3738_v21  ;;  %v3706_v61 = vmul.f32 %v3617_v31, %v6512_v13 }
 0x374   : > { %4000 = vst.msk [vmem:[%s6591_s24 + $0x68] sm:$0xff] %vm3986_vm3, %v3967_v52  ;;  %v3939_v46 = vmul.f32 %v4530_v18, %v6584_v17  ;;  %v4538_v25 = vunpack.c.h.bf16 %v4598_v33  ;;  %v4474_v50 = vunpack.c.h.bf16 %v4583_v57  ;;  %v4541_v18 = vunpack.c.l.bf16 %v4599_v10  ;;  %v4586_v57 = vld [vmem:[%s6571_s29 + $0x68] sm:$0xff]  }
 0x375   : > { %v3968_v22 = vadd.f32 %v3936_v48, %v3833_v23  ;;  %v3739_v0 = vmul.f32 %v6581_v42, %v3705_v2  ;;  %v3969_v20 = vadd.f32 %v3937_v3, %v3834_v39  ;;  %v3740_v35 = vmul.f32 %v6581_v42, %v3706_v61 }
 0x376   : > { %v3622_v36 = vpop.permute.xlu1 %3621  ;;  %v3627_v26 = vpop.permute.xlu0 %3626  ;;  %v3942_v3 = vmul.f32 %v4537_v27, %v6584_v17  ;;  %v4542_v23 = vunpack.c.h.bf16 %v4599_v10  ;;  %v4477_v39 = vunpack.c.l.bf16 %v4584_v5 }
 0x377   : > { %4001 = vst.msk [vmem:[%s6591_s24 + $0x70] sm:$0xff] %vm3986_vm3, %v3968_v22  ;;  %v3835_v13 = vadd.f32 %v4465_v44, %v3739_v0  ;;  %v3707_v58 = vmul.f32 %v3622_v36, %v6515_v34  ;;  %4002 = vst.msk [vmem:[%s6591_s24 + $0x78] sm:$0xff] %vm3986_vm3, %v3969_v20  ;;  %v3836_v60 = vadd.f32 %v4466_v55, %v3740_v35  ;;  %v4600_v44 = vld [vmem:[%s6565_s26 + $0x60] sm:$0xff]  }
 0x378   : > { %v3708_v40 = vmul.f32 %v3627_v26, %v6519_v7  ;;  %v3941_v34 = vmul.f32 %v4534_v41, %v6584_v17  ;;  %v4585_v0 = vld [vmem:[%s6571_s29 + $0x60] sm:$0xff]   ;;  %v3944_v20 = vmul.f32 %v4541_v18, %v6584_v17  ;;  %v4545_v35 = vunpack.c.l.bf16 %v4600_v44 }
 0x379   : > { %v3970_v4 = vadd.f32 %v3938_v12, %v3835_v13  ;;  %v3741_v19 = vmul.f32 %v6581_v42, %v3707_v58  ;;  %v3971_v9 = vadd.f32 %v3939_v46, %v3836_v60  ;;  %v4546_v36 = vunpack.c.h.bf16 %v4600_v44  ;;  %v4601_v13 = vld [vmem:[%s6565_s26 + $0x68] sm:$0xff]  }
 0x37a   : > { %v3742_v30 = vmul.f32 %v6581_v42, %v3708_v40  ;;  %v3632_v29 = vpop.permute.xlu1 %3631  ;;  %v3637_v11 = vpop.permute.xlu0 %3636  ;;  %v4549_v27 = vunpack.c.l.bf16 %v4601_v13 }
 0x37b   : > { %4003 = vst.msk [vmem:[%s6591_s24 + $0x80] sm:$0xff] %vm3986_vm3, %v3970_v4  ;;  %v3837_v7 = vadd.f32 %v4469_v37, %v3741_v19  ;;  %v3709_v38 = vmul.f32 %v3632_v29, %v6522_v43  ;;  %4004 = vst.msk [vmem:[%s6591_s24 + $0x88] sm:$0xff] %vm3986_vm3, %v3971_v9  ;;  %v3710_v48 = vmul.f32 %v3637_v11, %v6526_v54  ;;  %v4481_v37 = vunpack.c.l.bf16 %v4585_v0  ;;  %v4602_v29 = vld [vmem:[%s6565_s26 + $0x70] sm:$0xff]  }
 0x37c   : > { %v3838_v1 = vadd.f32 %v4470_v59, %v3742_v30  ;;  %v3943_v43 = vmul.f32 %v4538_v25, %v6584_v17  ;;  %v4482_v59 = vunpack.c.h.bf16 %v4585_v0 }
 0x37d   : > { %v3972_v52 = vadd.f32 %v3940_v32, %v3837_v7  ;;  %v3743_v21 = vmul.f32 %v6581_v42, %v3709_v38  ;;  %v3744_v16 = vmul.f32 %v6581_v42, %v3710_v48  ;;  %v3946_v32 = vmul.f32 %v4545_v35, %v6584_v17 }
 0x37e   : > { %v3973_v47 = vadd.f32 %v3941_v34, %v3838_v1  ;;  %v3642_v31 = vpop.permute.xlu1 %3641  ;;  %v3647_v2 = vpop.permute.xlu0 %3646  ;;  %v4550_v34 = vunpack.c.h.bf16 %v4601_v13  ;;  %v4485_v7 = vunpack.c.l.bf16 %v4586_v57  ;;  %v4486_v38 = vunpack.c.h.bf16 %v4586_v57 }
 0x37f   : > { %4005 = vst.msk [vmem:[%s6591_s24 + $0x90] sm:$0xff] %vm3986_vm3, %v3972_v52  ;;  %v3839_v54 = vadd.f32 %v4473_v62, %v3743_v21  ;;  %v3711_v55 = vmul.f32 %v3642_v31, %v6529_v6  ;;  %v3840_v61 = vadd.f32 %v4474_v50, %v3744_v16  ;;  %v3712_v22 = vmul.f32 %v3647_v2, %v6533_v63  ;;  %v4587_v50 = vld [vmem:[%s6571_s29 + $0x70] sm:$0xff]  }
 0x380   : > { %4006 = vst.msk [vmem:[%s6591_s24 + $0x98] sm:$0xff] %vm3986_vm3, %v3973_v47  ;;  %v3945_v6 = vmul.f32 %v4542_v23, %v6584_v17  ;;  %v3948_v52 = vmul.f32 %v4549_v27, %v6584_v17  ;;  %v4553_v21 = vunpack.c.l.bf16 %v4602_v29  ;;  %v4554_v47 = vunpack.c.h.bf16 %v4602_v29 }
 0x381   : > { %v3974_v12 = vadd.f32 %v3942_v3, %v3839_v54  ;;  %v3745_v28 = vmul.f32 %v6581_v42, %v3711_v55  ;;  %v3975_v46 = vadd.f32 %v3943_v43, %v3840_v61  ;;  %v3746_v41 = vmul.f32 %v6581_v42, %v3712_v22  ;;  %v4603_v43 = vld [vmem:[%s6565_s26 + $0x78] sm:$0xff]  }
 0x382   : > { %v3652_v33 = vpop.permute.xlu1 %3651  ;;  %v3657_v26 = vpop.permute.xlu0 %3656  ;;  %v4489_v31 = vunpack.c.l.bf16 %v4587_v50  ;;  %v4490_v2 = vunpack.c.h.bf16 %v4587_v50  ;;  %v4588_v55 = vld [vmem:[%s6571_s29 + $0x78] sm:$0xff]   ;;  %v3950_v22 = vmul.f32 %v4553_v21, %v6584_v17  ;;  %v4557_v0 = vunpack.c.l.bf16 %v4603_v43  ;;  %s5163_s29 = scalar_lea.vmem %s6783_s21, 4096 }
 0x383   : > { %4007 = vst.msk [vmem:[%s6591_s24 + $0xa0] sm:$0xff] %vm3986_vm3, %v3974_v12  ;;  %v3841_v63 = vadd.f32 %v4477_v39, %v3745_v28  ;;  %v3713_v58 = vmul.f32 %v3652_v33, %v6536_v14  ;;  %4008 = vst.msk [vmem:[%s6591_s24 + $0xa8] sm:$0xff] %vm3986_vm3, %v3975_v46  ;;  %v3842_v60 = vadd.f32 %v4478_v15, %v3746_v41  ;;  %v4493_v41 = vunpack.c.l.bf16 %v4588_v55  ;;  %p5164_p12 = scmp.ne.s32.totalorder %s6783_s21, %s5163_s29  ;;  %p5171_p2 = scmp.lt.s32.totalorder %s5169_s0, %s5163_s29 }
 0x384   : > { %v3714_v40 = vmul.f32 %v3657_v26, %v6540_v49  ;;  %v3947_v14 = vmul.f32 %v4546_v36, %v6584_v17  ;;  %v4494_v33 = vunpack.c.h.bf16 %v4588_v55 }
 0x385   : > { %v3976_v4 = vadd.f32 %v3944_v20, %v3841_v63  ;;  %v3747_v19 = vmul.f32 %v6581_v42, %v3713_v58  ;;  %v3977_v9 = vadd.f32 %v3945_v6, %v3842_v60  ;;  %v3951_v20 = vmul.f32 %v4554_v47, %v6584_v17  ;;  %p5165_p13 = pnand %p5164_p12, %p5343_p4  ;;  %p5172_p3 = por %p5171_p2, %p5170_p1 }
 0x386   : > { %v3748_v30 = vmul.f32 %v6581_v42, %v3714_v40  ;;  %v3662_v25 = vpop.permute.xlu1 %3661  ;;  %v3667_v10 = vpop.permute.xlu0 %3666 }
 0x387   : > { %4009 = vst.msk [vmem:[%s6591_s24 + $0xb0] sm:$0xff] %vm3986_vm3, %v3976_v4  ;;  %v3843_v49 = vadd.f32 %v4481_v37, %v3747_v19  ;;  %v3715_v11 = vmul.f32 %v3662_v25, %v6543_v56  ;;  %4010 = vst.msk [vmem:[%s6591_s24 + $0xb8] sm:$0xff] %vm3986_vm3, %v3977_v9  ;;  %v3716_v1 = vmul.f32 %v3667_v10, %v6547_v45  ;;  %p5166_p0 = pneg %p5165_p13 }
 0x388   : > { %v3844_v62 = vadd.f32 %v4482_v59, %v3748_v30  ;;  %v3949_v56 = vmul.f32 %v4550_v34, %v6584_v17  ;;  %v3952_v37 = vmul.f32 %v4557_v0, %v6584_v17 }
 0x389   : > { %v3978_v48 = vadd.f32 %v3946_v32, %v3843_v49  ;;  %v3749_v5 = vmul.f32 %v6581_v42, %v3715_v11  ;;  %v3750_v18 = vmul.f32 %v6581_v42, %v3716_v1  ;;  %p5173_p5 = pnand %p5172_p3, %p5166_p0 }
 0x38a   : > { %v3979_v3 = vadd.f32 %v3947_v14, %v3844_v62  ;;  %v3672_v16 = vpop.permute.xlu1 %3671  ;;  %v3677_v23 = vpop.permute.xlu0 %3676 }
 0x38b   : > { %4011 = vst.msk [vmem:[%s6591_s24 + $0xc0] sm:$0xff] %vm3986_vm3, %v3978_v48  ;;  %v3845_v45 = vadd.f32 %v4485_v7, %v3749_v5  ;;  %v3717_v44 = vmul.f32 %v3672_v16, %v6550_v24  ;;  %v3846_v54 = vadd.f32 %v4486_v38, %v3750_v18  ;;  %v3718_v39 = vmul.f32 %v3677_v23, %v6553_v51 }
 0x38c   : > { %4012 = vst.msk [vmem:[%s6591_s24 + $0xc8] sm:$0xff] %vm3986_vm3, %v3979_v3  ;;  %v4558_v24 = vunpack.c.h.bf16 %v4603_v43 }
 0x38d   : > { %v3980_v61 = vadd.f32 %v3948_v52, %v3845_v45  ;;  %v3751_v15 = vmul.f32 %v6581_v42, %v3717_v44  ;;  %v3981_v12 = vadd.f32 %v3949_v56, %v3846_v54  ;;  %v3752_v28 = vmul.f32 %v6581_v42, %v3718_v39 }
 0x38e   : > { %v3682_v35 = vpop.permute.xlu1 %3681  ;;  %v3687_v46 = vpop.permute.xlu0 %3686  ;;  %v3953_v59 = vmul.f32 %v4558_v24, %v6584_v17 }
 0x38f   : > { %4013 = vst.msk [vmem:[%s6591_s24 + $0xd0] sm:$0xff] %vm3986_vm3, %v3980_v61  ;;  %v3847_v51 = vadd.f32 %v4489_v31, %v3751_v15  ;;  %v3719_v6 = vmul.f32 %v3682_v35, %v6557_v8  ;;  %4014 = vst.msk [vmem:[%s6591_s24 + $0xd8] sm:$0xff] %vm3986_vm3, %v3981_v12  ;;  %v3848_v36 = vadd.f32 %v4490_v2, %v3752_v28 }
 0x390   : > { %v3720_v13 = vmul.f32 %v3687_v46, %v6559_v53 }
 0x391   : > { %v3982_v63 = vadd.f32 %v3950_v22, %v3847_v51  ;;  %v3753_v26 = vmul.f32 %v6581_v42, %v3719_v6  ;;  %v3983_v58 = vadd.f32 %v3951_v20, %v3848_v36 }
 0x392   : > { %v3754_v60 = vmul.f32 %v6581_v42, %v3720_v13 }
 0x393   : > { %4015 = vst.msk [vmem:[%s6591_s24 + $0xe0] sm:$0xff] %vm3986_vm3, %v3982_v63  ;;  %v3849_v8 = vadd.f32 %v4493_v41, %v3753_v26  ;;  %4016 = vst.msk [vmem:[%s6591_s24 + $0xe8] sm:$0xff] %vm3986_vm3, %v3983_v58 }
 0x394   : > { %v3850_v53 = vadd.f32 %v4494_v33, %v3754_v60 }
 0x395   : > { %v3984_v40 = vadd.f32 %v3952_v37, %v3849_v8 }
 0x396   : > { %v3985_v42 = vadd.f32 %v3953_v59, %v3850_v53 }
 0x397   : > { %4017 = vst.msk [vmem:[%s6591_s24 + $0xf0] sm:$0xff] %vm3986_vm3, %v3984_v40 }
 0x398   : > { %4018 = vst.msk [vmem:[%s6591_s24 + $0xf8] sm:$0xff] %vm3986_vm3, %v3985_v42 }
 0x399   : > { %5176 = shalt.err (!%p5173_p5)
}
 0x39a   : > { %s5177_s19 = scalar_lea.hbm %s6781_s28, 4096  ;;  %s5181_s17 = scalar_lea.hbm %s6846_s9, 8192 }
 0x39b   : > { %p5178_p6 = scmp.ne.s32.totalorder %s6781_s28, %s5177_s19  ;;  %p5182_p10 = scmp.lt.u32.totalorder %s6781_s28, %s6846_s9 }
 0x39c   : > { %p5183_p11 = scmp.lt.u32.totalorder %s5181_s17, %s5177_s19  ;;  %p5185_p13 = scmp.lt.u32.totalorder %s5177_s19, %s6781_s28 }
 0x39d   : > { %p5179_p7 = pnand %p5178_p6, %p5343_p4 }
 0x39e   : > { %p5184_p12 = por %p5183_p11, %p5182_p10 }
 0x39f   : > { %p5180_p9 = pneg %p5179_p7 }
 0x3a0   : > { %p5186_p0 = por %p5185_p13, %p5184_p12 }
 0x3a2   : > { %p5187_p1 = pnand %p5186_p0, %p5180_p9 }
 0x3a4   : > { %5190 = shalt.err (!%p5187_p1)
}
 0x3a5   : > { %s5248_s29 = smov 128   ;;  %s5249_s30 = smov 8  }
 0x3a6   : > { %4860 = dma.vmem_to_hbm [thread:$0]  (%p5343_p4), %s6783_s21, 4096, %s6781_s28, %s6791_s14, %s5248_s29, %s5248_s29, %s5249_s30  }
 0x3a7 PF: > { %p4866_p2 = scmp.ge.s32.totalorder %s5241_s16, 2  ;;  %s4051_s10 = sand.u32 1, %s5221_s11  }
 0x3a8   : > { %s4052_s0 = scalar_lea.sflag [#allocation4], %s4051_s10 }
 0x3a9   : > { %p4863_p3 = pnand %p4866_p2, %p5350_p8 }
 0x3ab   : > { %5216 = dma.done.wait (!%p4863_p3), %s4052_s0, 4096  }
 0x3ac   : > { %5218 = vsyncadd (!%p4863_p3), %s4052_s0, 4294963200  ;;  %s23_s16 = sadd.s32 1, %s5241_s16   ;;  %s7050_s11 = smov %s5225_s12 }
 0x3ad   : > { %p20_p5 = scmp.ge.s32.totalorder %s23_s16, 4   ;;  %s7051_s12 = smov %s5229_s13 }
 0x3ae   : > { %s7052_s13 = smov %s5356_s23  ;;  %s7053_s14 = smov %s5237_s15 }
 0x3af   : > { %s7054_s15 = smov %s7056_s18  ;;  %22 = sbr.rel (!%p20_p5) target bundleno = 6 (0x6), region = 112 }
 0x3b6   :  { %4057 = vsyncpa [#allocation4], 1 }
 0x3b7   :  { %4059 = vsyncpa [#allocation4 + $0x1], 1 }

</bundles_post_ra>
